<compile_context>
chip_gen: v6e
topology: v6e:2x2x1
jax: 0.10.0
libtpu: 0.0.40
codegen_flags: <defaults>
</compile_context>

<pallas_src>
import math
from functools import partial

import jax
import jax.numpy as jnp
from jax.experimental import pallas as pl
from jax.experimental.pallas import tpu as pltpu

LANE = 128
SUBLANE = 8


def _round_up(x, m):
    return ((x + m - 1) // m) * m


def _apply_act(y, act):
    """FCBlock nonlinearities (f32). For 'sine' the omega=30 factor is already
    folded into that layer's weight/bias, so this is plain sin."""
    if act == "none":
        return y
    if act == "sine":
        return jnp.sin(y)
    if act == "relu":
        return jnp.maximum(y, 0.0)
    if act == "sigmoid":
        return jax.nn.sigmoid(y)
    if act == "tanh":
        return jnp.tanh(y)
    if act == "selu":
        return jax.nn.selu(y)
    if act == "softplus":
        return jax.nn.softplus(y)
    if act == "elu":
        return jax.nn.elu(y)
    raise ValueError(f"unsupported activation: {act}")


# ----------------------------- fused Pallas kernel ---------------------------
def _fused_mlp_kernel(x_ref, w0_ref, b0_ref, wm_ref, bm_ref, wl_ref, bl_ref,
                      o_ref, *, acts, n_mid, in_features, first_fma):
    """One row tile (lane dim) through the whole MLP, feature-major layout.

    x_ref : (in_features, TM)       f32   coords tile (rows on lanes)
    w0_ref: (P, in_features)        f32   first-layer weight, PyTorch (out,in)
    b0_ref: (P, 1)                  f32
    wm_ref: (max(n_mid,1), P, P)    bf16  hidden->hidden weights (stacked)
    bm_ref: (max(n_mid,1), P, 1)    f32
    wl_ref: (out_sub, P)            bf16  last-layer weight
    bl_ref: (out_sub, 1)            f32
    o_ref : (out_sub, TM)           f32   lane-dense output tile
    """
    x = x_ref[...]

    # ---- layer 0: f32 (tiny K; keep full accuracy where sin(omega*.) is most
    #      sensitive).  For small in_features do VPU FMAs instead of an MXU dot.
    if first_fma:
        w0 = w0_ref[...]
        s = w0[:, 0:1] * x[0:1, :]
        for j in range(1, in_features):
            s = s + w0[:, j:j + 1] * x[j:j + 1, :]
    else:
        s = jnp.dot(w0_ref[...], x, preferred_element_type=jnp.float32)
    h = _apply_act(s + b0_ref[...], acts[0])

    # ---- hidden->hidden layers: bf16 operands on the MXU, f32 accumulate/act
    for l in range(n_mid):
        y = jnp.dot(wm_ref[l], h.astype(jnp.bfloat16),
                    preferred_element_type=jnp.float32)
        h = _apply_act(y + bm_ref[l], acts[1 + l])

    # ---- last layer: its own small (out_sub, P) weight; lane-dense output
    y = jnp.dot(wl_ref[...], h.astype(jnp.bfloat16),
                preferred_element_type=jnp.float32)
    y = _apply_act(y + bl_ref[...], acts[-1])
    o_ref[...] = y.astype(o_ref.dtype)


# ----------------------------- one-time parameter prep -----------------------
def prepare_fcblock_params(params, nonlinearity="sine", outermost_linear=True):
    """Fold omega, pad to lane/sublane multiples, cast MXU operands to bf16,
    stack hidden layers.  Weights are in PyTorch (out_features, in_features)
    layout (as produced by FCBlock / a hypernetwork).  Call once per params."""
    L = len(params)
    assert L >= 2
    in_features = params[0][0].shape[1]
    out_features = params[-1][0].shape[0]
    acts = tuple("none" if (i == L - 1 and outermost_linear) else nonlinearity
                 for i in range(L))

    hidden_dims = [params[i][0].shape[0] for i in range(L - 1)]
    hidden_dims += [params[i][0].shape[1] for i in range(1, L)]
    P = _round_up(max(max(hidden_dims), LANE), LANE)
    out_sub = _round_up(max(out_features, SUBLANE), SUBLANE)

    def fold(i, w, b):
        s = 30.0 if acts[i] == "sine" else 1.0   # SIREN omega folded into sine layers
        return jnp.asarray(w, jnp.float32) * s, jnp.asarray(b, jnp.float32) * s

    # layer 0: kept f32 (used in the f32 first-layer path)
    w, b = fold(0, *params[0])
    fo = w.shape[0]
    w0 = jnp.zeros((P, in_features), jnp.float32).at[:fo, :].set(w)
    b0 = jnp.zeros((P, 1), jnp.float32).at[:fo, 0].set(b)

    # hidden layers 1..L-2: zero-padded (columns beyond real fan-in stay zero so
    # padded activation rows never contaminate real outputs), stacked, bf16.
    wm_list, bm_list = [], []
    for i in range(1, L - 1):
        w, b = fold(i, *params[i])
        fo, fi = w.shape
        wm_list.append(jnp.zeros((P, P), jnp.float32).at[:fo, :fi].set(w))
        bm_list.append(jnp.zeros((P, 1), jnp.float32).at[:fo, 0].set(b))
    n_mid = len(wm_list)
    if n_mid == 0:  # dummy operand to keep shapes static; never read in-kernel
        wm_list = [jnp.zeros((P, P), jnp.float32)]
        bm_list = [jnp.zeros((P, 1), jnp.float32)]
    wm = jnp.stack(wm_list).astype(jnp.bfloat16)
    bm = jnp.stack(bm_list)

    # last layer: small (out_sub, P) operand, bf16
    w, b = fold(L - 1, *params[L - 1])
    fo, fi = w.shape
    wl = jnp.zeros((out_sub, P), jnp.float32).at[:fo, :fi].set(w).astype(jnp.bfloat16)
    bl = jnp.zeros((out_sub, 1), jnp.float32).at[:fo, 0].set(b)

    return dict(w0=w0, b0=b0, wm=wm, bm=bm, wl=wl, bl=bl,
                acts=acts, n_mid=n_mid, in_features=in_features,
                out_features=out_features, P=P, out_sub=out_sub,
                layer_dims=[(params[i][0].shape[1], params[i][0].shape[0])
                            for i in range(L)])


# ----------------------------- VMEM accounting --------------------------------
def _vmem_block_bytes(shape, itemsize):
    s = list(shape)
    s[-1] = _round_up(s[-1], LANE)
    s[-2] = _round_up(s[-2], SUBLANE * (4 // itemsize))   # bf16 packs 16 sublanes
    n = itemsize
    for d in s:
        n *= d
    return n


def _vmem_estimate(tm, p, in_features, out_sub, n_mid_pad):
    weights = (_vmem_block_bytes((p, in_features), 4) + _vmem_block_bytes((p, 1), 4)
               + n_mid_pad * (_vmem_block_bytes((p, p), 2)
                              + _vmem_block_bytes((p, 1), 4))
               + _vmem_block_bytes((out_sub, p), 2) + _vmem_block_bytes((out_sub, 1), 4))
    io = _vmem_block_bytes((in_features, tm), 4) + _vmem_block_bytes((out_sub, tm), 4)
    live = 4 * _vmem_block_bytes((p, tm), 4)   # h / y / bf16 copies headroom
    return 2 * (weights + io) + live           # x2: double-buffered pipeline


def _device_vmem_capacity():
    try:
        return int(getattr(pltpu.get_tpu_info(), "vmem_capacity_bytes"))
    except Exception:
        return None


# ----------------------------- forward wrapper --------------------------------
def fcblock_forward(coords, prepared, tile_m=None):
    """coords (..., in_features) -> (..., out_features) via the fused kernel."""
    in_features = prepared["in_features"]
    out_features = prepared["out_features"]
    P, out_sub, n_mid = prepared["P"], prepared["out_sub"], prepared["n_mid"]
    acts = prepared["acts"]
    n_mid_pad = max(n_mid, 1)

    lead = coords.shape[:-1]
    x = coords.reshape(-1, in_features).astype(jnp.float32).T   # (in_features, M)
    M = x.shape[1]

    cap = _device_vmem_capacity()
    if tile_m is None:
        # v5e/v6e (128 MiB VMEM): bigger row tiles amortize per-step overhead;
        # v7x / unknown (64 MiB): stay conservative.
        tile_m = 4096 if (cap is not None and cap >= 100 * 1024 * 1024) else 2048
    budget = int(0.55 * cap) if cap is not None else 40 * 1024 * 1024

    TM = max(LANE, _round_up(min(tile_m, _round_up(M, LANE)), LANE))
    while TM > LANE and _vmem_estimate(TM, P, in_features, out_sub, n_mid_pad) > budget:
        TM = max(LANE, _round_up(TM // 2, LANE))
    M_pad = _round_up(M, TM)
    if M_pad != M:
        x = jnp.pad(x, ((0, 0), (0, M_pad - M)))

    vmem_need = _vmem_estimate(TM, P, in_features, out_sub, n_mid_pad)
    vmem_limit = int(min(max(vmem_need + (16 << 20), 32 << 20), 100 << 20))
    if cap is not None:
        vmem_limit = int(min(vmem_limit, cap - (8 << 20)))
    vmem_limit = int(max(vmem_limit, vmem_need + (4 << 20)))

    # Advisory cost estimate so XLA can schedule neighbors around the fused call.
    flops = 2 * M_pad * sum(fi * fo for (fi, fo) in prepared["layer_dims"])
    transcendentals = M_pad * sum(fo for (fi, fo), a in
                                  zip(prepared["layer_dims"], acts) if a != "none")
    bytes_accessed = (x.size * 4 + out_sub * M_pad * 4
                      + prepared["w0"].size * 4 + prepared["wm"].size * 2
                      + prepared["wl"].size * 2)

    kernel = partial(_fused_mlp_kernel, acts=acts, n_mid=n_mid,
                     in_features=in_features, first_fma=(in_features <= 4))
    out_t = pl.pallas_call(
        kernel,
        out_shape=jax.ShapeDtypeStruct((out_sub, M_pad), jnp.float32),
        grid_spec=pltpu.PrefetchScalarGridSpec(
            num_scalar_prefetch=0,
            grid=(M_pad // TM,),
            in_specs=[
                pl.BlockSpec((in_features, TM), lambda i: (0, i)),     # coords tile
                pl.BlockSpec((P, in_features), lambda i: (0, 0)),      # w0 (resident)
                pl.BlockSpec((P, 1), lambda i: (0, 0)),                # b0
                pl.BlockSpec((n_mid_pad, P, P), lambda i: (0, 0, 0)),  # hidden W stack
                pl.BlockSpec((n_mid_pad, P, 1), lambda i: (0, 0, 0)),  # hidden biases
                pl.BlockSpec((out_sub, P), lambda i: (0, 0)),          # last W
                pl.BlockSpec((out_sub, 1), lambda i: (0, 0)),          # last bias
            ],
            out_specs=pl.BlockSpec((out_sub, TM), lambda i: (0, i)),
        ),
        compiler_params=pltpu.CompilerParams(
            # Row tiles are independent; on v7x the 2 TensorCores may split the
            # grid.  (If xprof shows one busy TC, switch to pltpu.CORE_PARALLEL.)
            dimension_semantics=("parallel",),
            vmem_limit_bytes=vmem_limit,
        ),
        cost_estimate=pl.CostEstimate(flops=int(flops),
                                      transcendentals=int(transcendentals),
                                      bytes_accessed=int(bytes_accessed)),
    )(x, prepared["w0"], prepared["b0"], prepared["wm"], prepared["bm"],
      prepared["wl"], prepared["bl"])

    out = out_t[:out_features, :M].T      # tiny: only out_features rows touched
    return out.reshape(*lead, out_features)


# ----------------------------- parameter init ---------------------------------
def init_fcblock_params(key, in_features, out_features, num_hidden_layers,
                        hidden_features, nonlinearity="sine"):
    """Matches FCBlock.__init__ shapes/init (PyTorch (out, in) weight layout)."""
    dims = ([in_features] + [hidden_features] * (num_hidden_layers + 1)
            + [out_features])
    params = []
    for i in range(len(dims) - 1):
        fan_in, fan_out = dims[i], dims[i + 1]
        key, kw, kb = jax.random.split(key, 3)
        if nonlinearity == "sine":
            lim = (1.0 / fan_in) if i == 0 else math.sqrt(6.0 / fan_in) / 30.0
            w = jax.random.uniform(kw, (fan_out, fan_in), jnp.float32, -lim, lim)
        else:  # relu-style: kaiming normal fan_in
            std = math.sqrt(2.0 / fan_in)
            w = std * jax.random.normal(kw, (fan_out, fan_in), jnp.float32)
        blim = 1.0 / math.sqrt(fan_in)
        b = jax.random.uniform(kb, (fan_out,), jnp.float32, -blim, blim)
        params.append((w, b))
    return params


# ----------------------------- references -------------------------------------
def fcblock_reference(coords, params, nonlinearity="sine", outermost_linear=True):
    """Full-f32, highest-precision reference of the original PyTorch math."""
    x = coords.astype(jnp.float32)
    L = len(params)
    for i, (w, b) in enumerate(params):
        y = jnp.dot(x, w.T, precision=jax.lax.Precision.HIGHEST) + b
        if i == L - 1 and outermost_linear:
            x = y
        elif nonlinearity == "sine":
            x = jnp.sin(30.0 * y)
        else:
            x = _apply_act(y, nonlinearity)
    return x


def fcblock_reference_bf16(coords, params, nonlinearity="sine",
                           outermost_linear=True):
    """Same layer numerics as the Pallas kernel (f32 first layer, bf16 MXU
    operands for the rest, omega folded) -- used for a tight correctness check."""
    lead = coords.shape[:-1]
    h = coords.reshape(-1, coords.shape[-1]).astype(jnp.float32)
    L = len(params)
    for i, (w, b) in enumerate(params):
        act = "none" if (i == L - 1 and outermost_linear) else nonlinearity
        s = 30.0 if act == "sine" else 1.0
        wf = jnp.asarray(w, jnp.float32) * s
        bf = jnp.asarray(b, jnp.float32) * s
        if i == 0:
            y = jnp.dot(h, wf.T, precision=jax.lax.Precision.HIGHEST) + bf
        else:
            y = jnp.dot(h.astype(jnp.bfloat16), wf.T.astype(jnp.bfloat16),
                        preferred_element_type=jnp.float32) + bf
        h = _apply_act(y, act)
    return h.reshape(*lead, -1)


# ----------------------------- demo --------------------------------------------
if __name__ == "__main__":
    key = jax.random.PRNGKey(0)

    # Small SIREN-like FCBlock: 2 -> 32 -> 32 -> 32 -> 1
    in_features, out_features = 2, 1
    hidden_features, num_hidden_layers = 32, 2
    batch, n_points = 2, 8

    k_params, k_coords = jax.random.split(key)
    params = init_fcblock_params(k_params, in_features, out_features,
                                 num_hidden_layers, hidden_features,
                                 nonlinearity="sine")
    coords = jax.random.uniform(k_coords, (batch, n_points, in_features),
                                jnp.float32, -1.0, 1.0)

    prepared = prepare_fcblock_params(params, nonlinearity="sine",
                                      outermost_linear=True)
    out = fcblock_forward(coords, prepared)
    out = jax.block_until_ready(out)
    assert out.shape == (batch, n_points, out_features), out.shape

    # Tight check against a reference using the kernel's exact dtype strategy.
    ref16 = fcblock_reference_bf16(coords, params, "sine", True)
    err16 = float(jnp.max(jnp.abs(out - ref16)))
    assert jnp.allclose(out, ref16, atol=5e-3, rtol=5e-3), err16

    # Loose sanity check against the full-f32 original semantics
    # (bf16 MXU operands + sine drift slightly from f32 HIGHEST).
    ref32 = fcblock_reference(coords, params, "sine", True)
    err32 = float(jnp.max(jnp.abs(out - ref32)))
    assert err32 < 0.25, err32

    print("KERNEL_OK")
</pallas_src>

<mosaic_0001>
module attributes {stable_mosaic.version = 11 : i64} {
  func.func @_fused_mlp_kernel(%arg0: i32, %arg1: memref<2x128xf32, #tpu.memory_space<vmem>>, %arg2: memref<128x2xf32, #tpu.memory_space<vmem>>, %arg3: memref<128x1xf32, #tpu.memory_space<vmem>>, %arg4: memref<2x128x128xbf16, #tpu.memory_space<vmem>>, %arg5: memref<2x128x1xf32, #tpu.memory_space<vmem>>, %arg6: memref<8x128xbf16, #tpu.memory_space<vmem>>, %arg7: memref<8x1xf32, #tpu.memory_space<vmem>>, %arg8: memref<8x128xf32, #tpu.memory_space<vmem>>) attributes {dimension_semantics = [#tpu.dimension_semantics<parallel>], iteration_bounds = array<i64: 1>, scalar_prefetch = 0 : i64, scratch_operands = 0 : i64, tpu.core_type = #tpu.core_type<tc>, window_params = [{transform_indices = @transform_0, window_bounds = array<i64: 2, 128>}, {pipeline_mode = #tpu.pipeline_mode<synchronous>, transform_indices = @transform_1, window_bounds = array<i64: 128, 2>}, {pipeline_mode = #tpu.pipeline_mode<synchronous>, transform_indices = @transform_2, window_bounds = array<i64: 128, 1>}, {pipeline_mode = #tpu.pipeline_mode<synchronous>, transform_indices = @transform_3, window_bounds = array<i64: 2, 128, 128>}, {pipeline_mode = #tpu.pipeline_mode<synchronous>, transform_indices = @transform_4, window_bounds = array<i64: 2, 128, 1>}, {pipeline_mode = #tpu.pipeline_mode<synchronous>, transform_indices = @transform_5, window_bounds = array<i64: 8, 128>}, {pipeline_mode = #tpu.pipeline_mode<synchronous>, transform_indices = @transform_6, window_bounds = array<i64: 8, 1>}, {transform_indices = @transform_7, window_bounds = array<i64: 8, 128>}]} {
    %c0 = arith.constant 0 : index
    %c0_0 = arith.constant 0 : index
    %0 = vector.load %arg1[%c0, %c0_0] : memref<2x128xf32, #tpu.memory_space<vmem>>, vector<2x128xf32>
    %c0_1 = arith.constant 0 : index
    %c0_2 = arith.constant 0 : index
    %1 = vector.load %arg2[%c0_1, %c0_2] : memref<128x2xf32, #tpu.memory_space<vmem>>, vector<128x2xf32>
    %2 = vector.extract_strided_slice %1 {offsets = [0, 0], sizes = [128, 1], strides = [1, 1]} : vector<128x2xf32> to vector<128x1xf32>
    %3 = vector.extract_strided_slice %0 {offsets = [0, 0], sizes = [1, 128], strides = [1, 1]} : vector<2x128xf32> to vector<1x128xf32>
    %4 = vector.broadcast %2 : vector<128x1xf32> to vector<128x128xf32>
    %5 = vector.broadcast %3 : vector<1x128xf32> to vector<128x128xf32>
    %6 = arith.mulf %4, %5 : vector<128x128xf32>
    %7 = vector.extract_strided_slice %1 {offsets = [0, 1], sizes = [128, 1], strides = [1, 1]} : vector<128x2xf32> to vector<128x1xf32>
    %8 = vector.extract_strided_slice %0 {offsets = [1, 0], sizes = [1, 128], strides = [1, 1]} : vector<2x128xf32> to vector<1x128xf32>
    %9 = vector.broadcast %7 : vector<128x1xf32> to vector<128x128xf32>
    %10 = vector.broadcast %8 : vector<1x128xf32> to vector<128x128xf32>
    %11 = arith.mulf %9, %10 : vector<128x128xf32>
    %12 = arith.addf %6, %11 : vector<128x128xf32>
    %c0_3 = arith.constant 0 : index
    %c0_4 = arith.constant 0 : index
    %13 = vector.load %arg3[%c0_3, %c0_4] : memref<128x1xf32, #tpu.memory_space<vmem>>, vector<128x1xf32>
    %14 = vector.broadcast %13 : vector<128x1xf32> to vector<128x128xf32>
    %15 = arith.addf %12, %14 : vector<128x128xf32>
    %16 = math.sin %15 : vector<128x128xf32>
    %c0_5 = arith.constant 0 : index
    %c0_6 = arith.constant 0 : index
    %c0_7 = arith.constant 0 : index
    %17 = vector.load %arg4[%c0_5, %c0_6, %c0_7] : memref<2x128x128xbf16, #tpu.memory_space<vmem>>, vector<1x128x128xbf16>
    %18 = vector.shape_cast %17 : vector<1x128x128xbf16> to vector<128x128xbf16>
    %19 = arith.truncf %16 : vector<128x128xf32> to vector<128x128xbf16>
    %cst = arith.constant dense<0.000000e+00> : vector<128x128xf32>
    %20 = tpu.matmul %18, %19, %cst {dimension_numbers = #tpu.dot_dimension_numbers<[1], [0], [0], [1], [0, 0, 1, 1], [], []>} : vector<128x128xbf16>, vector<128x128xbf16>, vector<128x128xf32> -> vector<128x128xf32>
    %c0_8 = arith.constant 0 : index
    %c0_9 = arith.constant 0 : index
    %c0_10 = arith.constant 0 : index
    %21 = vector.load %arg5[%c0_8, %c0_9, %c0_10] : memref<2x128x1xf32, #tpu.memory_space<vmem>>, vector<1x128x1xf32>
    %22 = vector.shape_cast %21 : vector<1x128x1xf32> to vector<128x1xf32>
    %23 = vector.broadcast %22 : vector<128x1xf32> to vector<128x128xf32>
    %24 = arith.addf %20, %23 : vector<128x128xf32>
    %25 = math.sin %24 : vector<128x128xf32>
    %c1 = arith.constant 1 : index
    %c0_11 = arith.constant 0 : index
    %c0_12 = arith.constant 0 : index
    %26 = vector.load %arg4[%c1, %c0_11, %c0_12] : memref<2x128x128xbf16, #tpu.memory_space<vmem>>, vector<1x128x128xbf16>
    %27 = vector.shape_cast %26 : vector<1x128x128xbf16> to vector<128x128xbf16>
    %28 = arith.truncf %25 : vector<128x128xf32> to vector<128x128xbf16>
    %cst_13 = arith.constant dense<0.000000e+00> : vector<128x128xf32>
    %29 = tpu.matmul %27, %28, %cst_13 {dimension_numbers = #tpu.dot_dimension_numbers<[1], [0], [0], [1], [0, 0, 1, 1], [], []>} : vector<128x128xbf16>, vector<128x128xbf16>, vector<128x128xf32> -> vector<128x128xf32>
    %c1_14 = arith.constant 1 : index
    %c0_15 = arith.constant 0 : index
    %c0_16 = arith.constant 0 : index
    %30 = vector.load %arg5[%c1_14, %c0_15, %c0_16] : memref<2x128x1xf32, #tpu.memory_space<vmem>>, vector<1x128x1xf32>
    %31 = vector.shape_cast %30 : vector<1x128x1xf32> to vector<128x1xf32>
    %32 = vector.broadcast %31 : vector<128x1xf32> to vector<128x128xf32>
    %33 = arith.addf %29, %32 : vector<128x128xf32>
    %34 = math.sin %33 : vector<128x128xf32>
    %c0_17 = arith.constant 0 : index
    %c0_18 = arith.constant 0 : index
    %35 = vector.load %arg6[%c0_17, %c0_18] : memref<8x128xbf16, #tpu.memory_space<vmem>>, vector<8x128xbf16>
    %36 = arith.truncf %34 : vector<128x128xf32> to vector<128x128xbf16>
    %cst_19 = arith.constant dense<0.000000e+00> : vector<8x128xf32>
    %37 = tpu.matmul %35, %36, %cst_19 {dimension_numbers = #tpu.dot_dimension_numbers<[1], [0], [0], [1], [0, 0, 1, 1], [], []>} : vector<8x128xbf16>, vector<128x128xbf16>, vector<8x128xf32> -> vector<8x128xf32>
    %c0_20 = arith.constant 0 : index
    %c0_21 = arith.constant 0 : index
    %38 = vector.load %arg7[%c0_20, %c0_21] : memref<8x1xf32, #tpu.memory_space<vmem>>, vector<8x1xf32>
    %39 = vector.broadcast %38 : vector<8x1xf32> to vector<8x128xf32>
    %40 = arith.addf %37, %39 : vector<8x128xf32>
    %c0_22 = arith.constant 0 : index
    %c0_23 = arith.constant 0 : index
    %41 = vector.load %arg8[%c0_22, %c0_23] : memref<8x128xf32, #tpu.memory_space<vmem>>, vector<8x128xf32>
    tpu.vector_store %arg8[%c0_22, %c0_23], %40 {strides = array<i32>} : memref<8x128xf32, #tpu.memory_space<vmem>>, vector<8x128xf32>,
    return
  }
  func.func @transform_0(%arg0: i32) -> (i32, i32) {
    %c0_i32 = arith.constant 0 : i32
    %c0_i32_0 = arith.constant 0 : i32
    return %c0_i32, %arg0 : i32, i32
  }
  func.func @transform_1(%arg0: i32) -> (i32, i32) {
    %c0_i32 = arith.constant 0 : i32
    %c0_i32_0 = arith.constant 0 : i32
    %c0_i32_1 = arith.constant 0 : i32
    return %c0_i32, %c0_i32_0 : i32, i32
  }
  func.func @transform_2(%arg0: i32) -> (i32, i32) {
    %c0_i32 = arith.constant 0 : i32
    %c0_i32_0 = arith.constant 0 : i32
    %c0_i32_1 = arith.constant 0 : i32
    return %c0_i32, %c0_i32_0 : i32, i32
  }
  func.func @transform_3(%arg0: i32) -> (i32, i32, i32) {
    %c0_i32 = arith.constant 0 : i32
    %c0_i32_0 = arith.constant 0 : i32
    %c0_i32_1 = arith.constant 0 : i32
    %c0_i32_2 = arith.constant 0 : i32
    return %c0_i32, %c0_i32_0, %c0_i32_1 : i32, i32, i32
  }
  func.func @transform_4(%arg0: i32) -> (i32, i32, i32) {
    %c0_i32 = arith.constant 0 : i32
    %c0_i32_0 = arith.constant 0 : i32
    %c0_i32_1 = arith.constant 0 : i32
    %c0_i32_2 = arith.constant 0 : i32
    return %c0_i32, %c0_i32_0, %c0_i32_1 : i32, i32, i32
  }
  func.func @transform_5(%arg0: i32) -> (i32, i32) {
    %c0_i32 = arith.constant 0 : i32
    %c0_i32_0 = arith.constant 0 : i32
    %c0_i32_1 = arith.constant 0 : i32
    return %c0_i32, %c0_i32_0 : i32, i32
  }
  func.func @transform_6(%arg0: i32) -> (i32, i32) {
    %c0_i32 = arith.constant 0 : i32
    %c0_i32_0 = arith.constant 0 : i32
    %c0_i32_1 = arith.constant 0 : i32
    return %c0_i32, %c0_i32_0 : i32, i32
  }
  func.func @transform_7(%arg0: i32) -> (i32, i32) {
    %c0_i32 = arith.constant 0 : i32
    %c0_i32_0 = arith.constant 0 : i32
    return %c0_i32, %arg0 : i32, i32
  }
}

</mosaic_0001>

<bundles_post_ra>
// kernel: tpu_custom_call.1
= control target key start
LH: loop header
LB: loop body
LE: loop exit
PB: predicated region body
PF: predicated region fallthrough
CT: control target
= control target key end

     0   :  { %v6767_v2 = vmov 1   ;;  %v6768_v7 = vmov 0   ;;  %s12663_s0 = inlined_call_operand.vmem [shape: f32[2,128], index: 0, kind: input, shape index: {}]   ;;  %s12664_s1 = inlined_call_operand.vmem [shape: f32[128,2], index: 1, kind: input, shape index: {}]   ;;  %s12665_s2 = inlined_call_operand.vmem [shape: f32[128,1], index: 2, kind: input, shape index: {}]   ;;  %s12666_s3 = inlined_call_operand.vmem [shape: bf16[2,128,128], index: 3, kind: input, shape index: {}]   ;;  %s12667_s4 = inlined_call_operand.vmem [shape: f32[2,128,1], index: 4, kind: input, shape index: {}]   ;;  %s12668_s5 = inlined_call_operand.vmem [shape: bf16[8,128], index: 5, kind: input, shape index: {}]   ;;  %s12669_s6 = inlined_call_operand.vmem [shape: f32[8,1], index: 6, kind: input, shape index: {}]   ;;  %s12670_s7 = inlined_call_operand.hbm [shape: f32[8,128], index: 7, kind: output, shape index: {}]  }
   0x1   :  { %v43_v0 = vld [vmem:[%s12664_s1 + $0x70] sm:$0xff]  ;;  %v41_v1 = vld [vmem:[%s12664_s1 + $0x60] sm:$0xff]  ;;  %6521 = vset.pattern.permute.xlu0 %v6767_v2  ;;  %6519 = vset.pattern.permute.xlu1 %v6767_v2  ;;  %v44_v3 = vld [vmem:[%s12664_s1 + $0x78] sm:$0xff] }
   0x2   :  { %202 = vperm.xlu1 %6519, %v43_v0   ;;  %194 = vperm.xlu0 %6521, %v41_v1   ;;  %v39_v4 = vld [vmem:[%s12664_s1 + $0x50] sm:$0xff]  ;;  %v37_v5 = vld [vmem:[%s12664_s1 + $0x40] sm:$0xff]  ;;  %v42_v6 = vld [vmem:[%s12664_s1 + $0x68] sm:$0xff] }
   0x3   :  { %v35_v8 = vld [vmem:[%s12664_s1 + $0x30] sm:$0xff]  ;;  %v33_v9 = vld [vmem:[%s12664_s1 + $0x20] sm:$0xff]  ;;  %v40_v13 = vld [vmem:[%s12664_s1 + $0x58] sm:$0xff] }
   0x4   :  { %v259_v10 = vld [vmem:[%s12665_s2 + $0x70] sm:$0xff]  ;;  %v6858_v12 = vld [vmem:[%s12664_s1] sm:$0xff] }
   0x5   :  { %v6852_v11 = vld [vmem:[%s12664_s1 + $0x10] sm:$0xff] }
   0x6   :  { %206 = vperm.xlu1 %6519, %v44_v3   ;;  %186 = vperm.xlu0 %6521, %v39_v4  }
   0xa   :  { %6520 = vset.pattern.permute.xlu1 %v6768_v7  ;;  %178 = vperm.xlu0 %6521, %v37_v5  }
   0xb   :  { %112 = vperm.xlu1 %6520, %v42_v6  }
   0xe   :  { %170 = vperm.xlu0 %6521, %v35_v8  }
   0xf   :  { %6522 = vset.pattern.permute.xlu1 %v6767_v2 }
  0x10   :  { %198 = vperm.xlu1 %6522, %v42_v6  }
  0x12   :  { %162 = vperm.xlu0 %6521, %v33_v9  }
  0x14   :  { %6523 = vset.pattern.permute.xlu1 %v6768_v7 }
  0x15   :  { %333 = vperm.xlu1 %6523, %v259_v10  }
  0x16   :  { %154 = vperm.xlu0 %6521, %v6852_v11  }
  0x19   :  { %97 = vperm.xlu1 %6523, %v39_v4  }
  0x1a   :  { %146 = vperm.xlu0 %6521, %v6858_v12  }
  0x1d   :  { %102 = vperm.xlu1 %6523, %v40_v13  }
  0x1e   :  { %12 = vsyncpa [#allocation3], 0  ;;  %6534 = vset.pattern.permute.xlu0 %v6768_v7  ;;  %v257_v14 = vld [vmem:[%s12665_s2 + $0x60] sm:$0xff]  ;;  %v260_v15 = vld [vmem:[%s12665_s2 + $0x78] sm:$0xff]  ;;  %v125_v62 = vlaneseq  ;;  %s6777_s15 = smov [#allocation2]  }
  0x1f   :  { %117 = vperm.xlu0 %6534, %v43_v0   ;;  %v38_v16 = vld [vmem:[%s12664_s1 + $0x48] sm:$0xff]  ;;  %v256_v18 = vld [vmem:[%s12665_s2 + $0x58] sm:$0xff]  ;;  %v255_v20 = vld [vmem:[%s12665_s2 + $0x50] sm:$0xff]  ;;  %s5943_s16 = sshll.u32 %s6777_s15, 4  ;;  %s5944_s16 = int_to_ptr.vmem [resolvable:$true] %s5943_s16 }
  0x20   :  { %v258_v17 = vld [vmem:[%s12665_s2 + $0x68] sm:$0xff]  ;;  %v252_v21 = vld [vmem:[%s12665_s2 + $0x38] sm:$0xff]  ;;  %v2059_v25 = vld [vmem:[%s12667_s4 + $0x70] sm:$0xff]  ;;  %s6745_s17 = scalar_lea.vmem %s5944_s16, 128  ;;  %p6750_p1 = scmp.lt.s32.totalorder %s5944_s16, %s5944_s16 }
  0x21   :  { %6524 = vset.pattern.permute.xlu1 %v6767_v2  ;;  %v254_v19 = vld [vmem:[%s12665_s2 + $0x48] sm:$0xff]  ;;  %v36_v23 = vld [vmem:[%s12664_s1 + $0x38] sm:$0xff]  ;;  %v253_v26 = vld [vmem:[%s12665_s2 + $0x40] sm:$0xff]  ;;  %p6746_p0 = scmp.ne.s32.totalorder %s5944_s16, %s6745_s17  ;;  %p6751_p2 = scmp.lt.s32.totalorder %s6745_s17, %s6745_s17 }
  0x22   :  { %190 = vperm.xlu1 %6524, %v40_v13   ;;  %v250_v22 = vld [vmem:[%s12665_s2 + $0x28] sm:$0xff]  ;;  %v248_v24 = vld [vmem:[%s12665_s2 + $0x18] sm:$0xff]  ;;  %v2057_v27 = vld [vmem:[%s12667_s4 + $0x60] sm:$0xff] }
  0x23   :  { %122 = vperm.xlu0 %6534, %v44_v3   ;;  %v2055_v28 = vld [vmem:[%s12667_s4 + $0x50] sm:$0xff]  ;;  %v34_v29 = vld [vmem:[%s12664_s1 + $0x28] sm:$0xff]  ;;  %v2053_v30 = vld [vmem:[%s12667_s4 + $0x40] sm:$0xff]  ;;  %p6752_p3 = por %p6751_p2, %p6750_p1 }
  0x24   :  { %v2051_v31 = vld [vmem:[%s12667_s4 + $0x30] sm:$0xff]  ;;  %v2049_v32 = vld [vmem:[%s12667_s4 + $0x20] sm:$0xff]  ;;  %v32_v36 = vld [vmem:[%s12664_s1 + $0x18] sm:$0xff] }
  0x25   :  { %v251_v33 = vld [vmem:[%s12665_s2 + $0x30] sm:$0xff]  ;;  %v2045_v35 = vld [vmem:[%s12667_s4] sm:$0xff]  ;;  %v30_v43 = vld [vmem:[%s12664_s1 + $0x8] sm:$0xff]  ;;  %p6753_p4 = pnand %p6752_p3, %p6746_p0 }
  0x26   :  { %6525 = vset.pattern.permute.xlu1 %v6768_v7  ;;  %v2047_v34 = vld [vmem:[%s12667_s4 + $0x10] sm:$0xff]  ;;  %v6115_v38 = vld [vmem:[%s12667_s4 + $0xe0] sm:$0xff]  ;;  %v246_v53 = vld [vmem:[%s12665_s2 + $0x8] sm:$0xff] }
  0x27   :  { %323 = vperm.xlu1 %6525, %v257_v14   ;;  %107 = vperm.xlu0 %6534, %v41_v1   ;;  %v6117_v37 = vld [vmem:[%s12667_s4 + $0xf0] sm:$0xff]  ;;  %v249_v39 = vld [vmem:[%s12665_s2 + $0x20] sm:$0xff]  ;;  %v2060_v56 = vld [vmem:[%s12667_s4 + $0x78] sm:$0xff] }
  0x28   :  { %v6113_v40 = vld [vmem:[%s12667_s4 + $0xd0] sm:$0xff]  ;;  %v6111_v41 = vld [vmem:[%s12667_s4 + $0xc0] sm:$0xff]  ;;  %v2058_v58 = vld [vmem:[%s12667_s4 + $0x68] sm:$0xff] }
  0x29   :  { %v6109_v42 = vld [vmem:[%s12667_s4 + $0xb0] sm:$0xff]  ;;  %v6107_v44 = vld [vmem:[%s12667_s4 + $0xa0] sm:$0xff]  ;;  %v2056_v61 = vld [vmem:[%s12667_s4 + $0x58] sm:$0xff] }
  0x2a   :  { %v6105_v45 = vld [vmem:[%s12667_s4 + $0x90] sm:$0xff]  ;;  %v6103_v48 = vld [vmem:[%s12667_s4 + $0x80] sm:$0xff]  ;;  %v2054_v1 = vld [vmem:[%s12667_s4 + $0x48] sm:$0xff] }
  0x2b   :  { %87 = vperm.xlu1 %6525, %v37_v5   ;;  %338 = vperm.xlu0 %6534, %v260_v15   ;;  %v247_v47 = vld [vmem:[%s12665_s2 + $0x10] sm:$0xff]  ;;  %v245_v50 = vld [vmem:[%s12665_s2] sm:$0xff]  ;;  %v2052_v4 = vld [vmem:[%s12667_s4 + $0x38] sm:$0xff] }
  0x2c   :  { %v5890_v51 = vld [vmem:[%s12669_s6] sm:$0xff]  ;;  %v2050_v10 = vld [vmem:[%s12667_s4 + $0x28] sm:$0xff] }
  0x2f   :  { %92 = vperm.xlu1 %6525, %v38_v16   ;;  %328 = vperm.xlu0 %6534, %v258_v17  }
  0x33   :  { %6526 = vset.pattern.permute.xlu1 %v6767_v2  ;;  %318 = vperm.xlu0 %6534, %v256_v18  }
  0x34   :  { %182 = vperm.xlu1 %6526, %v38_v16   ;;  %v2048_v16 = vld [vmem:[%s12667_s4 + $0x18] sm:$0xff] }
  0x37   :  { %308 = vperm.xlu0 %6534, %v254_v19  }
  0x38   :  { %6527 = vset.pattern.permute.xlu1 %v6768_v7 }
  0x39   :  { %313 = vperm.xlu1 %6527, %v255_v20  }
  0x3b   :  { %298 = vperm.xlu0 %6534, %v252_v21   ;;  %v2046_v21 = vld [vmem:[%s12667_s4 + $0x8] sm:$0xff] }
  0x3d   :  { %77 = vperm.xlu1 %6527, %v35_v8   ;;  %v28_v8 = vld [vmem:[%s12663_s0] sm:$0x3] }
  0x3f   :  { %288 = vperm.xlu0 %6534, %v250_v22  }
  0x41   :  { %82 = vperm.xlu1 %6527, %v36_v23  }
  0x43   :  { %278 = vperm.xlu0 %6534, %v248_v24  }
  0x45   :  { %6528 = vset.pattern.permute.xlu1 %v6767_v2 }
  0x46   :  { %174 = vperm.xlu1 %6528, %v36_v23  }
  0x47   :  { %2133 = vperm.xlu0 %6534, %v2059_v25  }
  0x4a   :  { %6529 = vset.pattern.permute.xlu1 %v6768_v7 }
  0x4b   :  { %303 = vperm.xlu1 %6529, %v253_v26   ;;  %2123 = vperm.xlu0 %6534, %v2057_v27  }
  0x4f   :  { %67 = vperm.xlu1 %6529, %v33_v9   ;;  %2113 = vperm.xlu0 %6534, %v2055_v28   ;;  %v6118_v28 = vld [vmem:[%s12667_s4 + $0xf8] sm:$0xff] }
  0x53   :  { %72 = vperm.xlu1 %6529, %v34_v29   ;;  %2103 = vperm.xlu0 %6534, %v2053_v30  }
  0x57   :  { %6530 = vset.pattern.permute.xlu1 %v6767_v2  ;;  %2093 = vperm.xlu0 %6534, %v2051_v31  }
  0x58   :  { %166 = vperm.xlu1 %6530, %v34_v29  }
  0x5b   :  { %2083 = vperm.xlu0 %6534, %v2049_v32  }
  0x5c   :  { %6531 = vset.pattern.permute.xlu1 %v6768_v7 }
  0x5d   :  { %293 = vperm.xlu1 %6531, %v251_v33  }
  0x5f   :  { %2073 = vperm.xlu0 %6534, %v2047_v34   ;;  %v6116_v34 = vld [vmem:[%s12667_s4 + $0xe8] sm:$0xff] }
  0x61   :  { %57 = vperm.xlu1 %6531, %v6852_v11  }
  0x63   :  { %2063 = vperm.xlu0 %6534, %v2045_v35  }
  0x65   :  { %62 = vperm.xlu1 %6531, %v32_v36  }
  0x67   :  { %4064 = vperm.xlu0 %6534, %v6117_v37   ;;  %v6114_v37 = vld [vmem:[%s12667_s4 + $0xd8] sm:$0xff] }
  0x69   :  { %6532 = vset.pattern.permute.xlu1 %v6767_v2 }
  0x6a   :  { %158 = vperm.xlu1 %6532, %v32_v36  }
  0x6b   :  { %4054 = vperm.xlu0 %6534, %v6115_v38  }
  0x6e   :  { %6533 = vset.pattern.permute.xlu1 %v6768_v7 }
  0x6f   :  { %283 = vperm.xlu1 %6533, %v249_v39   ;;  %4044 = vperm.xlu0 %6534, %v6113_v40   ;;  %v6112_v40 = vld [vmem:[%s12667_s4 + $0xc8] sm:$0xff] }
  0x73   :  { %4034 = vperm.xlu0 %6534, %v6111_v41   ;;  %47 = vperm.xlu1 %6533, %v6858_v12  }
  0x77   :  { %4024 = vperm.xlu0 %6534, %v6109_v42   ;;  %52 = vperm.xlu1 %6533, %v30_v43  }
  0x7b   :  { %4014 = vperm.xlu0 %6534, %v6107_v44   ;;  %6535 = vset.pattern.permute.xlu1 %v6767_v2  ;;  %v126_v2 = vshrl.u32 %v125_v62, 7 }
  0x7c   :  { %150 = vperm.xlu1 %6535, %v30_v43  }
  0x7d   :  { %v6975_v46 = vpop.permute.xlu0 %194  ;;  %v6999_v55 = vpop.permute.xlu1 %202  ;;  %v127_v5 = vsub.s32 0, %v126_v2 }
  0x7f   :  { %4004 = vperm.xlu0 %6534, %v6105_v45   ;;  %v7030_v11 = vrot.slane %v28_v8, %v127_v5  ;;  %v6110_v45 = vld [vmem:[%s12667_s4 + $0xb8] sm:$0xff] }
  0x80   :  { %6536 = vset.pattern.permute.xlu1 %v6768_v7  ;;  %v211_v7 = vsub.s32 1, %v126_v2  ;;  %v12675_v2 = vmov 920167782  }
  0x81   :  { %273 = vperm.xlu1 %6536, %v247_v47   ;;  %v6984_v49 = vpop.permute.xlu0 %186  ;;  %v207_v59 = vpop.permute.xlu1 %206 }
  0x82   :  { %v7032_v12 = vrot.slane %v28_v8, %v211_v7 }
  0x83   :  { %3994 = vperm.xlu0 %6534, %v6103_v48  }
  0x84   :  { %v228_v17 = vmul.f32 %v7032_v12, %v207_v59  ;;  %v7092_v5 = vmul.f32 %v7032_v12, %v6999_v55 }
  0x85   :  { %263 = vperm.xlu1 %6536, %v245_v50   ;;  %v6992_v52 = vpop.permute.xlu0 %178 }
  0x86   :  { %v113_v0 = vpop.permute.xlu1 %112 }
  0x87   :  { %5893 = vperm.xlu0 %6534, %v5890_v51   ;;  %v142_v23 = vmul.f32 %v7030_v11, %v113_v0 }
  0x89   :  { %268 = vperm.xlu1 %6536, %v246_v53   ;;  %v6997_v54 = vpop.permute.xlu0 %170  ;;  %v6108_v53 = vld [vmem:[%s12667_s4 + $0xa8] sm:$0xff] }
  0x8b   :  { %v199_v6 = vpop.permute.xlu1 %198 }
  0x8c   :  { %v226_v19 = vmul.f32 %v7032_v12, %v199_v6  ;;  %v12673_v6 = vmov 1326507024  }
  0x8d   :  { %2138 = vperm.xlu1 %6536, %v2060_v56   ;;  %v7004_v57 = vpop.permute.xlu0 %162 }
  0x8e   :  { %v242_v27 = vadd.f32 %v226_v19, %v142_v23  ;;  %v12689_v19 = vmov 2131351028  }
  0x90   :  { %v7035_v14 = vpop.permute.xlu1 %333 }
  0x91   :  { %2128 = vperm.xlu1 %6536, %v2058_v58   ;;  %v7009_v60 = vpop.permute.xlu0 %154 }
  0x94   :  { %v7050_v24 = vpop.permute.xlu1 %97 }
  0x95   :  { %2118 = vperm.xlu1 %6536, %v2056_v61   ;;  %v7014_v63 = vpop.permute.xlu0 %146 }
  0x98   :  { %v103_v31 = vpop.permute.xlu1 %102 }
  0x99   :  { %2108 = vperm.xlu1 %6536, %v2054_v1   ;;  %v140_v48 = vmul.f32 %v7030_v11, %v103_v31  ;;  %v6106_v1 = vld [vmem:[%s12667_s4 + $0x98] sm:$0xff] }
  0x9a   :  { %v7019_v3 = vpop.permute.xlu0 %117 }
  0x9d   :  { %2098 = vperm.xlu1 %6536, %v2052_v4   ;;  %v191_v38 = vpop.permute.xlu1 %190 }
  0x9e   :  { %v123_v9 = vpop.permute.xlu0 %122  ;;  %v224_v42 = vmul.f32 %v7032_v12, %v191_v38 }
  0x9f   :  { %v144_v13 = vmul.f32 %v7030_v11, %v123_v9 }
  0xa0   :  { %v240_v51 = vadd.f32 %v224_v42, %v140_v48 }
  0xa1   :  { %2088 = vperm.xlu1 %6536, %v2050_v10   ;;  %v244_v18 = vadd.f32 %v228_v17, %v144_v13  ;;  %v12679_v13 = vmov 2102212464  }
  0xa2   :  { %v7037_v15 = vpop.permute.xlu0 %107  ;;  %v7069_v43 = vpop.permute.xlu1 %323 }
  0xa5   :  { %2078 = vperm.xlu1 %6536, %v2048_v16  }
  0xa6   :  { %v339_v20 = vpop.permute.xlu0 %338  ;;  %v7080_v59 = vpop.permute.xlu1 %87 }
  0xa7   :  { %v7047_v22 = vadd.f32 %v339_v20, %v244_v18  ;;  %v12687_v18 = vmov 2475754826  }
  0xa9   :  { %12921 = vst [vmem:[#allocation5_spill] sm:$0xff] %v7047_v22  ;;  %2068 = vperm.xlu1 %6536, %v2046_v21   ;;  %v1920_v25 = vand.u32 2139095040, %v7047_v22  ;;  %v12671_v62 = vand.u32 2147483647, %v7047_v22 }
  0xaa   :  { %v329_v26 = vpop.permute.xlu0 %328  ;;  %v93_v23 = vpop.permute.xlu1 %92 }
  0xab   :  { %v1921_v29 = vshrl.u32 %v1920_v25, 23  ;;  %v7056_v30 = vadd.f32 %v329_v26, %v242_v27  ;;  %v1924_v9 = vand.u32 8388607, %v12671_v62  ;;  %v6104_v26 = vld [vmem:[%s12667_s4 + $0x88] sm:$0xff]  ;;  %v7115_v27 = vmul.f32 %v7032_v12, %v6984_v49 }
  0xac   :  { %v138_v49 = vmul.f32 %v7030_v11, %v93_v23 }
  0xad   :  { %12922 = vst [vmem:[#allocation6_spill] sm:$0xff] %v7056_v30  ;;  %4069 = vperm.xlu1 %6536, %v6118_v28   ;;  %v6011_v32 = vadd.s32 4294967169, %v1921_v29  ;;  %v1712_v33 = vand.u32 2139095040, %v7056_v30  ;;  %v12672_v17 = vand.u32 2147483647, %v7056_v30  ;;  %v7119_v28 = vmul.f32 %v7030_v11, %v7050_v24 }
  0xae   :  { %v319_v50 = vpop.permute.xlu0 %318 }
  0xaf   :  { %v1927_v35 = vadd.s32 1, %v6011_v32  ;;  %v1713_v36 = vshrl.u32 %v1712_v33, 23  ;;  %v7082_v61 = vadd.f32 %v319_v50, %v240_v51  ;;  %v12683_v32 = vmov 683565275  }
  0xb0   :  { %v1716_v24 = vand.u32 8388607, %v12672_v17 }
  0xb1   :  { %4059 = vperm.xlu1 %6536, %v6116_v34   ;;  %vm1928_vm0 = vcmp.gt.s32.totalorder %v1927_v35, 0  ;;  %v6003_v39 = vadd.s32 4294967169, %v1713_v36  ;;  %12923 = vst [vmem:[#allocation7_spill] sm:$0xff] %v7082_v61  ;;  %v1504_v8 = vand.u32 2139095040, %v7082_v61 }
  0xb2   :  { %v1929_v41 = vsel %vm1928_vm0, %v1927_v35, 0 }
  0xb3   :  { %v1719_v44 = vadd.s32 1, %v6003_v39  ;;  %v1931_v47 = vand.u32 31, %v1929_v41  ;;  %v7099_v10 = vshrl.u32 %v1929_v41, 5  ;;  %v1505_v36 = vshrl.u32 %v1504_v8, 23 }
  0xb5   :  { %4049 = vperm.xlu1 %6536, %v6114_v37   ;;  %vm1720_vm1 = vcmp.gt.s32.totalorder %v1719_v44, 0  ;;  %v7078_v56 = vsub.s32 32, %v1931_v47  ;;  %v1943_v16 = vshll.u32 %v12679_v13, %v1931_v47  ;;  %v1946_v21 = vshll.u32 %v12675_v2, %v1931_v47 }
  0xb6   :  { %v1721_v58 = vsel %vm1720_vm1, %v1719_v44, 0  ;;  %v1934_v33 = vshll.u32 %v12683_v32, %v1931_v47  ;;  %v1937_v34 = vshll.u32 %v12687_v18, %v1931_v47  ;;  %v1925_v37 = vor.u32 8388608, %v1924_v9 }
  0xb7   :  { %v1723_v0 = vand.u32 31, %v1721_v58  ;;  %v1944_v4 = vshrl.u32 %v12675_v2, %v7078_v56  ;;  %v1947_v7 = vshrl.u32 %v12673_v6, %v7078_v56  ;;  %v1935_v55 = vshrl.u32 %v12687_v18, %v7078_v56 }
  0xb8   :  { %v1938_v20 = vshrl.u32 %v12689_v19, %v7078_v56  ;;  %v1941_v29 = vshrl.u32 %v12679_v13, %v7078_v56  ;;  %v1940_v38 = vshll.u32 %v12689_v19, %v1931_v47  ;;  %vm1952_vm2 = vcmp.lt.s32.totalorder %v7099_v10, 4 }
  0xb9   :  { %4039 = vperm.xlu1 %6536, %v6112_v40   ;;  %v7108_v25 = vsub.s32 32, %v1723_v0  ;;  %v1945_v31 = vor.u32 %v1944_v4, %v1943_v16  ;;  %v1948_v35 = vor.u32 %v1947_v7, %v1946_v21  ;;  %v7129_v39 = vor.u32 %v1935_v55, %v1934_v33 }
  0xba   :  { %v7131_v40 = vor.u32 %v1938_v20, %v1937_v34  ;;  %v7136_v42 = vor.u32 %v1941_v29, %v1940_v38  ;;  %vm1949_vm3 = vcmp.lt.s32.totalorder %v7099_v10, 1  ;;  %v1735_v50 = vshll.u32 %v12679_v13, %v1723_v0  ;;  %v183_v34 = vpop.permute.xlu1 %182 }
  0xbb   :  { %v1736_v41 = vshrl.u32 %v12675_v2, %v7108_v25  ;;  %v1958_v44 = vsel %vm1952_vm2, %v1945_v31, 920167782  ;;  %v1962_v47 = vsel %vm1952_vm2, %v1948_v35, 1326507024  ;;  %v1727_v48 = vshrl.u32 %v12687_v18, %v7108_v25 }
  0xbc   :  { %v5995_v51 = vadd.s32 4294967169, %v1505_v36  ;;  %v1733_v4 = vshrl.u32 %v12679_v13, %v7108_v25  ;;  %v1738_v7 = vshll.u32 %v12675_v2, %v1723_v0  ;;  %vm1951_vm4 = vcmp.lt.s32.totalorder %v7099_v10, 3 }
  0xbd   :  { %4029 = vperm.xlu1 %6536, %v6110_v45   ;;  %v1739_v45 = vshrl.u32 %v12673_v6, %v7108_v25  ;;  %v1957_v8 = vsel %vm1949_vm3, %v7129_v39, %v7131_v40  ;;  %v1726_v9 = vshll.u32 %v12683_v32, %v1723_v0  ;;  %v1737_v16 = vor.u32 %v1736_v41, %v1735_v50 }
  0xbe   :  { %v1732_v55 = vshll.u32 %v12689_v19, %v1723_v0  ;;  %v1511_v21 = vadd.s32 1, %v5995_v51  ;;  %v1959_v23 = vsel %vm1951_vm4, %v7136_v42, %v1958_v44  ;;  %v1963_v29 = vsel %vm1951_vm4, %v1945_v31, %v1962_v47 }
  0xbf   :  { %v1740_v20 = vor.u32 %v1739_v45, %v1738_v7  ;;  %v7172_v33 = vor.u32 %v1727_v48, %v1726_v9  ;;  %vm1950_vm7 = vcmp.lt.s32.totalorder %v7099_v10, 2  ;;  %v7178_v36 = vshll.u32 %v1925_v37, 8 }
  0xc0   :  { %vm1512_vm6 = vcmp.gt.s32.totalorder %v1511_v21, 0  ;;  %v1960_v31 = vsel %vm1950_vm7, %v1957_v8, %v1959_v23  ;;  %v222_v47 = vmul.f32 %v7032_v12, %v183_v34  ;;  %v1717_v50 = vor.u32 8388608, %v1716_v24  ;;  %v309_v34 = vpop.permute.xlu0 %308 }
  0xc1   :  { %4019 = vperm.xlu1 %6536, %v6108_v53   ;;  %v7148_v53 = vshrl.u32 %v1721_v58, 5  ;;  %v1729_v58 = vshll.u32 %v12687_v18, %v1723_v0  ;;  %v1734_v0 = vor.u32 %v1733_v4, %v1732_v55  ;;  %v1513_v41 = vsel %vm1512_vm6, %v1511_v21, 0 }
  0xc2   :  { %v1515_v45 = vand.u32 31, %v1513_v41  ;;  %v7201_v7 = vmul.u32.u64.low %v7178_v36, %v1960_v31  ;;  %v7202_v8 = vmul.u32.u64.high %v7178_v36, %v1960_v31, %v7201_v7  ;;  %v7217_v23 = vshll.u32 %v1717_v50, 8 }
  0xc3   :  { %vm1744_vm5 = vcmp.lt.s32.totalorder %v7148_v53, 4  ;;  %vm1741_vm8 = vcmp.lt.s32.totalorder %v7148_v53, 1  ;;  %vm1743_vm9 = vcmp.lt.s32.totalorder %v7148_v53, 3  ;;  %vm1742_vm10 = vcmp.lt.s32.totalorder %v7148_v53, 2 }
  0xc4   :  { %v1750_v38 = vsel %vm1744_vm5, %v1737_v16, 920167782  ;;  %v1754_v44 = vsel %vm1744_vm5, %v1740_v20, 1326507024  ;;  %v7198_v4 = vsub.s32 32, %v1515_v45  ;;  %v238_v20 = vadd.f32 %v222_v47, %v138_v49 }
  0xc5   :  { %4009 = vperm.xlu1 %6536, %v6106_v1   ;;  %v1730_v1 = vshrl.u32 %v12689_v19, %v7108_v25  ;;  %v1751_v51 = vsel %vm1743_vm9, %v1734_v0, %v1750_v38  ;;  %v1755_v9 = vsel %vm1743_vm9, %v1737_v16, %v1754_v44  ;;  %v1933_v16 = vshrl.u32 %v12683_v32, %v7078_v56 }
  0xc6   :  { %v7227_v31 = vshrl.u32 %v1513_v41, 5  ;;  %v1527_v49 = vshll.u32 %v12679_v13, %v1515_v45  ;;  %v1519_v44 = vshrl.u32 %v12687_v18, %v7198_v4  ;;  %v1522_v47 = vshrl.u32 %v12689_v19, %v7198_v4 }
  0xc7   :  { %v7174_v35 = vor.u32 %v1730_v1, %v1729_v58  ;;  %v12678_v1 = vand.u32 2147483647, %v7082_v61  ;;  %v1530_v50 = vshll.u32 %v12675_v2, %v1515_v45  ;;  %v1954_v17 = vsel %vm1952_vm2, %v7136_v42, 2102212464 }
  0xc8   :  { %vm1536_vm11 = vcmp.lt.s32.totalorder %v7227_v31, 4  ;;  %vm1533_vm12 = vcmp.lt.s32.totalorder %v7227_v31, 1  ;;  %vm1535_vm13 = vcmp.lt.s32.totalorder %v7227_v31, 3  ;;  %vm1534_vm15 = vcmp.lt.s32.totalorder %v7227_v31, 2 }
  0xc9   :  { %3999 = vperm.xlu1 %6536, %v6104_v26   ;;  %v1961_v26 = vsel %vm1949_vm3, %v7131_v40, %v7136_v42  ;;  %v1749_v37 = vsel %vm1741_vm8, %v7172_v33, %v7174_v35  ;;  %v1753_v24 = vsel %vm1741_vm8, %v7174_v35, %v1734_v0  ;;  %v1953_v42 = vsel %vm1949_vm3, %v1933_v16, %v7129_v39 }
  0xca   :  { %v1964_v48 = vsel %vm1950_vm7, %v1961_v26, %v1963_v29  ;;  %v1752_v21 = vsel %vm1742_vm10, %v1749_v37, %v1751_v51  ;;  %v1528_v26 = vshrl.u32 %v12675_v2, %v7198_v4  ;;  %v1531_v29 = vshrl.u32 %v12673_v6, %v7198_v4 }
  0xcb   :  { %v7211_v58 = vmul.u32.u64.low %v7178_v36, %v1964_v48  ;;  %v7212_v55 = vmul.u32.u64.high %v7178_v36, %v1964_v48, %v7211_v58  ;;  %v1756_v38 = vsel %vm1742_vm10, %v1753_v24, %v1755_v9  ;;  %v1525_v48 = vshrl.u32 %v12679_v13, %v7198_v4 }
  0xcc   :  { %v7238_v56 = vmul.u32.u64.low %v7217_v23, %v1752_v21  ;;  %v7239_v37 = vmul.u32.u64.high %v7217_v23, %v1752_v21, %v7238_v56  ;;  %v1529_v41 = vor.u32 %v1528_v26, %v1527_v49  ;;  %v7242_v51 = vadd.f32 %v309_v34, %v238_v20  ;;  %v314_v49 = vpop.permute.xlu1 %313 }
  0xcd   :  { %v1518_v24 = vshll.u32 %v12683_v32, %v1515_v45  ;;  %v1521_v9 = vshll.u32 %v12687_v18, %v1515_v45  ;;  %v1524_v58 = vshll.u32 %v12689_v19, %v1515_v45  ;;  %v1532_v62 = vor.u32 %v1531_v29, %v1530_v50 }
  0xce   :  { %12924 = vst [vmem:[#allocation8_spill] sm:$0xff] %v7242_v51  ;;  %v7251_v6 = vmul.u32.u64.low %v7217_v23, %v1756_v38  ;;  %v7252_v2 = vmul.u32.u64.high %v7217_v23, %v1756_v38, %v7251_v6  ;;  %v1508_v21 = vand.u32 8388607, %v12678_v1  ;;  %v143_v45 = vmul.f32 %v7030_v11, %v7019_v3 }
  0xcf   :  { %v1520_v20 = vor.u32 %v1519_v44, %v1518_v24  ;;  %v1523_v26 = vor.u32 %v1522_v47, %v1521_v9  ;;  %v1526_v34 = vor.u32 %v1525_v48, %v1524_v58  ;;  %v1542_v29 = vsel %vm1536_vm11, %v1529_v41, 920167782 }
  0xd0   :  { %v239_v6 = vadd.f32 %v7115_v27, %v7119_v28  ;;  %v1955_v38 = vsel %vm1951_vm4, %v7131_v40, %v1954_v17  ;;  %v1746_v44 = vsel %vm1744_vm5, %v1734_v0, 2102212464  ;;  %v1546_v3 = vsel %vm1536_vm11, %v1532_v62, 1326507024 }
  0xd1   :  { %v1296_v47 = vand.u32 2139095040, %v7242_v51  ;;  %v1725_v39 = vshrl.u32 %v12683_v32, %v7108_v25  ;;  %v1975_v28 = vadd.s32 1, %v7202_v8  ;;  %v1509_v17 = vor.u32 8388608, %v1508_v21 }
  0xd2   :  { %v7278_v27 = vadd.f32 %v314_v49, %v239_v6  ;;  %v1541_v40 = vsel %vm1533_vm12, %v1520_v20, %v1523_v26  ;;  %v1543_v62 = vsel %vm1535_vm13, %v1526_v34, %v1542_v29  ;;  %v1747_v25 = vsel %vm1743_vm9, %v7174_v35, %v1746_v44 }
  0xd3   :  { %v1745_v0 = vsel %vm1741_vm8, %v1725_v39, %v7172_v33  ;;  %v1545_v16 = vsel %vm1533_vm12, %v1523_v26, %v1526_v34  ;;  %v1547_v48 = vsel %vm1535_vm13, %v1529_v41, %v1546_v3  ;;  %vm1974_vm14 = vc.u32 %v7212_v55, %v7201_v7 }
  0xd4   :  { %12925 = vst [vmem:[#allocation9_spill] sm:$0xff] %v7278_v27  ;;  %v1767_v50 = vadd.s32 1, %v7239_v37  ;;  %v1297_v24 = vshrl.u32 %v1296_v47, 23  ;;  %v243_v33 = vadd.f32 %v7092_v5, %v143_v45  ;;  %v1956_v9 = vsel %vm1950_vm7, %v1953_v42, %v1955_v38 }
  0xd5   :  { %vm1766_vm0 = vc.u32 %v7252_v2, %v7238_v56  ;;  %v1544_v35 = vsel %vm1534_vm15, %v1541_v40, %v1543_v62  ;;  %v1748_v41 = vsel %vm1742_vm10, %v1745_v0, %v1747_v25  ;;  %v1548_v58 = vsel %vm1534_vm15, %v1545_v16, %v1547_v48 }
  0xd6   :  { %v7310_v21 = vshll.u32 %v1509_v17, 8  ;;  %v5987_v49 = vadd.s32 4294967169, %v1297_v24  ;;  %v225_v5 = vmul.f32 %v7032_v12, %v6975_v46  ;;  %v141_v10 = vmul.f32 %v7030_v11, %v7037_v15 }
  0xd7   :  { %v1976_v45 = vsel %vm1974_vm14, %v1975_v28, %v7202_v8  ;;  %v1400_v42 = vand.u32 2139095040, %v7278_v27  ;;  %v1972_v29 = vmul.u32 %v7178_v36, %v1956_v9  ;;  %v1768_v53 = vsel %vm1766_vm0, %v1767_v50, %v7239_v37 }
  0xd8   :  { %v7321_v6 = vmul.u32.u64.low %v7310_v21, %v1544_v35  ;;  %v7322_v38 = vmul.u32.u64.high %v7310_v21, %v1544_v35, %v7321_v6  ;;  %v1764_v44 = vmul.u32 %v7217_v23, %v1748_v41  ;;  %v1303_v15 = vadd.s32 1, %v5987_v49 }
  0xd9   :  { %v7327_v46 = vmul.u32.u64.low %v7310_v21, %v1548_v58  ;;  %v7328_v3 = vmul.u32.u64.high %v7310_v21, %v1548_v58, %v7327_v46  ;;  %v7331_v8 = vadd.f32 %v7035_v14, %v243_v33  ;;  %v7333_v47 = vadd.s32 %v1976_v45, %v1972_v29 }
  0xda   :  { %v1538_v36 = vsel %vm1536_vm11, %v1526_v34, 2102212464  ;;  %v7337_v37 = vadd.s32 %v1768_v53, %v1764_v44  ;;  %v1517_v39 = vshrl.u32 %v12683_v32, %v7198_v4  ;;  %vm1304_vm1 = vcmp.gt.s32.totalorder %v1303_v15, 0 }
  0xdb   :  { %12926 = vst [vmem:[#allocation10_spill] sm:$0xff] %v7331_v8  ;;  %v1401_v23 = vshrl.u32 %v1400_v42, 23  ;;  %v241_v28 = vadd.f32 %v225_v5, %v141_v10  ;;  %v1305_v17 = vsel %vm1304_vm1, %v1303_v15, 0  ;;  %v1539_v14 = vsel %vm1535_vm13, %v1523_v26, %v1538_v36  ;;  %v7380_v15 = vpop.permute.xlu1 %77 }
  0xdc   :  { %v1537_v40 = vsel %vm1533_vm12, %v1517_v39, %v1520_v20  ;;  %v1307_v62 = vand.u32 31, %v1305_v17  ;;  %v1816_v0 = vand.u32 2139095040, %v7331_v8  ;;  %v1978_v34 = vadd.s32 536870912, %v7333_v47 }
  0xdd   :  { %v1770_v25 = vadd.s32 536870912, %v7337_v37  ;;  %v5991_v4 = vadd.s32 4294967169, %v1401_v23  ;;  %v7351_v48 = vadd.f32 %v7069_v43, %v241_v28  ;;  %v1540_v50 = vsel %vm1534_vm15, %v1537_v40, %v1539_v14 }
  0xde   :  { %v7348_v16 = vsub.s32 32, %v1307_v62  ;;  %v1559_v20 = vadd.s32 1, %v7322_v38  ;;  %v12677_v26 = vand.u32 2147483647, %v7242_v51  ;;  %vm1558_vm2 = vc.u32 %v7328_v3, %v7321_v6 }
  0xdf   :  { %12927 = vst [vmem:[#allocation11_spill] sm:$0xff] %v7351_v48  ;;  %v7359_v24 = vshrl.u32 %v1305_v17, 5  ;;  %v1319_v9 = vshll.u32 %v12679_v13, %v1307_v62  ;;  %v12928_v35 = vmov 920167782   ;;  %v12929_v58 = vmov 1326507024  }
  0xe0   :  { %v1311_v33 = vshrl.u32 %v12687_v18, %v7348_v16  ;;  %v1314_v43 = vshrl.u32 %v12689_v19, %v7348_v16  ;;  %v1317_v31 = vshrl.u32 %v12679_v13, %v7348_v16  ;;  %v1320_v41 = vshrl.u32 %v12928_v35, %v7348_v16 }
  0xe1   :  { %v1323_v49 = vshrl.u32 %v12929_v58, %v7348_v16  ;;  %v7372_v5 = vshrl.u32 %v1978_v34, 30  ;;  %v7374_v10 = vshrl.u32 %v1770_v25, 30  ;;  %v1322_v45 = vshll.u32 %v12928_v35, %v1307_v62 }
  0xe2   :  { %v1407_v42 = vadd.s32 1, %v5991_v4  ;;  %v1310_v29 = vshll.u32 %v12683_v32, %v1307_v62  ;;  %v1313_v53 = vshll.u32 %v12687_v18, %v1307_v62  ;;  %v1316_v44 = vshll.u32 %v12689_v19, %v1307_v62 }
  0xe3   :  { %12930 = vst [vmem:[#allocation12_spill] sm:$0xff] %v7372_v5  ;;  %12931 = vst [vmem:[#allocation13_spill] sm:$0xff] %v7374_v10  ;;  %v1321_v46 = vor.u32 %v1320_v41, %v1319_v9  ;;  %v1556_v36 = vmul.u32 %v7310_v21, %v1540_v50  ;;  %v1560_v39 = vsel %vm1558_vm2, %v1559_v20, %v7322_v38  ;;  %v1300_v23 = vand.u32 8388607, %v12677_v26  ;;  %v7411_v9 = vpop.permute.xlu1 %82 }
  0xe4   :  { %v1324_v28 = vor.u32 %v1323_v49, %v1322_v45  ;;  %v7389_v17 = vor.u32 %v1311_v33, %v1310_v29  ;;  %v7391_v40 = vor.u32 %v1314_v43, %v1313_v53  ;;  %v1318_v14 = vor.u32 %v1317_v31, %v1316_v44 }
  0xe5   :  { %vm1328_vm3 = vcmp.lt.s32.totalorder %v7359_v24, 4  ;;  %v1817_v62 = vshrl.u32 %v1816_v0, 23  ;;  %v1608_v34 = vand.u32 2139095040, %v7351_v48  ;;  %v7397_v25 = vadd.s32 %v1560_v39, %v1556_v36 }
  0xe6   :  { %v1334_v21 = vsel %vm1328_vm3, %v1321_v46, 920167782  ;;  %vm1408_vm4 = vcmp.gt.s32.totalorder %v1407_v42, 0  ;;  %v1980_v38 = vshll.u32 %v7372_v5, 30  ;;  %vm1325_vm5 = vcmp.lt.s32.totalorder %v7359_v24, 1 }
  0xe7   :  { %vm1327_vm6 = vcmp.lt.s32.totalorder %v7359_v24, 3  ;;  %v1338_v4 = vsel %vm1328_vm3, %v1324_v28, 1326507024  ;;  %v1772_v50 = vshll.u32 %v7374_v10, 30  ;;  %v1301_v0 = vor.u32 8388608, %v1300_v23 }
  0xe8   :  { %v1333_v20 = vsel %vm1325_vm5, %v7389_v17, %v7391_v40  ;;  %v1335_v33 = vsel %vm1327_vm6, %v1318_v14, %v1334_v21  ;;  %v6007_v43 = vadd.s32 4294967169, %v1817_v62  ;;  %v1337_v31 = vsel %vm1325_vm5, %v7391_v40, %v1318_v14 }
  0xe9   :  { %v1339_v41 = vsel %vm1327_vm6, %v1321_v46, %v1338_v4  ;;  %v1409_v49 = vsel %vm1408_vm4, %v1407_v42, 0  ;;  %v1609_v45 = vshrl.u32 %v1608_v34, 23  ;;  %v1562_v29 = vadd.s32 536870912, %v7397_v25  ;;  %v7448_v4 = vpop.permute.xlu1 %174 }
  0xea   :  { %vm1326_vm7 = vcmp.lt.s32.totalorder %v7359_v24, 2  ;;  %v7421_v53 = vsub.s32 %v7333_v47, %v1980_v38  ;;  %v1411_v36 = vand.u32 31, %v1409_v49  ;;  %v221_v39 = vmul.f32 %v7032_v12, %v6992_v52 }
  0xeb   :  { %v1336_v44 = vsel %vm1326_vm7, %v1333_v20, %v1335_v33  ;;  %v7428_v23 = vsub.s32 %v7337_v37, %v1772_v50  ;;  %v1340_v42 = vsel %vm1326_vm7, %v1337_v31, %v1339_v41  ;;  %v7432_v46 = vshll.u32 %v1301_v0, 8 }
  0xec   :  { %v7434_v28 = vadd.s32 1, %v6007_v43  ;;  %v137_v47 = vmul.f32 %v7030_v11, %v7080_v59  ;;  %v7438_v62 = vsub.s32 32, %v1411_v36  ;;  %v5999_v34 = vadd.s32 4294967169, %v1609_v45 }
  0xed   :  { %v7441_v38 = vshrl.u32 %v1562_v29, 30  ;;  %v7444_v52 = vmul.u32.u64.low %v7432_v46, %v1336_v44  ;;  %v7445_v37 = vmul.u32.u64.high %v7432_v46, %v1336_v44, %v7444_v52  ;;  %v1983_v50 = vsub.s32 0, %v7421_v53 }
  0xee   :  { %v7452_v0 = vmul.u32.u64.low %v7432_v46, %v1340_v42  ;;  %v7453_v20 = vmul.u32.u64.high %v7432_v46, %v1340_v42, %v7452_v0  ;;  %v1775_v33 = vsub.s32 0, %v7428_v23  ;;  %v1330_v43 = vsel %vm1328_vm3, %v1318_v14, 2102212464 }
  0xef   :  { %12932 = vst [vmem:[#allocation14_spill] sm:$0xff] %v7441_v38  ;;  %v7459_v31 = vshrl.u32 %v1409_v49, 5  ;;  %v1415_v41 = vshrl.u32 %v12687_v18, %v7438_v62  ;;  %vm1824_vm8 = vcmp.gt.s32.totalorder %v7434_v28, 0  ;;  %v1418_v45 = vshrl.u32 %v12689_v19, %v7438_v62 }
  0xf0   :  { %v1421_v29 = vshrl.u32 %v12679_v13, %v7438_v62  ;;  %v1423_v44 = vshll.u32 %v12679_v13, %v1411_v36  ;;  %v1424_v42 = vshrl.u32 %v12928_v35, %v7438_v62  ;;  %v1564_v14 = vshll.u32 %v7441_v38, 30 }
  0xf1   :  { %v1309_v49 = vshrl.u32 %v12683_v32, %v7348_v16  ;;  %v1414_v0 = vshll.u32 %v12683_v32, %v1411_v36  ;;  %v1417_v26 = vshll.u32 %v12687_v18, %v1411_v36  ;;  %v1420_v1 = vshll.u32 %v12689_v19, %v1411_v36  ;;  %v304_v19 = vpop.permute.xlu1 %303 }
  0xf2   :  { %v1425_v21 = vor.u32 %v1424_v42, %v1423_v44  ;;  %v1426_v59 = vshll.u32 %v12928_v35, %v1411_v36  ;;  %v1427_v13 = vshrl.u32 %v12929_v58, %v7438_v62  ;;  %v1331_v16 = vsel %vm1327_vm6, %v7391_v40, %v1330_v43 }
  0xf3   :  { %v1329_v10 = vsel %vm1325_vm5, %v1309_v49, %v7389_v17  ;;  %v12933_v32 = vand.u32 2147483647, %v7278_v27  ;;  %v7488_v18 = vor.u32 %v1415_v41, %v1414_v0  ;;  %v7490_v44 = vor.u32 %v1418_v45, %v1417_v26 }
  0xf4   :  { %v1422_v36 = vor.u32 %v1421_v29, %v1420_v1  ;;  %v1428_v42 = vor.u32 %v1427_v13, %v1426_v59  ;;  %vm1432_vm9 = vcmp.lt.s32.totalorder %v7459_v31, 4  ;;  %v7494_v48 = vsub.s32 %v7397_v25, %v1564_v14 }
  0xf5   :  { %v1404_v38 = vand.u32 8388607, %v12933_v32  ;;  %v1351_v17 = vadd.s32 1, %v7445_v37  ;;  %v1438_v40 = vsel %vm1432_vm9, %v1425_v21, 920167782  ;;  %v237_v43 = vadd.f32 %v221_v39, %v137_v47 }
  0xf6   :  { %v1615_v49 = vadd.s32 1, %v5999_v34  ;;  %v6012_v32 = vmin.u32 %v1983_v50, %v7421_v53  ;;  %vm1350_vm10 = vc.u32 %v7453_v20, %v7444_v52  ;;  %v1442_v13 = vsel %vm1432_vm9, %v1428_v42, 1326507024 }
  0xf7   :  { %v1332_v1 = vsel %vm1326_vm7, %v1329_v10, %v1331_v16  ;;  %vm1429_vm11 = vcmp.lt.s32.totalorder %v7459_v31, 1  ;;  %vm1431_vm12 = vcmp.lt.s32.totalorder %v7459_v31, 3  ;;  %v7508_v26 = vadd.f32 %v304_v19, %v237_v43 }
  0xf8   :  { %v6004_v25 = vmin.u32 %v1775_v33, %v7428_v23  ;;  %v1405_v39 = vor.u32 8388608, %v1404_v38  ;;  %v1437_v47 = vsel %vm1429_vm11, %v7488_v18, %v7490_v44  ;;  %v1439_v34 = vsel %vm1431_vm12, %v1422_v36, %v1438_v40  ;;  %v7524_v38 = vpop.permute.xlu1 %67 }
  0xf9   :  { %12934 = vst [vmem:[#allocation15_spill] sm:$0xff] %v7508_v26  ;;  %v1567_v24 = vsub.s32 0, %v7494_v48  ;;  %v1352_v10 = vsel %vm1350_vm10, %v1351_v17, %v7445_v37  ;;  %v1441_v19 = vsel %vm1429_vm11, %v7490_v44, %v1422_v36  ;;  %v1443_v50 = vsel %vm1431_vm12, %v1425_v21, %v1442_v13 }
  0xfa   :  { %v219_v59 = vmul.f32 %v7032_v12, %v6997_v54  ;;  %v1985_v33 = vclz %v6012_v32  ;;  %v1348_v41 = vmul.u32 %v7432_v46, %v1332_v1  ;;  %vm1430_vm13 = vcmp.lt.s32.totalorder %v7459_v31, 2 }
  0xfb   :  { %v1825_v37 = vsel %vm1824_vm8, %v7434_v28, 0  ;;  %vm1616_vm14 = vcmp.gt.s32.totalorder %v1615_v49, 0  ;;  %v1440_v45 = vsel %vm1430_vm13, %v1437_v47, %v1439_v34  ;;  %v1192_v21 = vand.u32 2139095040, %v7508_v26 }
  0xfc   :  { %v1777_v29 = vclz %v6004_v25  ;;  %v7536_v14 = vadd.s32 %v1352_v10, %v1348_v41  ;;  %v1444_v54 = vsel %vm1430_vm13, %v1441_v19, %v1443_v50  ;;  %v7540_v0 = vshll.u32 %v1405_v39, 8 }
  0xfd   :  { %v5996_v46 = vmin.u32 %v1567_v24, %v7494_v48  ;;  %v135_v16 = vmul.f32 %v7030_v11, %v7380_v15  ;;  %v1193_v28 = vshrl.u32 %v1192_v21, 23  ;;  %v12935_v42 = vand.u32 2147483647, %v7331_v8  ;;  %v7560_v15 = vpop.permute.xlu1 %72 }
  0xfe   :  { %v1617_v40 = vsel %vm1616_vm14, %v1615_v49, 0  ;;  %v6013_v43 = vadd.s32 4294967294, %v1985_v33  ;;  %v7550_v32 = vmul.u32.u64.low %v7540_v0, %v1440_v45  ;;  %v7551_v13 = vmul.u32.u64.high %v7540_v0, %v1440_v45, %v7550_v32  ;;  %12940 = vst [vmem:[#allocation20_spill] sm:$0xff] %v7560_v15 }
  0xff   :  { %v7547_v17 = vand.u32 8388607, %v12935_v42  ;;  %v7554_v1 = vand.u32 31, %v1825_v37  ;;  %v7557_v25 = vmul.u32.u64.low %v7540_v0, %v1444_v54  ;;  %v7558_v39 = vmul.u32.u64.high %v7540_v0, %v1444_v54, %v7557_v25 }
 0x100   :  { %12937 = vst [vmem:[#allocation17_spill] sm:$0xff] %v7550_v32  ;;  %v5983_v47 = vadd.s32 4294967169, %v1193_v28  ;;  %v7564_v34 = vmul.f32 %v7032_v12, %v7004_v57  ;;  %v6005_v49 = vadd.s32 4294967294, %v1777_v29  ;;  %v1354_v24 = vadd.s32 536870912, %v7536_v14 }
 0x101   :  { %12936 = vst [vmem:[#allocation16_spill] sm:$0xff] %v7547_v17  ;;  %12938 = vst [vmem:[#allocation18_spill] sm:$0xff] %v7554_v1  ;;  %v7567_v10 = vand.u32 31, %v1617_v40  ;;  %v1569_v19 = vclz %v5996_v46  ;;  %v7569_v33 = vadd.f32 %v219_v59, %v135_v16  ;;  %v7573_v41 = vmul.f32 %v7032_v12, %v7009_v60  ;;  %v7600_v25 = vpop.permute.xlu1 %166 }
 0x102   :  { %12939 = vst [vmem:[#allocation19_spill] sm:$0xff] %v7558_v39  ;;  %v1199_v50 = vadd.s32 1, %v5983_v47  ;;  %v7577_v45 = vmul.f32 %v7032_v12, %v7014_v63  ;;  %vm6014_vm15 = vcmp.lt.s32.totalorder %v6013_v43, 0  ;;  %v7580_v21 = vshrl.u32 %v1825_v37, 5 }
 0x103   :  { %12941 = vst [vmem:[#allocation21_spill] sm:$0xff] %v7567_v10  ;;  %v7583_v29 = vsub.s32 32, %v7554_v1  ;;  %v1434_v59 = vsel %vm1432_vm9, %v1422_v36, 2102212464  ;;  %v12945_v54 = vmov 683565275   ;;  %vm1454_vm2 = vc.u32 %v7558_v39, %v7550_v32 }
 0x104   :  { %12942 = vst [vmem:[#allocation22_spill] sm:$0xff] %v7577_v45  ;;  %12943 = vst [vmem:[#allocation23_spill] sm:$0xff] %v7580_v21  ;;  %v7589_v46 = vshll.u32 %v12945_v54, %v7554_v1  ;;  %vm6006_vm0 = vcmp.lt.s32.totalorder %v6005_v49, 0  ;;  %v7591_v60 = vshrl.u32 %v1354_v24, 30  ;;  %v1413_v63 = vshrl.u32 %v12945_v54, %v7438_v62 }
 0x105   :  { %12944 = vst [vmem:[#allocation24_spill] sm:$0xff] %v7583_v29  ;;  %vm1200_vm1 = vcmp.gt.s32.totalorder %v1199_v50, 0  ;;  %v7596_v37 = vsub.s32 32, %v7567_v10  ;;  %v7598_v16 = vsel %vm6014_vm15, 0, %v6013_v43  ;;  %v5997_v28 = vadd.s32 4294967294, %v1569_v19  ;;  %v294_v31 = vpop.permute.xlu1 %293 }
 0x106   :  { %12946 = vst [vmem:[#allocation25_spill] sm:$0xff] %v7589_v46  ;;  %12947 = vst [vmem:[#allocation26_spill] sm:$0xff] %v7591_v60  ;;  %v1201_v42 = vsel %vm1200_vm1, %v1199_v50, 0  ;;  %v1433_v36 = vsel %vm1429_vm11, %v1413_v63, %v7488_v18  ;;  %v1435_v47 = vsel %vm1431_vm12, %v7490_v44, %v1434_v59  ;;  %v1455_v62 = vadd.s32 1, %v7551_v13 }
 0x107   :  { %12948 = vst [vmem:[#allocation27_spill] sm:$0xff] %v7596_v37  ;;  %v1203_v24 = vand.u32 31, %v1201_v42  ;;  %v7609_v57 = vshrl.u32 %v1617_v40, 5  ;;  %v7611_v8 = vsel %vm6006_vm0, 0, %v6005_v49  ;;  %v7617_v43 = vshrl.u32 %v12945_v54, %v7583_v29 }
 0x108   :  { %v12950_v18 = vmov 2102212464   ;;  %v7623_v44 = vshll.u32 %v12928_v35, %v7567_v10  ;;  %v1356_v50 = vshll.u32 %v7591_v60, 30  ;;  %v1632_v49 = vshrl.u32 %v12928_v35, %v7596_v37 }
 0x109   :  { %12949 = vst [vmem:[#allocation28_spill] sm:$0xff] %v7617_v43  ;;  %v1631_v19 = vshll.u32 %v12950_v18, %v7567_v10  ;;  %v7626_v40 = vsub.s32 32, %v1203_v24  ;;  %v1973_v59 = vadd.s32 %v7201_v7, %v7212_v55  ;;  %v1989_v63 = vsub.s32 32, %v7598_v16 }
 0x10a   :  { %v1436_v5 = vsel %vm1430_vm13, %v1433_v36, %v1435_v47  ;;  %v1785_v45 = vsub.s32 4294967266, %v7611_v8  ;;  %vm5998_vm3 = vcmp.lt.s32.totalorder %v5997_v28, 0  ;;  %v1456_v10 = vsel %vm1454_vm2, %v1455_v62, %v7551_v13 }
 0x10b   :  { %v7638_v43 = vshrl.u32 %v1201_v42, 5  ;;  %v12951_v17 = vmov 2475754826   ;;  %v12952_v46 = vmov 2131351028   ;;  %v1213_v55 = vshrl.u32 %v12950_v18, %v7626_v40 }
 0x10c   :  { %v1207_v21 = vshrl.u32 %v12951_v17, %v7626_v40  ;;  %v1210_v7 = vshrl.u32 %v12952_v46, %v7626_v40  ;;  %v7647_v36 = vsub.s32 %v7536_v14, %v1356_v50  ;;  %v1452_v47 = vmul.u32 %v7540_v0, %v1436_v5 }
 0x10d   :  { %v1215_v13 = vshll.u32 %v12950_v18, %v1203_v24  ;;  %v1216_v42 = vshrl.u32 %v12928_v35, %v7626_v40  ;;  %v1206_v62 = vshll.u32 %v12945_v54, %v1203_v24  ;;  %v1209_v60 = vshll.u32 %v12951_v17, %v1203_v24 }
 0x10e   :  { %v1212_v1 = vshll.u32 %v12952_v46, %v1203_v24  ;;  %v1219_v29 = vshrl.u32 %v12929_v58, %v7626_v40  ;;  %v7658_v27 = vadd.s32 %v1456_v10, %v1452_v47  ;;  %v12953_v14 = vand.u32 2147483647, %v7508_v26 }
 0x10f   :  { %v1217_v5 = vor.u32 %v1216_v42, %v1215_v13  ;;  %v1218_v0 = vshll.u32 %v12928_v35, %v1203_v24  ;;  %v7663_v51 = vor.u32 %v1207_v21, %v1206_v62  ;;  %v7665_v22 = vor.u32 %v1210_v7, %v1209_v60 }
 0x110   :  { %v1196_v50 = vand.u32 8388607, %v12953_v14  ;;  %v1214_v32 = vor.u32 %v1213_v55, %v1212_v1  ;;  %vm1224_vm4 = vcmp.lt.s32.totalorder %v7638_v43, 4  ;;  %v7670_v39 = vshrl.u32 %v12929_v58, %v7596_v37  ;;  %v7679_v1 = vpop.permute.xlu1 %57 }
 0x111   :  { %v1993_v10 = vsub.s32 4294967266, %v7598_v16  ;;  %v1220_v47 = vor.u32 %v1219_v29, %v1218_v0  ;;  %v1230_v14 = vsel %vm1224_vm4, %v1217_v5, 920167782  ;;  %v7675_v13 = vor.u32 %v1632_v49, %v1631_v19 }
 0x112   :  { %v1991_v24 = vshrl.u32 %v1973_v59, %v1989_v63  ;;  %v1765_v21 = vadd.s32 %v7238_v56, %v7252_v2  ;;  %v1786_v60 = vadd.s32 127, %v1785_v45  ;;  %v1572_v7 = vsel %vm5998_vm3, 0, %v5997_v28 }
 0x113   :  { %12954 = vst [vmem:[#allocation29_spill] sm:$0xff] %v7675_v13  ;;  %v1458_v55 = vadd.s32 536870912, %v7658_v27  ;;  %vm1221_vm5 = vcmp.lt.s32.totalorder %v7638_v43, 1  ;;  %vm1223_vm6 = vcmp.lt.s32.totalorder %v7638_v43, 3  ;;  %v1359_v29 = vsub.s32 0, %v7647_v36 }
 0x114   :  { %v1197_v42 = vor.u32 8388608, %v1196_v50  ;;  %v1229_v19 = vsel %vm1221_vm5, %v7663_v51, %v7665_v22  ;;  %v1231_v2 = vsel %vm1223_vm6, %v1214_v32, %v1230_v14  ;;  %v1994_v56 = vadd.s32 127, %v1993_v10 }
 0x115   :  { %v1781_v45 = vsub.s32 32, %v7611_v8  ;;  %v1233_v28 = vsel %vm1221_vm5, %v7665_v22, %v1214_v32  ;;  %v1234_v49 = vsel %vm1224_vm4, %v1220_v47, 1326507024  ;;  %v1577_v59 = vsub.s32 4294967266, %v1572_v7 }
 0x116   :  { %v220_v63 = vmul.f32 %v7032_v12, %v7448_v4  ;;  %vm1222_vm7 = vcmp.lt.s32.totalorder %v7638_v43, 2  ;;  %v1235_v62 = vsel %vm1223_vm6, %v1217_v5, %v1234_v49  ;;  %v7703_v50 = vshrl.u32 %v1458_v55, 30  ;;  %v7717_v5 = vpop.permute.xlu1 %62 }
 0x117   :  { %v136_v0 = vmul.f32 %v7030_v11, %v7411_v9  ;;  %v1232_v10 = vsel %vm1222_vm7, %v1229_v19, %v1231_v2  ;;  %v7710_v14 = vadd.f32 %v294_v31, %v7569_v33  ;;  %v1787_v47 = vshll.u32 %v1786_v60, 23  ;;  %12957 = vst [vmem:[#allocation32_spill] sm:$0xff] %v7717_v5 }
 0x118   :  { %12955 = vst [vmem:[#allocation30_spill] sm:$0xff] %v7703_v50  ;;  %v5988_v37 = vmin.u32 %v1359_v29, %v7647_v36  ;;  %v1236_v4 = vsel %vm1222_vm7, %v1233_v28, %v1235_v62  ;;  %v7715_v26 = vshll.u32 %v1197_v42, 8  ;;  %v1783_v55 = vshrl.u32 %v1765_v21, %v1781_v45 }
 0x119   :  { %12956 = vst [vmem:[#allocation31_spill] sm:$0xff] %v7710_v14  ;;  %v1557_v9 = vadd.s32 %v7321_v6, %v7328_v3  ;;  %v1573_v49 = vsub.s32 32, %v1572_v7  ;;  %v984_v19 = vand.u32 2139095040, %v7710_v14  ;;  %v1578_v2 = vadd.s32 127, %v1577_v59 }
 0x11a   :  { %v236_v33 = vadd.f32 %v220_v63, %v136_v0  ;;  %v7723_v31 = vmul.u32.u64.low %v7715_v26, %v1232_v10  ;;  %v7724_v60 = vmul.u32.u64.high %v7715_v26, %v1232_v10, %v7723_v31  ;;  %vm1640_vm8 = vcmp.lt.s32.totalorder %v7609_v57, 4  ;;  %v299_v10 = vpop.permute.xlu0 %298 }
 0x11b   :  { %v1460_v29 = vshll.u32 %v7703_v50, 30  ;;  %v7730_v42 = vmul.u32.u64.low %v7715_v26, %v1236_v4  ;;  %v7731_v21 = vmul.u32.u64.high %v7715_v26, %v1236_v4, %v7730_v42  ;;  %v985_v45 = vshrl.u32 %v984_v19, 23  ;;  %v7743_v19 = vpop.permute.xlu1 %158 }
 0x11c   :  { %v1995_v6 = vshll.u32 %v1994_v56, 23  ;;  %v1782_v3 = vshll.u32 %v7428_v23, %v7611_v8  ;;  %v1788_v28 = vor.u32 4788187, %v1787_v47  ;;  %v1361_v59 = vclz %v5988_v37 }
 0x11d   :  { %v1990_v62 = vshll.u32 %v7421_v53, %v7598_v16  ;;  %v1575_v0 = vshrl.u32 %v1557_v9, %v1573_v49  ;;  %v5975_v50 = vadd.s32 4294967169, %v985_v45  ;;  %v1579_v15 = vshll.u32 %v1578_v2, 23 }
 0x11e   :  { %v1784_v5 = vor.u32 %v1783_v55, %v1782_v3  ;;  %v7739_v4 = vadd.f32 %v299_v10, %v236_v33  ;;  %v1226_v56 = vsel %vm1224_vm4, %v1214_v32, 2102212464  ;;  %v1574_v8 = vshll.u32 %v7494_v48, %v1572_v7 }
 0x11f   :  { %v7747_v23 = vsub.s32 %v7658_v27, %v1460_v29  ;;  %v1205_v53 = vshrl.u32 %v12945_v54, %v7626_v40  ;;  %v991_v37 = vadd.s32 1, %v5975_v50  ;;  %v7751_v16 = vor.u32 %v1991_v24, %v1990_v62  ;;  %v284_v29 = vpop.permute.xlu1 %283 }
 0x120   :  { %12958 = vst [vmem:[#allocation33_spill] sm:$0xff] %v7739_v4  ;;  %v7753_v47 = vor.u32 4788187, %v1995_v6  ;;  %v1789_v55 = vand.u32 2147483647, %v1788_v28  ;;  %v5989_v9 = vadd.s32 4294967294, %v1361_v59  ;;  %v1576_v49 = vor.u32 %v1575_v0, %v1574_v8 }
 0x121   :  { %v1225_v32 = vsel %vm1221_vm5, %v1205_v53, %v7663_v51  ;;  %v1227_v27 = vsel %vm1223_vm6, %v7665_v22, %v1226_v56  ;;  %vm992_vm9 = vcmp.gt.s32.totalorder %v991_v37, 0  ;;  %v1580_v48 = vor.u32 4788187, %v1579_v15 }
 0x122   :  { %v1088_v40 = vand.u32 2139095040, %v7739_v4  ;;  %v1247_v24 = vadd.s32 1, %v7724_v60  ;;  %v993_v7 = vsel %vm992_vm9, %v991_v37, 0  ;;  %v1791_v50 = vcvt.s32.f32 %v1784_v5 }
 0x123   :  { %v1463_v2 = vsub.s32 0, %v7747_v23  ;;  %vm1246_vm10 = vc.u32 %v7731_v21, %v7723_v31  ;;  %v12721_v33 = vand.u32 2147483647, %v7710_v14  ;;  %v7770_v51 = vsel %vm1640_vm8, %v7675_v13, 920167782 }
 0x124   :  { %12959 = vst [vmem:[#allocation34_spill] sm:$0xff] %v7770_v51  ;;  %vm5990_vm11 = vcmp.lt.s32.totalorder %v5989_v9, 0  ;;  %v1228_v22 = vsel %vm1222_vm7, %v1225_v32, %v1227_v27  ;;  %v995_v15 = vand.u32 31, %v993_v7  ;;  %v7776_v45 = vmul.f32 %v1791_v50, %v1789_v55 }
 0x125   :  { %v1583_v6 = vcvt.s32.f32 %v1576_v49  ;;  %v1581_v3 = vand.u32 2147483647, %v1580_v48  ;;  %v1089_v28 = vshrl.u32 %v1088_v40, 23  ;;  %v1248_v59 = vsel %vm1246_vm10, %v1247_v24, %v7724_v60  ;;  %v7807_v24 = vpop.permute.xlu1 %47 }
 0x126   :  { %v7779_v62 = vsub.s32 32, %v995_v15  ;;  %v7781_v0 = vsel %vm5990_vm11, 0, %v5989_v9  ;;  %v5992_v43 = vmin.u32 %v1463_v2, %v7747_v23  ;;  %v1244_v10 = vmul.u32 %v7715_v26, %v1228_v22 }
 0x127   :  { %v988_v56 = vand.u32 8388607, %v12721_v33  ;;  %v998_v8 = vshll.u32 %v12945_v54, %v995_v15  ;;  %v1001_v37 = vshll.u32 %v12951_v17, %v995_v15  ;;  %v7795_v9 = vshrl.u32 %v993_v7, 5 }
 0x128   :  { %v999_v53 = vshrl.u32 %v12951_v17, %v7779_v62  ;;  %v1002_v60 = vshrl.u32 %v12952_v46, %v7779_v62  ;;  %v7793_v55 = vadd.s32 %v1248_v59, %v1244_v10  ;;  %v1004_v49 = vshll.u32 %v12952_v46, %v995_v15 }
 0x129   :  { %v1005_v26 = vshrl.u32 %v12950_v18, %v7779_v62  ;;  %v1007_v48 = vshll.u32 %v12950_v18, %v995_v15  ;;  %v1008_v40 = vshrl.u32 %v12928_v35, %v7779_v62  ;;  %vm12758_vm12 = vcmp.lt.s32.totalorder %v7056_v30, 0 }
 0x12a   :  { %v7800_v32 = vor.u32 %v999_v53, %v998_v8  ;;  %v7802_v27 = vor.u32 %v1002_v60, %v1001_v37  ;;  %v1793_v7 = vxor.u32 2147483648, %v7776_v45  ;;  %v1584_v50 = vmul.f32 %v1583_v6, %v1581_v3 }
 0x12b   :  { %v133_v2 = vmul.f32 %v7030_v11, %v7524_v38  ;;  %v1006_v22 = vor.u32 %v1005_v26, %v1004_v49  ;;  %v1465_v59 = vclz %v5992_v43  ;;  %v1009_v10 = vor.u32 %v1008_v40, %v1007_v48  ;;  %v7843_v48 = vpop.permute.xlu1 %52 }
 0x12c   :  { %v1010_v8 = vshll.u32 %v12928_v35, %v995_v15  ;;  %v1011_v53 = vshrl.u32 %v12929_v58, %v7779_v62  ;;  %v1369_v37 = vsub.s32 4294967266, %v7781_v0  ;;  %v5979_v60 = vadd.s32 4294967169, %v1089_v28 }
 0x12d   :  { %v989_v33 = vor.u32 8388608, %v988_v56  ;;  %vm1013_vm13 = vcmp.lt.s32.totalorder %v7795_v9, 1  ;;  %v12960_v42 = vand.u32 2147483647, %v7056_v30  ;;  %v12961_v6 = vmov 0 }
 0x12e   :  { %v1250_v38 = vadd.s32 536870912, %v7793_v55  ;;  %v1012_v3 = vor.u32 %v1011_v53, %v1010_v8  ;;  %vm1016_vm15 = vcmp.lt.s32.totalorder %v7795_v9, 4  ;;  %v1021_v15 = vsel %vm1013_vm13, %v7800_v32, %v7802_v27 }
 0x12f   :  { %vm7820_vm14 = vcmp.le.f32.partialorder %v12960_v42, 0.7853982  ;;  %vm12756_vm0 = vcmp.lt.s32.totalorder %v7082_v61, 0  ;;  %vm1015_vm1 = vcmp.lt.s32.totalorder %v7795_v9, 3  ;;  %v1022_v42 = vsel %vm1016_vm15, %v1009_v10, 920167782 }
 0x130   :  { %v12962_v6 = vsel %vm7820_vm14, 4294967295, %v12961_v6  ;;  %v1025_v28 = vsel %vm1013_vm13, %v7802_v27, %v1006_v22  ;;  %v233_v43 = vadd.f32 %v7564_v34, %v133_v2  ;;  %v5993_v56 = vadd.s32 4294967294, %v1465_v59 }
 0x131   :  { %12963 = vst [vmem:[#allocation35_spill] sm:$0xff] %v12962_v6  ;;  %vm1014_vm2 = vcmp.lt.s32.totalorder %v7795_v9, 2  ;;  %v1023_v49 = vsel %vm1015_vm1, %v1006_v22, %v1022_v42  ;;  %v1026_v26 = vsel %vm1016_vm15, %v1012_v3, 1326507024  ;;  %v7849_v53 = vshll.u32 %v989_v33, 8 }
 0x132   :  { %v1024_v40 = vsel %vm1014_vm2, %v1021_v15, %v1023_v49  ;;  %v1027_v8 = vsel %vm1015_vm1, %v1009_v10, %v1026_v26  ;;  %v7851_v34 = vadd.f32 %v284_v29, %v233_v43  ;;  %v1370_v2 = vadd.s32 127, %v1369_v37 }
 0x133   :  { %v1095_v59 = vadd.s32 1, %v5979_v60  ;;  %v7853_v5 = vshrl.u32 %v1250_v38, 30  ;;  %v1028_v42 = vsel %vm1014_vm2, %v1025_v28, %v1027_v8  ;;  %v12966_v3 = vand.u32 2147483647, %v7082_v61 }
 0x134   :  { %12964 = vst [vmem:[#allocation36_spill] sm:$0xff] %v7851_v34  ;;  %v12967_v63 = vmov 0  ;;  %v7864_v15 = vmul.u32.u64.low %v7849_v53, %v1028_v42  ;;  %v7865_v10 = vmul.u32.u64.high %v7849_v53, %v1028_v42, %v7864_v15  ;;  %v1794_v37 = vsel %vm12758_vm12, %v1793_v7, %v7776_v45 }
 0x135   :  { %12965 = vst [vmem:[#allocation37_spill] sm:$0xff] %v7853_v5  ;;  %vm7859_vm3 = vcmp.le.f32.partialorder %v12966_v3, 0.7853982  ;;  %v7868_v33 = vmul.u32.u64.low %v7849_v53, %v1024_v40  ;;  %v7869_v29 = vmul.u32.u64.high %v7849_v53, %v1024_v40, %v7868_v33  ;;  %v1585_v60 = vxor.u32 2147483648, %v1584_v50 }
 0x136   :  { %v12968_v63 = vsel %vm7859_vm3, 4294967295, %v12967_v63  ;;  %v1365_v38 = vsub.s32 32, %v7781_v0  ;;  %vm5994_vm4 = vcmp.lt.s32.totalorder %v5993_v56, 0  ;;  %v12970_v28 = vor.u32 %v7670_v39, %v7623_v44  ;;  %v7896_v44 = vpop.permute.xlu1 %150 }
 0x137   :  { %12969 = vst [vmem:[#allocation38_spill] sm:$0xff] %v12968_v63  ;;  %v12972_v49 = vand.u32 2147483647, %v7753_v47  ;;  %v12973_v26 = vcvt.s32.f32 %v7751_v16  ;;  %v1018_v45 = vsel %vm1016_vm15, %v1006_v22, 2102212464  ;;  %v776_v7 = vand.u32 2139095040, %v7851_v34 }
 0x138   :  { %v7881_v43 = vsel %vm1640_vm8, %v12970_v28, 1326507024  ;;  %v1349_v8 = vadd.s32 %v7444_v52, %v7453_v20  ;;  %v1371_v42 = vshll.u32 %v1370_v2, 23  ;;  %vm1096_vm5 = vcmp.gt.s32.totalorder %v1095_v59, 0 }
 0x139   :  { %12971 = vst [vmem:[#allocation39_spill] sm:$0xff] %v7881_v43  ;;  %v7887_v40 = vmul.f32 %v12973_v26, %v12972_v49  ;;  %v997_v39 = vshrl.u32 %v12945_v54, %v7779_v62  ;;  %v1797_v16 = vsel %vm7820_vm14, %v7056_v30, %v1794_v37  ;;  %v7901_v47 = vsel %vm5994_vm4, 0, %v5993_v56  ;;  %v13009_v43 = vld [vmem:[#allocation28_spill] sm:$0xff] }
 0x13a   :  { %v1252_v22 = vshll.u32 %v7853_v5, 30  ;;  %v777_v3 = vshrl.u32 %v776_v7, 23  ;;  %v1586_v15 = vsel %vm12756_vm0, %v1585_v60, %v1584_v50  ;;  %v1367_v52 = vshrl.u32 %v1349_v8, %v1365_v38  ;;  %v274_v49 = vpop.permute.xlu1 %273  ;;  %v12975_v8 = vld [vmem:[#allocation20_spill] sm:$0xff]  ;;  %v289_v5 = vpop.permute.xlu0 %288 }
 0x13b   :  { %v1017_v20 = vsel %vm1013_vm13, %v997_v39, %v7800_v32  ;;  %v1019_v62 = vsel %vm1015_vm1, %v7802_v27, %v1018_v45  ;;  %v7912_v2 = vsel %vm1096_vm5, %v1095_v59, 0  ;;  %v1039_v56 = vadd.s32 1, %v7869_v29 }
 0x13c   :  { %v131_v37 = vmul.f32 %v7030_v11, %v7679_v1  ;;  %v5967_v28 = vadd.s32 4294967169, %v777_v3  ;;  %v1366_v50 = vshll.u32 %v7647_v36, %v7781_v0  ;;  %v1372_v60 = vor.u32 4788187, %v1371_v42 }
 0x13d   :  { %v1473_v38 = vsub.s32 4294967266, %v7901_v47  ;;  %vm1038_vm6 = vc.u32 %v7865_v10, %v7868_v33  ;;  %6553 = vcosq.f32 %v1797_v16  ;;  %v7923_v32 = vsub.s32 %v7793_v55, %v1252_v22 }
 0x13e   :  { %v1020_v27 = vsel %vm1014_vm2, %v1017_v20, %v1019_v62  ;;  %v783_v59 = vadd.s32 1, %v5967_v28  ;;  %6555 = vsinq.f32 %v1797_v16  ;;  %v7930_v1 = vsel %vm7859_vm3, %v7082_v61, %v1586_v15  ;;  %v12978_v20 = vld [vmem:[#allocation17_spill] sm:$0xff] }
 0x13f   :  { %v1368_v36 = vor.u32 %v1367_v52, %v1366_v50  ;;  %v7933_v0 = vand.u32 31, %v7912_v2  ;;  %v218_v26 = vmul.f32 %v7032_v12, %v7600_v25  ;;  %v1040_v55 = vsel %vm1038_vm6, %v1039_v56, %v7869_v29  ;;  %v12977_v52 = vld [vmem:[#allocation19_spill] sm:$0xff] }
 0x140   :  { %vm784_vm7 = vcmp.gt.s32.totalorder %v783_v59, 0  ;;  %v231_v9 = vadd.f32 %v7573_v41, %v131_v37  ;;  %v1373_v45 = vand.u32 2147483647, %v1372_v60  ;;  %v1474_v7 = vadd.s32 127, %v1473_v38 }
 0x141   :  { %12974 = vst [vmem:[#allocation40_spill] sm:$0xff] %v7933_v0  ;;  %v134_v42 = vmul.f32 %v7030_v11, %v12975_v8  ;;  %v1036_v39 = vmul.u32 %v7849_v53, %v1020_v27  ;;  %v1255_v16 = vsub.s32 0, %v7923_v32  ;;  %v12722_v22 = vand.u32 2147483647, %v7851_v34 }
 0x142   :  { %v785_v3 = vsel %vm784_vm7, %v783_v59, 0  ;;  %v7944_v15 = vadd.f32 %v274_v49, %v231_v9  ;;  %v2001_v25 = vxor.u32 2147483648, %v7887_v40  ;;  %6557 = vcosq.f32 %v7930_v1 }
 0x143   :  { %v1375_v29 = vcvt.s32.f32 %v1368_v36  ;;  %v7948_v41 = vadd.s32 %v1040_v55, %v1036_v39  ;;  %v1453_v62 = vadd.s32 %v12978_v20, %v12977_v52  ;;  %v7953_v56 = vsub.s32 32, %v7933_v0  ;;  %v12980_v55 = vld [vmem:[#allocation5_spill] sm:$0xff] }
 0x144   :  { %12976 = vst [vmem:[#allocation20_spill] sm:$0xff] %v7944_v15  ;;  %v234_v53 = vadd.f32 %v218_v26, %v134_v42  ;;  %v787_v37 = vand.u32 31, %v785_v3  ;;  %v1469_v50 = vsub.s32 32, %v7901_v47  ;;  %v1470_v60 = vshll.u32 %v7747_v23, %v7901_v47 }
 0x145   :  { %12979 = vst [vmem:[#allocation19_spill] sm:$0xff] %v7953_v56  ;;  %v7955_v28 = vmul.f32 %v1375_v29, %v1373_v45  ;;  %v1475_v38 = vshll.u32 %v1474_v7, 23  ;;  %v5984_v27 = vmin.u32 %v1255_v16, %v7923_v32  ;;  %v780_v59 = vand.u32 8388607, %v12722_v22 }
 0x146   :  { %v7963_v36 = vsub.s32 32, %v787_v37  ;;  %v568_v49 = vand.u32 2139095040, %v7944_v15  ;;  %vm1919_vm9 = vcmp.lt.s32.totalorder %v12980_v55, 0  ;;  %v1042_v26 = vadd.s32 536870912, %v7948_v41 }
 0x147   :  { %v7968_v9 = vshrl.u32 %v785_v3, 5  ;;  %v790_v45 = vshll.u32 %v12945_v54, %v787_v37  ;;  %v793_v23 = vshll.u32 %v12951_v17, %v787_v37  ;;  %v796_v8 = vshll.u32 %v12952_v46, %v787_v37 }
 0x148   :  { %v791_v47 = vshrl.u32 %v12951_v17, %v7963_v36  ;;  %v794_v7 = vshrl.u32 %v12952_v46, %v7963_v36  ;;  %v797_v42 = vshrl.u32 %v12950_v18, %v7963_v36  ;;  %v799_v39 = vshll.u32 %v12950_v18, %v787_v37 }
 0x149   :  { %v800_v16 = vshrl.u32 %v12928_v35, %v7963_v36  ;;  %v802_v3 = vshll.u32 %v12928_v35, %v787_v37  ;;  %v803_v29 = vshrl.u32 %v12929_v58, %v7963_v36  ;;  %v569_v34 = vshrl.u32 %v568_v49, 23 }
 0x14a   :  { %v7985_v52 = vor.u32 %v791_v47, %v790_v45  ;;  %v7987_v20 = vor.u32 %v794_v7, %v793_v23  ;;  %v798_v22 = vor.u32 %v797_v42, %v796_v8  ;;  %v7989_v14 = vpop.eup %6553  ;;  %v1471_v4 = vshrl.u32 %v1453_v62, %v1469_v50  ;;  %v12985_v50 = vld [vmem:[#allocation8_spill] sm:$0xff] }
 0x14b   :  { %12981 = vst [vmem:[#allocation17_spill] sm:$0xff] %v7989_v14  ;;  %v7991_v63 = vshrl.u32 %v1042_v26, 30  ;;  %v801_v61 = vor.u32 %v800_v16, %v799_v39  ;;  %v804_v6 = vor.u32 %v803_v29, %v802_v3  ;;  %v7993_v30 = vpop.eup %6555  ;;  %v1476_v37 = vor.u32 4788187, %v1475_v38 }
 0x14c   :  { %12983 = vst [vmem:[#allocation41_spill] sm:$0xff] %v7993_v30  ;;  %v1257_v51 = vclz %v5984_v27  ;;  %v7995_v13 = vadd.f32 %v289_v5, %v234_v53  ;;  %vm808_vm10 = vcmp.lt.s32.totalorder %v7968_v9, 4  ;;  %v781_v45 = vor.u32 8388608, %v780_v59 }
 0x14d   :  { %12982 = vst [vmem:[#allocation5_spill] sm:$0xff] %v7991_v63  ;;  %vm805_vm11 = vcmp.lt.s32.totalorder %v7968_v9, 1  ;;  %vm807_vm13 = vcmp.lt.s32.totalorder %v7968_v9, 3  ;;  %v814_v62 = vsel %vm808_vm10, %v801_v61, 920167782  ;;  %vm12755_vm15 = vcmp.lt.s32.totalorder %v12985_v50, 0 }
 0x14e   :  { %12984 = vst [vmem:[#allocation42_spill] sm:$0xff] %v7995_v13  ;;  %v813_v38 = vsel %vm805_vm11, %v7985_v52, %v7987_v20  ;;  %v815_v5 = vsel %vm807_vm13, %v798_v22, %v814_v62  ;;  %v818_v53 = vsel %vm808_vm10, %v804_v6, 1326507024  ;;  %v5959_v27 = vadd.s32 4294967169, %v569_v34 }
 0x14f   :  { %v1472_v59 = vor.u32 %v1471_v4, %v1470_v60  ;;  %v1044_v49 = vshll.u32 %v7991_v63, 30  ;;  %v817_v26 = vsel %vm805_vm11, %v7987_v20, %v798_v22  ;;  %v819_v23 = vsel %vm807_vm13, %v801_v61, %v818_v53  ;;  %v8017_v47 = vpop.eup %6557 }
 0x150   :  { %12986 = vst [vmem:[#allocation43_spill] sm:$0xff] %v8017_v47  ;;  %v8022_v7 = vsel %vm1919_vm9, %v2001_v25, %v7887_v40  ;;  %6559 = vsinq.f32 %v7930_v1  ;;  %v8026_v4 = vshrl.u32 %v7912_v2, 5  ;;  %vm806_vm1 = vcmp.lt.s32.totalorder %v7968_v9, 2  ;;  %v12997_v9 = vld [vmem:[#allocation24_spill] sm:$0xff] }
 0x151   :  { %v12988_v6 = vand.u32 2147483647, %v12985_v50  ;;  %v12989_v34 = vmov 0  ;;  %v1111_v61 = vshll.u32 %v12950_v18, %v7933_v0  ;;  %v5985_v60 = vadd.s32 4294967294, %v1257_v51 }
 0x152   :  { %12987 = vst [vmem:[#allocation44_spill] sm:$0xff] %v8026_v4  ;;  %v880_v40 = vand.u32 2139095040, %v7995_v13  ;;  %v816_v1 = vsel %vm806_vm1, %v813_v38, %v815_v5  ;;  %v1477_v25 = vand.u32 2147483647, %v1476_v37  ;;  %v820_v2 = vsel %vm806_vm1, %v817_v26, %v819_v23 }
 0x153   :  { %vm8031_vm2 = vcmp.le.f32.partialorder %v12988_v6, 0.7853982  ;;  %v8042_v8 = vshll.u32 %v781_v45, 8  ;;  %v575_v42 = vadd.s32 1, %v5959_v27  ;;  %v1377_v39 = vxor.u32 2147483648, %v7955_v28  ;;  %v12992_v45 = vld [vmem:[#allocation9_spill] sm:$0xff] }
 0x154   :  { %v12990_v34 = vsel %vm8031_vm2, 4294967295, %v12989_v34  ;;  %v1479_v16 = vcvt.s32.f32 %v1472_v59  ;;  %v1112_v3 = vshrl.u32 %v12928_v35, %v7953_v56  ;;  %v8048_v51 = vsub.s32 %v7948_v41, %v1044_v49 }
 0x155   :  { %12991 = vst [vmem:[#allocation45_spill] sm:$0xff] %v12990_v34  ;;  %v8051_v29 = vmul.u32.u64.low %v8042_v8, %v816_v1  ;;  %v8052_v62 = vmul.u32.u64.high %v8042_v8, %v816_v1, %v8051_v29  ;;  %v12738_v37 = vand.u32 2147483647, %v7944_v15  ;;  %vm576_vm4 = vcmp.gt.s32.totalorder %v575_v42, 0 }
 0x156   :  { %vm12757_vm5 = vcmp.lt.s32.totalorder %v12992_v45, 0  ;;  %vm5986_vm6 = vcmp.lt.s32.totalorder %v5985_v60, 0  ;;  %v8058_v38 = vmul.u32.u64.low %v8042_v8, %v820_v2  ;;  %v8059_v5 = vmul.u32.u64.high %v8042_v8, %v820_v2, %v8058_v38 }
 0x157   :  { %v577_v53 = vsel %vm576_vm4, %v575_v42, 0  ;;  %v1480_v27 = vmul.f32 %v1479_v16, %v1477_v25  ;;  %v881_v59 = vshrl.u32 %v880_v40, 23  ;;  %v216_v41 = vmul.f32 %v7032_v12, %v7743_v19  ;;  %v12993_v25 = vld [vmem:[#allocation32_spill] sm:$0xff] }
 0x158   :  { %v810_v49 = vsel %vm808_vm10, %v798_v22, 2102212464  ;;  %v1378_v26 = vsel %vm12755_vm15, %v1377_v39, %v7955_v28  ;;  %v8070_v23 = vshrl.u32 %v12929_v58, %v7953_v56  ;;  %v1047_v6 = vsub.s32 0, %v8048_v51 }
 0x159   :  { %v789_v1 = vshrl.u32 %v12945_v54, %v7963_v36  ;;  %v8075_v40 = vsel %vm5986_vm6, 0, %v5985_v60  ;;  %v132_v19 = vmul.f32 %v7030_v11, %v12993_v25  ;;  %v572_v22 = vand.u32 8388607, %v12738_v37 }
 0x15a   :  { %v579_v2 = vand.u32 31, %v577_v53  ;;  %v8081_v42 = vor.u32 %v1112_v3, %v1111_v61  ;;  %v8085_v28 = vshll.u32 %v12928_v35, %v7933_v0  ;;  %v811_v36 = vsel %vm807_vm13, %v7987_v20, %v810_v49 }
 0x15b   :  { %v809_v39 = vsel %vm805_vm11, %v789_v1, %v7985_v52  ;;  %v8096_v60 = vsel %vm8031_vm2, %v12985_v50, %v1378_v26  ;;  %v1481_v16 = vxor.u32 2147483648, %v1480_v27  ;;  %v5971_v61 = vadd.s32 4294967169, %v881_v59 }
 0x15c   :  { %12994 = vst [vmem:[#allocation9_spill] sm:$0xff] %v8081_v42  ;;  %v232_v3 = vadd.f32 %v216_v41, %v132_v19  ;;  %vm1120_vm7 = vcmp.lt.s32.totalorder %v8026_v4, 4  ;;  %v1265_v25 = vsub.s32 4294967266, %v8075_v40  ;;  %v8103_v52 = vmin.u32 %v1047_v6, %v8048_v51  ;;  %v279_v41 = vpop.permute.xlu0 %278 }
 0x15d   :  { %v812_v20 = vsel %vm806_vm1, %v809_v39, %v811_v36  ;;  %v831_v49 = vadd.s32 1, %v8052_v62  ;;  %v573_v26 = vor.u32 8388608, %v572_v22  ;;  %v8108_v1 = vsub.s32 32, %v579_v2  ;;  %v8110_v59 = vpop.eup %6559 }
 0x15e   :  { %12995 = vst [vmem:[#allocation32_spill] sm:$0xff] %v8110_v59  ;;  %6561 = vcosq.f32 %v8096_v60  ;;  %v8116_v19 = vsel %vm1120_vm7, %v8081_v42, 920167782  ;;  %vm830_vm10 = vc.u32 %v8059_v5, %v8051_v29  ;;  %v1831_v6 = vshrl.u32 %v12951_v17, %v12997_v9 }
 0x15f   :  { %12996 = vst [vmem:[#allocation46_spill] sm:$0xff] %v8116_v19  ;;  %v8124_v22 = vsel %vm12757_vm5, %v1481_v16, %v1480_v27  ;;  %v8128_v39 = vadd.s32 %v7723_v31, %v7731_v21  ;;  %v8130_v36 = vadd.s32 1, %v5971_v61  ;;  %v8132_v37 = vadd.f32 %v279_v41, %v232_v3  ;;  %v12999_v31 = vld [vmem:[#allocation18_spill] sm:$0xff]  ;;  %v13000_v3 = vld [vmem:[#allocation25_spill] sm:$0xff] }
 0x160   :  { %v8135_v15 = vadd.s32 127, %v1265_v25  ;;  %v828_v13 = vmul.u32 %v8042_v8, %v812_v20  ;;  %v832_v19 = vsel %vm830_vm10, %v831_v49, %v8052_v62  ;;  %v592_v27 = vshrl.u32 %v12928_v35, %v8108_v1 }
 0x161   :  { %12998 = vst [vmem:[#allocation24_spill] sm:$0xff] %v8132_v37  ;;  %v8142_v16 = vshll.u32 %v573_v26, 8  ;;  %v1833_v21 = vshll.u32 %v12951_v17, %v12999_v31  ;;  %v595_v61 = vshrl.u32 %v12929_v58, %v8108_v1  ;;  %v1832_v25 = vor.u32 %v1831_v6, %v13000_v3 }
 0x162   :  { %v1834_v41 = vshrl.u32 %v12952_v46, %v12997_v9  ;;  %v1836_v8 = vshll.u32 %v12952_v46, %v12999_v31  ;;  %v583_v62 = vshrl.u32 %v12951_v17, %v8108_v1  ;;  %v586_v20 = vshrl.u32 %v12952_v46, %v8108_v1 }
 0x163   :  { %v589_v49 = vshrl.u32 %v12950_v18, %v8108_v1  ;;  %v591_v26 = vshll.u32 %v12950_v18, %v579_v2  ;;  %v8160_v63 = vadd.s32 %v832_v19, %v828_v13  ;;  %v8162_v6 = vshrl.u32 %v577_v53, 5 }
 0x164   :  { %v582_v3 = vshll.u32 %v12945_v54, %v579_v2  ;;  %v594_v38 = vshll.u32 %v12928_v35, %v579_v2  ;;  %v585_v42 = vshll.u32 %v12951_v17, %v579_v2  ;;  %v588_v0 = vshll.u32 %v12952_v46, %v579_v2 }
 0x165   :  { %v593_v56 = vor.u32 %v592_v27, %v591_v26  ;;  %v1837_v47 = vshrl.u32 %v12950_v18, %v12997_v9  ;;  %vm888_vm11 = vcmp.gt.s32.totalorder %v8130_v36, 0  ;;  %v1835_v34 = vor.u32 %v1834_v41, %v1833_v21 }
 0x166   :  { %v596_v59 = vor.u32 %v595_v61, %v594_v38  ;;  %v1839_v13 = vshll.u32 %v12950_v18, %v12999_v31  ;;  %v1840_v53 = vshrl.u32 %v12928_v35, %v12997_v9  ;;  %v8175_v19 = vor.u32 %v583_v62, %v582_v3 }
 0x167   :  { %v8177_v50 = vor.u32 %v586_v20, %v585_v42  ;;  %v590_v14 = vor.u32 %v589_v49, %v588_v0  ;;  %v1843_v2 = vshrl.u32 %v12929_v58, %v12997_v9  ;;  %vm600_vm13 = vcmp.lt.s32.totalorder %v8162_v6, 4  ;;  %v13001_v42 = vld [vmem:[#allocation23_spill] sm:$0xff] }
 0x168   :  { %v1838_v27 = vor.u32 %v1837_v47, %v1836_v8  ;;  %v1841_v26 = vor.u32 %v1840_v53, %v1839_v13  ;;  %v1842_v38 = vshll.u32 %v12928_v35, %v12999_v31  ;;  %v834_v21 = vadd.s32 536870912, %v8160_v63 }
 0x169   :  { %vm597_vm1 = vcmp.lt.s32.totalorder %v8162_v6, 1  ;;  %v606_v61 = vsel %vm600_vm13, %v593_v56, 920167782  ;;  %vm1845_vm4 = vcmp.lt.s32.totalorder %v13001_v42, 1  ;;  %v610_v0 = vsel %vm600_vm13, %v596_v59, 1326507024 }
 0x16a   :  { %v1844_v9 = vor.u32 %v1843_v2, %v1842_v38  ;;  %vm1848_vm6 = vcmp.lt.s32.totalorder %v13001_v42, 4  ;;  %v1853_v47 = vsel %vm1845_vm4, %v1832_v25, %v1835_v34  ;;  %v13003_v31 = vand.u32 2147483647, %v12992_v45 }
 0x16b   :  { %v8194_v41 = vpop.eup %6561  ;;  %vm599_vm15 = vcmp.lt.s32.totalorder %v8162_v6, 3  ;;  %v605_v59 = vsel %vm597_vm1, %v8175_v19, %v8177_v50  ;;  %vm1847_vm0 = vcmp.lt.s32.totalorder %v13001_v42, 3  ;;  %v1854_v62 = vsel %vm1848_vm6, %v1841_v26, 920167782 }
 0x16c   :  { %13002 = vst [vmem:[#allocation18_spill] sm:$0xff] %v8194_v41  ;;  %vm8198_vm10 = vcmp.le.f32.partialorder %v13003_v31, 0.7853982  ;;  %v607_v20 = vsel %vm599_vm15, %v590_v14, %v606_v61  ;;  %vm1846_vm5 = vcmp.lt.s32.totalorder %v13001_v42, 2  ;;  %v1850_v49 = vsel %vm1848_vm6, %v1838_v27, 2102212464 }
 0x16d   :  { %v1855_v3 = vsel %vm1847_vm0, %v1838_v27, %v1854_v62  ;;  %v8217_v13 = vshrl.u32 %v834_v21, 30  ;;  %v609_v53 = vsel %vm597_vm1, %v8177_v50, %v590_v14  ;;  %v611_v2 = vsel %vm599_vm15, %v593_v56, %v610_v0  ;;  %v13007_v21 = vld [vmem:[#allocation16_spill] sm:$0xff] }
 0x16e   :  { %v1856_v38 = vsel %vm1846_vm5, %v1853_v47, %v1855_v3  ;;  %vm598_vm12 = vcmp.lt.s32.totalorder %v8162_v6, 2  ;;  %v1857_v61 = vsel %vm1845_vm4, %v1835_v34, %v1838_v27  ;;  %v1858_v31 = vsel %vm1848_vm6, %v1844_v9, 1326507024 }
 0x16f   :  { %13006 = vst [vmem:[#allocation25_spill] sm:$0xff] %v8217_v13  ;;  %v13008_v62 = vor.u32 8388608, %v13007_v21  ;;  %v608_v30 = vsel %vm598_vm12, %v605_v59, %v607_v20  ;;  %v1849_v56 = vsel %vm1845_vm4, %v13009_v43, %v1832_v25  ;;  %v1851_v0 = vsel %vm1847_vm0, %v1835_v34, %v1850_v49 }
 0x170   :  { %v1859_v47 = vsel %vm1847_vm0, %v1841_v26, %v1858_v31  ;;  %v612_v27 = vsel %vm598_vm12, %v609_v53, %v611_v2  ;;  %v889_v43 = vsel %vm888_vm11, %v8130_v36, 0  ;;  %v672_v25 = vand.u32 2139095040, %v8132_v37 }
 0x171   :  { %v1861_v41 = vshll.u32 %v13008_v62, 8  ;;  %v1860_v9 = vsel %vm1846_vm5, %v1857_v61, %v1859_v47  ;;  %v1267_v26 = vshll.u32 %v8135_v15, 23  ;;  %v1852_v53 = vsel %vm1846_vm5, %v1849_v56, %v1851_v0 }
 0x172   :  { %v8259_v20 = vmul.u32.u64.low %v8142_v16, %v608_v30  ;;  %v8260_v49 = vmul.u32.u64.high %v8142_v16, %v608_v30, %v8259_v20  ;;  %v13011_v2 = vsub.s32 32, %v8075_v40  ;;  %v129_v36 = vmul.f32 %v7030_v11, %v7807_v24 }
 0x173   :  { %v8246_v3 = vmul.u32.u64.low %v1861_v41, %v1856_v38  ;;  %v8247_v21 = vmul.u32.u64.high %v1861_v41, %v1856_v38, %v8246_v3  ;;  %v8254_v34 = vmul.u32.u64.low %v1861_v41, %v1860_v9  ;;  %v8255_v59 = vmul.u32.u64.high %v1861_v41, %v1860_v9, %v8254_v34  ;;  %v264_v9 = vpop.permute.xlu1 %263 }
 0x174   :  { %13010 = vst [vmem:[#allocation23_spill] sm:$0xff] %v8259_v20  ;;  %v1263_v38 = vshrl.u32 %v8128_v39, %v13011_v2  ;;  %v8271_v61 = vmul.u32.u64.low %v8142_v16, %v612_v27  ;;  %v8272_v31 = vmul.u32.u64.high %v8142_v16, %v612_v27, %v8271_v61  ;;  %v1485_v30 = vsel %vm8198_vm10, %v12992_v45, %v8124_v22 }
 0x175   :  { %v13013_v15 = vclz %v8103_v52  ;;  %v836_v62 = vshll.u32 %v8217_v13, 30  ;;  %v1871_v56 = vadd.s32 1, %v8247_v21  ;;  %v1262_v39 = vshll.u32 %v7923_v32, %v8075_v40  ;;  %v13015_v32 = vld [vmem:[#allocation22_spill] sm:$0xff] }
 0x176   :  { %13012 = vst [vmem:[#allocation16_spill] sm:$0xff] %v8272_v31  ;;  %v8284_v24 = vand.u32 31, %v889_v43  ;;  %v1868_v0 = vmul.u32 %v1861_v41, %v1852_v53  ;;  %vm1870_vm0 = vc.u32 %v8255_v59, %v8246_v3  ;;  %v1268_v47 = vor.u32 4788187, %v1267_v26 }
 0x177   :  { %v5977_v42 = vadd.s32 4294967294, %v13013_v15  ;;  %v673_v27 = vshrl.u32 %v672_v25, 23  ;;  %v602_v22 = vsel %vm600_vm13, %v590_v14, 2102212464  ;;  %v1872_v52 = vsel %vm1870_vm0, %v1871_v56, %v8247_v21  ;;  %v13020_v56 = vld [vmem:[#allocation15_spill] sm:$0xff] }
 0x178   :  { %13014 = vst [vmem:[#allocation28_spill] sm:$0xff] %v8284_v24  ;;  %v1264_v34 = vor.u32 %v1263_v38, %v1262_v39  ;;  %v581_v2 = vshrl.u32 %v12945_v54, %v8108_v1  ;;  %v1873_v61 = vadd.s32 %v1872_v52, %v1868_v0  ;;  %v229_v40 = vadd.f32 %v13015_v32, %v129_v36 }
 0x179   :  { %6563 = vsinq.f32 %v8096_v60  ;;  %v13016_v41 = vor.u32 %v8070_v23, %v8085_v28  ;;  %vm5978_vm5 = vcmp.lt.s32.totalorder %v5977_v42, 0  ;;  %v8303_v14 = vsub.s32 %v8160_v63, %v836_v62 }
 0x17a   :  { %v601_v1 = vsel %vm597_vm1, %v581_v2, %v8175_v19  ;;  %v603_v21 = vsel %vm599_vm15, %v8177_v50, %v602_v22  ;;  %v1874_v60 = vadd.s32 536870912, %v1873_v61  ;;  %v8311_v26 = vadd.f32 %v264_v9, %v229_v40  ;;  %v13021_v40 = vld [vmem:[#allocation12_spill] sm:$0xff] }
 0x17b   :  { %v8300_v25 = vsel %vm1120_vm7, %v13016_v41, 1326507024  ;;  %6565 = vcosq.f32 %v1485_v30  ;;  %v1269_v23 = vand.u32 2147483647, %v1268_v47  ;;  %v5963_v28 = vadd.s32 4294967169, %v673_v27 }
 0x17c   :  { %13017 = vst [vmem:[#allocation22_spill] sm:$0xff] %v8300_v25  ;;  %13018 = vst [vmem:[#allocation47_spill] sm:$0xff] %v8311_v26  ;;  %v623_v53 = vadd.s32 1, %v8260_v49  ;;  %v1271_v38 = vcvt.s32.f32 %v1264_v34  ;;  %v8315_v63 = vsub.s32 32, %v8284_v24  ;;  %vm622_vm11 = vc.u32 %v8272_v31, %v8259_v20  ;;  %v13033_v31 = vld [vmem:[#allocation27_spill] sm:$0xff] }
 0x17d   :  { %v8319_v19 = vshrl.u32 %v1874_v60, 30  ;;  %v1052_v36 = vsel %vm5978_vm5, 0, %v5977_v42  ;;  %v839_v50 = vsub.s32 0, %v8303_v14  ;;  %v604_v15 = vsel %vm598_vm12, %v601_v1, %v603_v21 }
 0x17e   :  { %13019 = vst [vmem:[#allocation48_spill] sm:$0xff] %v8315_v63  ;;  %v360_v62 = vand.u32 2139095040, %v8311_v26  ;;  %6567 = vsinq.f32 %v1485_v30  ;;  %vm1191_vm15 = vcmp.lt.s32.totalorder %v13020_v56, 0  ;;  %v8326_v39 = vshrl.u32 %v889_v43, 5 }
 0x17f   :  { %v8330_v0 = vmul.f32 %v7030_v11, %v7843_v48  ;;  %v1876_v47 = vshll.u32 %v8319_v19, 30  ;;  %v1272_v27 = vmul.f32 %v1271_v38, %v1269_v23  ;;  %v679_v42 = vadd.s32 1, %v5963_v28 }
 0x180   :  { %v624_v22 = vsel %vm622_vm11, %v623_v53, %v8260_v49  ;;  %v361_v52 = vshrl.u32 %v360_v62, 23  ;;  %v1053_v6 = vsub.s32 32, %v1052_v36  ;;  %v1057_v9 = vsub.s32 4294967266, %v1052_v36 }
 0x181   :  { %v620_v34 = vmul.u32 %v8142_v16, %v604_v15  ;;  %v8335_v30 = vsub.s32 %v1873_v61, %v1876_v47  ;;  %v903_v43 = vshll.u32 %v12950_v18, %v8284_v24  ;;  %v904_v11 = vshrl.u32 %v12928_v35, %v8315_v63 }
 0x182   :  { %v1037_v48 = vadd.s32 %v7868_v33, %v7865_v10  ;;  %v5968_v2 = vmin.u32 %v839_v50, %v8303_v14  ;;  %v2003_v41 = vsub.s32 4, %v13021_v40  ;;  %v5951_v16 = vadd.s32 4294967169, %v361_v52 }
 0x183   :  { %v8344_v32 = vadd.s32 %v624_v22, %v620_v34  ;;  %v1879_v49 = vsub.s32 0, %v8335_v30  ;;  %v1273_v61 = vxor.u32 2147483648, %v1272_v27  ;;  %v8350_v1 = vshll.u32 %v12928_v35, %v8284_v24 }
 0x184   :  { %v8354_v21 = vshrl.u32 %v12929_v58, %v8315_v63  ;;  %vm680_vm12 = vcmp.gt.s32.totalorder %v679_v42, 0  ;;  %v1055_v10 = vshrl.u32 %v1037_v48, %v1053_v6  ;;  %v8356_v33 = vadd.s32 127, %v1057_v9 }
 0x185   :  { %v6008_v60 = vmin.u32 %v1879_v49, %v8335_v30  ;;  %v367_v23 = vadd.s32 1, %v5951_v16  ;;  %v8359_v28 = vor.u32 %v904_v11, %v903_v43  ;;  %v1054_v53 = vshll.u32 %v8048_v51, %v1052_v36 }
 0x186   :  { %v841_v38 = vclz %v5968_v2  ;;  %v8364_v50 = vmul.f32 %v7032_v12, %v7896_v44  ;;  %v8366_v15 = vpop.eup %6563  ;;  %v626_v62 = vadd.s32 536870912, %v8344_v32  ;;  %v13023_v22 = vand.u32 2147483647, %v12980_v55  ;;  %v13026_v2 = vld [vmem:[#allocation11_spill] sm:$0xff] }
 0x187   :  { %13022 = vst [vmem:[#allocation15_spill] sm:$0xff] %v8359_v28  ;;  %v1881_v47 = vclz %v6008_v60  ;;  %v2004_v51 = vsel %vm1919_vm9, %v2003_v41, %v13021_v40  ;;  %v8380_v36 = vsel %vm1191_vm15, %v1273_v61, %v1272_v27  ;;  %v8382_v12 = vsel %vm680_vm12, %v679_v42, 0 }
 0x188   :  { %vm8371_vm13 = vcmp.le.f32.partialorder %v13023_v22, 0.7853982  ;;  %vm368_vm1 = vcmp.gt.s32.totalorder %v367_v23, 0  ;;  %v8388_v6 = vpop.eup %6565  ;;  %v8390_v9 = vor.u32 %v1055_v10, %v1054_v53  ;;  %v8395_v27 = vadd.s32 %v8051_v29, %v8059_v5 }
 0x189   :  { %v2005_v44 = vsel %vm8371_vm13, %v12980_v55, %v8022_v7  ;;  %v6009_v43 = vadd.s32 4294967294, %v1881_v47  ;;  %v369_v11 = vsel %vm368_vm1, %v367_v23, 0  ;;  %v2006_v42 = vsel %vm8371_vm13, 0, %v2004_v51  ;;  %v13028_v51 = vld [vmem:[#allocation10_spill] sm:$0xff] }
 0x18a   :  { %v371_v48 = vand.u32 31, %v369_v11  ;;  %v12761_v49 = vand.u32 2147483647, %v13026_v2  ;;  %v8400_v7 = vadd.s32 4294967294, %v841_v38  ;;  %v8402_v40 = vshrl.u32 %v626_v62, 30 }
 0x18b   :  { %vm6010_vm9 = vcmp.lt.s32.totalorder %v6009_v43, 0  ;;  %6569 = vcosq.f32 %v2005_v44  ;;  %v8404_v41 = vpop.eup %6567  ;;  %v1869_v16 = vadd.s32 %v8246_v3, %v8255_v59  ;;  %v12764_v29 = vand.u32 2147483647, %v8311_v26 }
 0x18c   :  { %13027 = vst [vmem:[#allocation12_spill] sm:$0xff] %v8402_v40  ;;  %v1884_v61 = vsel %vm6010_vm9, 0, %v6009_v43  ;;  %v8409_v5 = vsub.s32 32, %v371_v48  ;;  %6571 = vsinq.f32 %v2005_v44  ;;  %v2010_v23 = vadd.s32 3, %v2006_v42  ;;  %v13029_v42 = vld [vmem:[#allocation21_spill] sm:$0xff] }
 0x18d   :  { %v1885_v10 = vsub.s32 32, %v1884_v61  ;;  %v1889_v60 = vsub.s32 4294967266, %v1884_v61  ;;  %v1886_v53 = vshll.u32 %v8335_v30, %v1884_v61  ;;  %v1899_v38 = vsub.s32 4, %v8319_v19 }
 0x18e   :  { %v375_v62 = vshrl.u32 %v12951_v17, %v8409_v5  ;;  %v8417_v47 = vand.u32 8388607, %v12761_v49  ;;  %v378_v22 = vshrl.u32 %v12952_v46, %v8409_v5  ;;  %v381_v52 = vshrl.u32 %v12950_v18, %v8409_v5 }
 0x18f   :  { %v1887_v3 = vshrl.u32 %v1869_v16, %v1885_v10  ;;  %v1890_v59 = vadd.s32 127, %v1889_v60  ;;  %vm1815_vm4 = vcmp.lt.s32.totalorder %v13028_v51, 0  ;;  %v364_v30 = vand.u32 8388607, %v12764_v29 }
 0x190   :  { %v8426_v44 = vshrl.u32 %v369_v11, 5  ;;  %v374_v43 = vshll.u32 %v12945_v54, %v371_v48  ;;  %v1622_v61 = vshll.u32 %v12945_v54, %v13029_v42  ;;  %v377_v60 = vshll.u32 %v12951_v17, %v371_v48 }
 0x191   :  { %v1888_v16 = vor.u32 %v1887_v3, %v1886_v53  ;;  %v1891_v10 = vshll.u32 %v1890_v59, 23  ;;  %v380_v49 = vshll.u32 %v12952_v46, %v371_v48  ;;  %v383_v34 = vshll.u32 %v12950_v18, %v371_v48 }
 0x192   :  { %v384_v13 = vshrl.u32 %v12928_v35, %v8409_v5  ;;  %v386_v29 = vshll.u32 %v12928_v35, %v371_v48  ;;  %v387_v11 = vshrl.u32 %v12929_v58, %v8409_v5  ;;  %v13030_v26 = vand.u32 2147483647, %v13028_v51 }
 0x193   :  { %v1892_v53 = vor.u32 4788187, %v1891_v10  ;;  %v8445_v3 = vor.u32 %v375_v62, %v374_v43  ;;  %v8447_v59 = vor.u32 %v378_v22, %v377_v60  ;;  %v8449_v24 = vor.u32 %v381_v52, %v380_v49 }
 0x194   :  { %vm8441_vm6 = vcmp.le.f32.partialorder %v13030_v26, 0.7853982  ;;  %v385_v63 = vor.u32 %v384_v13, %v383_v34  ;;  %v388_v20 = vor.u32 %v387_v11, %v386_v29  ;;  %v1623_v48 = vshrl.u32 %v12951_v17, %v13033_v31 }
 0x195   :  { %v1626_v25 = vshrl.u32 %v12952_v46, %v13033_v31  ;;  %v1893_v4 = vand.u32 2147483647, %v1892_v53  ;;  %v1895_v26 = vcvt.s32.f32 %v1888_v16  ;;  %vm392_vm0 = vcmp.lt.s32.totalorder %v8426_v44, 4 }
 0x196   :  { %v1625_v62 = vshll.u32 %v12951_v17, %v13029_v42  ;;  %vm389_vm5 = vcmp.lt.s32.totalorder %v8426_v44, 1  ;;  %vm391_vm11 = vcmp.lt.s32.totalorder %v8426_v44, 3  ;;  %v398_v13 = vsel %vm392_vm0, %v385_v63, 920167782 }
 0x197   :  { %v402_v34 = vsel %vm392_vm0, %v388_v20, 1326507024  ;;  %vm5970_vm12 = vcmp.lt.s32.totalorder %v8400_v7, 0  ;;  %v1896_v49 = vmul.f32 %v1895_v26, %v1893_v4  ;;  %v365_v29 = vor.u32 8388608, %v364_v30 }
 0x198   :  { %v397_v22 = vsel %vm389_vm5, %v8445_v3, %v8447_v59  ;;  %v399_v52 = vsel %vm391_vm11, %v8449_v24, %v398_v13  ;;  %v8472_v43 = vpop.eup %6569  ;;  %v401_v20 = vsel %vm389_vm5, %v8447_v59, %v8449_v24  ;;  %v403_v4 = vsel %vm391_vm11, %v385_v63, %v402_v34  ;;  %v13035_v34 = vld [vmem:[#allocation39_spill] sm:$0xff] }
 0x199   :  { %v1624_v30 = vor.u32 %v1623_v48, %v1622_v61  ;;  %v1627_v16 = vor.u32 %v1626_v25, %v1625_v62  ;;  %v1897_v10 = vxor.u32 2147483648, %v1896_v49  ;;  %v1900_v60 = vsel %vm1815_vm4, %v1899_v38, %v8319_v19  ;;  %v6572_v53 = vpop.eup %6571 }
 0x19a   :  { %v8483_v11 = vand.u32 3, %v2010_v23  ;;  %vm390_vm13 = vcmp.lt.s32.totalorder %v8426_v44, 2  ;;  %v1613_v13 = vor.u32 8388608, %v8417_v47  ;;  %v1628_v63 = vshll.u32 %v12952_v46, %v13029_v42 }
 0x19b   :  { %v400_v26 = vsel %vm390_vm13, %v397_v22, %v399_v52  ;;  %v1629_v25 = vshrl.u32 %v12950_v18, %v13033_v31  ;;  %v1898_v61 = vsel %vm1815_vm4, %v1897_v10, %v1896_v49  ;;  %v404_v19 = vsel %vm390_vm13, %v401_v20, %v403_v4  ;;  %v13036_v49 = vld [vmem:[#allocation29_spill] sm:$0xff]  ;;  %v13037_v52 = vld [vmem:[#allocation34_spill] sm:$0xff] }
 0x19c   :  { %v8497_v23 = vshll.u32 %v365_v29, 8  ;;  %vm1637_vm1 = vcmp.lt.s32.totalorder %v7609_v57, 1  ;;  %v1901_v38 = vsel %vm8441_vm6, %v13028_v51, %v1898_v61  ;;  %vm1639_vm9 = vcmp.lt.s32.totalorder %v7609_v57, 3 }
 0x19d   :  { %v1630_v47 = vor.u32 %v1629_v25, %v1628_v63  ;;  %v1645_v42 = vsel %vm1637_vm1, %v1624_v30, %v1627_v16  ;;  %6573 = vcosq.f32 %v1901_v38  ;;  %v1651_v29 = vsel %vm1639_vm9, %v13036_v49, %v13035_v34 }
 0x19e   :  { %v8507_v48 = vmul.u32.u64.low %v8497_v23, %v400_v26  ;;  %v8508_v62 = vmul.u32.u64.high %v8497_v23, %v400_v26, %v8507_v48  ;;  %6575 = vsinq.f32 %v1901_v38  ;;  %vm1638_vm4 = vcmp.lt.s32.totalorder %v7609_v57, 2 }
 0x19f   :  { %v1642_v22 = vsel %vm1640_vm8, %v1630_v47, 2102212464  ;;  %v1647_v20 = vsel %vm1639_vm9, %v1630_v47, %v13037_v52  ;;  %v1621_v4 = vshrl.u32 %v12945_v54, %v13033_v31  ;;  %v1649_v26 = vsel %vm1637_vm1, %v1627_v16, %v1630_v47 }
 0x1a0   :  { %13034 = vst [vmem:[#allocation11_spill] sm:$0xff] %v8507_v48  ;;  %v1648_v10 = vsel %vm1638_vm4, %v1645_v42, %v1647_v20  ;;  %v1653_v63 = vshll.u32 %v1613_v13, 8  ;;  %v1902_v25 = vsel %vm8441_vm6, 0, %v1900_v60  ;;  %v1652_v34 = vsel %vm1638_vm4, %v1649_v26, %v1651_v29 }
 0x1a1   :  { %v8530_v61 = vmul.u32.u64.low %v8497_v23, %v404_v19  ;;  %v8531_v38 = vmul.u32.u64.high %v8497_v23, %v404_v19, %v8530_v61  ;;  %v1641_v31 = vsel %vm1637_vm1, %v1621_v4, %v1624_v30  ;;  %v1643_v42 = vsel %vm1639_vm9, %v1627_v16, %v1642_v22  ;;  %v269_v22 = vpop.permute.xlu1 %268 }
 0x1a2   :  { %v8539_v49 = vmul.u32.u64.low %v1653_v63, %v1652_v34  ;;  %v8540_v52 = vmul.u32.u64.high %v1653_v63, %v1652_v34, %v8539_v49  ;;  %v13039_v13 = vshll.u32 %v8356_v33, 23  ;;  %v8549_v60 = vsel %vm5970_vm12, 0, %v8400_v7 }
 0x1a3   :  { %13038 = vst [vmem:[#allocation10_spill] sm:$0xff] %v8531_v38  ;;  %v8551_v19 = vmul.u32.u64.low %v1653_v63, %v1648_v10  ;;  %v8552_v47 = vmul.u32.u64.high %v1653_v63, %v1648_v10, %v8551_v19  ;;  %v1063_v30 = vcvt.s32.f32 %v8390_v9  ;;  %v1906_v29 = vadd.s32 3, %v1902_v25 }
 0x1a4   :  { %v8544_v37 = vor.u32 4788187, %v13039_v13  ;;  %v2017_v16 = vxor.u32 2147483648, %v8472_v43  ;;  %v394_v33 = vsel %vm392_vm0, %v8449_v24, 2102212464  ;;  %v2014_v20 = vxor.u32 2147483648, %v6572_v53 }
 0x1a5   :  { %v373_v4 = vshrl.u32 %v12945_v54, %v8409_v5  ;;  %v1644_v7 = vsel %vm1638_vm4, %v1641_v31, %v1643_v42  ;;  %v230_v10 = vadd.f32 %v8364_v50, %v8330_v0  ;;  %v849_v26 = vsub.s32 4294967266, %v8549_v60 }
 0x1a6   :  { %v628_v25 = vshll.u32 %v8402_v40, 30  ;;  %vm2013_vm8 = vcmp.eq.s32.totalorder %v8483_v11, 0  ;;  %vm1662_vm6 = vc.u32 %v8540_v52, %v8551_v19  ;;  %v395_v57 = vsel %vm391_vm11, %v8447_v59, %v394_v33 }
 0x1a7   :  { %v393_v24 = vsel %vm389_vm5, %v373_v4, %v8445_v3  ;;  %v1663_v5 = vadd.s32 1, %v8552_v47  ;;  %v8578_v0 = vadd.f32 %v269_v22, %v230_v10  ;;  %v1907_v50 = vand.u32 3, %v1906_v29 }
 0x1a8   :  { %vm2016_vm0 = vcmp.eq.s32.totalorder %v8483_v11, 2  ;;  %v415_v61 = vadd.s32 1, %v8508_v62  ;;  %v1660_v34 = vmul.u32 %v1653_v63, %v1644_v7  ;;  %v2015_v31 = vsel %vm2013_vm8, %v8472_v43, %v2014_v20 }
 0x1a9   :  { %13040 = vst [vmem:[#allocation21_spill] sm:$0xff] %v8578_v0  ;;  %v2018_v42 = vsel %vm2016_vm0, %v2017_v16, %v6572_v53  ;;  %vm414_vm5 = vc.u32 %v8531_v38, %v8507_v48  ;;  %v1664_v3 = vsel %vm1662_vm6, %v1663_v5, %v8552_v47  ;;  %v845_v59 = vsub.s32 32, %v8549_v60 }
 0x1aa   :  { %v396_v49 = vsel %vm390_vm13, %v393_v24, %v395_v57  ;;  %v1665_v13 = vadd.s32 %v1664_v3, %v1660_v34  ;;  %v464_v29 = vand.u32 2139095040, %v8578_v0  ;;  %v6574_v33 = vpop.eup %6573  ;;  %v13041_v22 = vand.u32 2147483647, %v13020_v56 }
 0x1ab   :  { %v850_v43 = vadd.s32 127, %v849_v26  ;;  %v8597_v53 = vsub.s32 %v8344_v32, %v628_v25  ;;  %vm2009_vm12 = vweird.f32 %v12980_v55  ;;  %vm2012_vm1 = vcmp.lt.s32.totalorder %v8483_v11, 2  ;;  %v6576_v44 = vpop.eup %6575 }
 0x1ac   :  { %vm8592_vm11 = vcmp.le.f32.partialorder %v13041_v22, 0.7853982  ;;  %v1913_v47 = vxor.u32 2147483648, %v6574_v33  ;;  %v2019_v16 = vsel %vm2012_vm1, %v2015_v31, %v2018_v42  ;;  %v416_v20 = vsel %vm414_vm5, %v415_v61, %v8508_v62  ;;  %v13045_v31 = vld [vmem:[#allocation13_spill] sm:$0xff] }
 0x1ad   :  { %13044 = vst [vmem:[#allocation27_spill] sm:$0xff] %v8597_v53  ;;  %v1666_v4 = vadd.s32 536870912, %v1665_v13  ;;  %v1910_v7 = vxor.u32 2147483648, %v6576_v44  ;;  %vm1912_vm13 = vcmp.eq.s32.totalorder %v1907_v50, 2  ;;  %v412_v10 = vmul.u32 %v8497_v23, %v396_v49 }
 0x1ae   :  { %v465_v24 = vshrl.u32 %v464_v29, 23  ;;  %vm912_vm9 = vcmp.lt.s32.totalorder %v8326_v39, 4  ;;  %vm1908_vm4 = vcmp.lt.s32.totalorder %v1907_v50, 2  ;;  %vm1909_vm8 = vcmp.eq.s32.totalorder %v1907_v50, 0 }
 0x1af   :  { %v1914_v32 = vsel %vm1912_vm13, %v1913_v47, %v6576_v44  ;;  %v8604_v26 = vshrl.u32 %v1666_v4, 30  ;;  %v1911_v25 = vsel %vm1909_vm8, %v6574_v33, %v1910_v7  ;;  %v2020_v11 = vsel %vm2009_vm12, nan, %v2019_v16  ;;  %v13048_v16 = vld [vmem:[#allocation30_spill] sm:$0xff] }
 0x1b0   :  { %v8608_v57 = vadd.s32 %v416_v20, %v412_v10  ;;  %v5955_v62 = vadd.s32 4294967169, %v465_v24  ;;  %v1061_v5 = vand.u32 2147483647, %v8544_v37  ;;  %vm1905_vm6 = vweird.f32 %v13028_v51 }
 0x1b1   :  { %v1915_v23 = vsel %vm1908_vm4, %v1911_v25, %v1914_v32  ;;  %v1668_v61 = vshll.u32 %v8604_v26, 30  ;;  %v847_v34 = vshrl.u32 %v8395_v27, %v845_v59  ;;  %v1795_v42 = vsub.s32 4, %v13045_v31 }
 0x1b2   :  { %v1916_v50 = vsel %vm1905_vm6, nan, %v1915_v23  ;;  %v471_v3 = vadd.s32 1, %v5955_v62  ;;  %v851_v49 = vshll.u32 %v850_v43, 23  ;;  %v631_v55 = vsub.s32 0, %v8597_v53 }
 0x1b3   :  { %v2044_v29 = vpack.c.bf16 %v2020_v11, %v1916_v50  ;;  %v8616_v33 = vsub.s32 %v1665_v13, %v1668_v61  ;;  %v8619_v22 = vand.u32 31, %v8382_v12  ;;  %v846_v51 = vshll.u32 %v8303_v14, %v8549_v60  ;;  %v13046_v14 = vld [vmem:[#allocation6_spill] sm:$0xff] }
 0x1b4   :  { %v418_v37 = vadd.s32 536870912, %v8608_v57  ;;  %vm472_vm0 = vcmp.gt.s32.totalorder %v471_v3, 0  ;;  %v1277_v27 = vsel %vm8592_vm11, %v13020_v56, %v8380_v36  ;;  %v8630_v59 = vmul.f32 %v1063_v30, %v1061_v5 }
 0x1b5   :  { %6232 = vmatprep.subr.bf16.mxu0 %v2044_v29  ;;  %v1671_v13 = vsub.s32 0, %v8616_v33  ;;  %v473_v43 = vsel %vm472_vm0, %v471_v3, 0  ;;  %v8633_v44 = vor.u32 %v847_v34, %v846_v51  ;;  %vm13047_vm5 = vcmp.lt.s32.totalorder %v13046_v14, 0  ;;  %v13054_v3 = vld [vmem:[#allocation41_spill] sm:$0xff] }
 0x1b6   :  { %6233 = vmatpush3.bf16.msra.mxu0 %v2044_v29  ;;  %v1796_v60 = vsel %vm13047_vm5, %v1795_v42, %v13045_v31  ;;  %v475_v47 = vand.u32 31, %v473_v43  ;;  %v1483_v20 = vsub.s32 4, %v13048_v16  ;;  %v8641_v9 = vor.u32 4788187, %v851_v49 }
 0x1b7   :  { %v8644_v30 = vmin.u32 %v631_v55, %v8597_v53  ;;  %v6000_v4 = vmin.u32 %v1671_v13, %v8616_v33  ;;  %6577 = vcosq.f32 %v1277_v27  ;;  %v8650_v7 = vsel %vm912_vm9, %v8359_v28, 920167782 }
 0x1b8   :  { %13049 = vst [vmem:[#allocation39_spill] sm:$0xff] %v8650_v7  ;;  %v8653_v10 = vsub.s32 32, %v8619_v22  ;;  %v8655_v24 = vshrl.u32 %v418_v37, 30  ;;  %v1798_v11 = vsel %vm7820_vm14, 0, %v1796_v60  ;;  %v12777_v62 = vand.u32 2147483647, %v8578_v0 }
 0x1b9   :  { %v1673_v32 = vclz %v6000_v4  ;;  %v8660_v5 = vsub.s32 32, %v475_v47  ;;  %6579 = vsinq.f32 %v1277_v27  ;;  %vm13053_vm12 = vcmp.lt.s32.totalorder %v12992_v45, 0  ;;  %v13055_v37 = vld [vmem:[#allocation17_spill] sm:$0xff] }
 0x1ba   :  { %13050 = vst [vmem:[#allocation29_spill] sm:$0xff] %v8653_v10  ;;  %13051 = vst [vmem:[#allocation34_spill] sm:$0xff] %v8655_v24  ;;  %v1484_v34 = vsel %vm13053_vm12, %v1483_v20, %v13048_v16  ;;  %v1806_v49 = vxor.u32 2147483648, %v13054_v3  ;;  %v420_v55 = vshll.u32 %v8655_v24, 30  ;;  %v1661_v29 = vadd.s32 %v8551_v19, %v8540_v52 }
 0x1bb   :  { %v6001_v42 = vadd.s32 4294967294, %v1673_v32  ;;  %v1802_v51 = vadd.s32 3, %v1798_v11  ;;  %v1809_v27 = vxor.u32 2147483648, %v13055_v37  ;;  %vm1607_vm14 = vcmp.lt.s32.totalorder %v13026_v2, 0 }
 0x1bc   :  { %v468_v13 = vand.u32 8388607, %v12777_v62  ;;  %v488_v60 = vshrl.u32 %v12928_v35, %v8660_v5  ;;  %v1486_v16 = vsel %vm8198_vm10, 0, %v1484_v34  ;;  %v8681_v4 = vshrl.u32 %v473_v43, 5 }
 0x1bd   :  { %vm6002_vm1 = vcmp.lt.s32.totalorder %v6001_v42, 0  ;;  %v481_v52 = vshll.u32 %v12951_v17, %v475_v47  ;;  %v482_v19 = vshrl.u32 %v12952_v46, %v8660_v5  ;;  %v485_v11 = vshrl.u32 %v12950_v18, %v8660_v5 }
 0x1be   :  { %v1676_v20 = vsel %vm6002_vm1, 0, %v6001_v42  ;;  %v487_v62 = vshll.u32 %v12950_v18, %v475_v47  ;;  %v13056_v23 = vand.u32 2147483647, %v13026_v2  ;;  %v479_v43 = vshrl.u32 %v12951_v17, %v8660_v5 }
 0x1bf   :  { %v1677_v32 = vsub.s32 32, %v1676_v20  ;;  %v1681_v25 = vsub.s32 4294967266, %v1676_v20  ;;  %v484_v34 = vshll.u32 %v12952_v46, %v475_v47  ;;  %v490_v42 = vshll.u32 %v12928_v35, %v475_v47 }
 0x1c0   :  { %vm8691_vm13 = vcmp.le.f32.partialorder %v13056_v23, 0.7853982  ;;  %v491_v36 = vshrl.u32 %v12929_v58, %v8660_v5  ;;  %v1678_v61 = vshll.u32 %v8616_v33, %v1676_v20  ;;  %v489_v24 = vor.u32 %v488_v60, %v487_v62  ;;  %v13059_v33 = vld [vmem:[#allocation14_spill] sm:$0xff] }
 0x1c1   :  { %v1679_v50 = vshrl.u32 %v1661_v29, %v1677_v32  ;;  %v1682_v31 = vadd.s32 127, %v1681_v25  ;;  %v1691_v23 = vsub.s32 4, %v8604_v26  ;;  %v478_v40 = vshll.u32 %v12945_v54, %v475_v47 }
 0x1c2   :  { %v483_v0 = vor.u32 %v482_v19, %v481_v52  ;;  %v492_v48 = vor.u32 %v491_v36, %v490_v42  ;;  %v486_v28 = vor.u32 %v485_v11, %v484_v34  ;;  %vm496_vm10 = vcmp.lt.s32.totalorder %v8681_v4, 4 }
 0x1c3   :  { %v1680_v38 = vor.u32 %v1679_v50, %v1678_v61  ;;  %v1683_v7 = vshll.u32 %v1682_v31, 23  ;;  %v1803_v53 = vand.u32 3, %v1802_v51  ;;  %v480_v10 = vor.u32 %v479_v43, %v478_v40 }
 0x1c4   :  { %v506_v58 = vsel %vm496_vm10, %v492_v48, 1326507024  ;;  %v1587_v29 = vsub.s32 4, %v13059_v33  ;;  %v8708_v20 = vpop.eup %6577  ;;  %v8711_v62 = vsub.s32 %v8608_v57, %v420_v55  ;;  %v502_v36 = vsel %vm496_vm10, %v489_v24, 920167782 }
 0x1c5   :  { %v1684_v47 = vor.u32 4788187, %v1683_v7  ;;  %v1490_v61 = vadd.s32 3, %v1486_v16  ;;  %v1692_v50 = vsel %vm1607_vm14, %v1691_v23, %v8604_v26  ;;  %v469_v40 = vor.u32 8388608, %v468_v13 }
 0x1c6   :  { %vm493_vm4 = vcmp.lt.s32.totalorder %v8681_v4, 1  ;;  %vm495_vm8 = vcmp.lt.s32.totalorder %v8681_v4, 3  ;;  %v8720_v48 = vpop.eup %6579  ;;  %v1687_v51 = vcvt.s32.f32 %v1680_v38  ;;  %vm1804_vm6 = vcmp.lt.s32.totalorder %v1803_v53, 2 }
 0x1c7   :  { %v1685_v31 = vand.u32 2147483647, %v1684_v47  ;;  %v505_v57 = vsel %vm493_vm4, %v483_v0, %v486_v28  ;;  %v507_v7 = vsel %vm495_vm8, %v489_v24, %v506_v58  ;;  %vm1805_vm0 = vcmp.eq.s32.totalorder %v1803_v53, 0  ;;  %v13060_v24 = vld [vmem:[#allocation7_spill] sm:$0xff] }
 0x1c8   :  { %v501_v26 = vsel %vm493_vm4, %v480_v10, %v483_v0  ;;  %v503_v55 = vsel %vm495_vm8, %v486_v28, %v502_v36  ;;  %v1694_v60 = vsel %vm8691_vm13, 0, %v1692_v50  ;;  %vm1808_vm5 = vcmp.eq.s32.totalorder %v1803_v53, 2 }
 0x1c9   :  { %v1688_v13 = vmul.f32 %v1687_v51, %v1685_v31  ;;  %vm494_vm12 = vcmp.lt.s32.totalorder %v8681_v4, 2  ;;  %v1807_v38 = vsel %vm1805_vm0, %v13055_v37, %v1806_v49  ;;  %v1810_v16 = vsel %vm1808_vm5, %v1809_v27, %v13054_v3  ;;  %v13063_v27 = vld [vmem:[#allocation37_spill] sm:$0xff]  ;;  %v13070_v37 = vld [vmem:[#allocation43_spill] sm:$0xff] }
 0x1ca   :  { %v508_v58 = vsel %vm494_vm12, %v505_v57, %v507_v7  ;;  %vm13061_vm1 = vcmp.lt.s32.totalorder %v13060_v24, 0  ;;  %v504_v32 = vsel %vm494_vm12, %v501_v26, %v503_v55  ;;  %v8742_v25 = vshll.u32 %v469_v40, 8  ;;  %v13064_v40 = vld [vmem:[#allocation26_spill] sm:$0xff] }
 0x1cb   :  { %v1588_v52 = vsel %vm13061_vm1, %v1587_v29, %v13059_v33  ;;  %v1689_v19 = vxor.u32 2147483648, %v1688_v13  ;;  %v1491_v11 = vand.u32 3, %v1490_v61  ;;  %v1698_v43 = vadd.s32 3, %v1694_v60 }
 0x1cc   :  { %v477_v49 = vshrl.u32 %v12945_v54, %v8660_v5  ;;  %v1590_v3 = vsel %vm7859_vm3, 0, %v1588_v52  ;;  %v1275_v34 = vsub.s32 4, %v13063_v27  ;;  %v498_v23 = vsel %vm496_vm10, %v486_v28, 2102212464 }
 0x1cd   :  { %v1690_v42 = vsel %vm1607_vm14, %v1689_v19, %v1688_v13  ;;  %v8754_v33 = vmul.u32.u64.low %v8742_v25, %v508_v58  ;;  %v8755_v29 = vmul.u32.u64.high %v8742_v25, %v508_v58, %v8754_v33  ;;  %v1594_v50 = vadd.s32 3, %v1590_v3  ;;  %v13065_v13 = vld [vmem:[#allocation8_spill] sm:$0xff] }
 0x1ce   :  { %v1693_v47 = vsel %vm8691_vm13, %v13026_v2, %v1690_v42  ;;  %v8761_v5 = vmul.u32.u64.low %v8742_v25, %v504_v32  ;;  %v8762_v36 = vmul.u32.u64.high %v8742_v25, %v504_v32, %v8761_v5  ;;  %v1276_v61 = vsel %vm1191_vm15, %v1275_v34, %v13063_v27  ;;  %v13069_v32 = vld [vmem:[#allocation32_spill] sm:$0xff] }
 0x1cf   :  { %6581 = vcosq.f32 %v1693_v47  ;;  %v1278_v28 = vsel %vm8592_vm11, 0, %v1276_v61  ;;  %v1379_v31 = vsub.s32 4, %v13064_v40  ;;  %v1811_v8 = vsel %vm1804_vm6, %v1807_v38, %v1810_v16  ;;  %v13073_v38 = vld [vmem:[#allocation19_spill] sm:$0xff] }
 0x1d0   :  { %6583 = vsinq.f32 %v1693_v47  ;;  %v1494_v51 = vxor.u32 2147483648, %v8404_v41  ;;  %v1497_v57 = vxor.u32 2147483648, %v8388_v6  ;;  %v497_v7 = vsel %vm493_vm4, %v477_v49, %v480_v10 }
 0x1d1   :  { %v499_v26 = vsel %vm495_vm8, %v483_v0, %v498_v23  ;;  %v1282_v55 = vadd.s32 3, %v1278_v28  ;;  %vm13066_vm3 = vcmp.lt.s32.totalorder %v13065_v13, 0  ;;  %v13067_v60 = vclz %v8644_v30  ;;  %v13071_v28 = vld [vmem:[#allocation33_spill] sm:$0xff] }
 0x1d2   :  { %v1380_v63 = vsel %vm13066_vm3, %v1379_v31, %v13064_v40  ;;  %v423_v53 = vsub.s32 0, %v8711_v62  ;;  %vm1801_vm15 = vweird.f32 %v13046_v14  ;;  %v8789_v10 = vand.u32 3, %v1698_v43 }
 0x1d3   :  { %v8783_v58 = vadd.s32 4294967294, %v13067_v60  ;;  %v1382_v16 = vsel %vm8031_vm2, 0, %v1380_v63  ;;  %v8791_v52 = vsel %vm1801_vm15, nan, %v1811_v8  ;;  %vm1489_vm11 = vweird.f32 %v12992_v45  ;;  %v13072_v8 = vld [vmem:[#allocation18_spill] sm:$0xff] }
 0x1d4   :  { %vm1493_vm14 = vcmp.eq.s32.totalorder %v1491_v11, 0  ;;  %v1595_v0 = vand.u32 3, %v1594_v50  ;;  %v500_v30 = vsel %vm494_vm12, %v497_v7, %v499_v26  ;;  %vm1496_vm13 = vcmp.eq.s32.totalorder %v1491_v11, 2 }
 0x1d5   :  { %v1495_v19 = vsel %vm1493_vm14, %v8388_v6, %v1494_v51  ;;  %v1598_v49 = vxor.u32 2147483648, %v13069_v32  ;;  %v1498_v14 = vsel %vm1496_vm13, %v1497_v57, %v8404_v41  ;;  %v1601_v3 = vxor.u32 2147483648, %v13070_v37 }
 0x1d6   :  { %v1283_v43 = vand.u32 3, %v1282_v55  ;;  %v1386_v27 = vadd.s32 3, %v1382_v16  ;;  %v519_v34 = vadd.s32 1, %v8762_v36  ;;  %vm1492_vm2 = vcmp.lt.s32.totalorder %v1491_v11, 2 }
 0x1d7   :  { %v1286_v42 = vxor.u32 2147483648, %v8720_v48  ;;  %v1289_v23 = vxor.u32 2147483648, %v8708_v20  ;;  %vm1701_vm10 = vcmp.eq.s32.totalorder %v8789_v10, 0  ;;  %vm1704_vm4 = vcmp.eq.s32.totalorder %v8789_v10, 2 }
 0x1d8   :  { %vm518_vm8 = vc.u32 %v8755_v29, %v8761_v5  ;;  %vm1597_vm6 = vcmp.eq.s32.totalorder %v1595_v0, 0  ;;  %vm1700_vm0 = vcmp.lt.s32.totalorder %v8789_v10, 2  ;;  %v516_v6 = vmul.u32 %v8742_v25, %v500_v30  ;;  %v6537_v25 = vld [vmem:[%s12666_s3] sm:$0xff]  }
 0x1d9   :  { %v1499_v41 = vsel %vm1492_vm2, %v1495_v19, %v1498_v14  ;;  %v1599_v4 = vsel %vm1597_vm6, %v13070_v37, %v1598_v49  ;;  %vm1600_vm5 = vcmp.eq.s32.totalorder %v1595_v0, 2  ;;  %vm1697_vm12 = vweird.f32 %v13026_v2  ;;  %6248 = vmatprep.mubr.bf16.mxu0 %v6537_v25  ;;  %v13074_v37 = vld [vmem:[#allocation40_spill] sm:$0xff] }
 0x1da   :  { %v1602_v11 = vsel %vm1600_vm5, %v1601_v3, %v13069_v32  ;;  %vm1285_vm1 = vcmp.eq.s32.totalorder %v1283_v43, 0  ;;  %vm1288_vm3 = vcmp.eq.s32.totalorder %v1283_v43, 2  ;;  %v1387_v33 = vand.u32 3, %v1386_v27  ;;  %v13104_v25 = vld [vmem:[#allocation24_spill] sm:$0xff] }
 0x1db   :  { %v520_v47 = vsel %vm518_vm8, %v519_v34, %v8762_v36  ;;  %v1287_v61 = vsel %vm1285_vm1, %v8708_v20, %v1286_v42  ;;  %v1290_v50 = vsel %vm1288_vm3, %v1289_v23, %v8720_v48  ;;  %v1085_v40 = vand.u32 2147483647, %v13071_v28  ;;  %v13075_v23 = vld [vmem:[#allocation31_spill] sm:$0xff] }
 0x1dc   :  { %vm1593_vm15 = vweird.f32 %v13060_v24  ;;  %vm1596_vm14 = vcmp.lt.s32.totalorder %v1595_v0, 2  ;;  %v1390_v31 = vxor.u32 2147483648, %v8366_v15  ;;  %v1393_v51 = vxor.u32 2147483648, %v13072_v8  ;;  %v6582_v57 = vpop.eup %6581 }
 0x1dd   :  { %v1500_v36 = vsel %vm1489_vm11, nan, %v1499_v41  ;;  %v1603_v20 = vsel %vm1596_vm14, %v1599_v4, %v1602_v11  ;;  %vm1281_vm13 = vweird.f32 %v13020_v56  ;;  %vm1284_vm2 = vcmp.lt.s32.totalorder %v1283_v43, 2  ;;  %v6584_v48 = vpop.eup %6583 }
 0x1de   :  { %v1705_v7 = vxor.u32 2147483648, %v6582_v57  ;;  %v8825_v26 = vadd.s32 %v520_v47, %v516_v6  ;;  %v1291_v55 = vsel %vm1284_vm2, %v1287_v61, %v1290_v50  ;;  %vm1389_vm8 = vcmp.eq.s32.totalorder %v1387_v33, 0  ;;  %v13076_v61 = vld [vmem:[#allocation44_spill] sm:$0xff] }
 0x1df   :  { %v1702_v63 = vxor.u32 2147483648, %v6584_v48  ;;  %vm1392_vm6 = vcmp.eq.s32.totalorder %v1387_v33, 2  ;;  %v1092_v60 = vand.u32 8388607, %v1085_v40  ;;  %v1103_v45 = vshrl.u32 %v12951_v17, %v13073_v38 }
 0x1e0   :  { %v1706_v16 = vsel %vm1704_vm4, %v1705_v7, %v6584_v48  ;;  %v1604_v0 = vsel %vm1593_vm15, nan, %v1603_v20  ;;  %v1391_v30 = vsel %vm1389_vm8, %v13072_v8, %v1390_v31  ;;  %v1394_v19 = vsel %vm1392_vm6, %v1393_v51, %v8366_v15  ;;  %v13080_v31 = vld [vmem:[#allocation22_spill] sm:$0xff]  ;;  %v13081_v8 = vld [vmem:[#allocation9_spill] sm:$0xff] }
 0x1e1   :  { %v1703_v32 = vsel %vm1701_vm10, %v6582_v57, %v1702_v63  ;;  %v2042_v49 = vpack.c.bf16 %v1604_v0, %v1500_v36  ;;  %v1292_v14 = vsel %vm1281_vm13, nan, %v1291_v55  ;;  %v1102_v3 = vshll.u32 %v12945_v54, %v13074_v37  ;;  %v13082_v36 = vld [vmem:[#allocation46_spill] sm:$0xff] }
 0x1e2   :  { %v1707_v43 = vsel %vm1700_vm0, %v1703_v32, %v1706_v16  ;;  %vm1388_vm11 = vcmp.lt.s32.totalorder %v1387_v33, 2  ;;  %v1105_v24 = vshll.u32 %v12951_v17, %v13074_v37  ;;  %v1106_v15 = vshrl.u32 %v12952_v46, %v13073_v38 }
 0x1e3   :  { %v1708_v27 = vsel %vm1697_vm12, nan, %v1707_v43  ;;  %v1395_v34 = vsel %vm1388_vm11, %v1391_v30, %v1394_v19  ;;  %v1093_v42 = vor.u32 8388608, %v1092_v60  ;;  %v1104_v56 = vor.u32 %v1103_v45, %v1102_v3  ;;  %v13086_v3 = vld [vmem:[#allocation36_spill] sm:$0xff] }
 0x1e4   :  { %vm983_vm10 = vcmp.lt.s32.totalorder %v13075_v23, 0  ;;  %v2043_v6 = vpack.c.bf16 %v8791_v52, %v1708_v27  ;;  %v1107_v41 = vor.u32 %v1106_v15, %v1105_v24  ;;  %v1108_v10 = vshll.u32 %v12952_v46, %v13074_v37 }
 0x1e5   :  { %v1109_v4 = vshrl.u32 %v12950_v18, %v13073_v38  ;;  %v5952_v11 = vmin.u32 %v423_v53, %v8711_v62  ;;  %v522_v2 = vadd.s32 536870912, %v8825_v26  ;;  %vm1385_vm4 = vweird.f32 %v13065_v13 }
 0x1e6   :  { %v1101_v33 = vshrl.u32 %v12945_v54, %v13073_v38  ;;  %6234 = vmatprep.subr.bf16.mxu0 %v2043_v6  ;;  %v1396_v52 = vsel %vm1385_vm4, nan, %v1395_v34  ;;  %vm1117_vm0 = vcmp.lt.s32.totalorder %v13076_v61, 1  ;;  %vm1119_vm5 = vcmp.lt.s32.totalorder %v13076_v61, 3 }
 0x1e7   :  { %v1110_v47 = vor.u32 %v1109_v4, %v1108_v10  ;;  %v13077_v50 = vand.u32 2147483647, %v13075_v23  ;;  %6235 = vmatpush3.bf16.msra.mxu0 %v2043_v6  ;;  %v2041_v53 = vpack.c.bf16 %v1396_v52, %v1292_v14  ;;  %vm1118_vm1 = vcmp.lt.s32.totalorder %v13076_v61, 2  ;;  %v13093_v61 = vld [vmem:[#allocation42_spill] sm:$0xff] }
 0x1e8   :  { %v1125_v13 = vsel %vm1117_vm0, %v1104_v56, %v1107_v41  ;;  %v1131_v51 = vsel %vm1119_vm5, %v13081_v8, %v13080_v31  ;;  %6236 = vmatprep.subr.bf16.mxu0 %v2042_v49  ;;  %v1133_v7 = vshll.u32 %v1093_v42, 8  ;;  %vm5962_vm3 = vcmp.lt.s32.totalorder %v8783_v58, 0  ;;  %v13095_v31 = vld [vmem:[#allocation23_spill] sm:$0xff] }
 0x1e9   :  { %vm8868_vm12 = vcmp.le.f32.partialorder %v13077_v50, 0.7853982  ;;  %v1122_v57 = vsel %vm1120_vm7, %v1110_v47, 2102212464  ;;  %v1127_v20 = vsel %vm1119_vm5, %v1110_v47, %v13082_v36  ;;  %v1129_v48 = vsel %vm1117_vm0, %v1107_v41, %v1110_v47  ;;  %v13096_v36 = vld [vmem:[#allocation48_spill] sm:$0xff] }
 0x1ea   :  { %v1121_v55 = vsel %vm1117_vm0, %v1101_v33, %v1104_v56  ;;  %v1123_v63 = vsel %vm1119_vm5, %v1107_v41, %v1122_v57  ;;  %v1128_v60 = vsel %vm1118_vm1, %v1125_v13, %v1127_v20  ;;  %v13083_v38 = vand.u32 2147483647, %v8641_v9  ;;  %v13091_v56 = vld [vmem:[#allocation29_spill] sm:$0xff]  ;;  %v13094_v13 = vld [vmem:[#allocation16_spill] sm:$0xff] }
 0x1eb   :  { %v13084_v45 = vcvt.s32.f32 %v8633_v44  ;;  %v1132_v0 = vsel %vm1118_vm1, %v1129_v48, %v1131_v51  ;;  %v8887_v30 = vmul.u32.u64.low %v1133_v7, %v1128_v60  ;;  %v8888_v19 = vmul.u32.u64.high %v1133_v7, %v1128_v60, %v8887_v30  ;;  %6237 = vmatpush3.bf16.msra.mxu0 %v2042_v49 }
 0x1ec   :  { %v13085_v32 = vor.u32 %v8354_v21, %v8350_v1  ;;  %v8898_v37 = vshrl.u32 %v522_v2, 30  ;;  %v8900_v9 = vmul.u32.u64.low %v1133_v7, %v1132_v0  ;;  %v8901_v44 = vmul.u32.u64.high %v1133_v7, %v1132_v0, %v8900_v9  ;;  %6238 = vmatprep.subr.bf16.mxu0 %v2041_v53 }
 0x1ed   :  { %v856_v16 = vmul.f32 %v13084_v45, %v13083_v38  ;;  %vm775_vm7 = vcmp.lt.s32.totalorder %v13086_v3, 0  ;;  %v636_v43 = vsel %vm5962_vm3, 0, %v8783_v58  ;;  %v425_v24 = vclz %v5952_v11  ;;  %v13097_v45 = vld [vmem:[#allocation28_spill] sm:$0xff] }
 0x1ee   :  { %v8896_v14 = vsel %vm912_vm9, %v13085_v32, 1326507024  ;;  %v1124_v15 = vsel %vm1118_vm1, %v1121_v55, %v1123_v63  ;;  %v13087_v1 = vxor.u32 2147483648, %v8630_v59  ;;  %v8913_v49 = vshrl.u32 %v8382_v12, 5 }
 0x1ef   :  { %v695_v27 = vshll.u32 %v12950_v18, %v8619_v22  ;;  %v8919_v58 = vshll.u32 %v12928_v35, %v8619_v22  ;;  %v13088_v34 = vand.u32 2147483647, %v13086_v3  ;;  %v696_v6 = vshrl.u32 %v12928_v35, %v13091_v56  ;;  %6239 = vmatpush3.bf16.msra.mxu0 %v2041_v53 }
 0x1f0   :  { %v1066_v21 = vsel %vm983_vm10, %v13087_v1, %v8630_v59  ;;  %v13092_v59 = vmov 1326507024   ;;  %v857_v41 = vxor.u32 2147483648, %v856_v16  ;;  %v1143_v10 = vadd.s32 1, %v8888_v19 }
 0x1f1   :  { %vm8923_vm15 = vcmp.le.f32.partialorder %v13088_v34, 0.7853982  ;;  %v8931_v12 = vshrl.u32 %v13092_v59, %v13091_v56  ;;  %v637_v4 = vsub.s32 32, %v636_v43  ;;  %v524_v11 = vshll.u32 %v8898_v37, 30 }
 0x1f2   :  { %v1140_v2 = vmul.u32 %v1133_v7, %v1124_v15  ;;  %vm1142_vm14 = vc.u32 %v8901_v44, %v8887_v30  ;;  %v1069_v33 = vsel %vm8868_vm12, %v13075_v23, %v1066_v21  ;;  %v5953_v52 = vadd.s32 4294967294, %v425_v24 }
 0x1f3   :  { %v1144_v47 = vsel %vm1142_vm14, %v1143_v10, %v8888_v19  ;;  %v877_v50 = vand.u32 2147483647, %v13093_v61  ;;  %v621_v8 = vadd.s32 %v13095_v31, %v13094_v13  ;;  %v641_v51 = vsub.s32 4294967266, %v636_v43  ;;  %v13100_v31 = vld [vmem:[#allocation39_spill] sm:$0xff] }
 0x1f4   :  { %v1145_v57 = vadd.s32 %v1144_v47, %v1140_v2  ;;  %v895_v53 = vshrl.u32 %v12951_v17, %v13096_v36  ;;  %v8946_v20 = vor.u32 %v696_v6, %v695_v27  ;;  %v700_v48 = vor.u32 %v8931_v12, %v8919_v58  ;;  %v13099_v47 = vld [vmem:[#allocation15_spill] sm:$0xff] }
 0x1f5   :  { %v858_v7 = vsel %vm775_vm7, %v857_v41, %v856_v16  ;;  %v898_v55 = vshrl.u32 %v12952_v46, %v13096_v36  ;;  %v639_v63 = vshrl.u32 %v621_v8, %v637_v4  ;;  %v8955_v60 = vsub.s32 %v8825_v26, %v524_v11  ;;  %v13098_v16 = vld [vmem:[#allocation27_spill] sm:$0xff] }
 0x1f6   :  { %v1146_v38 = vadd.s32 536870912, %v1145_v57  ;;  %v894_v0 = vshll.u32 %v12945_v54, %v13097_v45  ;;  %6585 = vsinq.f32 %v1069_v33  ;;  %vm5954_vm13 = vcmp.lt.s32.totalorder %v5953_v52, 0 }
 0x1f7   :  { %v884_v19 = vand.u32 8388607, %v877_v50  ;;  %v897_v32 = vshll.u32 %v12951_v17, %v13097_v45  ;;  %v638_v9 = vshll.u32 %v13098_v16, %v636_v43  ;;  %v642_v24 = vadd.s32 127, %v641_v51 }
 0x1f8   :  { %v8964_v15 = vshrl.u32 %v1146_v38, 30  ;;  %v896_v1 = vor.u32 %v895_v53, %v894_v0  ;;  %vm704_vm2 = vcmp.lt.s32.totalorder %v8913_v49, 4  ;;  %v8970_v26 = vsel %vm8923_vm15, %v13086_v3, %v858_v7 }
 0x1f9   :  { %v899_v21 = vor.u32 %v898_v55, %v897_v32  ;;  %v900_v27 = vshll.u32 %v12952_v46, %v13097_v45  ;;  %v901_v58 = vshrl.u32 %v12950_v18, %v13096_v36  ;;  %v8976_v34 = vor.u32 %v639_v63, %v638_v9  ;;  %v13101_v63 = vld [vmem:[#allocation5_spill] sm:$0xff] }
 0x1fa   :  { %v428_v43 = vsel %vm5954_vm13, 0, %v5953_v52  ;;  %v527_v6 = vsub.s32 0, %v8955_v60  ;;  %v1148_v12 = vshll.u32 %v8964_v15, 30  ;;  %v885_v41 = vor.u32 8388608, %v884_v19 }
 0x1fb   :  { %v902_v10 = vor.u32 %v901_v58, %v900_v27  ;;  %vm909_vm8 = vcmp.lt.s32.totalorder %v8326_v39, 1  ;;  %vm911_vm6 = vcmp.lt.s32.totalorder %v8326_v39, 3  ;;  %v643_v4 = vshll.u32 %v642_v24, 23 }
 0x1fc   :  { %v8982_v11 = vsub.s32 %v1145_v57, %v1148_v12  ;;  %v917_v2 = vsel %vm909_vm8, %v896_v1, %v899_v21  ;;  %v923_v52 = vsel %vm911_vm6, %v13099_v47, %v8896_v14  ;;  %vm910_vm11 = vcmp.lt.s32.totalorder %v8326_v39, 2 }
 0x1fd   :  { %v914_v13 = vsel %vm912_vm9, %v902_v10, 2102212464  ;;  %v919_v8 = vsel %vm911_vm6, %v902_v10, %v13100_v31  ;;  %v921_v51 = vsel %vm909_vm8, %v899_v21, %v902_v10  ;;  %v429_v57 = vsub.s32 32, %v428_v43  ;;  %v13103_v10 = vld [vmem:[#allocation11_spill] sm:$0xff] }
 0x1fe   :  { %v1151_v53 = vsub.s32 0, %v8982_v11  ;;  %v893_v7 = vshrl.u32 %v12945_v54, %v13096_v36  ;;  %v920_v14 = vsel %vm910_vm11, %v917_v2, %v919_v8  ;;  %v5956_v55 = vmin.u32 %v527_v6, %v8955_v60 }
 0x1ff   :  { %v1067_v38 = vsub.s32 4, %v13101_v63  ;;  %v924_v45 = vsel %vm910_vm11, %v921_v51, %v923_v52  ;;  %v925_v0 = vshll.u32 %v885_v41, 8  ;;  %v433_v19 = vsub.s32 4294967266, %v428_v43 }
 0x200   :  { %v5980_v32 = vmin.u32 %v1151_v53, %v8982_v11  ;;  %v913_v16 = vsel %vm909_vm8, %v893_v7, %v896_v1  ;;  %v915_v36 = vsel %vm911_vm6, %v899_v21, %v914_v13  ;;  %6587 = vcosq.f32 %v1069_v33  ;;  %v13102_v1 = vld [vmem:[#allocation10_spill] sm:$0xff] }
 0x201   :  { %v9012_v9 = vmul.u32.u64.low %v925_v0, %v924_v45  ;;  %v9013_v24 = vmul.u32.u64.high %v925_v0, %v924_v45, %v9012_v9  ;;  %v9015_v27 = vmul.u32.u64.low %v925_v0, %v920_v14  ;;  %v9016_v58 = vmul.u32.u64.high %v925_v0, %v920_v14, %v9015_v27 }
 0x202   :  { %v9022_v6 = vsel %vm704_vm2, %v8946_v20, 920167782  ;;  %v9024_v12 = vor.u32 4788187, %v643_v4  ;;  %v1153_v41 = vclz %v5980_v32  ;;  %v413_v2 = vadd.s32 %v13103_v10, %v13102_v1 }
 0x203   :  { %v529_v21 = vclz %v5956_v55  ;;  %v1068_v47 = vsel %vm983_vm10, %v1067_v38, %v13101_v63  ;;  %v916_v52 = vsel %vm910_vm11, %v913_v16, %v915_v36  ;;  %v9033_v33 = vpop.eup %6585  ;;  %v714_v13 = vsel %vm704_vm2, %v700_v48, 1326507024 }
 0x204   :  { %6589 = vcosq.f32 %v8970_v26  ;;  %v647_v4 = vcvt.s32.f32 %v8976_v34  ;;  %v5981_v31 = vadd.s32 4294967294, %v1153_v41  ;;  %v431_v8 = vshrl.u32 %v413_v2, %v429_v57 }
 0x205   :  { %v434_v51 = vadd.s32 127, %v433_v19  ;;  %vm934_vm9 = vc.u32 %v9013_v24, %v9015_v27  ;;  %v935_v53 = vadd.s32 1, %v9016_v58  ;;  %v645_v39 = vand.u32 2147483647, %v9024_v12 }
 0x206   :  { %v1070_v7 = vsel %vm8868_vm12, 0, %v1068_v47  ;;  %vm5982_vm10 = vcmp.lt.s32.totalorder %v5981_v31, 0  ;;  %v932_v14 = vmul.u32 %v925_v0, %v916_v52  ;;  %v430_v48 = vshll.u32 %v8711_v62, %v428_v43 }
 0x207   :  { %v5957_v55 = vadd.s32 4294967294, %v529_v21  ;;  %v1156_v63 = vsel %vm5982_vm10, 0, %v5981_v31  ;;  %v936_v38 = vsel %vm934_vm9, %v935_v53, %v9016_v58  ;;  %v1141_v57 = vadd.s32 %v8887_v30, %v8901_v44 }
 0x208   :  { %v1157_v45 = vsub.s32 32, %v1156_v63  ;;  %v1161_v19 = vsub.s32 4294967266, %v1156_v63  ;;  %v937_v32 = vadd.s32 %v936_v38, %v932_v14  ;;  %v9049_v16 = vor.u32 %v431_v8, %v430_v48 }
 0x209   :  { %v435_v36 = vshll.u32 %v434_v51, 23  ;;  %v1074_v9 = vadd.s32 3, %v1070_v7  ;;  %v669_v41 = vand.u32 2147483647, %v13104_v25  ;;  %v1158_v0 = vshll.u32 %v8982_v11, %v1156_v63 }
 0x20a   :  { %v1159_v1 = vshrl.u32 %v1141_v57, %v1157_v45  ;;  %v1162_v62 = vadd.s32 127, %v1161_v19  ;;  %v938_v43 = vadd.s32 536870912, %v937_v32  ;;  %vm5958_vm4 = vcmp.lt.s32.totalorder %v5957_v55, 0 }
 0x20b   :  { %v686_v58 = vshll.u32 %v12945_v54, %v8619_v22  ;;  %v687_v30 = vshrl.u32 %v12951_v17, %v13091_v56  ;;  %v690_v44 = vshrl.u32 %v12952_v46, %v13091_v56  ;;  %v689_v11 = vshll.u32 %v12951_v17, %v8619_v22 }
 0x20c   :  { %v1160_v10 = vor.u32 %v1159_v1, %v1158_v0  ;;  %v1163_v2 = vshll.u32 %v1162_v62, 23  ;;  %v9059_v21 = vshrl.u32 %v938_v43, 30  ;;  %v9063_v47 = vor.u32 4788187, %v435_v36 }
 0x20d   :  { %v1078_v52 = vxor.u32 2147483648, %v9033_v33  ;;  %vm1087_vm0 = vcmp.lt.s32.totalorder %v13071_v28, 0  ;;  %v676_v31 = vand.u32 8388607, %v669_v41  ;;  %v688_v53 = vor.u32 %v687_v30, %v686_v58  ;;  %v9070_v14 = vpop.eup %6587 }
 0x20e   :  { %v1164_v8 = vor.u32 4788187, %v1163_v2  ;;  %v940_v51 = vshll.u32 %v9059_v21, 30  ;;  %v691_v7 = vor.u32 %v690_v44, %v689_v11  ;;  %v9073_v48 = vsel %vm5958_vm4, 0, %v5957_v55 }
 0x20f   :  { %v9075_v63 = vand.u32 3, %v1074_v9  ;;  %v692_v38 = vshll.u32 %v12952_v46, %v8619_v22  ;;  %v693_v57 = vshrl.u32 %v12950_v18, %v13091_v56  ;;  %v1167_v19 = vcvt.s32.f32 %v1160_v10 }
 0x210   :  { %v1165_v45 = vand.u32 2147483647, %v1164_v8  ;;  %v1171_v36 = vsub.s32 4, %v8964_v15  ;;  %v9082_v0 = vsub.s32 %v937_v32, %v940_v51  ;;  %v677_v62 = vor.u32 8388608, %v676_v31 }
 0x211   :  { %v9084_v1 = vpop.eup %6589  ;;  %v694_v43 = vor.u32 %v693_v57, %v692_v38  ;;  %vm701_vm5 = vcmp.lt.s32.totalorder %v8913_v49, 1  ;;  %vm703_vm12 = vcmp.lt.s32.totalorder %v8913_v49, 3  ;;  %vm9096_vm1 = vcmp.le.f32.partialorder %v1085_v40, 0.7853982 }
 0x212   :  { %v1168_v55 = vmul.f32 %v1167_v19, %v1165_v45  ;;  %v943_v22 = vsub.s32 0, %v9082_v0  ;;  %v709_v9 = vsel %vm701_vm5, %v688_v53, %v691_v7  ;;  %v715_v58 = vsel %vm703_vm12, %v8946_v20, %v714_v13 }
 0x213   :  { %v685_v30 = vshrl.u32 %v12945_v54, %v13091_v56  ;;  %v711_v44 = vsel %vm703_vm12, %v694_v43, %v9022_v6  ;;  %v713_v10 = vsel %vm701_vm5, %v691_v7, %v694_v43  ;;  %vm702_vm3 = vcmp.lt.s32.totalorder %v8913_v49, 2 }
 0x214   :  { %v1169_v2 = vxor.u32 2147483648, %v1168_v55  ;;  %v5972_v11 = vmin.u32 %v943_v22, %v9082_v0  ;;  %v706_v40 = vsel %vm704_vm2, %v694_v43, 2102212464  ;;  %v537_v20 = vsub.s32 4294967266, %v9073_v48 }
 0x215   :  { %v712_v56 = vsel %vm702_vm3, %v709_v9, %v711_v44  ;;  %v716_v13 = vsel %vm702_vm3, %v713_v10, %v715_v58  ;;  %v717_v6 = vshll.u32 %v677_v62, 8  ;;  %v1172_v8 = vsel %vm1087_vm0, %v1171_v36, %v8964_v15 }
 0x216   :  { %v1170_v31 = vsel %vm1087_vm0, %v1169_v2, %v1168_v55  ;;  %v945_v51 = vclz %v5972_v11  ;;  %v705_v38 = vsel %vm701_vm5, %v685_v30, %v688_v53  ;;  %v707_v45 = vsel %vm703_vm12, %v691_v7, %v706_v40 }
 0x217   :  { %v1173_v57 = vsel %vm9096_vm1, %v13071_v28, %v1170_v31  ;;  %v9128_v19 = vmul.u32.u64.low %v717_v6, %v716_v13  ;;  %v9129_v62 = vmul.u32.u64.high %v717_v6, %v716_v13, %v9128_v19  ;;  %v517_v15 = vadd.s32 %v8761_v5, %v8755_v29 }
 0x218   :  { %6591 = vcosq.f32 %v1173_v57  ;;  %v5973_v43 = vadd.s32 4294967294, %v945_v51  ;;  %v9131_v55 = vmul.u32.u64.low %v717_v6, %v712_v56  ;;  %v9132_v22 = vmul.u32.u64.high %v717_v6, %v712_v56, %v9131_v55 }
 0x219   :  { %v533_v53 = vsub.s32 32, %v9073_v48  ;;  %v538_v36 = vadd.s32 127, %v537_v20  ;;  %6593 = vsinq.f32 %v1173_v57  ;;  %vm1077_vm14 = vcmp.eq.s32.totalorder %v9075_v63, 0 }
 0x21a   :  { %v1081_v7 = vxor.u32 2147483648, %v9070_v14  ;;  %vm5974_vm13 = vcmp.lt.s32.totalorder %v5973_v43, 0  ;;  %v708_v9 = vsel %vm702_vm3, %v705_v38, %v707_v45  ;;  %v1079_v58 = vsel %vm1077_vm14, %v9070_v14, %v1078_v52 }
 0x21b   :  { %v1174_v30 = vsel %vm9096_vm1, 0, %v1172_v8  ;;  %v948_v44 = vsel %vm5974_vm13, 0, %v5973_v43  ;;  %vm726_vm2 = vc.u32 %v9129_v62, %v9131_v55  ;;  %v933_v29 = vadd.s32 %v9015_v27, %v9013_v24 }
 0x21c   :  { %v949_v5 = vsub.s32 32, %v948_v44  ;;  %v953_v10 = vsub.s32 4294967266, %v948_v44  ;;  %v727_v2 = vadd.s32 1, %v9132_v22  ;;  %v535_v11 = vshrl.u32 %v517_v15, %v533_v53 }
 0x21d   :  { %v539_v40 = vshll.u32 %v538_v36, 23  ;;  %vm1080_vm8 = vcmp.eq.s32.totalorder %v9075_v63, 2  ;;  %v724_v49 = vmul.u32 %v717_v6, %v708_v9  ;;  %v950_v52 = vshll.u32 %v9082_v0, %v948_v44 }
 0x21e   :  { %v951_v14 = vshrl.u32 %v933_v29, %v949_v5  ;;  %v954_v32 = vadd.s32 127, %v953_v10  ;;  %v728_v20 = vsel %vm726_vm2, %v727_v2, %v9132_v22  ;;  %v534_v56 = vshll.u32 %v8955_v60, %v9073_v48 }
 0x21f   :  { %v1082_v24 = vsel %vm1080_vm8, %v1081_v7, %v9033_v33  ;;  %v1178_v27 = vadd.s32 3, %v1174_v30  ;;  %v729_v13 = vadd.s32 %v728_v20, %v724_v49  ;;  %6595 = vsinq.f32 %v8970_v26  ;;  %v13107_v33 = vld [vmem:[#allocation25_spill] sm:$0xff] }
 0x220   :  { %v648_v6 = vmul.f32 %v647_v4, %v645_v39  ;;  %v952_v31 = vor.u32 %v951_v14, %v950_v52  ;;  %v955_v0 = vshll.u32 %v954_v32, 23  ;;  %v437_v8 = vand.u32 2147483647, %v9063_v47 }
 0x221   :  { %v536_v51 = vor.u32 %v535_v11, %v534_v56  ;;  %vm1076_vm6 = vcmp.lt.s32.totalorder %v9075_v63, 2  ;;  %v730_v38 = vadd.s32 536870912, %v729_v13  ;;  %v540_v60 = vor.u32 4788187, %v539_v40  ;;  %v13122_v40 = vld [vmem:[#allocation12_spill] sm:$0xff] }
 0x222   :  { %v1083_v48 = vsel %vm1076_vm6, %v1079_v58, %v1082_v24  ;;  %v859_v57 = vsub.s32 4, %v13107_v33  ;;  %v956_v45 = vor.u32 4788187, %v955_v0  ;;  %v439_v26 = vcvt.s32.f32 %v9049_v16  ;;  %v13110_v24 = vld [vmem:[#allocation20_spill] sm:$0xff] }
 0x223   :  { %v1179_v19 = vand.u32 3, %v1178_v27  ;;  %v9165_v12 = vshrl.u32 %v730_v38, 30  ;;  %v649_v34 = vxor.u32 2147483648, %v648_v6  ;;  %vm1073_vm11 = vweird.f32 %v13075_v23 }
 0x224   :  { %v957_v4 = vand.u32 2147483647, %v956_v45  ;;  %v959_v39 = vcvt.s32.f32 %v952_v31  ;;  %v440_v43 = vmul.f32 %v439_v26, %v437_v8  ;;  %v543_v22 = vcvt.s32.f32 %v536_v51  ;;  %v13118_v26 = vld [vmem:[#allocation21_spill] sm:$0xff] }
 0x225   :  { %v6592_v47 = vpop.eup %6591  ;;  %v1084_v63 = vsel %vm1073_vm11, nan, %v1083_v48  ;;  %v732_v15 = vshll.u32 %v9165_v12, 30  ;;  %v541_v36 = vand.u32 2147483647, %v540_v60  ;;  %v860_v16 = vsel %vm775_vm7, %v859_v57, %v13107_v33  ;;  %v13114_v60 = vld [vmem:[#allocation47_spill] sm:$0xff] }
 0x226   :  { %v6594_v53 = vpop.eup %6593  ;;  %v1185_v7 = vxor.u32 2147483648, %v6592_v47  ;;  %v960_v9 = vmul.f32 %v959_v39, %v957_v4  ;;  %vm1184_vm9 = vcmp.eq.s32.totalorder %v1179_v19, 2  ;;  %vm879_vm10 = vcmp.lt.s32.totalorder %v13093_v61, 0 }
 0x227   :  { %v1182_v58 = vxor.u32 2147483648, %v6594_v53  ;;  %v733_v23 = vsub.s32 %v729_v13, %v732_v15  ;;  %vm1181_vm4 = vcmp.eq.s32.totalorder %v1179_v19, 0  ;;  %v963_v29 = vsub.s32 4, %v9059_v21 }
 0x228   :  { %v1186_v30 = vsel %vm1184_vm9, %v1185_v7, %v6594_v53  ;;  %v961_v44 = vxor.u32 2147483648, %v960_v9  ;;  %vm1180_vm0 = vcmp.lt.s32.totalorder %v1179_v19, 2  ;;  %v862_v10 = vsel %vm8923_vm15, 0, %v860_v16 }
 0x229   :  { %v1183_v5 = vsel %vm1181_vm4, %v6592_v47, %v1182_v58  ;;  %v735_v2 = vsub.s32 0, %v733_v23  ;;  %vm1177_vm5 = vweird.f32 %v13071_v28  ;;  %vm9179_vm7 = vcmp.le.f32.partialorder %v877_v50, 0.7853982 }
 0x22a   :  { %v1187_v11 = vsel %vm1180_vm0, %v1183_v5, %v1186_v30  ;;  %v962_v49 = vsel %vm879_vm10, %v961_v44, %v960_v9  ;;  %v544_v52 = vmul.f32 %v543_v22, %v541_v36  ;;  %v866_v56 = vadd.s32 3, %v862_v10 }
 0x22b   :  { %v1188_v14 = vsel %vm1177_vm5, nan, %v1187_v11  ;;  %v965_v42 = vsel %vm9179_vm7, %v13093_v61, %v962_v49  ;;  %v5964_v32 = vmin.u32 %v735_v2, %v733_v23  ;;  %v964_v28 = vsel %vm879_vm10, %v963_v29, %v9059_v21 }
 0x22c   :  { %v2040_v20 = vpack.c.bf16 %v1188_v14, %v1084_v63  ;;  %6597 = vcosq.f32 %v965_v42  ;;  %v6596_v50 = vpop.eup %6595  ;;  %vm567_vm15 = vcmp.lt.s32.totalorder %v13110_v24, 0  ;;  %v441_v27 = vxor.u32 2147483648, %v440_v43 }
 0x22d   :  { %6599 = vsinq.f32 %v965_v42  ;;  %v737_v13 = vclz %v5964_v32  ;;  %v650_v31 = vsel %vm567_vm15, %v649_v34, %v648_v6  ;;  %v545_v0 = vxor.u32 2147483648, %v544_v52 }
 0x22e   :  { %6240 = vmatprep.subr.bf16.mxu0 %v2040_v20  ;;  %v966_v8 = vsel %vm9179_vm7, 0, %v964_v28  ;;  %v13111_v38 = vand.u32 2147483647, %v13110_v24  ;;  %v13115_v48 = vand.u32 2147483647, %v13114_v60  ;;  %vm359_vm3 = vcmp.lt.s32.totalorder %v13114_v60, 0 }
 0x22f   :  { %6241 = vmatpush3.bf16.msra.mxu0 %v2040_v20  ;;  %v5965_v51 = vadd.s32 4294967294, %v737_v13  ;;  %v867_v6 = vand.u32 3, %v866_v56  ;;  %v442_v45 = vsel %vm359_vm3, %v441_v27, %v440_v43  ;;  %vm463_vm14 = vcmp.lt.s32.totalorder %v13118_v26, 0  ;;  %v13123_v28 = vld [vmem:[#allocation34_spill] sm:$0xff] }
 0x230   :  { %vm9198_vm12 = vcmp.le.f32.partialorder %v13111_v38, 0.7853982  ;;  %vm9204_vm1 = vcmp.le.f32.partialorder %v13115_v48, 0.7853982  ;;  %v870_v19 = vxor.u32 2147483648, %v6596_v50  ;;  %v873_v34 = vxor.u32 2147483648, %v9084_v1 }
 0x231   :  { %v653_v57 = vsel %vm9198_vm12, %v13110_v24, %v650_v31  ;;  %vm5966_vm13 = vcmp.lt.s32.totalorder %v5965_v51, 0  ;;  %v970_v4 = vadd.s32 3, %v966_v8  ;;  %v546_v47 = vsel %vm463_vm14, %v545_v0, %v544_v52 }
 0x232   :  { %v740_v39 = vsel %vm5966_vm13, 0, %v5965_v51  ;;  %v725_v22 = vadd.s32 %v9131_v55, %v9129_v62  ;;  %6601 = vcosq.f32 %v653_v57  ;;  %v445_v43 = vsel %vm9204_vm1, %v13114_v60, %v442_v45 }
 0x233   :  { %v741_v63 = vsub.s32 32, %v740_v39  ;;  %v745_v15 = vsub.s32 4294967266, %v740_v39  ;;  %v13119_v53 = vand.u32 2147483647, %v13118_v26  ;;  %vm869_vm8 = vcmp.eq.s32.totalorder %v867_v6, 0 }
 0x234   :  { %vm872_vm6 = vcmp.eq.s32.totalorder %v867_v6, 2  ;;  %v742_v7 = vshll.u32 %v733_v23, %v740_v39  ;;  %v871_v55 = vsel %vm869_vm8, %v9084_v1, %v870_v19  ;;  %v971_v30 = vand.u32 3, %v970_v4 }
 0x235   :  { %vm9225_vm2 = vcmp.le.f32.partialorder %v13119_v53, 0.7853982  ;;  %v743_v16 = vshrl.u32 %v725_v22, %v741_v63  ;;  %v746_v9 = vadd.s32 127, %v745_v15  ;;  %v874_v58 = vsel %vm872_vm6, %v873_v34, %v6596_v50 }
 0x236   :  { %v549_v62 = vsel %vm9225_vm2, %v13118_v26, %v546_v47  ;;  %6603 = vsinq.f32 %v653_v57  ;;  %vm868_vm11 = vcmp.lt.s32.totalorder %v867_v6, 2  ;;  %vm865_vm9 = vweird.f32 %v13086_v3  ;;  %v9296_v6 = vpop.permute.xlu1 %2138 }
 0x237   :  { %v744_v44 = vor.u32 %v743_v16, %v742_v7  ;;  %v747_v29 = vshll.u32 %v746_v9, 23  ;;  %6605 = vcosq.f32 %v445_v43  ;;  %v875_v23 = vsel %vm868_vm11, %v871_v55, %v874_v58 }
 0x238   :  { %6607 = vcosq.f32 %v549_v62  ;;  %vm976_vm10 = vcmp.eq.s32.totalorder %v971_v30, 2  ;;  %v651_v49 = vsub.s32 4, %v13122_v40  ;;  %v547_v42 = vsub.s32 4, %v8898_v37 }
 0x239   :  { %v6598_v5 = vpop.eup %6597  ;;  %v748_v10 = vor.u32 4788187, %v747_v29  ;;  %6609 = vsinq.f32 %v549_v62  ;;  %v751_v14 = vcvt.s32.f32 %v744_v44  ;;  %v876_v32 = vsel %vm865_vm9, nan, %v875_v23 }
 0x23a   :  { %v6600_v2 = vpop.eup %6599  ;;  %v977_v11 = vxor.u32 2147483648, %v6598_v5  ;;  %6611 = vsinq.f32 %v445_v43  ;;  %vm973_vm4 = vcmp.eq.s32.totalorder %v971_v30, 0  ;;  %vm972_vm0 = vcmp.lt.s32.totalorder %v971_v30, 2 }
 0x23b   :  { %v974_v1 = vxor.u32 2147483648, %v6600_v2  ;;  %v749_v52 = vand.u32 2147483647, %v748_v10  ;;  %v443_v50 = vsub.s32 4, %v13123_v28  ;;  %vm969_vm5 = vweird.f32 %v13093_v61 }
 0x23c   :  { %v978_v20 = vsel %vm976_vm10, %v977_v11, %v6600_v2  ;;  %v652_v13 = vsel %vm567_vm15, %v651_v49, %v13122_v40  ;;  %v548_v8 = vsel %vm463_vm14, %v547_v42, %v8898_v37  ;;  %vm671_vm7 = vcmp.lt.s32.totalorder %v13104_v25, 0 }
 0x23d   :  { %v975_v56 = vsel %vm973_vm4, %v6598_v5, %v974_v1  ;;  %v752_v3 = vmul.f32 %v751_v14, %v749_v52  ;;  %v755_v38 = vsub.s32 4, %v9165_v12  ;;  %v654_v61 = vsel %vm9198_vm12, 0, %v652_v13 }
 0x23e   :  { %v979_v27 = vsel %vm972_vm0, %v975_v56, %v978_v20  ;;  %vm9250_vm13 = vcmp.le.f32.partialorder %v669_v41, 0.7853982  ;;  %v444_v37 = vsel %vm359_vm3, %v443_v50, %v13123_v28  ;;  %v550_v21 = vsel %vm9225_vm2, 0, %v548_v8  ;;  %v6542_v8 = vld [vmem:[%s12666_s3 + $0x28] sm:$0xff]  }
 0x23f   :  { %v980_v31 = vsel %vm969_vm5, nan, %v979_v27  ;;  %v753_v0 = vxor.u32 2147483648, %v752_v3  ;;  %v6602_v48 = vpop.eup %6601  ;;  %v658_v41 = vadd.s32 3, %v654_v61  ;;  %v756_v34 = vsel %vm671_vm7, %v755_v38, %v9165_v12  ;;  %v6544_v38 = vld [vmem:[%s12666_s3 + $0x38] sm:$0xff]  }
 0x240   :  { %v2039_v51 = vpack.c.bf16 %v980_v31, %v876_v32  ;;  %v446_v4 = vsel %vm9204_vm1, 0, %v444_v37  ;;  %v554_v47 = vadd.s32 3, %v550_v21  ;;  %v758_v15 = vsel %vm9250_vm13, 0, %v756_v34  ;;  %v9300_v37 = vpop.permute.xlu1 %2128 }
 0x241   :  { %v754_v57 = vsel %vm671_vm7, %v753_v0, %v752_v3  ;;  %v450_v43 = vadd.s32 3, %v446_v4  ;;  %v659_v53 = vand.u32 3, %v658_v41  ;;  %v665_v9 = vxor.u32 2147483648, %v6602_v48  ;;  %v6539_v0 = vld [vmem:[%s12666_s3 + $0x10] sm:$0xff]  }
 0x242   :  { %6242 = vmatprep.subr.bf16.mxu0 %v2039_v51  ;;  %v757_v45 = vsel %vm9250_vm13, %v13104_v25, %v754_v57  ;;  %v555_v16 = vand.u32 3, %v554_v47  ;;  %v762_v62 = vadd.s32 3, %v758_v15  ;;  %vm657_vm11 = vweird.f32 %v13110_v24 }
 0x243   :  { %6243 = vmatpush3.bf16.msra.mxu0 %v2039_v51  ;;  %6613 = vcosq.f32 %v757_v45  ;;  %v6604_v19 = vpop.eup %6603  ;;  %v451_v58 = vand.u32 3, %v450_v43  ;;  %vm661_vm15 = vcmp.eq.s32.totalorder %v659_v53, 0  ;;  %vm664_vm12 = vcmp.eq.s32.totalorder %v659_v53, 2  ;;  %v6543_v51 = vld [vmem:[%s12666_s3 + $0x30] sm:$0xff]  }
 0x244   :  { %6615 = vsinq.f32 %v757_v45  ;;  %v6606_v39 = vpop.eup %6605  ;;  %v662_v7 = vxor.u32 2147483648, %v6604_v19  ;;  %vm557_vm1 = vcmp.eq.s32.totalorder %v555_v16, 0  ;;  %vm560_vm3 = vcmp.eq.s32.totalorder %v555_v16, 2  ;;  %v9304_v21 = vpop.permute.xlu1 %2118 }
 0x245   :  { %v6608_v22 = vpop.eup %6607  ;;  %v457_v30 = vxor.u32 2147483648, %v6606_v39  ;;  %v666_v29 = vsel %vm664_vm12, %v665_v9, %v6604_v19  ;;  %v763_v5 = vand.u32 3, %v762_v62  ;;  %vm453_vm14 = vcmp.eq.s32.totalorder %v451_v58, 0 }
 0x246   :  { %v6610_v63 = vpop.eup %6609  ;;  %v561_v12 = vxor.u32 2147483648, %v6608_v22  ;;  %v663_v44 = vsel %vm661_vm15, %v6602_v48, %v662_v7  ;;  %vm456_vm2 = vcmp.eq.s32.totalorder %v451_v58, 2  ;;  %vm660_vm8 = vcmp.lt.s32.totalorder %v659_v53, 2  ;;  %v9292_v48 = vpop.permute.xlu0 %2133 }
 0x247   :  { %v6612_v36 = vpop.eup %6611  ;;  %v558_v55 = vxor.u32 2147483648, %v6610_v63  ;;  %vm556_vm6 = vcmp.lt.s32.totalorder %v555_v16, 2  ;;  %v667_v1 = vsel %vm660_vm8, %v663_v44, %v666_v29  ;;  %vm768_vm9 = vcmp.eq.s32.totalorder %v763_v5, 2 }
 0x248   :  { %v454_v33 = vxor.u32 2147483648, %v6612_v36  ;;  %v562_v10 = vsel %vm560_vm3, %v561_v12, %v6610_v63  ;;  %v458_v40 = vsel %vm456_vm2, %v457_v30, %v6612_v36  ;;  %vm452_vm10 = vcmp.lt.s32.totalorder %v451_v58, 2  ;;  %v9308_v41 = vpop.permute.xlu1 %2108 }
 0x249   :  { %v559_v23 = vsel %vm557_vm1, %v6608_v22, %v558_v55  ;;  %vm765_vm4 = vcmp.eq.s32.totalorder %v763_v5, 0  ;;  %vm553_vm0 = vweird.f32 %v13118_v26  ;;  %v668_v56 = vsel %vm657_vm11, nan, %v667_v1  ;;  %v6538_v26 = vld [vmem:[%s12666_s3 + $0x8] sm:$0xff]  }
 0x24a   :  { %v455_v11 = vsel %vm453_vm14, %v6606_v39, %v454_v33  ;;  %v563_v14 = vsel %vm556_vm6, %v559_v23, %v562_v10  ;;  %vm764_vm5 = vcmp.lt.s32.totalorder %v763_v5, 2  ;;  %vm761_vm7 = vweird.f32 %v13104_v25  ;;  %v6540_v25 = vld [vmem:[%s12666_s3 + $0x18] sm:$0xff]   ;;  %v9294_v61 = vpop.permute.xlu0 %2123 }
 0x24b   :  { %v459_v20 = vsel %vm452_vm10, %v455_v11, %v458_v40  ;;  %v564_v28 = vsel %vm553_vm0, nan, %v563_v14  ;;  %vm449_vm13 = vweird.f32 %v13114_v60  ;;  %v6541_v60 = vld [vmem:[%s12666_s3 + $0x20] sm:$0xff]  }
 0x24c   :  { %v460_v13 = vsel %vm449_vm13, nan, %v459_v20  ;;  %v9312_v4 = vpop.permute.xlu1 %2098 }
 0x24d   :  { %v2037_v31 = vpack.c.bf16 %v564_v28, %v460_v13 }
 0x24e   :  { %v9298_v57 = vpop.permute.xlu0 %2113 }
 0x250   :  { %v6614_v2 = vpop.eup %6613  ;;  %v9314_v47 = vpop.permute.xlu1 %2088 }
 0x251   :  { %v6616_v49 = vpop.eup %6615  ;;  %v769_v52 = vxor.u32 2147483648, %v6614_v2 }
 0x252   :  { %v766_v42 = vxor.u32 2147483648, %v6616_v49  ;;  %v9302_v45 = vpop.permute.xlu0 %2103 }
 0x253   :  { %v770_v32 = vsel %vm768_vm9, %v769_v52, %v6616_v49 }
 0x254   :  { %v767_v3 = vsel %vm765_vm4, %v6614_v2, %v766_v42  ;;  %v2079_v9 = vpop.permute.xlu1 %2078 }
 0x255   :  { %v771_v50 = vsel %vm764_vm5, %v767_v3, %v770_v32 }
 0x256   :  { %v772_v27 = vsel %vm761_vm7, nan, %v771_v50  ;;  %v9306_v19 = vpop.permute.xlu0 %2093 }
 0x257   :  { %v2038_v24 = vpack.c.bf16 %v772_v27, %v668_v56 }
 0x258   :  { %v2069_v1 = vpop.permute.xlu1 %2068 }
 0x259   :  { %6244 = vmatprep.subr.bf16.mxu0 %v2038_v24 }
 0x25a   :  { %6245 = vmatpush3.bf16.msra.mxu0 %v2038_v24  ;;  %v9310_v34 = vpop.permute.xlu0 %2083 }
 0x25b   :  { %6246 = vmatprep.subr.bf16.mxu0 %v2037_v31 }
 0x25e   :  { %6247 = vmatpush3.bf16.msra.mxu0 %v2037_v31  ;;  %v2074_v39 = vpop.permute.xlu0 %2073 }
 0x261   :  { %6249 = vmatmul.mubr.bf16.vlgmr.msra.gmra.mxu0 %v6538_v26 }
 0x262   :  { %6252 = vmatprep.mubr.bf16.mxu0 %v6539_v0  ;;  %v2064_v15 = vpop.permute.xlu0 %2063 }
 0x269   :  { %6253 = vmatmul.mubr.bf16.gmra.mxu0 %v6540_v25 }
 0x26a   :  { %6256 = vmatprep.mubr.bf16.mxu0 %v6541_v60 }
 0x271   :  { %6257 = vmatmul.mubr.bf16.gmra.mxu0 %v6542_v8 }
 0x272   :  { %6260 = vmatprep.mubr.bf16.mxu0 %v6543_v51 }
 0x279   :  { %6261 = vmatmul.mubr.bf16.gmra.mxu0 %v6544_v38 }
 0x321   :  { %v6250_v22 = vpop.f32.mrf.mxu0 }
 0x322   :  { %v9316_v63 = vadd.f32 %v6250_v22, %v2074_v39 }
 0x323   :  { %v2223_v43 = vpop.f32.mrf.mxu0 }
 0x324   :  { %13126 = vst [vmem:[#allocation13_spill] sm:$0xff] %v9316_v63  ;;  %v12793_v53 = vand.u32 2147483647, %v9316_v63  ;;  %v2497_v36 = vand.u32 2139095040, %v9316_v63  ;;  %v9320_v7 = vadd.f32 %v2223_v43, %v2064_v15 }
 0x325   :  { %v6251_v16 = vpop.f32.mrf.mxu0 }
 0x326   :  { %13127 = vst [vmem:[#allocation6_spill] sm:$0xff] %v9320_v7  ;;  %v2498_v62 = vshrl.u32 %v2497_v36, 23  ;;  %v2501_v55 = vand.u32 8388607, %v12793_v53  ;;  %v12792_v12 = vand.u32 2147483647, %v9320_v7  ;;  %v9326_v33 = vadd.f32 %v6251_v16, %v2079_v9 }
 0x327   :  { %v2289_v58 = vand.u32 2139095040, %v9320_v7  ;;  %v2226_v40 = vpop.f32.mrf.mxu0 }
 0x328   :  { %13128 = vst [vmem:[#allocation30_spill] sm:$0xff] %v9326_v33  ;;  %v6031_v30 = vadd.s32 4294967169, %v2498_v62  ;;  %v2293_v29 = vand.u32 8388607, %v12792_v12  ;;  %v2601_v23 = vand.u32 2139095040, %v9326_v33  ;;  %v2502_v10 = vor.u32 8388608, %v2501_v55 }
 0x329   :  { %v2290_v44 = vshrl.u32 %v2289_v58, 23  ;;  %v9331_v20 = vadd.f32 %v2226_v40, %v2069_v1  ;;  %v12791_v28 = vand.u32 2147483647, %v9326_v33 }
 0x32a   :  { %v2504_v5 = vadd.s32 1, %v6031_v30  ;;  %v2294_v11 = vor.u32 8388608, %v2293_v29  ;;  %v2602_v49 = vshrl.u32 %v2601_v23, 23  ;;  %v9333_v56 = vshll.u32 %v2502_v10, 8 }
 0x32b   :  { %v6023_v2 = vadd.s32 4294967169, %v2290_v44  ;;  %13129 = vst [vmem:[#allocation35_spill] sm:$0xff] %v9331_v20 }
 0x32c   :  { %vm2505_vm15 = vcmp.gt.s32.totalorder %v2504_v5, 0  ;;  %v9335_v3 = vshll.u32 %v2294_v11, 8  ;;  %v9338_v50 = vadd.s32 4294967169, %v2602_v49 }
 0x32d   :  { %v2506_v52 = vsel %vm2505_vm15, %v2504_v5, 0  ;;  %v2296_v14 = vadd.s32 1, %v6023_v2 }
 0x32e   :  { %v2507_v42 = vshrl.u32 %v2506_v52, 5  ;;  %v2508_v32 = vand.u32 31, %v2506_v52 }
 0x32f   :  { %vm2297_vm12 = vcmp.gt.s32.totalorder %v2296_v14, 0 }
 0x330   :  { %v2509_v27 = vsub.s32 32, %v2508_v32  ;;  %v2511_v13 = vshll.u32 %v12945_v54, %v2508_v32  ;;  %v2514_v24 = vshll.u32 %v12951_v17, %v2508_v32  ;;  %v2517_v31 = vshll.u32 %v12952_v46, %v2508_v32 }
 0x331   :  { %v2520_v26 = vshll.u32 %v12950_v18, %v2508_v32  ;;  %v2523_v0 = vshll.u32 %v12928_v35, %v2508_v32  ;;  %vm2526_vm1 = vcmp.lt.s32.totalorder %v2507_v42, 1  ;;  %vm2527_vm3 = vcmp.lt.s32.totalorder %v2507_v42, 2 }
 0x332   :  { %v2512_v25 = vshrl.u32 %v12951_v17, %v2509_v27  ;;  %v2515_v60 = vshrl.u32 %v12952_v46, %v2509_v27  ;;  %v2518_v8 = vshrl.u32 %v12950_v18, %v2509_v27  ;;  %v2510_v51 = vshrl.u32 %v12945_v54, %v2509_v27 }
 0x333   :  { %v2521_v38 = vshrl.u32 %v12928_v35, %v2509_v27  ;;  %v2524_v39 = vshrl.u32 %v13092_v59, %v2509_v27  ;;  %vm2528_vm14 = vcmp.lt.s32.totalorder %v2507_v42, 3  ;;  %v2298_v36 = vsel %vm2297_vm12, %v2296_v14, 0 }
 0x334   :  { %v2513_v22 = vor.u32 %v2512_v25, %v2511_v13  ;;  %v2516_v15 = vor.u32 %v2515_v60, %v2514_v24  ;;  %v2519_v43 = vor.u32 %v2518_v8, %v2517_v31  ;;  %vm2529_vm2 = vcmp.lt.s32.totalorder %v2507_v42, 4 }
 0x335   :  { %v2522_v16 = vor.u32 %v2521_v38, %v2520_v26  ;;  %v2525_v9 = vor.u32 %v2524_v39, %v2523_v0  ;;  %v2300_v62 = vand.u32 31, %v2298_v36  ;;  %v2299_v49 = vshrl.u32 %v2298_v36, 5 }
 0x336   :  { %v2530_v55 = vsel %vm2526_vm1, %v2510_v51, %v2513_v22  ;;  %v2531_v58 = vsel %vm2529_vm2, %v2519_v43, 2102212464  ;;  %v2534_v30 = vsel %vm2526_vm1, %v2513_v22, %v2516_v15  ;;  %v2538_v44 = vsel %vm2526_vm1, %v2516_v15, %v2519_v43 }
 0x337   :  { %v2532_v29 = vsel %vm2528_vm14, %v2516_v15, %v2531_v58  ;;  %v2535_v5 = vsel %vm2529_vm2, %v2522_v16, 920167782  ;;  %v2539_v23 = vsel %vm2529_vm2, %v2525_v9, 1326507024  ;;  %v2301_v10 = vsub.s32 32, %v2300_v62 }
 0x338   :  { %v2533_v2 = vsel %vm2527_vm3, %v2530_v55, %v2532_v29  ;;  %v2536_v11 = vsel %vm2528_vm14, %v2519_v43, %v2535_v5  ;;  %v2540_v40 = vsel %vm2528_vm14, %v2522_v16, %v2539_v23  ;;  %v2303_v32 = vshll.u32 %v12945_v54, %v2300_v62 }
 0x339   :  { %v2537_v1 = vsel %vm2527_vm3, %v2534_v30, %v2536_v11  ;;  %v2541_v52 = vsel %vm2527_vm3, %v2538_v44, %v2540_v40  ;;  %v2549_v14 = vmul.u32 %v9333_v56, %v2533_v2  ;;  %v2302_v26 = vshrl.u32 %v12945_v54, %v2301_v10 }
 0x33a   :  { %v9364_v27 = vmul.u32.u64.low %v9333_v56, %v2541_v52  ;;  %v9365_v13 = vmul.u32.u64.high %v9333_v56, %v2541_v52, %v9364_v27  ;;  %v9368_v24 = vmul.u32.u64.low %v9333_v56, %v2537_v1  ;;  %v9369_v31 = vmul.u32.u64.high %v9333_v56, %v2537_v1, %v9368_v24 }
 0x33b   :  { %v2304_v0 = vshrl.u32 %v12951_v17, %v2301_v10  ;;  %v2306_v42 = vshll.u32 %v12951_v17, %v2300_v62  ;;  %v2307_v25 = vshrl.u32 %v12952_v46, %v2301_v10  ;;  %v2309_v60 = vshll.u32 %v12952_v46, %v2300_v62 }
 0x33c   :  { %v2310_v8 = vshrl.u32 %v12950_v18, %v2301_v10  ;;  %v2312_v51 = vshll.u32 %v12950_v18, %v2300_v62  ;;  %v2313_v38 = vshrl.u32 %v12928_v35, %v2301_v10  ;;  %v2315_v22 = vshll.u32 %v12928_v35, %v2300_v62 }
 0x33d   :  { %v2305_v39 = vor.u32 %v2304_v0, %v2303_v32  ;;  %v2308_v56 = vor.u32 %v2307_v25, %v2306_v42  ;;  %v2316_v15 = vshrl.u32 %v13092_v59, %v2301_v10  ;;  %vm2551_vm8 = vc.u32 %v9365_v13, %v9368_v24 }
 0x33e   :  { %v2552_v43 = vadd.s32 1, %v9369_v31  ;;  %v2311_v36 = vor.u32 %v2310_v8, %v2309_v60  ;;  %vm2318_vm6 = vcmp.lt.s32.totalorder %v2299_v49, 1  ;;  %v2314_v16 = vor.u32 %v2313_v38, %v2312_v51 }
 0x33f   :  { %v2317_v9 = vor.u32 %v2316_v15, %v2315_v22  ;;  %vm2319_vm11 = vcmp.lt.s32.totalorder %v2299_v49, 2  ;;  %vm2320_vm9 = vcmp.lt.s32.totalorder %v2299_v49, 3  ;;  %vm2321_vm10 = vcmp.lt.s32.totalorder %v2299_v49, 4 }
 0x340   :  { %v2553_v55 = vsel %vm2551_vm8, %v2552_v43, %v9369_v31  ;;  %v2322_v58 = vsel %vm2318_vm6, %v2302_v26, %v2305_v39  ;;  %v2326_v30 = vsel %vm2318_vm6, %v2305_v39, %v2308_v56  ;;  %v2323_v62 = vsel %vm2321_vm10, %v2311_v36, 2102212464 }
 0x341   :  { %v2554_v44 = vadd.s32 %v2553_v55, %v2549_v14  ;;  %v2327_v29 = vsel %vm2321_vm10, %v2314_v16, 920167782  ;;  %v2330_v5 = vsel %vm2318_vm6, %v2308_v56, %v2311_v36  ;;  %v2324_v23 = vsel %vm2320_vm9, %v2308_v56, %v2323_v62 }
 0x342   :  { %v2328_v10 = vsel %vm2320_vm9, %v2311_v36, %v2327_v29  ;;  %v2331_v2 = vsel %vm2321_vm10, %v2317_v9, 1326507024  ;;  %v2608_v11 = vadd.s32 1, %v9338_v50  ;;  %v2393_v32 = vand.u32 2139095040, %v9331_v20 }
 0x343   :  { %v2555_v40 = vadd.s32 536870912, %v2554_v44  ;;  %v2329_v1 = vsel %vm2319_vm11, %v2326_v30, %v2328_v10  ;;  %v2332_v52 = vsel %vm2320_vm9, %v2314_v16, %v2331_v2  ;;  %v2325_v27 = vsel %vm2319_vm11, %v2322_v58, %v2324_v23 }
 0x344   :  { %v2333_v31 = vsel %vm2319_vm11, %v2330_v5, %v2332_v52  ;;  %v9392_v14 = vmul.u32.u64.low %v9335_v3, %v2329_v1  ;;  %v9393_v26 = vmul.u32.u64.high %v9335_v3, %v2329_v1, %v9392_v14  ;;  %vm2609_vm4 = vcmp.gt.s32.totalorder %v2608_v11, 0 }
 0x345   :  { %v9396_v0 = vshrl.u32 %v2555_v40, 30  ;;  %v9399_v42 = vmul.u32.u64.low %v9335_v3, %v2333_v31  ;;  %v9400_v50 = vmul.u32.u64.high %v9335_v3, %v2333_v31, %v9399_v42  ;;  %v2610_v25 = vsel %vm2609_vm4, %v2608_v11, 0 }
 0x346   :  { %v2612_v8 = vand.u32 31, %v2610_v25  ;;  %v2341_v51 = vmul.u32 %v9335_v3, %v2325_v27  ;;  %v2344_v49 = vadd.s32 1, %v9393_v26  ;;  %v2605_v38 = vand.u32 8388607, %v12791_v28 }
 0x347   :  { %13130 = vst [vmem:[#allocation41_spill] sm:$0xff] %v9396_v0  ;;  %v2557_v60 = vshll.u32 %v9396_v0, 30  ;;  %vm2343_vm0 = vc.u32 %v9400_v50, %v9392_v14  ;;  %v2394_v22 = vshrl.u32 %v2393_v32, 23  ;;  %v2611_v43 = vshrl.u32 %v2610_v25, 5 }
 0x348   :  { %v2613_v56 = vsub.s32 32, %v2612_v8  ;;  %v2345_v15 = vsel %vm2343_vm0, %v2344_v49, %v9393_v26  ;;  %v2615_v36 = vshll.u32 %v12945_v54, %v2612_v8  ;;  %v2618_v16 = vshll.u32 %v12951_v17, %v2612_v8 }
 0x349   :  { %v9407_v39 = vsub.s32 %v2554_v44, %v2557_v60  ;;  %v2346_v9 = vadd.s32 %v2345_v15, %v2341_v51  ;;  %v2621_v58 = vshll.u32 %v12952_v46, %v2612_v8  ;;  %v2624_v62 = vshll.u32 %v12950_v18, %v2612_v8 }
 0x34a   :  { %v2616_v55 = vshrl.u32 %v12951_v17, %v2613_v56  ;;  %v2619_v30 = vshrl.u32 %v12952_v46, %v2613_v56  ;;  %v2622_v44 = vshrl.u32 %v12950_v18, %v2613_v56  ;;  %v2625_v29 = vshrl.u32 %v12928_v35, %v2613_v56 }
 0x34b   :  { %v2560_v3 = vsub.s32 0, %v9407_v39  ;;  %v2347_v23 = vadd.s32 536870912, %v2346_v9  ;;  %v2627_v2 = vshll.u32 %v12928_v35, %v2612_v8  ;;  %v2628_v52 = vshrl.u32 %v13092_v59, %v2613_v56 }
 0x34c   :  { %v2617_v10 = vor.u32 %v2616_v55, %v2615_v36  ;;  %v2620_v11 = vor.u32 %v2619_v30, %v2618_v16  ;;  %v2623_v40 = vor.u32 %v2622_v44, %v2621_v58  ;;  %v2626_v1 = vor.u32 %v2625_v29, %v2624_v62 }
 0x34d   :  { %v6032_v5 = vmin.u32 %v2560_v3, %v9407_v39  ;;  %v9424_v32 = vshrl.u32 %v2347_v23, 30  ;;  %v2606_v27 = vor.u32 8388608, %v2605_v38  ;;  %v2629_v31 = vor.u32 %v2628_v52, %v2627_v2 }
 0x34e   :  { %vm2630_vm5 = vcmp.lt.s32.totalorder %v2611_v43, 1  ;;  %v6027_v26 = vadd.s32 4294967169, %v2394_v22  ;;  %v2614_v42 = vshrl.u32 %v12945_v54, %v2613_v56  ;;  %vm2632_vm7 = vcmp.lt.s32.totalorder %v2611_v43, 3 }
 0x34f   :  { %13131 = vst [vmem:[#allocation17_spill] sm:$0xff] %v9424_v32  ;;  %vm2633_vm13 = vcmp.lt.s32.totalorder %v2611_v43, 4  ;;  %v2638_v25 = vsel %vm2630_vm5, %v2617_v10, %v2620_v11  ;;  %v2562_v60 = vclz %v6032_v5  ;;  %v2349_v15 = vshll.u32 %v9424_v32, 30 }
 0x350   :  { %v2635_v51 = vsel %vm2633_vm13, %v2623_v40, 2102212464  ;;  %v2639_v8 = vsel %vm2633_vm13, %v2626_v1, 920167782  ;;  %v2643_v49 = vsel %vm2633_vm13, %v2629_v31, 1326507024  ;;  %v2642_v16 = vsel %vm2630_vm5, %v2620_v11, %v2623_v40 }
 0x351   :  { %vm2631_vm15 = vcmp.lt.s32.totalorder %v2611_v43, 2  ;;  %v2640_v36 = vsel %vm2632_vm7, %v2623_v40, %v2639_v8  ;;  %v2644_v3 = vsel %vm2632_vm7, %v2626_v1, %v2643_v49  ;;  %v2646_v22 = vshll.u32 %v2606_v27, 8 }
 0x352   :  { %v2641_v38 = vsel %vm2631_vm15, %v2638_v25, %v2640_v36  ;;  %v2634_v56 = vsel %vm2630_vm5, %v2614_v42, %v2617_v10  ;;  %v2636_v55 = vsel %vm2632_vm7, %v2620_v11, %v2635_v51  ;;  %v2645_v58 = vsel %vm2631_vm15, %v2642_v16, %v2644_v3  ;;  %v6254_v42 = vpop.f32.mrf.mxu0 }
 0x353   :  { %v9433_v30 = vmul.u32.u64.low %v2646_v22, %v2641_v38  ;;  %v9434_v44 = vmul.u32.u64.high %v2646_v22, %v2641_v38, %v9433_v30  ;;  %v2400_v62 = vadd.s32 1, %v6027_v26  ;;  %v6033_v29 = vadd.s32 4294967294, %v2562_v60 }
 0x354   :  { %v9437_v5 = vsub.s32 %v2346_v9, %v2349_v15  ;;  %v9439_v23 = vmul.u32.u64.low %v2646_v22, %v2645_v58  ;;  %v9440_v2 = vmul.u32.u64.high %v2646_v22, %v2645_v58, %v9439_v23  ;;  %v2637_v40 = vsel %vm2631_vm15, %v2634_v56, %v2636_v55 }
 0x355   :  { %vm2401_vm12 = vcmp.gt.s32.totalorder %v2400_v62, 0  ;;  %v12790_v1 = vand.u32 2147483647, %v9331_v20  ;;  %v2656_v11 = vadd.s32 1, %v9434_v44  ;;  %vm6034_vm1 = vcmp.lt.s32.totalorder %v6033_v29, 0 }
 0x356   :  { %v2402_v10 = vsel %vm2401_vm12, %v2400_v62, 0  ;;  %v2352_v27 = vsub.s32 0, %v9437_v5  ;;  %v2653_v31 = vmul.u32 %v2646_v22, %v2637_v40  ;;  %vm2655_vm3 = vc.u32 %v9440_v2, %v9433_v30 }
 0x357   :  { %v2404_v52 = vand.u32 31, %v2402_v10  ;;  %v2657_v26 = vsel %vm2655_vm3, %v2656_v11, %v9434_v44  ;;  %v2397_v43 = vand.u32 8388607, %v12790_v1  ;;  %v9451_v25 = vsel %vm6034_vm1, 0, %v6033_v29 }
 0x358   :  { %v2658_v60 = vadd.s32 %v2657_v26, %v2653_v31  ;;  %v6024_v51 = vmin.u32 %v2352_v27, %v9437_v5  ;;  %v9457_v36 = vadd.f32 %v6254_v42, %v9306_v19  ;;  %v2570_v16 = vsub.s32 4294967266, %v9451_v25 }
 0x359   :  { %v2405_v9 = vsub.s32 32, %v2404_v52  ;;  %v2398_v38 = vor.u32 8388608, %v2397_v43  ;;  %v2407_v3 = vshll.u32 %v12945_v54, %v2404_v52  ;;  %v2410_v55 = vshll.u32 %v12951_v17, %v2404_v52 }
 0x35a   :  { %v2659_v8 = vadd.s32 536870912, %v2658_v60  ;;  %13132 = vst [vmem:[#allocation14_spill] sm:$0xff] %v9457_v36  ;;  %v2413_v58 = vshll.u32 %v12952_v46, %v2404_v52  ;;  %v2550_v62 = vadd.s32 %v9368_v24, %v9365_v13  ;;  %v2354_v19 = vclz %v6024_v51 }
 0x35b   :  { %v2408_v49 = vshrl.u32 %v12951_v17, %v2405_v9  ;;  %v2411_v15 = vshrl.u32 %v12952_v46, %v2405_v9  ;;  %v2414_v22 = vshrl.u32 %v12950_v18, %v2405_v9  ;;  %v2417_v44 = vshrl.u32 %v12928_v35, %v2405_v9 }
 0x35c   :  { %v9462_v56 = vshrl.u32 %v2659_v8, 30  ;;  %v2403_v29 = vshrl.u32 %v2402_v10, 5  ;;  %v2416_v23 = vshll.u32 %v12950_v18, %v2404_v52  ;;  %v2419_v43 = vshll.u32 %v12928_v35, %v2404_v52 }
 0x35d   :  { %v2409_v11 = vor.u32 %v2408_v49, %v2407_v3  ;;  %v2412_v27 = vor.u32 %v2411_v15, %v2410_v55  ;;  %v2415_v31 = vor.u32 %v2414_v22, %v2413_v58  ;;  %v2420_v42 = vshrl.u32 %v13092_v59, %v2405_v9 }
 0x35e   :  { %13133 = vst [vmem:[#allocation7_spill] sm:$0xff] %v9462_v56  ;;  %v2661_v40 = vshll.u32 %v9462_v56, 30  ;;  %v2418_v26 = vor.u32 %v2417_v44, %v2416_v23  ;;  %v2913_v8 = vand.u32 2139095040, %v9457_v36  ;;  %v2566_v1 = vsub.s32 32, %v9451_v25 }
 0x35f   :  { %v2571_v28 = vadd.s32 127, %v2570_v16  ;;  %v2438_v24 = vshll.u32 %v2398_v38, 8  ;;  %v6025_v10 = vadd.s32 4294967294, %v2354_v19  ;;  %v2421_v51 = vor.u32 %v2420_v42, %v2419_v43 }
 0x360   :  { %v9475_v13 = vsub.s32 %v2658_v60, %v2661_v40  ;;  %vm2422_vm14 = vcmp.lt.s32.totalorder %v2403_v29, 1  ;;  %vm2425_vm2 = vcmp.lt.s32.totalorder %v2403_v29, 4  ;;  %v2406_v15 = vshrl.u32 %v12945_v54, %v2405_v9 }
 0x361   :  { %v2427_v3 = vsel %vm2425_vm2, %v2415_v31, 2102212464  ;;  %v2430_v52 = vsel %vm2422_vm14, %v2409_v11, %v2412_v27  ;;  %vm2424_vm8 = vcmp.lt.s32.totalorder %v2403_v29, 3  ;;  %v2431_v22 = vsel %vm2425_vm2, %v2418_v26, 920167782 }
 0x362   :  { %v2664_v49 = vsub.s32 0, %v9475_v13  ;;  %v2434_v55 = vsel %vm2422_vm14, %v2412_v27, %v2415_v31  ;;  %v2914_v58 = vshrl.u32 %v2913_v8, 23  ;;  %vm2423_vm6 = vcmp.lt.s32.totalorder %v2403_v29, 2 }
 0x363   :  { %v2426_v44 = vsel %vm2422_vm14, %v2406_v15, %v2409_v11  ;;  %v2432_v16 = vsel %vm2424_vm8, %v2415_v31, %v2431_v22  ;;  %v2435_v60 = vsel %vm2425_vm2, %v2421_v51, 1326507024  ;;  %v2428_v19 = vsel %vm2424_vm8, %v2412_v27, %v2427_v3 }
 0x364   :  { %v6036_v38 = vmin.u32 %v2664_v49, %v9475_v13  ;;  %v2433_v23 = vsel %vm2423_vm6, %v2430_v52, %v2432_v16  ;;  %v2436_v40 = vsel %vm2424_vm8, %v2418_v26, %v2435_v60  ;;  %vm6026_vm11 = vcmp.lt.s32.totalorder %v6025_v10, 0 }
 0x365   :  { %v2437_v43 = vsel %vm2423_vm6, %v2434_v55, %v2436_v40  ;;  %v9480_v42 = vmul.u32.u64.low %v2438_v24, %v2433_v23  ;;  %v9481_v12 = vmul.u32.u64.high %v2438_v24, %v2433_v23, %v9480_v42  ;;  %v2568_v9 = vshrl.u32 %v2550_v62, %v2566_v1 }
 0x366   :  { %v9484_v53 = vmul.u32.u64.low %v2438_v24, %v2437_v43  ;;  %v9485_v32 = vmul.u32.u64.high %v2438_v24, %v2437_v43, %v9484_v53  ;;  %v6047_v8 = vadd.s32 4294967169, %v2914_v58  ;;  %v2572_v29 = vshll.u32 %v2571_v28, 23 }
 0x367   :  { %v2429_v11 = vsel %vm2423_vm6, %v2426_v44, %v2428_v19  ;;  %v2567_v31 = vshll.u32 %v9407_v39, %v9451_v25  ;;  %v9489_v51 = vsel %vm6026_vm11, 0, %v6025_v10  ;;  %v2666_v27 = vclz %v6036_v38 }
 0x368   :  { %v2920_v26 = vadd.s32 1, %v6047_v8  ;;  %v2448_v49 = vadd.s32 1, %v9481_v12  ;;  %v12796_v15 = vand.u32 2147483647, %v9457_v36  ;;  %v2445_v1 = vmul.u32 %v2438_v24, %v2429_v11 }
 0x369   :  { %v9493_v3 = vor.u32 %v2568_v9, %v2567_v31  ;;  %vm2447_vm9 = vc.u32 %v9485_v32, %v9480_v42  ;;  %v9497_v53 = vor.u32 4788187, %v2572_v29  ;;  %v2358_v28 = vsub.s32 32, %v9489_v51  ;;  %v2239_v31 = vpop.f32.mrf.mxu0 }
 0x36a   :  { %vm2921_vm10 = vcmp.gt.s32.totalorder %v2920_v26, 0  ;;  %v2449_v39 = vsel %vm2447_vm9, %v2448_v49, %v9481_v12  ;;  %v6037_v25 = vadd.s32 4294967294, %v2666_v27  ;;  %v2342_v52 = vadd.s32 %v9392_v14, %v9400_v50 }
 0x36b   :  { %v2450_v62 = vadd.s32 %v2449_v39, %v2445_v1  ;;  %v2922_v10 = vsel %vm2921_vm10, %v2920_v26, 0  ;;  %v2576_v55 = vcvt.s32.f32 %v9493_v3  ;;  %v2917_v58 = vand.u32 8388607, %v12796_v15 }
 0x36c   :  { %v2924_v22 = vand.u32 31, %v2922_v10  ;;  %v2574_v44 = vand.u32 2147483647, %v9497_v53  ;;  %v9507_v16 = vshrl.u32 %v2342_v52, %v2358_v28  ;;  %v2362_v60 = vsub.s32 4294967266, %v9489_v51 }
 0x36d   :  { %v2451_v24 = vadd.s32 536870912, %v2450_v62  ;;  %vm6038_vm4 = vcmp.lt.s32.totalorder %v6037_v25, 0  ;;  %v2923_v19 = vshrl.u32 %v2922_v10, 5  ;;  %v2918_v52 = vor.u32 8388608, %v2917_v58 }
 0x36e   :  { %v2925_v12 = vsub.s32 32, %v2924_v22  ;;  %v2927_v14 = vshll.u32 %v12945_v54, %v2924_v22  ;;  %v2930_v23 = vshll.u32 %v12951_v17, %v2924_v22  ;;  %v2933_v40 = vshll.u32 %v12952_v46, %v2924_v22 }
 0x36f   :  { %v9510_v38 = vshrl.u32 %v2451_v24, 30  ;;  %v2936_v43 = vshll.u32 %v12950_v18, %v2924_v22  ;;  %v2363_v27 = vadd.s32 127, %v2362_v60  ;;  %v2939_v49 = vshll.u32 %v12928_v35, %v2924_v22 }
 0x370   :  { %v2928_v50 = vshrl.u32 %v12951_v17, %v2925_v12  ;;  %v2931_v8 = vshrl.u32 %v12952_v46, %v2925_v12  ;;  %v2934_v29 = vshrl.u32 %v12950_v18, %v2925_v12  ;;  %v2937_v11 = vshrl.u32 %v12928_v35, %v2925_v12 }
 0x371   :  { %13134 = vst [vmem:[#allocation38_spill] sm:$0xff] %v9510_v38  ;;  %v2453_v9 = vshll.u32 %v9510_v38, 30  ;;  %v2940_v3 = vshrl.u32 %v13092_v59, %v2925_v12  ;;  %v9526_v10 = vsel %vm6038_vm4, 0, %v6037_v25  ;;  %v9529_v15 = vadd.f32 %v2239_v31, %v9310_v34 }
 0x372   :  { %v2929_v26 = vor.u32 %v2928_v50, %v2927_v14  ;;  %v2932_v53 = vor.u32 %v2931_v8, %v2930_v23  ;;  %v2935_v28 = vor.u32 %v2934_v29, %v2933_v40  ;;  %v2938_v39 = vor.u32 %v2937_v11, %v2936_v43 }
 0x373   :  { %v9523_v1 = vsub.s32 %v2450_v62, %v2453_v9  ;;  %v2941_v24 = vor.u32 %v2940_v3, %v2939_v49  ;;  %13135 = vst [vmem:[#allocation37_spill] sm:$0xff] %v9529_v15  ;;  %v2926_v14 = vshrl.u32 %v12945_v54, %v2925_v12  ;;  %vm2942_vm0 = vcmp.lt.s32.totalorder %v2923_v19, 1  ;;  %v6255_v9 = vpop.f32.mrf.mxu0 }
 0x374   :  { %vm2945_vm5 = vcmp.lt.s32.totalorder %v2923_v19, 4  ;;  %vm2943_vm7 = vcmp.lt.s32.totalorder %v2923_v19, 2  ;;  %vm2944_vm13 = vcmp.lt.s32.totalorder %v2923_v19, 3  ;;  %v2950_v62 = vsel %vm2942_vm0, %v2929_v26, %v2932_v53 }
 0x375   :  { %v2456_v60 = vsub.s32 0, %v9523_v1  ;;  %v2951_v22 = vsel %vm2945_vm5, %v2938_v39, 920167782  ;;  %v2947_v25 = vsel %vm2945_vm5, %v2935_v28, 2102212464  ;;  %v2954_v23 = vsel %vm2942_vm0, %v2932_v53, %v2935_v28 }
 0x376   :  { %v2952_v58 = vsel %vm2944_vm13, %v2935_v28, %v2951_v22  ;;  %v2955_v40 = vsel %vm2945_vm5, %v2941_v24, 1326507024  ;;  %v2958_v43 = vshll.u32 %v2918_v52, 8  ;;  %v2705_v12 = vand.u32 2139095040, %v9529_v15 }
 0x377   :  { %v6028_v50 = vmin.u32 %v2456_v60, %v9523_v1  ;;  %v2953_v34 = vsel %vm2943_vm7, %v2950_v62, %v2952_v58  ;;  %v2364_v8 = vshll.u32 %v2363_v27, 23  ;;  %v2674_v29 = vsub.s32 4294967266, %v9526_v10 }
 0x378   :  { %v2946_v11 = vsel %vm2942_vm0, %v2926_v14, %v2929_v26  ;;  %v2956_v31 = vsel %vm2944_vm13, %v2938_v39, %v2955_v40  ;;  %v2948_v49 = vsel %vm2944_vm13, %v2932_v53, %v2947_v25  ;;  %v9552_v27 = vadd.f32 %v6255_v9, %v9312_v4 }
 0x379   :  { %v2957_v3 = vsel %vm2943_vm7, %v2954_v23, %v2956_v31  ;;  %v9544_v60 = vmul.u32.u64.low %v2958_v43, %v2953_v34  ;;  %v9545_v28 = vmul.u32.u64.high %v2958_v43, %v2953_v34, %v9544_v60  ;;  %v2458_v24 = vclz %v6028_v50 }
 0x37a   :  { %v9548_v52 = vmul.u32.u64.low %v2958_v43, %v2957_v3  ;;  %v9549_v62 = vmul.u32.u64.high %v2958_v43, %v2957_v3, %v9548_v52  ;;  %13136 = vst [vmem:[#allocation26_spill] sm:$0xff] %v9552_v27  ;;  %v2577_v22 = vmul.f32 %v2576_v55, %v2574_v44  ;;  %v2359_v26 = vshll.u32 %v9437_v5, %v9489_v51 }
 0x37b   :  { %v2706_v39 = vshrl.u32 %v2705_v12, 23  ;;  %v2365_v14 = vor.u32 4788187, %v2364_v8  ;;  %v2670_v53 = vsub.s32 32, %v9526_v10  ;;  %v2949_v25 = vsel %vm2943_vm7, %v2946_v11, %v2948_v49 }
 0x37c   :  { %v2361_v58 = vor.u32 %v9507_v16, %v2359_v26  ;;  %v2675_v23 = vadd.s32 127, %v2674_v29  ;;  %v2968_v50 = vadd.s32 1, %v9545_v28  ;;  %vm12835_vm15 = vcmp.lt.s32.totalorder %v9316_v63, 0 }
 0x37d   :  { %v6039_v34 = vadd.s32 4294967169, %v2706_v39  ;;  %v2654_v4 = vadd.s32 %v9433_v30, %v9440_v2  ;;  %v6029_v55 = vadd.s32 4294967294, %v2458_v24  ;;  %v3017_v5 = vand.u32 2139095040, %v9552_v27  ;;  %v2242_v30 = vpop.f32.mrf.mxu0 }
 0x37e   :  { %v2578_v51 = vxor.u32 2147483648, %v2577_v22  ;;  %v2965_v44 = vmul.u32 %v2958_v43, %v2949_v25  ;;  %vm2967_vm12 = vc.u32 %v9549_v62, %v9544_v60  ;;  %v2366_v40 = vand.u32 2147483647, %v2365_v14 }
 0x37f   :  { %v2712_v19 = vadd.s32 1, %v6039_v34  ;;  %v2672_v16 = vshrl.u32 %v2654_v4, %v2670_v53  ;;  %v2969_v12 = vsel %vm2967_vm12, %v2968_v50, %v9545_v28  ;;  %v12797_v9 = vand.u32 2147483647, %v9529_v15 }
 0x380   :  { %v2368_v8 = vcvt.s32.f32 %v2361_v58  ;;  %v2676_v29 = vshll.u32 %v2675_v23, 23  ;;  %v2970_v11 = vadd.s32 %v2969_v12, %v2965_v44  ;;  %v2671_v2 = vshll.u32 %v9475_v13, %v9526_v10 }
 0x381   :  { %vm2713_vm1 = vcmp.gt.s32.totalorder %v2712_v19, 0  ;;  %vm6030_vm3 = vcmp.lt.s32.totalorder %v6029_v55, 0  ;;  %v3018_v31 = vshrl.u32 %v3017_v5, 23  ;;  %v9572_v49 = vsel %vm12835_vm15, %v2578_v51, %v2577_v22 }
 0x382   :  { %v2714_v43 = vsel %vm2713_vm1, %v2712_v19, 0  ;;  %v2971_v3 = vadd.s32 536870912, %v2970_v11  ;;  %v9574_v28 = vmul.f32 %v2368_v8, %v2366_v40  ;;  %v9576_v52 = vor.u32 %v2672_v16, %v2671_v2 }
 0x383   :  { %v2716_v24 = vand.u32 31, %v2714_v43  ;;  %v2709_v26 = vand.u32 8388607, %v12797_v9  ;;  %v9581_v39 = vadd.f32 %v2242_v30, %v9314_v47  ;;  %v9583_v13 = vor.u32 4788187, %v2676_v29 }
 0x384   :  { %v9585_v10 = vsel %vm6030_vm3, 0, %v6029_v55  ;;  %v9587_v14 = vshrl.u32 %v2971_v3, 30  ;;  %v2715_v53 = vshrl.u32 %v2714_v43, 5  ;;  %v6051_v23 = vadd.s32 4294967169, %v3018_v31 }
 0x385   :  { %13137 = vst [vmem:[#allocation8_spill] sm:$0xff] %v9581_v39  ;;  %v2717_v22 = vsub.s32 32, %v2716_v24  ;;  %v2719_v25 = vshll.u32 %v12945_v54, %v2716_v24  ;;  %v2722_v58 = vshll.u32 %v12951_v17, %v2716_v24  ;;  %v2725_v4 = vshll.u32 %v12952_v46, %v2716_v24 }
 0x386   :  { %v2973_v50 = vshll.u32 %v9587_v14, 30  ;;  %v2728_v5 = vshll.u32 %v12950_v18, %v2716_v24  ;;  %v2731_v12 = vshll.u32 %v12928_v35, %v2716_v24  ;;  %v2680_v8 = vcvt.s32.f32 %v9576_v52 }
 0x387   :  { %v2720_v34 = vshrl.u32 %v12951_v17, %v2717_v22  ;;  %v2723_v47 = vshrl.u32 %v12952_v46, %v2717_v22  ;;  %v2726_v55 = vshrl.u32 %v12950_v18, %v2717_v22  ;;  %v2729_v51 = vshrl.u32 %v12928_v35, %v2717_v22 }
 0x388   :  { %v2732_v44 = vshrl.u32 %v13092_v59, %v2717_v22  ;;  %v9599_v19 = vsub.s32 %v2970_v11, %v2973_v50  ;;  %v2710_v29 = vor.u32 8388608, %v2709_v26  ;;  %v13138_v43 = vand.u32 2147483647, %v9316_v63 }
 0x389   :  { %v2721_v40 = vor.u32 %v2720_v34, %v2719_v25  ;;  %v2724_v16 = vor.u32 %v2723_v47, %v2722_v58  ;;  %v2727_v30 = vor.u32 %v2726_v55, %v2725_v4  ;;  %v2730_v2 = vor.u32 %v2729_v51, %v2728_v5 }
 0x38a   :  { %vm9605_vm14 = vcmp.le.f32.partialorder %v13138_v43, 0.7853982  ;;  %v13139_v31 = vmov 0  ;;  %v2976_v3 = vsub.s32 0, %v9599_v19  ;;  %v2733_v9 = vor.u32 %v2732_v44, %v2731_v12 }
 0x38b   :  { %v13140_v31 = vsel %vm9605_vm14, 4294967295, %v13139_v31  ;;  %vm2734_vm2 = vcmp.lt.s32.totalorder %v2715_v53, 1  ;;  %v2466_v25 = vsub.s32 4294967266, %v9585_v10  ;;  %vm2737_vm8 = vcmp.lt.s32.totalorder %v2715_v53, 4 }
 0x38c   :  { %13141 = vst [vmem:[#allocation45_spill] sm:$0xff] %v13140_v31  ;;  %v2742_v24 = vsel %vm2734_vm2, %v2721_v40, %v2724_v16  ;;  %v3024_v52 = vadd.s32 1, %v6051_v23  ;;  %v2718_v26 = vshrl.u32 %v12945_v54, %v2717_v22  ;;  %vm2736_vm6 = vcmp.lt.s32.totalorder %v2715_v53, 3 }
 0x38d   :  { %v2739_v58 = vsel %vm2737_vm8, %v2727_v30, 2102212464  ;;  %v2743_v50 = vsel %vm2737_vm8, %v2730_v2, 920167782  ;;  %vm2735_vm11 = vcmp.lt.s32.totalorder %v2715_v53, 2  ;;  %v2746_v47 = vsel %vm2734_vm2, %v2724_v16, %v2727_v30 }
 0x38e   :  { %v2744_v34 = vsel %vm2736_vm6, %v2727_v30, %v2743_v50  ;;  %v2750_v4 = vshll.u32 %v2710_v29, 8  ;;  %v6048_v55 = vmin.u32 %v2976_v3, %v9599_v19  ;;  %v2738_v5 = vsel %vm2734_vm2, %v2718_v26, %v2721_v40 }
 0x38f   :  { %v2745_v51 = vsel %vm2735_vm11, %v2742_v24, %v2744_v34  ;;  %v2747_v44 = vsel %vm2737_vm8, %v2733_v9, 1326507024  ;;  %v2740_v12 = vsel %vm2736_vm6, %v2724_v16, %v2739_v58  ;;  %v2678_v22 = vand.u32 2147483647, %v9583_v13 }
 0x390   :  { %v2748_v43 = vsel %vm2736_vm6, %v2730_v2, %v2747_v44  ;;  %v9615_v11 = vmul.u32.u64.low %v2750_v4, %v2745_v51  ;;  %v9616_v38 = vmul.u32.u64.high %v2750_v4, %v2745_v51, %v9615_v11  ;;  %v2467_v23 = vadd.s32 127, %v2466_v25 }
 0x391   :  { %v2749_v56 = vsel %vm2735_vm11, %v2746_v47, %v2748_v43  ;;  %vm3025_vm9 = vcmp.gt.s32.totalorder %v3024_v52, 0  ;;  %v13142_v40 = vand.u32 2147483647, %v9552_v27  ;;  %v2978_v9 = vclz %v6048_v55 }
 0x392   :  { %v9621_v30 = vmul.u32.u64.low %v2750_v4, %v2749_v56  ;;  %v9622_v29 = vmul.u32.u64.high %v2750_v4, %v2749_v56, %v9621_v30  ;;  %v3026_v24 = vsel %vm3025_vm9, %v3024_v52, 0  ;;  %v2741_v16 = vsel %vm2735_vm11, %v2738_v5, %v2740_v12 }
 0x393   :  { %v3021_v3 = vand.u32 8388607, %v13142_v40  ;;  %v3028_v2 = vand.u32 31, %v3026_v24  ;;  %v2809_v26 = vand.u32 2139095040, %v9581_v39  ;;  %v9632_v13 = vsel %vm9605_vm14, %v9316_v63, %v9572_v49 }
 0x394   :  { %v2446_v56 = vadd.s32 %v9480_v42, %v9485_v32  ;;  %v2760_v58 = vadd.s32 1, %v9616_v38  ;;  %v9638_v52 = vmul.f32 %v2680_v8, %v2678_v22  ;;  %v2462_v53 = vsub.s32 32, %v9585_v10 }
 0x395   :  { %v3029_v50 = vsub.s32 32, %v3028_v2  ;;  %v2463_v47 = vshll.u32 %v9523_v1, %v9585_v10  ;;  %v2468_v55 = vshll.u32 %v2467_v23, 23  ;;  %v2757_v49 = vmul.u32 %v2750_v4, %v2741_v16 }
 0x396   :  { %vm2759_vm10 = vc.u32 %v9622_v29, %v9615_v11  ;;  %v6049_v5 = vadd.s32 4294967294, %v2978_v9  ;;  %v3022_v42 = vor.u32 8388608, %v3021_v3  ;;  %v2810_v51 = vshrl.u32 %v2809_v26, 23 }
 0x397   :  { %v2761_v32 = vsel %vm2759_vm10, %v2760_v58, %v9616_v38  ;;  %v3027_v44 = vshrl.u32 %v3026_v24, 5  ;;  %v3032_v12 = vshrl.u32 %v12951_v17, %v3029_v50  ;;  %v3035_v43 = vshrl.u32 %v12952_v46, %v3029_v50 }
 0x398   :  { %v2762_v8 = vadd.s32 %v2761_v32, %v2757_v49  ;;  %v3031_v22 = vshll.u32 %v12945_v54, %v3028_v2  ;;  %v3034_v1 = vshll.u32 %v12951_v17, %v3028_v2  ;;  %v3037_v10 = vshll.u32 %v12952_v46, %v3028_v2 }
 0x399   :  { %v3038_v4 = vshrl.u32 %v12950_v18, %v3029_v50  ;;  %vm12833_vm4 = vcmp.lt.s32.totalorder %v9320_v7, 0  ;;  %v2464_v23 = vshrl.u32 %v2446_v56, %v2462_v53  ;;  %v3040_v30 = vshll.u32 %v12950_v18, %v3028_v2 }
 0x39a   :  { %v2763_v38 = vadd.s32 536870912, %v2762_v8  ;;  %v3041_v40 = vshrl.u32 %v12928_v35, %v3029_v50  ;;  %v9656_v3 = vor.u32 4788187, %v2468_v55  ;;  %v3033_v24 = vor.u32 %v3032_v12, %v3031_v22 }
 0x39b   :  { %v3036_v9 = vor.u32 %v3035_v43, %v3034_v1  ;;  %v3039_v16 = vor.u32 %v3038_v4, %v3037_v10  ;;  %v3043_v49 = vshll.u32 %v12928_v35, %v3028_v2  ;;  %v3044_v32 = vshrl.u32 %v13092_v59, %v3029_v50 }
 0x39c   :  { %v9658_v26 = vshrl.u32 %v2763_v38, 30  ;;  %v3042_v58 = vor.u32 %v3041_v40, %v3040_v30  ;;  %vm6050_vm0 = vcmp.lt.s32.totalorder %v6049_v5, 0  ;;  %vm3049_vm5 = vcmp.lt.s32.totalorder %v3027_v44, 4 }
 0x39d   :  { %v3062_v56 = vshll.u32 %v3022_v42, 8  ;;  %v6043_v53 = vadd.s32 4294967169, %v2810_v51  ;;  %v13144_v34 = vand.u32 2147483647, %v9320_v7  ;;  %v13145_v25 = vmov 0 }
 0x39e   :  { %13143 = vst [vmem:[#allocation32_spill] sm:$0xff] %v9658_v26  ;;  %v2765_v55 = vshll.u32 %v9658_v26, 30  ;;  %v3045_v12 = vor.u32 %v3044_v32, %v3043_v49  ;;  %vm3046_vm13 = vcmp.lt.s32.totalorder %v3027_v44, 1  ;;  %v3051_v43 = vsel %vm3049_vm5, %v3039_v16, 2102212464 }
 0x39f   :  { %vm9664_vm7 = vcmp.le.f32.partialorder %v13144_v34, 0.7853982  ;;  %v3030_v2 = vshrl.u32 %v12945_v54, %v3029_v50  ;;  %vm3048_vm12 = vcmp.lt.s32.totalorder %v3027_v44, 3  ;;  %v3054_v22 = vsel %vm3046_vm13, %v3033_v24, %v3036_v9 }
 0x3a0   :  { %v13146_v25 = vsel %vm9664_vm7, 4294967295, %v13145_v25  ;;  %v3055_v1 = vsel %vm3049_vm5, %v3042_v58, 920167782  ;;  %vm12834_vm1 = vcmp.lt.s32.totalorder %v9326_v33, 0  ;;  %v9673_v42 = vsub.s32 %v2762_v8, %v2765_v55 }
 0x3a1   :  { %13147 = vst [vmem:[#allocation43_spill] sm:$0xff] %v13146_v25  ;;  %vm3047_vm3 = vcmp.lt.s32.totalorder %v3027_v44, 2  ;;  %v3056_v34 = vsel %vm3048_vm12, %v3039_v16, %v3055_v1  ;;  %v3058_v51 = vsel %vm3046_vm13, %v3036_v9, %v3039_v16  ;;  %v3050_v10 = vsel %vm3046_vm13, %v3030_v2, %v3033_v24 }
 0x3a2   :  { %v3052_v4 = vsel %vm3048_vm12, %v3036_v9, %v3051_v43  ;;  %v3057_v38 = vsel %vm3047_vm3, %v3054_v22, %v3056_v34  ;;  %v3059_v30 = vsel %vm3049_vm5, %v3045_v12, 1326507024  ;;  %v2768_v40 = vsub.s32 0, %v9673_v42 }
 0x3a3   :  { %v3060_v50 = vsel %vm3048_vm12, %v3042_v58, %v3059_v30  ;;  %v9678_v49 = vmul.u32.u64.low %v3062_v56, %v3057_v38  ;;  %v9679_v32 = vmul.u32.u64.high %v3062_v56, %v3057_v38, %v9678_v49  ;;  %v13148_v8 = vxor.u32 2147483648, %v9574_v28 }
 0x3a4   :  { %v2465_v16 = vor.u32 %v2464_v23, %v2463_v47  ;;  %v3061_v24 = vsel %vm3047_vm3, %v3058_v51, %v3060_v50  ;;  %v2816_v9 = vadd.s32 1, %v6043_v53  ;;  %v9689_v43 = vsel %vm6050_vm0, 0, %v6049_v5 }
 0x3a5   :  { %v2371_v55 = vsel %vm12833_vm4, %v13148_v8, %v9574_v28  ;;  %v6040_v12 = vmin.u32 %v2768_v40, %v9673_v42  ;;  %v9692_v58 = vmul.u32.u64.low %v3062_v56, %v3061_v24  ;;  %v9693_v2 = vmul.u32.u64.high %v3062_v56, %v3061_v24, %v9692_v58 }
 0x3a6   :  { %6617 = vcosq.f32 %v9632_v13  ;;  %v2682_v22 = vxor.u32 2147483648, %v9638_v52  ;;  %v3053_v1 = vsel %vm3047_vm3, %v3050_v10, %v3052_v4  ;;  %vm2817_vm2 = vcmp.gt.s32.totalorder %v2816_v9, 0  ;;  %v6258_v10 = vpop.f32.mrf.mxu0 }
 0x3a7   :  { %v2470_v28 = vand.u32 2147483647, %v9656_v3  ;;  %v3072_v47 = vadd.s32 1, %v9679_v32  ;;  %v13149_v23 = vand.u32 2147483647, %v9581_v39  ;;  %v2818_v53 = vsel %vm2817_vm2, %v2816_v9, 0 }
 0x3a8   :  { %6619 = vsinq.f32 %v9632_v13  ;;  %v9706_v34 = vsel %vm9664_vm7, %v9320_v7, %v2371_v55  ;;  %v2986_v51 = vsub.s32 4294967266, %v9689_v43  ;;  %v2820_v44 = vand.u32 31, %v2818_v53 }
 0x3a9   :  { %v2813_v5 = vand.u32 8388607, %v13149_v23  ;;  %v2472_v4 = vcvt.s32.f32 %v2465_v16  ;;  %v2770_v38 = vclz %v6040_v12  ;;  %v3069_v3 = vmul.u32 %v3062_v56, %v3053_v1 }
 0x3aa   :  { %vm3071_vm8 = vc.u32 %v9693_v2, %v9678_v49  ;;  %v9714_v30 = vsel %vm12834_vm1, %v2682_v22, %v9638_v52  ;;  %v2966_v13 = vadd.s32 %v9544_v60, %v9549_v62  ;;  %v2821_v50 = vsub.s32 32, %v2820_v44 }
 0x3ab   :  { %v3073_v40 = vsel %vm3071_vm8, %v3072_v47, %v9679_v32  ;;  %v9719_v8 = vmul.f32 %v2472_v4, %v2470_v28  ;;  %v2814_v16 = vor.u32 8388608, %v2813_v5  ;;  %v9722_v56 = vadd.f32 %v6258_v10, %v9298_v57 }
 0x3ac   :  { %v3074_v55 = vadd.s32 %v3073_v40, %v3069_v3  ;;  %v2982_v24 = vsub.s32 32, %v9689_v43  ;;  %v2987_v9 = vadd.s32 127, %v2986_v51  ;;  %v2824_v12 = vshrl.u32 %v12951_v17, %v2821_v50 }
 0x3ad   :  { %v2827_v52 = vshrl.u32 %v12952_v46, %v2821_v50  ;;  %v6041_v58 = vadd.s32 4294967294, %v2770_v38  ;;  %v2823_v60 = vshll.u32 %v12945_v54, %v2820_v44  ;;  %v2826_v62 = vshll.u32 %v12951_v17, %v2820_v44 }
 0x3ae   :  { %v3075_v22 = vadd.s32 536870912, %v3074_v55  ;;  %v2829_v32 = vshll.u32 %v12952_v46, %v2820_v44  ;;  %v2830_v1 = vshrl.u32 %v12950_v18, %v2821_v50  ;;  %v2832_v57 = vshll.u32 %v12950_v18, %v2820_v44 }
 0x3af   :  { %v2833_v28 = vshrl.u32 %v12928_v35, %v2821_v50  ;;  %v2819_v23 = vshrl.u32 %v2818_v53, 5  ;;  %v2825_v5 = vor.u32 %v2824_v12, %v2823_v60  ;;  %v2828_v51 = vor.u32 %v2827_v52, %v2826_v62 }
 0x3b0   :  { %v9733_v47 = vshrl.u32 %v3075_v22, 30  ;;  %v2831_v10 = vor.u32 %v2830_v1, %v2829_v32  ;;  %v2835_v38 = vshll.u32 %v12928_v35, %v2820_v44  ;;  %v2836_v3 = vshrl.u32 %v13092_v59, %v2821_v50 }
 0x3b1   :  { %v2834_v4 = vor.u32 %v2833_v28, %v2832_v57  ;;  %v2983_v40 = vshll.u32 %v9599_v19, %v9689_v43  ;;  %v2984_v25 = vshrl.u32 %v2966_v13, %v2982_v24  ;;  %v2988_v7 = vshll.u32 %v2987_v9, 23 }
 0x3b2   :  { %13150 = vst [vmem:[#allocation33_spill] sm:$0xff] %v9733_v47  ;;  %v3077_v31 = vshll.u32 %v9733_v47, 30  ;;  %v13151_v63 = vand.u32 2147483647, %v9326_v33  ;;  %v13152_v22 = vmov 0  ;;  %vm6042_vm11 = vcmp.lt.s32.totalorder %v6041_v58, 0 }
 0x3b3   :  { %v2837_v53 = vor.u32 %v2836_v3, %v2835_v38  ;;  %v2854_v12 = vshll.u32 %v2814_v16, 8  ;;  %v3329_v44 = vand.u32 2139095040, %v9722_v56  ;;  %v9747_v52 = vpop.eup %6617  ;;  %v2822_v19 = vshrl.u32 %v12945_v54, %v2821_v50 }
 0x3b4   :  { %vm9742_vm6 = vcmp.le.f32.partialorder %v13151_v63, 0.7853982  ;;  %13155 = vst [vmem:[#allocation19_spill] sm:$0xff] %v9747_v52  ;;  %v9749_v60 = vsub.s32 %v3074_v55, %v3077_v31  ;;  %vm2838_vm9 = vcmp.lt.s32.totalorder %v2819_v23, 1  ;;  %vm2841_vm10 = vcmp.lt.s32.totalorder %v2819_v23, 4 }
 0x3b5   :  { %v13153_v22 = vsel %vm9742_vm6, 4294967295, %v13152_v22  ;;  %vm2840_vm0 = vcmp.lt.s32.totalorder %v2819_v23, 3  ;;  %v2843_v43 = vsel %vm2841_vm10, %v2831_v10, 2102212464  ;;  %v2846_v63 = vsel %vm2838_vm9, %v2825_v5, %v2828_v51  ;;  %v9753_v24 = vpop.eup %6619 }
 0x3b6   :  { %13154 = vst [vmem:[#allocation18_spill] sm:$0xff] %v13153_v22  ;;  %v2847_v13 = vsel %vm2841_vm10, %v2834_v4, 920167782  ;;  %13156 = vst [vmem:[#allocation40_spill] sm:$0xff] %v9753_v24  ;;  %v3080_v9 = vsub.s32 0, %v9749_v60  ;;  %vm2839_vm5 = vcmp.lt.s32.totalorder %v2819_v23, 2  ;;  %v2850_v62 = vsel %vm2838_vm9, %v2828_v51, %v2831_v10 }
 0x3b7   :  { %v2848_v16 = vsel %vm2840_vm0, %v2831_v10, %v2847_v13  ;;  %v2773_v31 = vsel %vm6042_vm11, 0, %v6041_v58  ;;  %v2851_v55 = vsel %vm2841_vm10, %v2837_v53, 1326507024  ;;  %v3330_v32 = vshrl.u32 %v3329_v44, 23 }
 0x3b8   :  { %v2849_v50 = vsel %vm2839_vm5, %v2846_v63, %v2848_v16  ;;  %v6052_v1 = vmin.u32 %v3080_v9, %v9749_v60  ;;  %v2842_v57 = vsel %vm2838_vm9, %v2822_v19, %v2825_v5  ;;  %v2844_v28 = vsel %vm2840_vm0, %v2828_v51, %v2843_v43 }
 0x3b9   :  { %v2852_v38 = vsel %vm2840_vm0, %v2834_v4, %v2851_v55  ;;  %v9765_v52 = vmul.u32.u64.low %v2854_v12, %v2849_v50  ;;  %v9766_v13 = vmul.u32.u64.high %v2854_v12, %v2849_v50, %v9765_v52  ;;  %v6063_v10 = vadd.s32 4294967169, %v3330_v32 }
 0x3ba   :  { %v2853_v3 = vsel %vm2839_vm5, %v2850_v62, %v2852_v38  ;;  %v2989_v58 = vor.u32 4788187, %v2988_v7  ;;  %v3082_v24 = vclz %v6052_v1  ;;  %v2774_v44 = vsub.s32 32, %v2773_v31 }
 0x3bb   :  { %v9769_v63 = vmul.u32.u64.low %v2854_v12, %v2853_v3  ;;  %v9770_v53 = vmul.u32.u64.high %v2854_v12, %v2853_v3, %v9769_v63  ;;  %v2778_v9 = vsub.s32 4294967266, %v2773_v31  ;;  %v2845_v5 = vsel %vm2839_vm5, %v2842_v57, %v2844_v28 }
 0x3bc   :  { %v3336_v19 = vadd.s32 1, %v6063_v10  ;;  %6621 = vcosq.f32 %v9706_v34  ;;  %v9778_v51 = vsel %vm9742_vm6, %v9326_v33, %v9714_v30  ;;  %v2474_v4 = vxor.u32 2147483648, %v9719_v8 }
 0x3bd   :  { %v2985_v7 = vor.u32 %v2984_v25, %v2983_v40  ;;  %v2758_v43 = vadd.s32 %v9615_v11, %v9622_v29  ;;  %v6053_v16 = vadd.s32 4294967294, %v3082_v24  ;;  %v2864_v62 = vadd.s32 1, %v9766_v13  ;;  %v2255_v25 = vpop.f32.mrf.mxu0 }
 0x3be   :  { %vm3337_vm13 = vcmp.gt.s32.totalorder %v3336_v19, 0  ;;  %v2990_v23 = vand.u32 2147483647, %v2989_v58  ;;  %v2861_v50 = vmul.u32 %v2854_v12, %v2845_v5  ;;  %vm2863_vm12 = vc.u32 %v9770_v53, %v9765_v52 }
 0x3bf   :  { %v12810_v55 = vand.u32 2147483647, %v9722_v56  ;;  %v2776_v32 = vshrl.u32 %v2758_v43, %v2774_v44  ;;  %v2779_v30 = vadd.s32 127, %v2778_v9  ;;  %v2865_v1 = vsel %vm2863_vm12, %v2864_v62, %v9766_v13 }
 0x3c0   :  { %v3338_v57 = vsel %vm3337_vm13, %v3336_v19, 0  ;;  %6623 = vsinq.f32 %v9706_v34  ;;  %vm12832_vm3 = vcmp.lt.s32.totalorder %v9331_v20, 0  ;;  %v2992_v11 = vcvt.s32.f32 %v2985_v7 }
 0x3c1   :  { %v2866_v29 = vadd.s32 %v2865_v1, %v2861_v50  ;;  %6625 = vcosq.f32 %v9778_v51  ;;  %v2775_v40 = vshll.u32 %v9673_v42, %v2773_v31  ;;  %vm6054_vm2 = vcmp.lt.s32.totalorder %v6053_v16, 0 }
 0x3c2   :  { %v3340_v12 = vand.u32 31, %v3338_v57  ;;  %v9795_v24 = vsel %vm12832_vm3, %v2474_v4, %v9719_v8  ;;  %v9797_v28 = vmul.f32 %v2992_v11, %v2990_v23  ;;  %v3333_v34 = vand.u32 8388607, %v12810_v55 }
 0x3c3   :  { %v2867_v38 = vadd.s32 536870912, %v2866_v29  ;;  %v9801_v3 = vor.u32 %v2776_v32, %v2775_v40  ;;  %v2780_v13 = vshll.u32 %v2779_v30, 23  ;;  %v9804_v58 = vadd.f32 %v2255_v25, %v9302_v45 }
 0x3c4   :  { %v3341_v10 = vsub.s32 32, %v3340_v12  ;;  %v9806_v42 = vsel %vm6054_vm2, 0, %v6053_v16  ;;  %v3343_v8 = vshll.u32 %v12945_v54, %v3340_v12  ;;  %v3346_v63 = vshll.u32 %v12951_v17, %v3340_v12 }
 0x3c5   :  { %v9808_v31 = vshrl.u32 %v2867_v38, 30  ;;  %v3349_v5 = vshll.u32 %v12952_v46, %v3340_v12  ;;  %v3339_v45 = vshrl.u32 %v3338_v57, 5  ;;  %v3352_v7 = vshll.u32 %v12950_v18, %v3340_v12 }
 0x3c6   :  { %v3344_v44 = vshrl.u32 %v12951_v17, %v3341_v10  ;;  %v3347_v9 = vshrl.u32 %v12952_v46, %v3341_v10  ;;  %v3350_v19 = vshrl.u32 %v12950_v18, %v3341_v10  ;;  %v3353_v43 = vshrl.u32 %v12928_v35, %v3341_v10 }
 0x3c7   :  { %13157 = vst [vmem:[#allocation31_spill] sm:$0xff] %v9808_v31  ;;  %v2869_v4 = vshll.u32 %v9808_v31, 30  ;;  %v2781_v16 = vor.u32 4788187, %v2780_v13  ;;  %v3355_v1 = vshll.u32 %v12928_v35, %v3340_v12  ;;  %v3356_v11 = vshrl.u32 %v13092_v59, %v3341_v10 }
 0x3c8   :  { %v3345_v62 = vor.u32 %v3344_v44, %v3343_v8  ;;  %v3348_v23 = vor.u32 %v3347_v9, %v3346_v63  ;;  %v3351_v50 = vor.u32 %v3350_v19, %v3349_v5  ;;  %v3354_v30 = vor.u32 %v3353_v43, %v3352_v7 }
 0x3c9   :  { %v9819_v32 = vsub.s32 %v2866_v29, %v2869_v4  ;;  %v9823_v25 = vpop.eup %6621  ;;  %v3090_v40 = vsub.s32 4294967266, %v9806_v42  ;;  %v3334_v57 = vor.u32 8388608, %v3333_v34  ;;  %v3342_v38 = vshrl.u32 %v12945_v54, %v3341_v10 }
 0x3ca   :  { %13158 = vst [vmem:[#allocation44_spill] sm:$0xff] %v9823_v25  ;;  %v3121_v55 = vand.u32 2139095040, %v9804_v58  ;;  %v13159_v13 = vand.u32 2147483647, %v9331_v20  ;;  %v13160_v8 = vmov 0  ;;  %v3357_v12 = vor.u32 %v3356_v11, %v3355_v1 }
 0x3cb   :  { %v2872_v29 = vsub.s32 0, %v9819_v32  ;;  %vm3358_vm11 = vcmp.lt.s32.totalorder %v3339_v45, 1  ;;  %vm3361_vm9 = vcmp.lt.s32.totalorder %v3339_v45, 4  ;;  %vm3359_vm10 = vcmp.lt.s32.totalorder %v3339_v45, 2 }
 0x3cc   :  { %vm9830_vm8 = vcmp.le.f32.partialorder %v13159_v13, 0.7853982  ;;  %vm3360_vm0 = vcmp.lt.s32.totalorder %v3339_v45, 3  ;;  %v3366_v63 = vsel %vm3358_vm11, %v3345_v62, %v3348_v23  ;;  %v3367_v34 = vsel %vm3361_vm9, %v3354_v30, 920167782 }
 0x3cd   :  { %v13161_v8 = vsel %vm9830_vm8, 4294967295, %v13160_v8  ;;  %v6044_v10 = vmin.u32 %v2872_v29, %v9819_v32  ;;  %v3363_v44 = vsel %vm3361_vm9, %v3351_v50, 2102212464  ;;  %v3368_v9 = vsel %vm3360_vm0, %v3351_v50, %v3367_v34  ;;  %v9839_v19 = vpop.eup %6623 }
 0x3ce   :  { %13162 = vst [vmem:[#allocation22_spill] sm:$0xff] %v13161_v8  ;;  %v3370_v5 = vsel %vm3358_vm11, %v3348_v23, %v3351_v50  ;;  %13163 = vst [vmem:[#allocation9_spill] sm:$0xff] %v9839_v19  ;;  %v3369_v4 = vsel %vm3359_vm10, %v3366_v63, %v3368_v9  ;;  %v3371_v7 = vsel %vm3361_vm9, %v3357_v12, 1326507024  ;;  %v3374_v43 = vshll.u32 %v3334_v57, 8  ;;  %v9842_v11 = vpop.eup %6625 }
 0x3cf   :  { %v3122_v1 = vshrl.u32 %v3121_v55, 23  ;;  %13164 = vst [vmem:[#allocation46_spill] sm:$0xff] %v9842_v11  ;;  %v2782_v13 = vand.u32 2147483647, %v2781_v16  ;;  %v2874_v25 = vclz %v6044_v10  ;;  %v3362_v22 = vsel %vm3358_vm11, %v3342_v38, %v3345_v62 }
 0x3d0   :  { %v3372_v29 = vsel %vm3360_vm0, %v3354_v30, %v3371_v7  ;;  %v3364_v33 = vsel %vm3360_vm0, %v3348_v23, %v3363_v44  ;;  %v9848_v50 = vmul.u32.u64.low %v3374_v43, %v3369_v4  ;;  %v9849_v0 = vmul.u32.u64.high %v3374_v43, %v3369_v4, %v9848_v50  ;;  %v6259_v23 = vpop.f32.mrf.mxu0 }
 0x3d1   :  { %v3373_v34 = vsel %vm3359_vm10, %v3370_v5, %v3372_v29  ;;  %v3086_v12 = vsub.s32 32, %v9806_v42  ;;  %v3091_v57 = vadd.s32 127, %v3090_v40  ;;  %6627 = vsinq.f32 %v9778_v51 }
 0x3d2   :  { %v9853_v55 = vmul.u32.u64.low %v3374_v43, %v3373_v34  ;;  %v9854_v63 = vmul.u32.u64.high %v3374_v43, %v3373_v34, %v9853_v55  ;;  %vm12863_vm5 = vcmp.lt.s32.totalorder %v9457_v36, 0  ;;  %v3070_v16 = vadd.s32 %v9678_v49, %v9693_v2 }
 0x3d3   :  { %v6055_v62 = vadd.s32 4294967169, %v3122_v1  ;;  %v2784_v30 = vcvt.s32.f32 %v9801_v3  ;;  %v6045_v38 = vadd.s32 4294967294, %v2874_v25  ;;  %v3365_v10 = vsel %vm3359_vm10, %v3362_v22, %v3364_v33 }
 0x3d4   :  { %v12817_v44 = vand.u32 2147483647, %v9804_v58  ;;  %v9867_v40 = vsel %vm9830_vm8, %v9331_v20, %v9795_v24  ;;  %v2994_v51 = vxor.u32 2147483648, %v9797_v28  ;;  %v3384_v9 = vadd.s32 1, %v9849_v0 }
 0x3d5   :  { %v3128_v49 = vadd.s32 1, %v6055_v62  ;;  %v9871_v2 = vmul.f32 %v2784_v30, %v2782_v13  ;;  %v3088_v5 = vshrl.u32 %v3070_v16, %v3086_v12  ;;  %v3092_v3 = vshll.u32 %v3091_v57, 23 }
 0x3d6   :  { %v9874_v45 = vadd.f32 %v6259_v23, %v9304_v21  ;;  %v3087_v33 = vshll.u32 %v9749_v60, %v9806_v42  ;;  %v3381_v22 = vmul.u32 %v3374_v43, %v3365_v10  ;;  %vm3383_vm13 = vc.u32 %v9854_v63, %v9848_v50 }
 0x3d7   :  { %vm3129_vm12 = vcmp.gt.s32.totalorder %v3128_v49, 0  ;;  %vm6046_vm2 = vcmp.lt.s32.totalorder %v6045_v38, 0  ;;  %v3385_v24 = vsel %vm3383_vm13, %v3384_v9, %v9849_v0  ;;  %v3125_v25 = vand.u32 8388607, %v12817_v44 }
 0x3d8   :  { %v3130_v4 = vsel %vm3129_vm12, %v3128_v49, 0  ;;  %6629 = vcosq.f32 %v9867_v40  ;;  %v9887_v21 = vsel %vm12863_vm5, %v2994_v51, %v9797_v28  ;;  %v3386_v60 = vadd.s32 %v3385_v24, %v3381_v22 }
 0x3d9   :  { %v3132_v42 = vand.u32 31, %v3130_v4  ;;  %v9890_v43 = vor.u32 %v3088_v5, %v3087_v33  ;;  %v9892_v1 = vor.u32 4788187, %v3092_v3  ;;  %v2862_v0 = vadd.s32 %v9765_v52, %v9770_v53 }
 0x3da   :  { %v9896_v13 = vsel %vm6046_vm2, 0, %v6045_v38  ;;  %v3387_v29 = vadd.s32 536870912, %v3386_v60  ;;  %v3433_v12 = vand.u32 2139095040, %v9874_v45  ;;  %v3126_v57 = vor.u32 8388608, %v3125_v25 }
 0x3db   :  { %v3133_v34 = vsub.s32 32, %v3132_v42  ;;  %v3131_v28 = vshrl.u32 %v3130_v4, 5  ;;  %v3135_v55 = vshll.u32 %v12945_v54, %v3132_v42  ;;  %v3138_v16 = vshll.u32 %v12951_v17, %v3132_v42 }
 0x3dc   :  { %v9901_v62 = vshrl.u32 %v3387_v29, 30  ;;  %v3141_v52 = vshll.u32 %v12952_v46, %v3132_v42  ;;  %v3144_v38 = vshll.u32 %v12950_v18, %v3132_v42  ;;  %v3147_v51 = vshll.u32 %v12928_v35, %v3132_v42 }
 0x3dd   :  { %v3136_v23 = vshrl.u32 %v12951_v17, %v3133_v34  ;;  %v3139_v30 = vshrl.u32 %v12952_v46, %v3133_v34  ;;  %v3142_v53 = vshrl.u32 %v12950_v18, %v3133_v34  ;;  %v3145_v10 = vshrl.u32 %v12928_v35, %v3133_v34 }
 0x3de   :  { %v3389_v9 = vshll.u32 %v9901_v62, 30  ;;  %v3148_v3 = vshrl.u32 %v13092_v59, %v3133_v34  ;;  %v9912_v33 = vpop.eup %6627  ;;  %v2878_v22 = vsub.s32 32, %v9896_v13  ;;  %v2882_v24 = vsub.s32 4294967266, %v9896_v13 }
 0x3df   :  { %v3137_v49 = vor.u32 %v3136_v23, %v3135_v55  ;;  %v3140_v5 = vor.u32 %v3139_v30, %v3138_v16  ;;  %13165 = vst [vmem:[#allocation36_spill] sm:$0xff] %v9912_v33  ;;  %v3143_v25 = vor.u32 %v3142_v53, %v3141_v52  ;;  %v3146_v4 = vor.u32 %v3145_v10, %v3144_v38 }
 0x3e0   :  { %v9916_v29 = vsub.s32 %v3386_v60, %v3389_v9  ;;  %v3149_v44 = vor.u32 %v3148_v3, %v3147_v51  ;;  %vm3150_vm11 = vcmp.lt.s32.totalorder %v3131_v28, 1  ;;  %v3166_v7 = vshll.u32 %v3126_v57, 8  ;;  %v2258_v51 = vpop.f32.mrf.mxu0 }
 0x3e1   :  { %v13166_v42 = vand.u32 2147483647, %v9457_v36  ;;  %v13167_v55 = vmov 0  ;;  %vm12844_vm10 = vcmp.lt.s32.totalorder %v9529_v15, 0  ;;  %v3134_v16 = vshrl.u32 %v12945_v54, %v3133_v34 }
 0x3e2   :  { %vm3153_vm0 = vcmp.lt.s32.totalorder %v3131_v28, 4  ;;  %v3158_v23 = vsel %vm3150_vm11, %v3137_v49, %v3140_v5  ;;  %v3434_v30 = vshrl.u32 %v3433_v12, 23  ;;  %v3392_v60 = vsub.s32 0, %v9916_v29 }
 0x3e3   :  { %vm9920_vm9 = vcmp.le.f32.partialorder %v13166_v42, 0.7853982  ;;  %vm3152_vm13 = vcmp.lt.s32.totalorder %v3131_v28, 3  ;;  %v3155_v52 = vsel %vm3153_vm0, %v3143_v25, 2102212464  ;;  %vm3151_vm12 = vcmp.lt.s32.totalorder %v3131_v28, 2 }
 0x3e4   :  { %v13168_v55 = vsel %vm9920_vm9, 4294967295, %v13167_v55  ;;  %v3159_v53 = vsel %vm3153_vm0, %v3146_v4, 920167782  ;;  %v3162_v38 = vsel %vm3150_vm11, %v3140_v5, %v3143_v25  ;;  %v3163_v10 = vsel %vm3153_vm0, %v3149_v44, 1326507024 }
 0x3e5   :  { %13169 = vst [vmem:[#allocation29_spill] sm:$0xff] %v13168_v55  ;;  %v3160_v57 = vsel %vm3152_vm13, %v3143_v25, %v3159_v53  ;;  %v2883_v9 = vadd.s32 127, %v2882_v24  ;;  %v6064_v3 = vmin.u32 %v3392_v60, %v9916_v29  ;;  %v3154_v34 = vsel %vm3150_vm11, %v3134_v16, %v3137_v49  ;;  %v9932_v19 = vpop.eup %6629 }
 0x3e6   :  { %v3161_v42 = vsel %vm3151_vm12, %v3158_v23, %v3160_v57  ;;  %13170 = vst [vmem:[#allocation42_spill] sm:$0xff] %v9932_v19  ;;  %v13171_v12 = vand.u32 2147483647, %v9529_v15  ;;  %v13172_v8 = vmov 0  ;;  %v3156_v53 = vsel %vm3152_vm13, %v3140_v5, %v3155_v52 }
 0x3e7   :  { %v3164_v20 = vsel %vm3152_vm13, %v3146_v4, %v3163_v10  ;;  %v9940_v25 = vmul.u32.u64.low %v3166_v7, %v3161_v42  ;;  %v9941_v44 = vmul.u32.u64.high %v3166_v7, %v3161_v42, %v9940_v25  ;;  %v3094_v24 = vand.u32 2147483647, %v9892_v1 }
 0x3e8   :  { %vm9936_vm2 = vcmp.le.f32.partialorder %v13171_v12, 0.7853982  ;;  %v3394_v60 = vclz %v6064_v3  ;;  %v3165_v49 = vsel %vm3151_vm12, %v3162_v38, %v3164_v20  ;;  %v9947_v16 = vadd.f32 %v2258_v51, %v9308_v41 }
 0x3e9   :  { %v13173_v8 = vsel %vm9936_vm2, 4294967295, %v13172_v8  ;;  %v2880_v23 = vshrl.u32 %v2862_v0, %v2878_v22  ;;  %v9949_v57 = vmul.u32.u64.low %v3166_v7, %v3165_v49  ;;  %v9950_v12 = vmul.u32.u64.high %v3166_v7, %v3165_v49, %v9949_v57 }
 0x3ea   :  { %13174 = vst [vmem:[#allocation16_spill] sm:$0xff] %v13173_v8  ;;  %v6067_v19 = vadd.s32 4294967169, %v3434_v30  ;;  %v3096_v5 = vcvt.s32.f32 %v9890_v43  ;;  %v2884_v4 = vshll.u32 %v2883_v9, 23  ;;  %v3157_v52 = vsel %vm3151_vm12, %v3154_v34, %v3156_v53  ;;  %v6262_v30 = vpop.f32.mrf.mxu0 }
 0x3eb   :  { %v12823_v10 = vand.u32 2147483647, %v9874_v45  ;;  %6631 = vsinq.f32 %v9867_v40  ;;  %v2879_v20 = vshll.u32 %v9819_v32, %v9896_v13  ;;  %v3176_v41 = vadd.s32 1, %v9941_v44 }
 0x3ec   :  { %v3440_v1 = vadd.s32 1, %v6067_v19  ;;  %v9963_v0 = vsel %vm9920_vm9, %v9457_v36, %v9887_v21  ;;  %v13175_v43 = vxor.u32 2147483648, %v9871_v2  ;;  %v9970_v22 = vmul.f32 %v3096_v5, %v3094_v24 }
 0x3ed   :  { %v6065_v40 = vadd.s32 4294967294, %v3394_v60  ;;  %v9972_v32 = vor.u32 %v2880_v23, %v2879_v20  ;;  %v3173_v13 = vmul.u32 %v3166_v7, %v3157_v52  ;;  %vm3175_vm11 = vc.u32 %v9950_v12, %v9940_v25 }
 0x3ee   :  { %v2787_v28 = vsel %vm12844_vm10, %v13175_v43, %v9871_v2  ;;  %vm3441_vm0 = vcmp.gt.s32.totalorder %v3440_v1, 0  ;;  %v9976_v19 = vor.u32 4788187, %v2884_v4  ;;  %v3177_v21 = vsel %vm3175_vm11, %v3176_v41, %v9941_v44 }
 0x3ef   :  { %v3437_v38 = vand.u32 8388607, %v12823_v10  ;;  %v3225_v2 = vand.u32 2139095040, %v9947_v16  ;;  %6633 = vcosq.f32 %v9963_v0  ;;  %v3178_v51 = vadd.s32 %v3177_v21, %v3173_v13 }
 0x3f0   :  { %v3442_v9 = vsel %vm3441_vm0, %v3440_v1, 0  ;;  %v9984_v3 = vadd.f32 %v6262_v30, %v9292_v48  ;;  %v9989_v7 = vsel %vm9936_vm2, %v9529_v15, %v2787_v28  ;;  %vm6066_vm13 = vcmp.lt.s32.totalorder %v6065_v40, 0 }
 0x3f1   :  { %v3444_v42 = vand.u32 31, %v3442_v9  ;;  %v2888_v53 = vcvt.s32.f32 %v9972_v32  ;;  %v3382_v44 = vadd.s32 %v9848_v50, %v9854_v63  ;;  %v3179_v24 = vadd.s32 536870912, %v3178_v51 }
 0x3f2   :  { %v12827_v60 = vand.u32 2147483647, %v9947_v16  ;;  %v2886_v48 = vand.u32 2147483647, %v9976_v19  ;;  %v3438_v49 = vor.u32 8388608, %v3437_v38  ;;  %v3226_v57 = vshrl.u32 %v3225_v2, 23 }
 0x3f3   :  { %v3445_v23 = vsub.s32 32, %v3444_v42  ;;  %v9997_v5 = vsel %vm6066_vm13, 0, %v6065_v40  ;;  %v9999_v4 = vshrl.u32 %v3179_v24, 30  ;;  %v3443_v52 = vshrl.u32 %v3442_v9, 5 }
 0x3f4   :  { %v3447_v20 = vshll.u32 %v12945_v54, %v3444_v42  ;;  %v3450_v1 = vshll.u32 %v12951_v17, %v3444_v42  ;;  %v3453_v50 = vshll.u32 %v12952_v46, %v3444_v42  ;;  %v3456_v63 = vshll.u32 %v12950_v18, %v3444_v42 }
 0x3f5   :  { %v3448_v41 = vshrl.u32 %v12951_v17, %v3445_v23  ;;  %v3181_v43 = vshll.u32 %v9999_v4, 30  ;;  %v3451_v28 = vshrl.u32 %v12952_v46, %v3445_v23  ;;  %v3454_v40 = vshrl.u32 %v12950_v18, %v3445_v23 }
 0x3f6   :  { %v3457_v30 = vshrl.u32 %v12928_v35, %v3445_v23  ;;  %v3459_v13 = vshll.u32 %v12928_v35, %v3444_v42  ;;  %v3460_v19 = vshrl.u32 %v13092_v59, %v3445_v23  ;;  %v3229_v21 = vand.u32 8388607, %v12827_v60 }
 0x3f7   :  { %v3449_v32 = vor.u32 %v3448_v41, %v3447_v20  ;;  %v10014_v38 = vsub.s32 %v3178_v51, %v3181_v43  ;;  %v3452_v2 = vor.u32 %v3451_v28, %v3450_v1  ;;  %v3455_v9 = vor.u32 %v3454_v40, %v3453_v50 }
 0x3f8   :  { %v3458_v24 = vor.u32 %v3457_v30, %v3456_v63  ;;  %v10016_v10 = vpop.eup %6631  ;;  %v3402_v34 = vsub.s32 4294967266, %v9997_v5  ;;  %v3461_v11 = vor.u32 %v3460_v19, %v3459_v13  ;;  %v3478_v33 = vshll.u32 %v3438_v49, 8 }
 0x3f9   :  { %13176 = vst [vmem:[#allocation23_spill] sm:$0xff] %v10016_v10  ;;  %v6059_v8 = vadd.s32 4294967169, %v3226_v57  ;;  %v3184_v20 = vsub.s32 0, %v10014_v38  ;;  %v3446_v42 = vshrl.u32 %v12945_v54, %v3445_v23  ;;  %vm3462_vm12 = vcmp.lt.s32.totalorder %v3443_v52, 1 }
 0x3fa   :  { %vm3465_vm11 = vcmp.lt.s32.totalorder %v3443_v52, 4  ;;  %vm3463_vm0 = vcmp.lt.s32.totalorder %v3443_v52, 2  ;;  %vm3464_vm13 = vcmp.lt.s32.totalorder %v3443_v52, 3  ;;  %v3470_v51 = vsel %vm3462_vm12, %v3449_v32, %v3452_v2 }
 0x3fb   :  { %v3471_v41 = vsel %vm3465_vm11, %v3458_v24, 920167782  ;;  %v6056_v1 = vmin.u32 %v3184_v20, %v10014_v38  ;;  %v3467_v50 = vsel %vm3465_vm11, %v3455_v9, 2102212464  ;;  %v3474_v43 = vsel %vm3462_vm12, %v3452_v2, %v3455_v9 }
 0x3fc   :  { %v3472_v63 = vsel %vm3464_vm13, %v3455_v9, %v3471_v41  ;;  %v10025_v49 = vpop.eup %6633  ;;  %v3398_v57 = vsub.s32 32, %v9997_v5  ;;  %v3475_v28 = vsel %vm3465_vm11, %v3461_v11, 1326507024  ;;  %v3232_v40 = vadd.s32 1, %v6059_v8 }
 0x3fd   :  { %13177 = vst [vmem:[#allocation48_spill] sm:$0xff] %v10025_v49  ;;  %v3473_v23 = vsel %vm3463_vm0, %v3470_v51, %v3472_v63  ;;  %v3403_v30 = vadd.s32 127, %v3402_v34  ;;  %v3186_v13 = vclz %v6056_v1  ;;  %v3466_v19 = vsel %vm3462_vm12, %v3446_v42, %v3449_v32 }
 0x3fe   :  { %v3476_v60 = vsel %vm3464_vm13, %v3458_v24, %v3475_v28  ;;  %v3468_v20 = vsel %vm3464_vm13, %v3452_v2, %v3467_v50  ;;  %v10033_v10 = vmul.u32.u64.low %v3478_v33, %v3473_v23  ;;  %v10034_v9 = vmul.u32.u64.high %v3478_v33, %v3473_v23, %v10033_v10 }
 0x3ff   :  { %v3477_v41 = vsel %vm3463_vm0, %v3474_v43, %v3476_v60  ;;  %v10037_v49 = vmul.f32 %v2888_v53, %v2886_v48  ;;  %v3230_v8 = vor.u32 8388608, %v3229_v21  ;;  %6635 = vsinq.f32 %v9963_v0 }
 0x400   :  { %v10039_v31 = vmul.u32.u64.low %v3478_v33, %v3477_v41  ;;  %v10040_v51 = vmul.u32.u64.high %v3478_v33, %v3477_v41, %v10039_v31  ;;  %vm12857_vm12 = vcmp.lt.s32.totalorder %v9552_v27, 0  ;;  %v3400_v11 = vshrl.u32 %v3382_v44, %v3398_v57 }
 0x401   :  { %vm3233_vm11 = vcmp.gt.s32.totalorder %v3232_v40, 0  ;;  %v3404_v34 = vshll.u32 %v3403_v30, 23  ;;  %v6057_v32 = vadd.s32 4294967294, %v3186_v13  ;;  %v3469_v60 = vsel %vm3463_vm0, %v3466_v19, %v3468_v20 }
 0x402   :  { %v3234_v2 = vsel %vm3233_vm11, %v3232_v40, 0  ;;  %6637 = vcosq.f32 %v9989_v7  ;;  %v13178_v53 = vxor.u32 2147483648, %v9970_v22  ;;  %v3488_v0 = vadd.s32 1, %v10034_v9 }
 0x403   :  { %v3236_v48 = vand.u32 31, %v3234_v2  ;;  %v2890_v44 = vxor.u32 2147483648, %v10037_v49  ;;  %v3399_v21 = vshll.u32 %v9916_v29, %v9997_v5  ;;  %v10057_v52 = vshll.u32 %v3230_v8, 8 }
 0x404   :  { %v10051_v31 = vsel %vm12857_vm12, %v13178_v53, %v9970_v22  ;;  %v3485_v42 = vmul.u32 %v3478_v33, %v3469_v60  ;;  %vm3487_vm0 = vc.u32 %v10040_v51, %v10033_v10  ;;  %v3745_v22 = vand.u32 2139095040, %v9984_v3 }
 0x405   :  { %v3237_v1 = vsub.s32 32, %v3236_v48  ;;  %v3401_v50 = vor.u32 %v3400_v11, %v3399_v21  ;;  %v3405_v63 = vor.u32 4788187, %v3404_v34  ;;  %vm6058_vm13 = vcmp.lt.s32.totalorder %v6057_v32, 0 }
 0x406   :  { %v3489_v43 = vsel %vm3487_vm0, %v3488_v0, %v10034_v9  ;;  %v3235_v23 = vshrl.u32 %v3234_v2, 5  ;;  %v3239_v28 = vshll.u32 %v12945_v54, %v3236_v48  ;;  %v3242_v33 = vshll.u32 %v12951_v17, %v3236_v48 }
 0x407   :  { %v3490_v57 = vadd.s32 %v3489_v43, %v3485_v42  ;;  %v3240_v29 = vshrl.u32 %v12951_v17, %v3237_v1  ;;  %v3243_v5 = vshrl.u32 %v12952_v46, %v3237_v1  ;;  %v3245_v40 = vshll.u32 %v12952_v46, %v3236_v48 }
 0x408   :  { %v3246_v30 = vshrl.u32 %v12950_v18, %v3237_v1  ;;  %v10070_v13 = vsel %vm6058_vm13, 0, %v6057_v32  ;;  %v3248_v20 = vshll.u32 %v12950_v18, %v3236_v48  ;;  %v3249_v41 = vshrl.u32 %v12928_v35, %v3237_v1 }
 0x409   :  { %v3491_v19 = vadd.s32 536870912, %v3490_v57  ;;  %v3408_v9 = vcvt.s32.f32 %v3401_v50  ;;  %v3241_v8 = vor.u32 %v3240_v29, %v3239_v28  ;;  %v3244_v11 = vor.u32 %v3243_v5, %v3242_v33 }
 0x40a   :  { %v3247_v34 = vor.u32 %v3246_v30, %v3245_v40  ;;  %v3250_v2 = vor.u32 %v3249_v41, %v3248_v20  ;;  %v3251_v53 = vshll.u32 %v12928_v35, %v3236_v48  ;;  %v3252_v0 = vshrl.u32 %v13092_v59, %v3237_v1 }
 0x40b   :  { %v10074_v60 = vshrl.u32 %v3491_v19, 30  ;;  %v13179_v21 = vand.u32 2147483647, %v9552_v27  ;;  %v13180_v32 = vmov 0  ;;  %vm12843_vm0 = vcmp.lt.s32.totalorder %v9581_v39, 0 }
 0x40c   :  { %v3406_v42 = vand.u32 2147483647, %v3405_v63  ;;  %v3194_v50 = vsub.s32 4294967266, %v10070_v13  ;;  %vm3257_vm13 = vcmp.lt.s32.totalorder %v3235_v23, 4  ;;  %v3746_v43 = vshrl.u32 %v3745_v22, 23  ;;  %v10088_v28 = vpop.eup %6635 }
 0x40d   :  { %vm10080_vm11 = vcmp.le.f32.partialorder %v13179_v21, 0.7853982  ;;  %v3493_v29 = vshll.u32 %v10074_v60, 30  ;;  %v3253_v5 = vor.u32 %v3252_v0, %v3251_v53  ;;  %vm3254_vm3 = vcmp.lt.s32.totalorder %v3235_v23, 1  ;;  %13183 = vst [vmem:[#allocation27_spill] sm:$0xff] %v10088_v28 }
 0x40e   :  { %v13181_v32 = vsel %vm10080_vm11, 4294967295, %v13180_v32  ;;  %v3259_v48 = vsel %vm3257_vm13, %v3247_v34, 2102212464  ;;  %v3238_v33 = vshrl.u32 %v12945_v54, %v3237_v1  ;;  %vm3256_vm4 = vcmp.lt.s32.totalorder %v3235_v23, 3 }
 0x40f   :  { %13182 = vst [vmem:[#allocation28_spill] sm:$0xff] %v13181_v32  ;;  %v3262_v40 = vsel %vm3254_vm3, %v3241_v8, %v3244_v11  ;;  %v3263_v30 = vsel %vm3257_vm13, %v3250_v2, 920167782  ;;  %v10092_v19 = vsub.s32 %v3490_v57, %v3493_v29  ;;  %vm3255_vm1 = vcmp.lt.s32.totalorder %v3235_v23, 2  ;;  %v10094_v22 = vpop.eup %6637 }
 0x410   :  { %v3264_v63 = vsel %vm3256_vm4, %v3247_v34, %v3263_v30  ;;  %v3266_v20 = vsel %vm3254_vm3, %v3244_v11, %v3247_v34  ;;  %13184 = vst [vmem:[#allocation15_spill] sm:$0xff] %v10094_v22  ;;  %v3258_v41 = vsel %vm3254_vm3, %v3238_v33, %v3241_v8  ;;  %v3260_v53 = vsel %vm3256_vm4, %v3244_v11, %v3259_v48 }
 0x411   :  { %v3265_v0 = vsel %vm3255_vm1, %v3262_v40, %v3264_v63  ;;  %v3267_v21 = vsel %vm3257_vm13, %v3253_v5, 1326507024  ;;  %v13185_v24 = vand.u32 2147483647, %v9581_v39  ;;  %v13186_v1 = vmov 0 }
 0x412   :  { %v3496_v57 = vsub.s32 0, %v10092_v19  ;;  %v3268_v29 = vsel %vm3256_vm4, %v3250_v2, %v3267_v21  ;;  %v10106_v30 = vmul.u32.u64.low %v10057_v52, %v3265_v0  ;;  %v10107_v34 = vmul.u32.u64.high %v10057_v52, %v3265_v0, %v10106_v30 }
 0x413   :  { %vm10100_vm15 = vcmp.le.f32.partialorder %v13185_v24, 0.7853982  ;;  %v3409_v8 = vmul.f32 %v3408_v9, %v3406_v42  ;;  %v3190_v11 = vsub.s32 32, %v10070_v13  ;;  %v3269_v48 = vsel %vm3255_vm1, %v3266_v20, %v3268_v29  ;;  %v2271_v20 = vpop.f32.mrf.mxu0 }
 0x414   :  { %v13187_v1 = vsel %vm10100_vm15, 4294967295, %v13186_v1  ;;  %v6079_v5 = vadd.s32 4294967169, %v3746_v43  ;;  %v3195_v33 = vadd.s32 127, %v3194_v50  ;;  %v6068_v24 = vmin.u32 %v3496_v57, %v10092_v19 }
 0x415   :  { %13188 = vst [vmem:[#allocation39_spill] sm:$0xff] %v13187_v1  ;;  %v10114_v40 = vmul.u32.u64.low %v10057_v52, %v3269_v48  ;;  %v10115_v63 = vmul.u32.u64.high %v10057_v52, %v3269_v48, %v10114_v40  ;;  %6639 = vsinq.f32 %v9989_v7  ;;  %v3174_v2 = vadd.s32 %v9940_v25, %v9950_v12 }
 0x416   :  { %v3261_v0 = vsel %vm3255_vm1, %v3258_v41, %v3260_v53  ;;  %v3752_v9 = vadd.s32 1, %v6079_v5  ;;  %v10125_v42 = vsel %vm10080_vm11, %v9552_v27, %v10051_v31  ;;  %v2891_v50 = vsel %vm12843_vm0, %v2890_v44, %v10037_v49 }
 0x417   :  { %v3498_v43 = vclz %v6068_v24  ;;  %v3280_v7 = vadd.s32 1, %v10107_v34  ;;  %v3410_v25 = vxor.u32 2147483648, %v3409_v8  ;;  %v3192_v12 = vshrl.u32 %v3174_v2, %v3190_v11 }
 0x418   :  { %v13189_v23 = vand.u32 2147483647, %v9984_v3  ;;  %vm3753_vm4 = vcmp.gt.s32.totalorder %v3752_v9, 0  ;;  %v3196_v53 = vshll.u32 %v3195_v33, 23  ;;  %v3277_v31 = vmul.u32 %v10057_v52, %v3261_v0 }
 0x419   :  { %vm3279_vm1 = vc.u32 %v10115_v63, %v10106_v30  ;;  %v3754_v21 = vsel %vm3753_vm4, %v3752_v9, 0  ;;  %v6069_v57 = vadd.s32 4294967294, %v3498_v43  ;;  %v10140_v29 = vadd.f32 %v2271_v20, %v9294_v61 }
 0x41a   :  { %v3749_v41 = vand.u32 8388607, %v13189_v23  ;;  %v3281_v49 = vsel %vm3279_vm1, %v3280_v7, %v10107_v34  ;;  %v3756_v44 = vand.u32 31, %v3754_v21  ;;  %6641 = vcosq.f32 %v10125_v42 }
 0x41b   :  { %vm12865_vm3 = vcmp.lt.s32.totalorder %v9722_v56, 0  ;;  %v3191_v11 = vshll.u32 %v10014_v38, %v10070_v13  ;;  %v3282_v48 = vadd.s32 %v3281_v49, %v3277_v31  ;;  %v10149_v52 = vsel %vm10100_vm15, %v9581_v39, %v2891_v50 }
 0x41c   :  { %v10153_v34 = vsel %vm12865_vm3, %v3410_v25, %v3409_v8  ;;  %v3750_v5 = vor.u32 8388608, %v3749_v41  ;;  %v3757_v61 = vsub.s32 32, %v3756_v44  ;;  %v10157_v24 = vor.u32 4788187, %v3196_v53 }
 0x41d   :  { %v10155_v33 = vor.u32 %v3192_v12, %v3191_v11  ;;  %v3486_v40 = vadd.s32 %v10033_v10, %v10040_v51  ;;  %v3283_v38 = vadd.s32 536870912, %v3282_v48  ;;  %vm6070_vm13 = vcmp.lt.s32.totalorder %v6069_v57, 0 }
 0x41e   :  { %v3760_v13 = vshrl.u32 %v12951_v17, %v3757_v61  ;;  %v3763_v2 = vshrl.u32 %v12952_v46, %v3757_v61  ;;  %v3537_v0 = vand.u32 2139095040, %v10140_v29  ;;  %v3759_v8 = vshll.u32 %v12945_v54, %v3756_v44 }
 0x41f   :  { %v10164_v9 = vshrl.u32 %v3283_v38, 30  ;;  %v3762_v50 = vshll.u32 %v12951_v17, %v3756_v44  ;;  %v3766_v43 = vshrl.u32 %v12950_v18, %v3757_v61  ;;  %v3755_v7 = vshrl.u32 %v3754_v21, 5 }
 0x420   :  { %v3765_v20 = vshll.u32 %v12952_v46, %v3756_v44  ;;  %v3768_v10 = vshll.u32 %v12950_v18, %v3756_v44  ;;  %v3769_v51 = vshrl.u32 %v12928_v35, %v3757_v61  ;;  %v3501_v25 = vsel %vm6070_vm13, 0, %v6069_v57 }
 0x421   :  { %v3285_v12 = vshll.u32 %v10164_v9, 30  ;;  %v3761_v23 = vor.u32 %v3760_v13, %v3759_v8  ;;  %v3764_v41 = vor.u32 %v3763_v2, %v3762_v50  ;;  %v3771_v49 = vshll.u32 %v12928_v35, %v3756_v44 }
 0x422   :  { %v3767_v53 = vor.u32 %v3766_v43, %v3765_v20  ;;  %v3770_v31 = vor.u32 %v3769_v51, %v3768_v10  ;;  %v3772_v11 = vshrl.u32 %v13092_v59, %v3757_v61  ;;  %v10175_v38 = vpop.eup %6639  ;;  %v3198_v21 = vand.u32 2147483647, %v10157_v24 }
 0x423   :  { %13190 = vst [vmem:[#allocation5_spill] sm:$0xff] %v10175_v38  ;;  %v10178_v22 = vsub.s32 %v3282_v48, %v3285_v12  ;;  %v10180_v1 = vshll.u32 %v3750_v5, 8  ;;  %v3538_v39 = vshrl.u32 %v3537_v0, 23  ;;  %v3502_v57 = vsub.s32 32, %v3501_v25 }
 0x424   :  { %v3506_v15 = vsub.s32 4294967266, %v3501_v25  ;;  %v3773_v28 = vor.u32 %v3772_v11, %v3771_v49  ;;  %vm3774_vm4 = vcmp.lt.s32.totalorder %v3755_v7, 1  ;;  %v13191_v13 = vand.u32 2147483647, %v9722_v56 }
 0x425   :  { %v3288_v44 = vsub.s32 0, %v10178_v22  ;;  %vm3776_vm13 = vcmp.lt.s32.totalorder %v3755_v7, 3  ;;  %vm3777_vm0 = vcmp.lt.s32.totalorder %v3755_v7, 4  ;;  %v3782_v48 = vsel %vm3774_vm4, %v3761_v23, %v3764_v41 }
 0x426   :  { %vm10184_vm1 = vcmp.le.f32.partialorder %v13191_v13, 0.7853982  ;;  %v3779_v24 = vsel %vm3777_vm0, %v3767_v53, 2102212464  ;;  %v3783_v5 = vsel %vm3777_vm0, %v3770_v31, 920167782  ;;  %v3786_v0 = vsel %vm3774_vm4, %v3764_v41, %v3767_v53 }
 0x427   :  { %v3787_v8 = vsel %vm3777_vm0, %v3773_v28, 1326507024  ;;  %v6060_v50 = vmin.u32 %v3288_v44, %v10178_v22  ;;  %v3758_v43 = vshrl.u32 %v12945_v54, %v3757_v61  ;;  %vm3775_vm10 = vcmp.lt.s32.totalorder %v3755_v7, 2  ;;  %v10194_v10 = vpop.eup %6641  ;;  %v6263_v61 = vpop.f32.mrf.mxu0 }
 0x428   :  { %v3784_v20 = vsel %vm3776_vm13, %v3767_v53, %v3783_v5  ;;  %13194 = vst [vmem:[#allocation10_spill] sm:$0xff] %v10194_v10  ;;  %v3788_v12 = vsel %vm3776_vm13, %v3770_v31, %v3787_v8  ;;  %v12848_v49 = vand.u32 2147483647, %v10140_v29  ;;  %v6071_v11 = vadd.s32 4294967169, %v3538_v39 }
 0x429   :  { %v3785_v51 = vsel %vm3775_vm10, %v3782_v48, %v3784_v20  ;;  %v3290_v13 = vclz %v6060_v50  ;;  %v3778_v38 = vsel %vm3774_vm4, %v3758_v43, %v3761_v23  ;;  %v3780_v28 = vsel %vm3776_vm13, %v3764_v41, %v3779_v24 }
 0x42a   :  { %v3789_v44 = vsel %vm3775_vm10, %v3786_v0, %v3788_v12  ;;  %v10207_v5 = vmul.u32.u64.low %v10180_v1, %v3785_v51  ;;  %v10208_v48 = vmul.u32.u64.high %v10180_v1, %v3785_v51, %v10207_v5  ;;  %v3504_v31 = vshrl.u32 %v3486_v40, %v3502_v57 }
 0x42b   :  { %v10203_v26 = vmul.u32.u64.low %v10180_v1, %v3789_v44  ;;  %v10204_v53 = vmul.u32.u64.high %v10180_v1, %v3789_v44, %v10203_v26  ;;  %v3507_v8 = vadd.s32 127, %v3506_v15  ;;  %v6061_v39 = vadd.s32 4294967294, %v3290_v13 }
 0x42c   :  { %v3544_v50 = vadd.s32 1, %v6071_v11  ;;  %6643 = vsinq.f32 %v10125_v42  ;;  %v3200_v23 = vcvt.s32.f32 %v10155_v33  ;;  %v3541_v41 = vand.u32 8388607, %v12848_v49 }
 0x42d   :  { %v10216_v24 = vadd.f32 %v6263_v61, %v9296_v6  ;;  %6645 = vcosq.f32 %v10149_v52  ;;  %v3503_v26 = vshll.u32 %v10092_v19, %v3501_v25  ;;  %v3781_v0 = vsel %vm3775_vm10, %v3778_v38, %v3780_v28  ;;  %v2274_v6 = vpop.f32.mrf.mxu0 }
 0x42e   :  { %vm3545_vm0 = vcmp.gt.s32.totalorder %v3544_v50, 0  ;;  %6647 = vsinq.f32 %v10149_v52  ;;  %v10226_v15 = vsel %vm10184_vm1, %v9722_v56, %v10153_v34  ;;  %v10228_v42 = vmul.f32 %v3200_v23, %v3198_v21 }
 0x42f   :  { %vm3799_vm4 = vc.u32 %v10204_v53, %v10207_v5  ;;  %v10232_v33 = vor.u32 %v3504_v31, %v3503_v26  ;;  %v3508_v19 = vshll.u32 %v3507_v8, 23  ;;  %vm6062_vm13 = vcmp.lt.s32.totalorder %v6061_v39, 0 }
 0x430   :  { %v3800_v40 = vadd.s32 1, %v10208_v48  ;;  %v3797_v52 = vmul.u32 %v10180_v1, %v3781_v0  ;;  %v3542_v7 = vor.u32 8388608, %v3541_v41  ;;  %v3546_v25 = vsel %vm3545_vm0, %v3544_v50, 0 }
 0x431   :  { %v3849_v38 = vand.u32 2139095040, %v10216_v24  ;;  %6649 = vcosq.f32 %v10226_v15  ;;  %v10240_v21 = vadd.f32 %v2274_v6, %v9300_v37  ;;  %v10243_v43 = vsel %vm6062_vm13, 0, %v6061_v39 }
 0x432   :  { %v3801_v34 = vsel %vm3799_vm4, %v3800_v40, %v10208_v48  ;;  %v3548_v51 = vand.u32 31, %v3546_v25  ;;  %v10245_v12 = vor.u32 4788187, %v3508_v19  ;;  %v10250_v11 = vadd.s32 %v10106_v30, %v10115_v63 }
 0x433   :  { %v3802_v20 = vadd.s32 %v3801_v34, %v3797_v52  ;;  %v12850_v13 = vand.u32 2147483647, %v10216_v24  ;;  %v10253_v37 = vshll.u32 %v3542_v7, 8  ;;  %v3850_v61 = vshrl.u32 %v3849_v38, 23 }
 0x434   :  { %v3549_v44 = vsub.s32 32, %v3548_v51  ;;  %v3298_v48 = vsub.s32 4294967266, %v10243_v43  ;;  %v3547_v31 = vshrl.u32 %v3546_v25, 5  ;;  %v3551_v8 = vshll.u32 %v12945_v54, %v3548_v51 }
 0x435   :  { %v3803_v28 = vadd.s32 536870912, %v3802_v20  ;;  %v3554_v39 = vshll.u32 %v12951_v17, %v3548_v51  ;;  %v3557_v63 = vshll.u32 %v12952_v46, %v3548_v51  ;;  %v3560_v26 = vshll.u32 %v12950_v18, %v3548_v51 }
 0x436   :  { %v3552_v23 = vshrl.u32 %v12951_v17, %v3549_v44  ;;  %v3555_v30 = vshrl.u32 %v12952_v46, %v3549_v44  ;;  %v3558_v41 = vshrl.u32 %v12950_v18, %v3549_v44  ;;  %v3561_v0 = vshrl.u32 %v12928_v35, %v3549_v44 }
 0x437   :  { %v10258_v50 = vshrl.u32 %v3803_v28, 30  ;;  %v3563_v6 = vshll.u32 %v12928_v35, %v3548_v51  ;;  %v3564_v7 = vshrl.u32 %v13092_v59, %v3549_v44  ;;  %vm3566_vm10 = vcmp.lt.s32.totalorder %v3547_v31, 1 }
 0x438   :  { %v3553_v40 = vor.u32 %v3552_v23, %v3551_v8  ;;  %v3556_v52 = vor.u32 %v3555_v30, %v3554_v39  ;;  %v3559_v38 = vor.u32 %v3558_v41, %v3557_v63  ;;  %v3562_v34 = vor.u32 %v3561_v0, %v3560_v26 }
 0x439   :  { %v3805_v19 = vshll.u32 %v10258_v50, 30  ;;  %v10269_v25 = vpop.eup %6643  ;;  %v6083_v28 = vadd.s32 4294967169, %v3850_v61  ;;  %v3565_v57 = vor.u32 %v3564_v7, %v3563_v6  ;;  %vm3567_vm0 = vcmp.lt.s32.totalorder %v3547_v31, 2 }
 0x43a   :  { %13195 = vst [vmem:[#allocation11_spill] sm:$0xff] %v10269_v25  ;;  %v10271_v49 = vpop.eup %6645  ;;  %vm3569_vm4 = vcmp.lt.s32.totalorder %v3547_v31, 4  ;;  %vm3568_vm13 = vcmp.lt.s32.totalorder %v3547_v31, 3  ;;  %v3574_v39 = vsel %vm3566_vm10, %v3553_v40, %v3556_v52  ;;  %v3550_v63 = vshrl.u32 %v12945_v54, %v3549_v44 }
 0x43b   :  { %13196 = vst [vmem:[#allocation24_spill] sm:$0xff] %v10271_v49  ;;  %v10273_v1 = vsub.s32 %v3802_v20, %v3805_v19  ;;  %v10275_v51 = vpop.eup %6647  ;;  %v3571_v8 = vsel %vm3569_vm4, %v3559_v38, 2102212464  ;;  %v3575_v23 = vsel %vm3569_vm4, %v3562_v34, 920167782  ;;  %v3578_v41 = vsel %vm3566_vm10, %v3556_v52, %v3559_v38 }
 0x43c   :  { %13197 = vst [vmem:[#allocation25_spill] sm:$0xff] %v10275_v51  ;;  %v3576_v61 = vsel %vm3568_vm13, %v3559_v38, %v3575_v23  ;;  %v3579_v26 = vsel %vm3569_vm4, %v3565_v57, 1326507024  ;;  %v10285_v0 = vand.u32 8388607, %v12850_v13  ;;  %v3856_v6 = vadd.s32 1, %v6083_v28 }
 0x43d   :  { %v3808_v30 = vsub.s32 0, %v10273_v1  ;;  %v3577_v20 = vsel %vm3567_vm0, %v3574_v39, %v3576_v61  ;;  %v3570_v49 = vsel %vm3566_vm10, %v3550_v63, %v3553_v40  ;;  %v3572_v44 = vsel %vm3568_vm13, %v3556_v52, %v3571_v8 }
 0x43e   :  { %v10287_v19 = vpop.eup %6649  ;;  %v3580_v23 = vsel %vm3568_vm13, %v3562_v34, %v3579_v26  ;;  %v3294_v38 = vsub.s32 32, %v10243_v43  ;;  %v10296_v57 = vmul.u32.u64.low %v10253_v37, %v3577_v20  ;;  %v10297_v61 = vmul.u32.u64.high %v10253_v37, %v3577_v20, %v10296_v57  ;;  %v6545_v20 = vld [vmem:[%s12666_s3 + $0x40] sm:$0xff]  }
 0x43f   :  { %v6080_v7 = vmin.u32 %v3808_v30, %v10273_v1  ;;  %v3581_v39 = vsel %vm3567_vm0, %v3578_v41, %v3580_v23  ;;  %v3299_v28 = vadd.s32 127, %v3298_v48  ;;  %v3573_v52 = vsel %vm3567_vm0, %v3570_v49, %v3572_v44  ;;  %6280 = vmatprep.mubr.bf16.mxu1 %v6545_v20 }
 0x440   :  { %v10301_v51 = vmul.u32.u64.low %v10253_v37, %v3581_v39  ;;  %v10302_v30 = vmul.u32.u64.high %v10253_v37, %v3581_v39, %v10301_v51  ;;  %vm3857_vm10 = vcmp.gt.s32.totalorder %v3856_v6, 0  ;;  %v3798_v63 = vadd.s32 %v10207_v5, %v10204_v53 }
 0x441   :  { %v3810_v13 = vclz %v6080_v7  ;;  %v3858_v48 = vsel %vm3857_vm10, %v3856_v6, 0  ;;  %v10315_v51 = vshrl.u32 %v10250_v11, %v3294_v38  ;;  %v3592_v49 = vadd.s32 1, %v10297_v61 }
 0x442   :  { %v3854_v31 = vor.u32 8388608, %v10285_v0  ;;  %v3860_v26 = vand.u32 31, %v3858_v48  ;;  %v3300_v7 = vshll.u32 %v3299_v28, 23  ;;  %v3589_v44 = vmul.u32 %v10253_v37, %v3573_v52 }
 0x443   :  { %v6081_v41 = vadd.s32 4294967294, %v3810_v13  ;;  %vm3591_vm4 = vc.u32 %v10302_v30, %v10296_v57  ;;  %v3641_v11 = vand.u32 2139095040, %v10240_v21  ;;  %v3859_v39 = vshrl.u32 %v3858_v48, 5 }
 0x444   :  { %v3593_v5 = vsel %vm3591_vm4, %v3592_v49, %v10297_v61  ;;  %v3861_v13 = vsub.s32 32, %v3860_v26  ;;  %v3863_v28 = vshll.u32 %v12945_v54, %v3860_v26  ;;  %v3866_v61 = vshll.u32 %v12951_v17, %v3860_v26 }
 0x445   :  { %vm6082_vm0 = vcmp.lt.s32.totalorder %v6081_v41, 0  ;;  %v3594_v38 = vadd.s32 %v3593_v5, %v3589_v44  ;;  %v3869_v40 = vshll.u32 %v12952_v46, %v3860_v26  ;;  %v3872_v48 = vshll.u32 %v12950_v18, %v3860_v26 }
 0x446   :  { %v3813_v53 = vsel %vm6082_vm0, 0, %v6081_v41  ;;  %v3864_v37 = vshrl.u32 %v12951_v17, %v3861_v13  ;;  %v3867_v52 = vshrl.u32 %v12952_v46, %v3861_v13  ;;  %v3870_v34 = vshrl.u32 %v12950_v18, %v3861_v13 }
 0x447   :  { %v3814_v6 = vsub.s32 32, %v3813_v53  ;;  %v3818_v23 = vsub.s32 4294967266, %v3813_v53  ;;  %v3815_v0 = vshll.u32 %v10273_v1, %v3813_v53  ;;  %v3595_v41 = vadd.s32 536870912, %v3594_v38 }
 0x448   :  { %v3865_v49 = vor.u32 %v3864_v37, %v3863_v28  ;;  %v3873_v5 = vshrl.u32 %v12928_v35, %v3861_v13  ;;  %v3868_v10 = vor.u32 %v3867_v52, %v3866_v61  ;;  %v3871_v25 = vor.u32 %v3870_v34, %v3869_v40 }
 0x449   :  { %v3816_v8 = vshrl.u32 %v3798_v63, %v3814_v6  ;;  %v3819_v20 = vadd.s32 127, %v3818_v23  ;;  %v10332_v53 = vshrl.u32 %v3595_v41, 30  ;;  %v3875_v63 = vshll.u32 %v12928_v35, %v3860_v26 }
 0x44a   :  { %v3876_v6 = vshrl.u32 %v13092_v59, %v3861_v13  ;;  %vm12864_vm13 = vcmp.lt.s32.totalorder %v9804_v58, 0  ;;  %v10338_v23 = vor.u32 4788187, %v3300_v7  ;;  %v3874_v37 = vor.u32 %v3873_v5, %v3872_v48 }
 0x44b   :  { %v3817_v44 = vor.u32 %v3816_v8, %v3815_v0  ;;  %v3820_v1 = vshll.u32 %v3819_v20, 23  ;;  %v3597_v28 = vshll.u32 %v10332_v53, 30  ;;  %v3894_v32 = vshll.u32 %v3854_v31, 8 }
 0x44c   :  { %v3862_v0 = vshrl.u32 %v12945_v54, %v3861_v13  ;;  %v3877_v20 = vor.u32 %v3876_v6, %v3875_v63  ;;  %v3642_v41 = vshrl.u32 %v3641_v11, 23  ;;  %vm3878_vm10 = vcmp.lt.s32.totalorder %v3859_v39, 1 }
 0x44d   :  { %v3821_v8 = vor.u32 4788187, %v3820_v1  ;;  %v3824_v27 = vcvt.s32.f32 %v3817_v44  ;;  %v10342_v52 = vsub.s32 %v3594_v38, %v3597_v28  ;;  %vm3881_vm0 = vcmp.lt.s32.totalorder %v3859_v39, 4 }
 0x44e   :  { %vm3880_vm4 = vcmp.lt.s32.totalorder %v3859_v39, 3  ;;  %v3883_v40 = vsel %vm3881_vm0, %v3871_v25, 2102212464  ;;  %v3886_v34 = vsel %vm3878_vm10, %v3865_v49, %v3868_v10  ;;  %v3887_v26 = vsel %vm3881_vm0, %v3874_v37, 920167782 }
 0x44f   :  { %v3600_v7 = vsub.s32 0, %v10342_v52  ;;  %vm3879_vm12 = vcmp.lt.s32.totalorder %v3859_v39, 2  ;;  %v3888_v61 = vsel %vm3880_vm4, %v3871_v25, %v3887_v26  ;;  %v3890_v48 = vsel %vm3878_vm10, %v3868_v10, %v3871_v25 }
 0x450   :  { %v3822_v31 = vand.u32 2147483647, %v3821_v8  ;;  %v3889_v1 = vsel %vm3879_vm12, %v3886_v34, %v3888_v61  ;;  %v3891_v13 = vsel %vm3881_vm0, %v3877_v20, 1326507024  ;;  %v6075_v5 = vadd.s32 4294967169, %v3642_v41 }
 0x451   :  { %v6072_v11 = vmin.u32 %v3600_v7, %v10342_v52  ;;  %v3882_v38 = vsel %vm3878_vm10, %v3862_v0, %v3865_v49  ;;  %v3884_v44 = vsel %vm3880_vm4, %v3868_v10, %v3883_v40  ;;  %v3892_v63 = vsel %vm3880_vm4, %v3874_v37, %v3891_v13 }
 0x452   :  { %v3893_v6 = vsel %vm3879_vm12, %v3890_v48, %v3892_v63  ;;  %v10348_v28 = vmul.u32.u64.low %v3894_v32, %v3889_v1  ;;  %v10349_v55 = vmul.u32.u64.high %v3894_v32, %v3889_v1, %v10348_v28  ;;  %v3648_v47 = vadd.s32 1, %v6075_v5 }
 0x453   :  { %v3602_v36 = vclz %v6072_v11  ;;  %v10352_v26 = vmul.u32.u64.low %v3894_v32, %v3893_v6  ;;  %v10353_v25 = vmul.u32.u64.high %v3894_v32, %v3893_v6, %v10352_v26  ;;  %v13198_v8 = vand.u32 2147483647, %v10240_v21 }
 0x454   :  { %v13199_v49 = vxor.u32 2147483648, %v10228_v42  ;;  %v3825_v37 = vmul.f32 %v3824_v27, %v3822_v31  ;;  %v3885_v0 = vsel %vm3879_vm12, %v3882_v38, %v3884_v44  ;;  %vm3649_vm10 = vcmp.gt.s32.totalorder %v3648_v47, 0 }
 0x455   :  { %v10357_v20 = vand.u32 8388607, %v13198_v8  ;;  %v13200_v41 = vand.u32 2147483647, %v10245_v12  ;;  %v13201_v40 = vcvt.s32.f32 %v10232_v33  ;;  %v13202_v7 = vshll.u32 %v10178_v22, %v10243_v43 }
 0x456   :  { %v10364_v10 = vsel %vm12864_vm13, %v13199_v49, %v10228_v42  ;;  %v6073_v48 = vadd.s32 4294967294, %v3602_v36  ;;  %v3650_v1 = vsel %vm3649_vm10, %v3648_v47, 0  ;;  %v3302_v42 = vand.u32 2147483647, %v10338_v23 }
 0x457   :  { %v10371_v34 = vmul.f32 %v13201_v40, %v13200_v41  ;;  %v10377_v61 = vor.u32 %v10315_v51, %v13202_v7  ;;  %vm12866_vm0 = vcmp.lt.s32.totalorder %v9984_v3, 0  ;;  %v3590_v27 = vadd.s32 %v10296_v57, %v10302_v30 }
 0x458   :  { %v3904_v12 = vadd.s32 1, %v10349_v55  ;;  %v3652_v33 = vand.u32 31, %v3650_v1  ;;  %vm6074_vm12 = vcmp.lt.s32.totalorder %v6073_v48, 0  ;;  %v3901_v39 = vmul.u32 %v3894_v32, %v3885_v0 }
 0x459   :  { %vm3903_vm4 = vc.u32 %v10353_v25, %v10348_v28  ;;  %v3646_v22 = vor.u32 8388608, %v10357_v20  ;;  %v3826_v43 = vxor.u32 2147483648, %v3825_v37  ;;  %v3605_v36 = vsel %vm6074_vm12, 0, %v6073_v48 }
 0x45a   :  { %v3905_v47 = vsel %vm3903_vm4, %v3904_v12, %v10349_v55  ;;  %v3653_v51 = vsub.s32 32, %v3652_v33  ;;  %v3606_v31 = vsub.s32 32, %v3605_v36  ;;  %v3610_v13 = vsub.s32 4294967266, %v3605_v36 }
 0x45b   :  { %v3906_v5 = vadd.s32 %v3905_v47, %v3901_v39  ;;  %v3651_v11 = vshrl.u32 %v3650_v1, 5  ;;  %v3607_v57 = vshll.u32 %v10342_v52, %v3605_v36  ;;  %v3655_v30 = vshll.u32 %v12945_v54, %v3652_v33 }
 0x45c   :  { %v3656_v32 = vshrl.u32 %v12951_v17, %v3653_v51  ;;  %v3659_v38 = vshrl.u32 %v12952_v46, %v3653_v51  ;;  %v3608_v44 = vshrl.u32 %v3590_v27, %v3606_v31  ;;  %v3611_v63 = vadd.s32 127, %v3610_v13 }
 0x45d   :  { %v3907_v6 = vadd.s32 536870912, %v3906_v5  ;;  %v3658_v26 = vshll.u32 %v12951_v17, %v3652_v33  ;;  %v13203_v55 = vand.u32 2147483647, %v9984_v3  ;;  %v3661_v52 = vshll.u32 %v12952_v46, %v3652_v33 }
 0x45e   :  { %v3657_v20 = vor.u32 %v3656_v32, %v3655_v30  ;;  %v3662_v49 = vshrl.u32 %v12950_v18, %v3653_v51  ;;  %v3664_v0 = vshll.u32 %v12950_v18, %v3652_v33  ;;  %v3609_v41 = vor.u32 %v3608_v44, %v3607_v57 }
 0x45f   :  { %vm10395_vm10 = vcmp.le.f32.partialorder %v13203_v55, 0.7853982  ;;  %v3612_v40 = vshll.u32 %v3611_v63, 23  ;;  %v10402_v7 = vshrl.u32 %v3907_v6, 30  ;;  %v3665_v48 = vshrl.u32 %v12928_v35, %v3653_v51 }
 0x460   :  { %v3660_v1 = vor.u32 %v3659_v38, %v3658_v26  ;;  %v3663_v27 = vor.u32 %v3662_v49, %v3661_v52  ;;  %v3667_v12 = vshll.u32 %v12928_v35, %v3652_v33  ;;  %v3668_v39 = vshrl.u32 %v13092_v59, %v3653_v51 }
 0x461   :  { %v3827_v36 = vsel %vm12866_vm0, %v3826_v43, %v3825_v37  ;;  %v3613_v47 = vor.u32 4788187, %v3612_v40  ;;  %v3909_v31 = vshll.u32 %v10402_v7, 30  ;;  %v3666_v13 = vor.u32 %v3665_v48, %v3664_v0 }
 0x462   :  { %v13206_v57 = vand.u32 2147483647, %v9804_v58  ;;  %v3616_v32 = vcvt.s32.f32 %v3609_v41  ;;  %v3654_v38 = vshrl.u32 %v12945_v54, %v3653_v51  ;;  %v3669_v44 = vor.u32 %v3668_v39, %v3667_v12 }
 0x463   :  { %vm3670_vm4 = vcmp.lt.s32.totalorder %v3651_v11, 1  ;;  %v3614_v33 = vand.u32 2147483647, %v3613_v47  ;;  %v10417_v63 = vsub.s32 %v3906_v5, %v3909_v31  ;;  %vm3671_vm5 = vcmp.lt.s32.totalorder %v3651_v11, 2 }
 0x464   :  { %vm10412_vm12 = vcmp.le.f32.partialorder %v13206_v57, 0.7853982  ;;  %vm3673_vm13 = vcmp.lt.s32.totalorder %v3651_v11, 4  ;;  %vm3672_vm3 = vcmp.lt.s32.totalorder %v3651_v11, 3  ;;  %v3678_v43 = vsel %vm3670_vm4, %v3657_v20, %v3660_v1 }
 0x465   :  { %v3675_v37 = vsel %vm3673_vm13, %v3663_v27, 2102212464  ;;  %v3679_v6 = vsel %vm3673_vm13, %v3666_v13, 920167782  ;;  %v3617_v26 = vmul.f32 %v3616_v32, %v3614_v33  ;;  %v3912_v55 = vsub.s32 0, %v10417_v63 }
 0x466   :  { %v3680_v52 = vsel %vm3672_vm3, %v3663_v27, %v3679_v6  ;;  %v3682_v51 = vsel %vm3670_vm4, %v3660_v1, %v3663_v27  ;;  %v3683_v5 = vsel %vm3673_vm13, %v3669_v44, 1326507024  ;;  %v3686_v0 = vshll.u32 %v3646_v22, 8 }
 0x467   :  { %v3681_v49 = vsel %vm3671_vm5, %v3678_v43, %v3680_v52  ;;  %v3830_v41 = vsel %vm10395_vm10, %v9984_v3, %v3827_v36  ;;  %v6084_v40 = vmin.u32 %v3912_v55, %v10417_v63  ;;  %v3674_v48 = vsel %vm3670_vm4, %v3654_v38, %v3657_v20 }
 0x468   :  { %v3676_v12 = vsel %vm3672_vm3, %v3660_v1, %v3675_v37  ;;  %v3684_v39 = vsel %vm3672_vm3, %v3666_v13, %v3683_v5  ;;  %v10433_v31 = vmul.u32.u64.low %v3686_v0, %v3681_v49  ;;  %v10434_v27 = vmul.u32.u64.high %v3686_v0, %v3681_v49, %v10433_v31 }
 0x469   :  { %v3685_v47 = vsel %vm3671_vm5, %v3682_v51, %v3684_v39  ;;  %v3828_v22 = vsub.s32 4, %v10258_v50  ;;  %v3618_v57 = vxor.u32 2147483648, %v3617_v26  ;;  %v3914_v32 = vclz %v6084_v40 }
 0x46a   :  { %v10438_v44 = vmul.u32.u64.low %v3686_v0, %v3685_v47  ;;  %v10439_v36 = vmul.u32.u64.high %v3686_v0, %v3685_v47, %v10438_v44  ;;  %v3514_v33 = vxor.u32 2147483648, %v10371_v34  ;;  %v3304_v20 = vcvt.s32.f32 %v10377_v61 }
 0x46b   :  { %v3677_v1 = vsel %vm3671_vm5, %v3674_v48, %v3676_v12  ;;  %6651 = vsinq.f32 %v3830_v41  ;;  %v3206_v13 = vsel %vm10412_vm12, %v9804_v58, %v10364_v10  ;;  %v13209_v38 = vand.u32 2147483647, %v9874_v45 }
 0x46c   :  { %v6085_v43 = vadd.s32 4294967294, %v3914_v32  ;;  %6653 = vcosq.f32 %v3830_v41  ;;  %v3305_v6 = vmul.f32 %v3304_v20, %v3302_v42  ;;  %vm3536_vm13 = vcmp.lt.s32.totalorder %v10140_v29, 0 }
 0x46d   :  { %vm10450_vm3 = vcmp.le.f32.partialorder %v13209_v38, 0.7853982  ;;  %v3696_v61 = vadd.s32 1, %v10434_v27  ;;  %vm13212_vm5 = vcmp.lt.s32.totalorder %v9984_v3, 0  ;;  %v3619_v10 = vsel %vm3536_vm13, %v3618_v57, %v3617_v26 }
 0x46e   :  { %v3829_v11 = vsel %vm13212_vm5, %v3828_v22, %v10258_v50  ;;  %vm6086_vm4 = vcmp.lt.s32.totalorder %v6085_v43, 0  ;;  %v3693_v55 = vmul.u32 %v3686_v0, %v3677_v1  ;;  %vm3695_vm0 = vc.u32 %v10439_v36, %v10433_v31 }
 0x46f   :  { %vm13213_vm8 = vcmp.lt.s32.totalorder %v9874_v45, 0  ;;  %v13214_v42 = vand.u32 2147483647, %v10140_v29  ;;  %v3917_v51 = vsel %vm6086_vm4, 0, %v6085_v43  ;;  %v3697_v50 = vsel %vm3695_vm0, %v3696_v61, %v10434_v27 }
 0x470   :  { %v3515_v23 = vsel %vm13213_vm8, %v3514_v33, %v10371_v34  ;;  %v3902_v26 = vadd.s32 %v10348_v28, %v10353_v25  ;;  %v3918_v49 = vsub.s32 32, %v3917_v51  ;;  %v3922_v5 = vsub.s32 4294967266, %v3917_v51 }
 0x471   :  { %vm10470_vm7 = vcmp.le.f32.partialorder %v13214_v42, 0.7853982  ;;  %v3698_v0 = vadd.s32 %v3697_v50, %v3693_v55  ;;  %6655 = vsinq.f32 %v10226_v15  ;;  %v3306_v41 = vxor.u32 2147483648, %v3305_v6 }
 0x472   :  { %v3622_v34 = vsel %vm10470_vm7, %v10140_v29, %v3619_v10  ;;  %v3831_v40 = vsel %vm10395_vm10, 0, %v3829_v11  ;;  %v3919_v48 = vshll.u32 %v10417_v63, %v3917_v51  ;;  %v3920_v12 = vshrl.u32 %v3902_v26, %v3918_v49 }
 0x473   :  { %v3923_v39 = vadd.s32 127, %v3922_v5  ;;  %v3699_v47 = vadd.s32 536870912, %v3698_v0  ;;  %6657 = vcosq.f32 %v3206_v13  ;;  %v3518_v28 = vsel %vm10450_vm3, %v9874_v45, %v3515_v23 }
 0x474   :  { %vm12869_vm8 = vcmp.lt.s32.totalorder %v9947_v16, 0  ;;  %6659 = vcosq.f32 %v3622_v34  ;;  %v3921_v15 = vor.u32 %v3920_v12, %v3919_v48  ;;  %v3835_v22 = vadd.s32 3, %v3831_v40 }
 0x475   :  { %v3924_v25 = vshll.u32 %v3923_v39, 23  ;;  %v3700_v27 = vshrl.u32 %v3699_v47, 30  ;;  %v3307_v8 = vsel %vm12869_vm8, %v3306_v41, %v3305_v6  ;;  %6661 = vsinq.f32 %v3622_v34 }
 0x476   :  { %v3932_v63 = vsub.s32 4, %v10402_v7  ;;  %6663 = vsinq.f32 %v3206_v13  ;;  %v3620_v44 = vsub.s32 4, %v10332_v53  ;;  %v13217_v33 = vand.u32 2147483647, %v9947_v16 }
 0x477   :  { %v3925_v57 = vor.u32 4788187, %v3924_v25  ;;  %v3701_v32 = vshll.u32 %v3700_v27, 30  ;;  %6665 = vcosq.f32 %v3518_v28  ;;  %vm3848_vm10 = vcmp.lt.s32.totalorder %v10216_v24, 0 }
 0x478   :  { %vm10494_vm0 = vcmp.le.f32.partialorder %v13217_v33, 0.7853982  ;;  %v6652_v1 = vpop.eup %6651  ;;  %v3928_v13 = vcvt.s32.f32 %v3921_v15  ;;  %6667 = vsinq.f32 %v3518_v28  ;;  %v3836_v11 = vand.u32 3, %v3835_v22 }
 0x479   :  { %v3310_v38 = vsel %vm10494_vm0, %v9947_v16, %v3307_v8  ;;  %v3926_v43 = vand.u32 2147483647, %v3925_v57  ;;  %v10502_v6 = vsub.s32 %v3698_v0, %v3701_v32  ;;  %v6654_v61 = vpop.eup %6653  ;;  %v3933_v10 = vsel %vm3848_vm10, %v3932_v63, %v10402_v7 }
 0x47a   :  { %v3621_v42 = vsel %vm3536_vm13, %v3620_v44, %v10332_v53  ;;  %v3412_v51 = vsub.s32 4, %v9901_v62  ;;  %6669 = vcosq.f32 %v3310_v38  ;;  %v3839_v50 = vxor.u32 2147483648, %v6652_v1 }
 0x47b   :  { %v3929_v55 = vmul.f32 %v3928_v13, %v3926_v43  ;;  %v3704_v23 = vsub.s32 0, %v10502_v6  ;;  %v13220_v26 = vand.u32 2147483647, %v10216_v24  ;;  %v3516_v5 = vsub.s32 4, %v10074_v60 }
 0x47c   :  { %v3842_v41 = vxor.u32 2147483648, %v6654_v61  ;;  %6671 = vsinq.f32 %v3310_v38  ;;  %vm3838_vm13 = vcmp.eq.s32.totalorder %v3836_v11, 0  ;;  %vm3841_vm8 = vcmp.eq.s32.totalorder %v3836_v11, 2 }
 0x47d   :  { %vm10515_vm4 = vcmp.le.f32.partialorder %v13220_v26, 0.7853982  ;;  %v3930_v7 = vxor.u32 2147483648, %v3929_v55  ;;  %v6076_v0 = vmin.u32 %v3704_v23, %v10502_v6  ;;  %v3623_v53 = vsel %vm10470_vm7, 0, %v3621_v42 }
 0x47e   :  { %v3935_v34 = vsel %vm10515_vm4, 0, %v3933_v10  ;;  %v10525_v40 = vpop.eup %6655  ;;  %v3724_v39 = vsub.s32 4, %v3700_v27  ;;  %vm13223_vm5 = vcmp.lt.s32.totalorder %v9722_v56, 0  ;;  %v3840_v28 = vsel %vm3838_vm13, %v6654_v61, %v3839_v50 }
 0x47f   :  { %v3931_v48 = vsel %vm3848_vm10, %v3930_v7, %v3929_v55  ;;  %v3706_v12 = vclz %v6076_v0  ;;  %v3413_v47 = vsel %vm13223_vm5, %v3412_v51, %v9901_v62  ;;  %v3939_v25 = vadd.s32 3, %v3935_v34 }
 0x480   :  { %v3934_v15 = vsel %vm10515_vm4, %v10216_v24, %v3931_v48  ;;  %vm13224_vm7 = vcmp.lt.s32.totalorder %v9874_v45, 0  ;;  %v10538_v8 = vpop.eup %6657  ;;  %v3843_v63 = vsel %vm3841_vm8, %v3842_v41, %v6652_v1  ;;  %v3627_v57 = vadd.s32 3, %v3623_v53 }
 0x481   :  { %v3517_v52 = vsel %vm13224_vm7, %v3516_v5, %v10074_v60  ;;  %v6077_v22 = vadd.s32 4294967294, %v3706_v12  ;;  %6673 = vcosq.f32 %v3934_v15  ;;  %v6660_v32 = vpop.eup %6659  ;;  %v13225_v44 = vand.u32 2147483647, %v10240_v21 }
 0x482   :  { %vm3834_vm5 = vweird.f32 %v9984_v3  ;;  %6675 = vsinq.f32 %v3934_v15  ;;  %v3415_v33 = vsel %vm10184_vm1, 0, %v3413_v47  ;;  %v6662_v60 = vpop.eup %6661  ;;  %vm3837_vm13 = vcmp.lt.s32.totalorder %v3836_v11, 2 }
 0x483   :  { %vm10542_vm10 = vcmp.le.f32.partialorder %v13225_v44, 0.7853982  ;;  %vm6078_vm4 = vcmp.lt.s32.totalorder %v6077_v22, 0  ;;  %vm13228_vm8 = vcmp.lt.s32.totalorder %v10240_v21, 0  ;;  %v3519_v38 = vsel %vm10450_vm3, 0, %v3517_v52  ;;  %v10553_v43 = vpop.eup %6663 }
 0x484   :  { %v3725_v1 = vsel %vm13228_vm8, %v3724_v39, %v3700_v27  ;;  %v3694_v13 = vadd.s32 %v10433_v31, %v10439_v36  ;;  %v3709_v61 = vsel %vm6078_vm4, 0, %v6077_v22  ;;  %v3844_v10 = vsel %vm3837_vm13, %v3840_v28, %v3843_v63  ;;  %v6666_v2 = vpop.eup %6665 }
 0x485   :  { %v10557_v55 = vand.u32 3, %v3939_v25  ;;  %v3710_v23 = vsub.s32 32, %v3709_v61  ;;  %v3714_v42 = vsub.s32 4294967266, %v3709_v61  ;;  %v10559_v51 = vand.u32 3, %v3627_v57  ;;  %v6668_v49 = vpop.eup %6667 }
 0x486   :  { %v3419_v11 = vadd.s32 3, %v3415_v33  ;;  %v3631_v50 = vxor.u32 2147483648, %v6662_v60  ;;  %v3634_v27 = vxor.u32 2147483648, %v6660_v32  ;;  %v3727_v37 = vsel %vm10542_vm10, 0, %v3725_v1 }
 0x487   :  { %v3523_v26 = vadd.s32 3, %v3519_v38  ;;  %v3711_v5 = vshll.u32 %v10502_v6, %v3709_v61  ;;  %v3712_v31 = vshrl.u32 %v3694_v13, %v3710_v23  ;;  %v3715_v36 = vadd.s32 127, %v3714_v42  ;;  %v10572_v53 = vpop.eup %6669 }
 0x488   :  { %v3204_v7 = vsub.s32 4, %v9999_v4  ;;  %v10567_v0 = vsel %vm3834_vm5, nan, %v3844_v10  ;;  %v3423_v41 = vxor.u32 2147483648, %v10525_v40  ;;  %v3426_v34 = vxor.u32 2147483648, %v10287_v19 }
 0x489   :  { %v3713_v48 = vor.u32 %v3712_v31, %v3711_v5  ;;  %v3716_v12 = vshll.u32 %v3715_v36, 23  ;;  %vm3633_vm4 = vcmp.eq.s32.totalorder %v10559_v51, 2  ;;  %v3420_v6 = vand.u32 3, %v3419_v11  ;;  %v10580_v28 = vpop.eup %6671  ;;  %v13236_v31 = vld [vmem:[#allocation33_spill] sm:$0xff]  ;;  %v13273_v36 = vld [vmem:[#allocation43_spill] sm:$0xff] }
 0x48a   :  { %vm3630_vm13 = vcmp.eq.s32.totalorder %v10559_v51, 0  ;;  %v3635_v3 = vsel %vm3633_vm4, %v3634_v27, %v6662_v60  ;;  %v3731_v39 = vadd.s32 3, %v3727_v37  ;;  %v3308_v47 = vsub.s32 4, %v10164_v9 }
 0x48b   :  { %v3717_v15 = vor.u32 4788187, %v3716_v12  ;;  %v3632_v25 = vsel %vm3630_vm13, %v6660_v32, %v3631_v50  ;;  %v3524_v52 = vand.u32 3, %v3523_v26  ;;  %vm13229_vm7 = vcmp.lt.s32.totalorder %v9804_v58, 0 }
 0x48c   :  { %v3205_v22 = vsel %vm13229_vm7, %v3204_v7, %v9999_v4  ;;  %v3527_v63 = vxor.u32 2147483648, %v6668_v49  ;;  %v3530_v57 = vxor.u32 2147483648, %v6666_v2  ;;  %vm13230_vm5 = vcmp.lt.s32.totalorder %v9947_v16, 0 }
 0x48d   :  { %v3309_v44 = vsel %vm13230_vm5, %v3308_v47, %v10164_v9  ;;  %v2996_v33 = vsub.s32 4, %v9587_v14  ;;  %v3718_v60 = vand.u32 2147483647, %v3717_v15  ;;  %v3720_v1 = vcvt.s32.f32 %v3713_v48  ;;  %v13241_v15 = vld [vmem:[#allocation26_spill] sm:$0xff] }
 0x48e   :  { %vm3422_vm4 = vcmp.eq.s32.totalorder %v3420_v6, 0  ;;  %vm3425_vm3 = vcmp.eq.s32.totalorder %v3420_v6, 2  ;;  %v6674_v38 = vpop.eup %6673  ;;  %vm3626_vm13 = vweird.f32 %v10140_v29  ;;  %vm3418_vm8 = vweird.f32 %v9722_v56 }
 0x48f   :  { %v3424_v32 = vsel %vm3422_vm4, %v10287_v19, %v3423_v41  ;;  %v3427_v4 = vsel %vm3425_vm3, %v3426_v34, %v10525_v40  ;;  %v3207_v13 = vsel %vm10412_vm12, 0, %v3205_v22  ;;  %v3311_v9 = vsel %vm10494_vm0, 0, %v3309_v44  ;;  %v6676_v61 = vpop.eup %6675  ;;  %v13231_v19 = vld [vmem:[#allocation14_spill] sm:$0xff] }
 0x490   :  { %v3721_v10 = vmul.f32 %v3720_v1, %v3718_v60  ;;  %v3946_v23 = vxor.u32 2147483648, %v6674_v38  ;;  %vm3526_vm5 = vcmp.eq.s32.totalorder %v3524_v52, 0  ;;  %vm3529_vm1 = vcmp.eq.s32.totalorder %v3524_v52, 2 }
 0x491   :  { %v3943_v42 = vxor.u32 2147483648, %v6676_v61  ;;  %v3528_v11 = vsel %vm3526_vm5, %v6666_v2, %v3527_v63  ;;  %v3531_v50 = vsel %vm3529_vm1, %v3530_v57, %v6668_v49  ;;  %vm13232_vm4 = vcmp.lt.s32.totalorder %v13231_v19, 0 }
 0x492   :  { %v2997_v40 = vsel %vm13232_vm4, %v2996_v33, %v9587_v14  ;;  %v3722_v27 = vxor.u32 2147483648, %v3721_v10  ;;  %vm13233_vm12 = vcmp.eq.s32.totalorder %v10557_v55, 2  ;;  %v3211_v20 = vadd.s32 3, %v3207_v13  ;;  %v13245_v33 = vld [vmem:[#allocation32_spill] sm:$0xff]  ;;  %v13247_v13 = vld [vmem:[#allocation37_spill] sm:$0xff] }
 0x493   :  { %v3947_v30 = vsel %vm13233_vm12, %v3946_v23, %v6676_v61  ;;  %v3315_v37 = vadd.s32 3, %v3311_v9  ;;  %vm13234_vm0 = vcmp.eq.s32.totalorder %v10557_v55, 0  ;;  %vm13235_vm3 = vcmp.lt.s32.totalorder %v10559_v51, 2  ;;  %v13249_v61 = vld [vmem:[#allocation31_spill] sm:$0xff]  ;;  %v13250_v23 = vld [vmem:[#allocation48_spill] sm:$0xff] }
 0x494   :  { %v3944_v26 = vsel %vm13234_vm0, %v6674_v38, %v3943_v42  ;;  %v3636_v5 = vsel %vm13235_vm3, %v3632_v25, %v3635_v3  ;;  %vm3421_vm7 = vcmp.lt.s32.totalorder %v3420_v6, 2  ;;  %v3100_v2 = vsub.s32 4, %v13236_v31  ;;  %v13246_v38 = vld [vmem:[#allocation27_spill] sm:$0xff] }
 0x495   :  { %vm13237_vm1 = vcmp.lt.s32.totalorder %v10240_v21, 0  ;;  %vm13238_vm5 = vcmp.lt.s32.totalorder %v10557_v55, 2  ;;  %vm3525_vm4 = vcmp.lt.s32.totalorder %v3524_v52, 2  ;;  %v2999_v7 = vsel %vm9920_vm9, 0, %v2997_v40  ;;  %v13251_v42 = vld [vmem:[#allocation11_spill] sm:$0xff] }
 0x496   :  { %v3723_v49 = vsel %vm13237_vm1, %v3722_v27, %v3721_v10  ;;  %v3948_v14 = vsel %vm13238_vm5, %v3944_v26, %v3947_v30  ;;  %vm13240_vm12 = vweird.f32 %v10216_v24  ;;  %v3428_v34 = vsel %vm3421_vm7, %v3424_v32, %v3427_v4  ;;  %v13253_v30 = vld [vmem:[#allocation41_spill] sm:$0xff]  ;;  %v13270_v26 = vld [vmem:[#allocation6_spill] sm:$0xff] }
 0x497   :  { %v3726_v41 = vsel %vm10542_vm10, %v10240_v21, %v3723_v49  ;;  %v3949_v51 = vsel %vm13240_vm12, nan, %v3948_v14  ;;  %v3532_v48 = vsel %vm3525_vm4, %v3528_v11, %v3531_v50  ;;  %v3212_v6 = vand.u32 3, %v3211_v20  ;;  %v13252_v50 = vld [vmem:[#allocation10_spill] sm:$0xff] }
 0x498   :  { %6677 = vcosq.f32 %v3726_v41  ;;  %v3974_v12 = vpack.c.bf16 %v3949_v51, %v10567_v0  ;;  %v3316_v3 = vand.u32 3, %v3315_v37  ;;  %v3319_v55 = vxor.u32 2147483648, %v10580_v28  ;;  %v13258_v51 = vld [vmem:[#allocation13_spill] sm:$0xff] }
 0x499   :  { %6679 = vsinq.f32 %v3726_v41  ;;  %v3003_v47 = vadd.s32 3, %v2999_v7  ;;  %vm13242_vm9 = vcmp.lt.s32.totalorder %v13241_v15, 0  ;;  %v10627_v24 = vsel %vm3626_vm13, nan, %v3636_v5 }
 0x49a   :  { %v3101_v25 = vsel %vm13242_vm9, %v3100_v2, %v13236_v31  ;;  %6264 = vmatprep.subr.bf16.mxu1 %v3974_v12  ;;  %v10629_v62 = vand.u32 3, %v3731_v39  ;;  %v3429_v0 = vsel %vm3418_vm8, nan, %v3428_v34  ;;  %v3322_v52 = vxor.u32 2147483648, %v10572_v53  ;;  %v13255_v31 = vld [vmem:[#allocation8_spill] sm:$0xff] }
 0x49b   :  { %6265 = vmatpush3.bf16.msra.mxu1 %v3974_v12  ;;  %vm13243_vm10 = vweird.f32 %v9874_v45  ;;  %v3215_v63 = vxor.u32 2147483648, %v10553_v43  ;;  %v3218_v57 = vxor.u32 2147483648, %v10538_v8  ;;  %v3103_v29 = vsel %vm10080_vm11, 0, %v3101_v25 }
 0x49c   :  { %v3533_v22 = vsel %vm13243_vm10, nan, %v3532_v48  ;;  %vm3214_vm13 = vcmp.eq.s32.totalorder %v3212_v6, 0  ;;  %vm3318_vm7 = vcmp.eq.s32.totalorder %v3316_v3, 0  ;;  %v3107_v39 = vadd.s32 3, %v3103_v29 }
 0x49d   :  { %v2788_v60 = vsub.s32 4, %v13245_v33  ;;  %v3320_v56 = vsel %vm3318_vm7, %v10572_v53, %v3319_v55  ;;  %vm3321_vm8 = vcmp.eq.s32.totalorder %v3316_v3, 2  ;;  %v3004_v1 = vand.u32 3, %v3003_v47 }
 0x49e   :  { %v3007_v32 = vxor.u32 2147483648, %v13246_v38  ;;  %v3323_v45 = vsel %vm3321_vm8, %v3322_v52, %v10580_v28  ;;  %v3108_v4 = vand.u32 3, %v3107_v39  ;;  %vm13248_vm0 = vcmp.lt.s32.totalorder %v13247_v13, 0 }
 0x49f   :  { %v2789_v9 = vsel %vm13248_vm0, %v2788_v60, %v13245_v33  ;;  %v2892_v10 = vsub.s32 4, %v13249_v61  ;;  %vm3737_vm11 = vcmp.eq.s32.totalorder %v10629_v62, 2  ;;  %vm3210_vm3 = vweird.f32 %v9804_v58 }
 0x4a0   :  { %vm3217_vm1 = vcmp.eq.s32.totalorder %v3212_v6, 2  ;;  %v3010_v53 = vxor.u32 2147483648, %v13250_v23  ;;  %v3111_v11 = vxor.u32 2147483648, %v13251_v42  ;;  %v3114_v40 = vxor.u32 2147483648, %v13252_v50 }
 0x4a1   :  { %vm3734_vm5 = vcmp.eq.s32.totalorder %v10629_v62, 0  ;;  %v3216_v28 = vsel %vm3214_vm13, %v10538_v8, %v3215_v63  ;;  %v3219_v27 = vsel %vm3217_vm1, %v3218_v57, %v10553_v43  ;;  %vm3317_vm4 = vcmp.lt.s32.totalorder %v3316_v3, 2 }
 0x4a2   :  { %v2580_v20 = vsub.s32 4, %v13253_v30  ;;  %vm3733_vm12 = vcmp.lt.s32.totalorder %v10629_v62, 2  ;;  %v3324_v37 = vsel %vm3317_vm4, %v3320_v56, %v3323_v45  ;;  %vm3006_vm9 = vcmp.eq.s32.totalorder %v3004_v1, 0  ;;  %v13265_v62 = vld [vmem:[#allocation24_spill] sm:$0xff] }
 0x4a3   :  { %v2791_v5 = vsel %vm9936_vm2, 0, %v2789_v9  ;;  %vm13256_vm10 = vcmp.lt.s32.totalorder %v13255_v31, 0  ;;  %vm3730_vm7 = vweird.f32 %v10240_v21  ;;  %v3008_v8 = vsel %vm3006_vm9, %v13250_v23, %v3007_v32 }
 0x4a4   :  { %v2893_v2 = vsel %vm13256_vm10, %v2892_v10, %v13249_v61  ;;  %vm3009_vm13 = vcmp.eq.s32.totalorder %v3004_v1, 2  ;;  %vm3110_vm8 = vcmp.eq.s32.totalorder %v3108_v4, 0  ;;  %vm3113_vm0 = vcmp.eq.s32.totalorder %v3108_v4, 2  ;;  %v13264_v10 = vld [vmem:[#allocation7_spill] sm:$0xff] }
 0x4a5   :  { %v3011_v43 = vsel %vm3009_vm13, %v3010_v53, %v13246_v38  ;;  %v3112_v49 = vsel %vm3110_vm8, %v13252_v50, %v3111_v11  ;;  %v3115_v14 = vsel %vm3113_vm0, %v3114_v40, %v13251_v42  ;;  %v2895_v7 = vsel %vm10100_vm15, 0, %v2893_v2  ;;  %v6678_v48 = vpop.eup %6677  ;;  %v13266_v50 = vld [vmem:[#allocation30_spill] sm:$0xff]  ;;  %v13268_v40 = vld [vmem:[#allocation17_spill] sm:$0xff] }
 0x4a6   :  { %vm3213_vm2 = vcmp.lt.s32.totalorder %v3212_v6, 2  ;;  %vm3314_vm1 = vweird.f32 %v9947_v16  ;;  %v2795_v41 = vadd.s32 3, %v2791_v5  ;;  %vm13259_vm4 = vcmp.lt.s32.totalorder %v13258_v51, 0  ;;  %v6680_v55 = vpop.eup %6679  ;;  %v13272_v2 = vld [vmem:[#allocation38_spill] sm:$0xff] }
 0x4a7   :  { %v2581_v34 = vsel %vm13259_vm4, %v2580_v20, %v13253_v30  ;;  %v3220_v12 = vsel %vm3213_vm2, %v3216_v28, %v3219_v27  ;;  %v3325_v3 = vsel %vm3314_vm1, nan, %v3324_v37  ;;  %vm3005_vm9 = vcmp.lt.s32.totalorder %v3004_v1, 2 }
 0x4a8   :  { %vm3109_vm10 = vcmp.lt.s32.totalorder %v3108_v4, 2  ;;  %v3738_v47 = vxor.u32 2147483648, %v6678_v48  ;;  %v3012_v25 = vsel %vm3005_vm9, %v3008_v8, %v3011_v43  ;;  %v2899_v63 = vadd.s32 3, %v2895_v7  ;;  %v13262_v4 = vld [vmem:[#allocation15_spill] sm:$0xff] }
 0x4a9   :  { %v3116_v52 = vsel %vm3109_vm10, %v3112_v49, %v3115_v14  ;;  %v3735_v57 = vxor.u32 2147483648, %v6680_v55  ;;  %v3972_v44 = vpack.c.bf16 %v3533_v22, %v3429_v0  ;;  %vm3002_vm15 = vweird.f32 %v13231_v19  ;;  %v13261_v22 = vld [vmem:[#allocation5_spill] sm:$0xff] }
 0x4aa   :  { %v2583_v6 = vsel %vm9605_vm14, 0, %v2581_v34  ;;  %v3739_v29 = vsel %vm3737_vm11, %v3738_v47, %v6680_v55  ;;  %v3221_v39 = vsel %vm3210_vm3, nan, %v3220_v12  ;;  %vm3106_vm13 = vweird.f32 %v13241_v15  ;;  %v13263_v15 = vld [vmem:[#allocation25_spill] sm:$0xff]  ;;  %v13275_v34 = vld [vmem:[#allocation36_spill] sm:$0xff]  ;;  %v13276_v12 = vld [vmem:[#allocation46_spill] sm:$0xff] }
 0x4ab   :  { %v2796_v33 = vand.u32 3, %v2795_v41  ;;  %v3736_v60 = vsel %vm3734_vm5, %v6678_v48, %v3735_v57  ;;  %v3971_v56 = vpack.c.bf16 %v3325_v3, %v3221_v39  ;;  %v3013_v1 = vsel %vm3002_vm15, nan, %v3012_v25  ;;  %v13277_v55 = vld [vmem:[#allocation35_spill] sm:$0xff]  ;;  %v13279_v25 = vld [vmem:[#allocation40_spill] sm:$0xff] }
 0x4ac   :  { %v3117_v0 = vsel %vm3106_vm13, nan, %v3116_v52  ;;  %v3740_v19 = vsel %vm3733_vm12, %v3736_v60, %v3739_v29  ;;  %v2799_v38 = vxor.u32 2147483648, %v13261_v22  ;;  %v2900_v32 = vand.u32 3, %v2899_v63  ;;  %v13280_v63 = vld [vmem:[#allocation19_spill] sm:$0xff] }
 0x4ad   :  { %v2587_v45 = vadd.s32 3, %v2583_v6  ;;  %v3741_v58 = vsel %vm3730_vm7, nan, %v3740_v19  ;;  %v2802_v9 = vxor.u32 2147483648, %v13262_v4  ;;  %v2903_v61 = vxor.u32 2147483648, %v13263_v15  ;;  %v13281_v6 = vld [vmem:[#allocation22_spill] sm:$0xff] }
 0x4ae   :  { %v2684_v23 = vsub.s32 4, %v13264_v10  ;;  %v3973_v53 = vpack.c.bf16 %v3741_v58, %v10627_v24  ;;  %v10694_v42 = vpack.c.bf16 %v3117_v0, %v3013_v1  ;;  %vm2797_vm14 = vcmp.lt.s32.totalorder %v2796_v33, 2 }
 0x4af   :  { %v2906_v11 = vxor.u32 2147483648, %v13265_v62  ;;  %vm2798_vm11 = vcmp.eq.s32.totalorder %v2796_v33, 0  ;;  %vm2801_vm3 = vcmp.eq.s32.totalorder %v2796_v33, 2  ;;  %vm13267_vm5 = vcmp.lt.s32.totalorder %v13266_v50, 0 }
 0x4b0   :  { %v2685_v21 = vsel %vm13267_vm5, %v2684_v23, %v13264_v10  ;;  %v2372_v28 = vsub.s32 4, %v13268_v40  ;;  %6266 = vmatprep.subr.bf16.mxu1 %v3973_v53  ;;  %v2800_v27 = vsel %vm2798_vm11, %v13262_v4, %v2799_v38  ;;  %vm2898_vm12 = vweird.f32 %v13255_v31  ;;  %v13286_v10 = vld [vmem:[#allocation44_spill] sm:$0xff] }
 0x4b1   :  { %vm2902_vm7 = vcmp.eq.s32.totalorder %v2900_v32, 0  ;;  %v2588_v24 = vand.u32 3, %v2587_v45  ;;  %v2687_v20 = vsel %vm9742_vm6, 0, %v2685_v21  ;;  %6267 = vmatpush3.bf16.msra.mxu1 %v3973_v53  ;;  %vm2905_vm8 = vcmp.eq.s32.totalorder %v2900_v32, 2  ;;  %v13284_v45 = vld [vmem:[#allocation42_spill] sm:$0xff] }
 0x4b2   :  { %v2691_v37 = vadd.s32 3, %v2687_v20  ;;  %vm13271_vm0 = vcmp.lt.s32.totalorder %v13270_v26, 0  ;;  %v2476_v8 = vsub.s32 4, %v13272_v2  ;;  %6268 = vmatprep.subr.bf16.mxu1 %v3972_v44  ;;  %vm2794_vm2 = vweird.f32 %v13247_v13 }
 0x4b3   :  { %v2373_v5 = vsel %vm13271_vm0, %v2372_v28, %v13268_v40  ;;  %v2803_v43 = vsel %vm2801_vm3, %v2802_v9, %v13261_v22  ;;  %v2904_v49 = vsel %vm2902_vm7, %v13265_v62, %v2903_v61  ;;  %v2907_v14 = vsel %vm2905_vm8, %v2906_v11, %v13263_v15  ;;  %v13283_v22 = vld [vmem:[#allocation23_spill] sm:$0xff]  ;;  %v13285_v15 = vld [vmem:[#allocation9_spill] sm:$0xff] }
 0x4b4   :  { %vm13274_vm6 = vnez %v13273_v36  ;;  %v2692_v41 = vand.u32 3, %v2691_v37  ;;  %v2695_v48 = vxor.u32 2147483648, %v13275_v34  ;;  %v2698_v3 = vxor.u32 2147483648, %v13276_v12 }
 0x4b5   :  { %v2375_v7 = vsel %vm13274_vm6, 0, %v2373_v5  ;;  %vm13278_vm1 = vcmp.lt.s32.totalorder %v13277_v55, 0  ;;  %v2591_v52 = vxor.u32 2147483648, %v13279_v25  ;;  %v2594_v57 = vxor.u32 2147483648, %v13280_v63  ;;  %6269 = vmatpush3.bf16.msra.mxu1 %v3972_v44  ;;  %v6547_v5 = vld [vmem:[%s12666_s3 + $0x50] sm:$0xff]  }
 0x4b6   :  { %v2477_v47 = vsel %vm13278_vm1, %v2476_v8, %v13272_v2  ;;  %v2379_v16 = vadd.s32 3, %v2375_v7  ;;  %vm13282_vm4 = vnez %v13281_v6  ;;  %v2804_v39 = vsel %vm2797_vm14, %v2800_v27, %v2803_v43  ;;  %6270 = vmatprep.subr.bf16.mxu1 %v3971_v56  ;;  %v6548_v2 = vld [vmem:[%s12666_s3 + $0x58] sm:$0xff]   ;;  %v6550_v8 = vld [vmem:[%s12666_s3 + $0x68] sm:$0xff]   ;;  %v6551_v43 = vld [vmem:[%s12666_s3 + $0x70] sm:$0xff]  }
 0x4b7   :  { %v2479_v29 = vsel %vm13282_vm4, 0, %v2477_v47  ;;  %vm2901_vm9 = vcmp.lt.s32.totalorder %v2900_v32, 2  ;;  %vm2590_vm10 = vcmp.eq.s32.totalorder %v2588_v24, 0  ;;  %vm2593_vm15 = vcmp.eq.s32.totalorder %v2588_v24, 2 }
 0x4b8   :  { %v2908_v60 = vsel %vm2901_vm9, %v2904_v49, %v2907_v14  ;;  %vm2694_vm13 = vcmp.eq.s32.totalorder %v2692_v41, 0  ;;  %vm2697_vm11 = vcmp.eq.s32.totalorder %v2692_v41, 2  ;;  %v2483_v1 = vadd.s32 3, %v2479_v29  ;;  %v6552_v49 = vld [vmem:[%s12666_s3 + $0x78] sm:$0xff]   ;;  %v10769_v14 = vpop.permute.xlu0 %4064 }
 0x4b9   :  { %v2696_v0 = vsel %vm2694_vm13, %v13276_v12, %v2695_v48  ;;  %v2699_v19 = vsel %vm2697_vm11, %v2698_v3, %v13275_v34  ;;  %v2487_v38 = vxor.u32 2147483648, %v13283_v22  ;;  %v2490_v58 = vxor.u32 2147483648, %v13284_v45  ;;  %6271 = vmatpush3.bf16.msra.mxu1 %v3971_v56  ;;  %13287 = vst [vmem:[#allocation20_spill] sm:$0xff] %v10769_v14 }
 0x4ba   :  { %v2592_v44 = vsel %vm2590_vm10, %v13280_v63, %v2591_v52  ;;  %v2595_v33 = vsel %vm2593_vm15, %v2594_v57, %v13279_v25  ;;  %v2380_v32 = vand.u32 3, %v2379_v16  ;;  %v2484_v4 = vand.u32 3, %v2483_v1  ;;  %6272 = vmatprep.subr.bf16.mxu1 %v10694_v42 }
 0x4bb   :  { %v2909_v9 = vsel %vm2898_vm12, nan, %v2908_v60  ;;  %vm2693_vm14 = vcmp.lt.s32.totalorder %v2692_v41, 2  ;;  %v2383_v61 = vxor.u32 2147483648, %v13285_v15  ;;  %v2386_v23 = vxor.u32 2147483648, %v13286_v10  ;;  %v10775_v41 = vpop.permute.xlu1 %4069 }
 0x4bc   :  { %vm2589_vm3 = vcmp.lt.s32.totalorder %v2588_v24, 2  ;;  %v2700_v53 = vsel %vm2693_vm14, %v2696_v0, %v2699_v19  ;;  %vm2486_vm5 = vcmp.eq.s32.totalorder %v2484_v4, 0  ;;  %vm2489_vm7 = vcmp.eq.s32.totalorder %v2484_v4, 2  ;;  %v10771_v36 = vpop.permute.xlu0 %4054  ;;  %13289 = vst [vmem:[#allocation21_spill] sm:$0xff] %v10775_v41 }
 0x4bd   :  { %v2805_v62 = vsel %vm2794_vm2, nan, %v2804_v39  ;;  %v2596_v11 = vsel %vm2589_vm3, %v2592_v44, %v2595_v33  ;;  %v2488_v56 = vsel %vm2486_vm5, %v13284_v45, %v2487_v38  ;;  %v2491_v31 = vsel %vm2489_vm7, %v2490_v58, %v13283_v22  ;;  %6273 = vmatpush3.bf16.msra.mxu1 %v10694_v42  ;;  %13288 = vst [vmem:[#allocation47_spill] sm:$0xff] %v10771_v36 }
 0x4be   :  { %v3969_v21 = vpack.c.bf16 %v2909_v9, %v2805_v62  ;;  %vm2690_vm12 = vweird.f32 %v13266_v50  ;;  %vm2382_vm8 = vcmp.eq.s32.totalorder %v2380_v32, 0  ;;  %vm2385_vm0 = vcmp.eq.s32.totalorder %v2380_v32, 2 }
 0x4bf   :  { %v2701_v40 = vsel %vm2690_vm12, nan, %v2700_v53  ;;  %v2384_v28 = vsel %vm2382_vm8, %v13286_v10, %v2383_v61  ;;  %v2387_v27 = vsel %vm2385_vm0, %v2386_v23, %v13285_v15  ;;  %vm2485_vm6 = vcmp.lt.s32.totalorder %v2484_v4, 2  ;;  %v10779_v48 = vpop.permute.xlu1 %4059 }
 0x4c0   :  { %6274 = vmatprep.subr.bf16.mxu1 %v3969_v21  ;;  %vm2586_vm2 = vweird.f32 %v13258_v51  ;;  %v2492_v13 = vsel %vm2485_vm6, %v2488_v56, %v2491_v31  ;;  %vm2381_vm1 = vcmp.lt.s32.totalorder %v2380_v32, 2  ;;  %vm2482_vm4 = vweird.f32 %v13277_v55  ;;  %v6546_v51 = vld [vmem:[%s12666_s3 + $0x48] sm:$0xff]   ;;  %v10773_v7 = vpop.permute.xlu0 %4044  ;;  %13290 = vst [vmem:[#allocation12_spill] sm:$0xff] %v10779_v48 }
 0x4c1   :  { %v2597_v24 = vsel %vm2586_vm2, nan, %v2596_v11  ;;  %v2388_v20 = vsel %vm2381_vm1, %v2384_v28, %v2387_v27  ;;  %6275 = vmatpush3.bf16.msra.mxu1 %v3969_v21  ;;  %v2493_v50 = vsel %vm2482_vm4, nan, %v2492_v13  ;;  %vm2378_vm9 = vweird.f32 %v13270_v26  ;;  %v6549_v26 = vld [vmem:[%s12666_s3 + $0x60] sm:$0xff]  }
 0x4c2   :  { %v3968_v30 = vpack.c.bf16 %v2701_v40, %v2597_v24  ;;  %v2389_v42 = vsel %vm2378_vm9, nan, %v2388_v20 }
 0x4c3   :  { %v3967_v37 = vpack.c.bf16 %v2493_v50, %v2389_v42  ;;  %v10783_v3 = vpop.permute.xlu1 %4049 }
 0x4c4   :  { %6276 = vmatprep.subr.bf16.mxu1 %v3968_v30  ;;  %v10777_v34 = vpop.permute.xlu0 %4034  ;;  %13291 = vst [vmem:[#allocation34_spill] sm:$0xff] %v10783_v3 }
 0x4c5   :  { %6277 = vmatpush3.bf16.msra.mxu1 %v3968_v30 }
 0x4c6   :  { %6278 = vmatprep.subr.bf16.mxu1 %v3967_v37 }
 0x4c7   :  { %v10787_v47 = vpop.permute.xlu1 %4039 }
 0x4c8   :  { %v10781_v12 = vpop.permute.xlu0 %4024  ;;  %13292 = vst [vmem:[#allocation14_spill] sm:$0xff] %v10787_v47 }
 0x4c9   :  { %6279 = vmatpush3.bf16.msra.mxu1 %v3967_v37 }
 0x4cb   :  { %v10789_v52 = vpop.permute.xlu1 %4029 }
 0x4cc   :  { %6281 = vmatmul.mubr.bf16.vlgmr.msra.gmra.mxu1 %v6546_v51  ;;  %v10785_v55 = vpop.permute.xlu0 %4014 }
 0x4cd   :  { %6284 = vmatprep.mubr.bf16.mxu1 %v6547_v5 }
 0x4cf   :  { %v10796_v60 = vpop.permute.xlu1 %4019 }
 0x4d0   :  { %v4005_v25 = vpop.permute.xlu0 %4004 }
 0x4d3   :  { %v4010_v44 = vpop.permute.xlu1 %4009 }
 0x4d4   :  { %6285 = vmatmul.mubr.bf16.gmra.mxu1 %v6548_v2  ;;  %v3995_v16 = vpop.permute.xlu0 %3994 }
 0x4d5   :  { %6288 = vmatprep.mubr.bf16.mxu1 %v6549_v26 }
 0x4dc   :  { %6289 = vmatmul.mubr.bf16.gmra.mxu1 %v6550_v8 }
 0x4dd   :  { %6292 = vmatprep.mubr.bf16.mxu1 %v6551_v43 }
 0x4e4   :  { %6293 = vmatmul.mubr.bf16.gmra.mxu1 %v6552_v49 }
 0x58c   :  { %v6282_v63 = vpop.f32.mrf.mxu1 }
 0x58d   :  { %v10791_v57 = vadd.f32 %v6282_v63, %v4005_v25 }
 0x58e   :  { %v4154_v6 = vpop.f32.mrf.mxu1 }
 0x58f   :  { %13293 = vst [vmem:[#allocation33_spill] sm:$0xff] %v10791_v57  ;;  %v4428_v29 = vand.u32 2139095040, %v10791_v57  ;;  %v10794_v39 = vadd.f32 %v4154_v6, %v3995_v16  ;;  %v12875_v19 = vand.u32 2147483647, %v10791_v57 }
 0x590   :  { %v6283_v45 = vpop.f32.mrf.mxu1 }
 0x591   :  { %13294 = vst [vmem:[#allocation29_spill] sm:$0xff] %v10794_v39  ;;  %v4429_v1 = vshrl.u32 %v4428_v29, 23  ;;  %v4220_v0 = vand.u32 2139095040, %v10794_v39  ;;  %v4432_v32 = vand.u32 8388607, %v12875_v19  ;;  %v10802_v4 = vadd.f32 %v6283_v45, %v4010_v44 }
 0x593   :  { %v6135_v22 = vadd.s32 4294967169, %v4429_v1  ;;  %v4221_v38 = vshrl.u32 %v4220_v0, 23  ;;  %13295 = vst [vmem:[#allocation26_spill] sm:$0xff] %v10802_v4  ;;  %v4433_v10 = vor.u32 8388608, %v4432_v32  ;;  %v4532_v53 = vand.u32 2139095040, %v10802_v4 }
 0x595   :  { %v4435_v58 = vadd.s32 1, %v6135_v22  ;;  %v6127_v33 = vadd.s32 4294967169, %v4221_v38  ;;  %v4473_v16 = vshll.u32 %v4433_v10, 8  ;;  %v4533_v0 = vshrl.u32 %v4532_v53, 23 }
 0x597   :  { %vm4436_vm10 = vcmp.gt.s32.totalorder %v4435_v58, 0  ;;  %v4227_v15 = vadd.s32 1, %v6127_v33 }
 0x598   :  { %v4437_v9 = vsel %vm4436_vm10, %v4435_v58, 0 }
 0x599   :  { %v4439_v61 = vand.u32 31, %v4437_v9  ;;  %v4438_v62 = vshrl.u32 %v4437_v9, 5  ;;  %vm4228_vm15 = vcmp.gt.s32.totalorder %v4227_v15, 0  ;;  %v12873_v9 = vand.u32 2147483647, %v10794_v39 }
 0x59a   :  { %v4229_v37 = vsel %vm4228_vm15, %v4227_v15, 0  ;;  %v6139_v15 = vadd.s32 4294967169, %v4533_v0 }
 0x59b   :  { %v4440_v23 = vsub.s32 32, %v4439_v61  ;;  %v4442_v11 = vshll.u32 %v12945_v54, %v4439_v61  ;;  %v4445_v56 = vshll.u32 %v12951_v17, %v4439_v61  ;;  %v4448_v40 = vshll.u32 %v12952_v46, %v4439_v61 }
 0x59c   :  { %v4451_v27 = vshll.u32 %v12950_v18, %v4439_v61  ;;  %v4454_v24 = vshll.u32 %v12928_v35, %v4439_v61  ;;  %vm4457_vm13 = vcmp.lt.s32.totalorder %v4438_v62, 1  ;;  %v4231_v2 = vand.u32 31, %v4229_v37 }
 0x59d   :  { %v4443_v31 = vshrl.u32 %v12951_v17, %v4440_v23  ;;  %v4446_v21 = vshrl.u32 %v12952_v46, %v4440_v23  ;;  %v4449_v28 = vshrl.u32 %v12950_v18, %v4440_v23  ;;  %v4452_v13 = vshrl.u32 %v12928_v35, %v4440_v23 }
 0x59e   :  { %v4455_v30 = vshrl.u32 %v13092_v59, %v4440_v23  ;;  %vm4460_vm11 = vcmp.lt.s32.totalorder %v4438_v62, 4  ;;  %vm4459_vm14 = vcmp.lt.s32.totalorder %v4438_v62, 3  ;;  %vm4458_vm3 = vcmp.lt.s32.totalorder %v4438_v62, 2 }
 0x59f   :  { %v4444_v20 = vor.u32 %v4443_v31, %v4442_v11  ;;  %v4447_v50 = vor.u32 %v4446_v21, %v4445_v56  ;;  %v4450_v42 = vor.u32 %v4449_v28, %v4448_v40  ;;  %v4453_v51 = vor.u32 %v4452_v13, %v4451_v27 }
 0x5a0   :  { %v4456_v5 = vor.u32 %v4455_v30, %v4454_v24  ;;  %v10823_v1 = vsub.s32 32, %v4231_v2  ;;  %v4441_v44 = vshrl.u32 %v12945_v54, %v4440_v23  ;;  %v10838_v10 = vshrl.u32 %v4229_v37, 5 }
 0x5a1   :  { %v4465_v26 = vsel %vm4457_vm13, %v4444_v20, %v4447_v50  ;;  %v4469_v8 = vsel %vm4457_vm13, %v4447_v50, %v4450_v42  ;;  %v4466_v43 = vsel %vm4460_vm11, %v4453_v51, 920167782  ;;  %v4462_v33 = vsel %vm4460_vm11, %v4450_v42, 2102212464 }
 0x5a2   :  { %v4470_v49 = vsel %vm4460_vm11, %v4456_v5, 1326507024  ;;  %v4467_v25 = vsel %vm4459_vm14, %v4450_v42, %v4466_v43  ;;  %v4244_v32 = vshrl.u32 %v12928_v35, %v10823_v1  ;;  %v4461_v61 = vsel %vm4457_vm13, %v4441_v44, %v4444_v20 }
 0x5a3   :  { %v4471_v63 = vsel %vm4459_vm14, %v4453_v51, %v4470_v49  ;;  %v4468_v6 = vsel %vm4458_vm3, %v4465_v26, %v4467_v25  ;;  %v4243_v53 = vshll.u32 %v12950_v18, %v4231_v2  ;;  %v4247_v11 = vshrl.u32 %v13092_v59, %v10823_v1 }
 0x5a4   :  { %v4472_v29 = vsel %vm4458_vm3, %v4469_v8, %v4471_v63  ;;  %v10828_v45 = vmul.u32.u64.low %v4473_v16, %v4468_v6  ;;  %v10829_v58 = vmul.u32.u64.high %v4473_v16, %v4468_v6, %v10828_v45  ;;  %v4463_v56 = vsel %vm4459_vm14, %v4447_v50, %v4462_v33 }
 0x5a5   :  { %v10825_v22 = vmul.u32.u64.low %v4473_v16, %v4472_v29  ;;  %v10826_v38 = vmul.u32.u64.high %v4473_v16, %v4472_v29, %v10825_v22  ;;  %v4235_v23 = vshrl.u32 %v12951_v17, %v10823_v1  ;;  %v4238_v31 = vshrl.u32 %v12952_v46, %v10823_v1  ;;  %v4157_v29 = vpop.f32.mrf.mxu1 }
 0x5a6   :  { %v4241_v21 = vshrl.u32 %v12950_v18, %v10823_v1  ;;  %v4483_v40 = vadd.s32 1, %v10829_v58  ;;  %v4234_v28 = vshll.u32 %v12945_v54, %v4231_v2  ;;  %v4245_v27 = vor.u32 %v4244_v32, %v4243_v53  ;;  %v4000_v22 = vpop.permute.xlu1 %3999 }
 0x5a7   :  { %v4246_v13 = vshll.u32 %v12928_v35, %v4231_v2  ;;  %vm4482_vm5 = vc.u32 %v10826_v38, %v10828_v45  ;;  %v4237_v24 = vshll.u32 %v12951_v17, %v4231_v2  ;;  %v4240_v30 = vshll.u32 %v12952_v46, %v4231_v2 }
 0x5a8   :  { %v4539_v20 = vadd.s32 1, %v6139_v15  ;;  %v4464_v50 = vsel %vm4458_vm3, %v4461_v61, %v4463_v56  ;;  %v4224_v42 = vand.u32 8388607, %v12873_v9  ;;  %v4236_v51 = vor.u32 %v4235_v23, %v4234_v28 }
 0x5a9   :  { %v4248_v37 = vor.u32 %v4247_v11, %v4246_v13  ;;  %v4239_v5 = vor.u32 %v4238_v31, %v4237_v24  ;;  %v4242_v26 = vor.u32 %v4241_v21, %v4240_v30  ;;  %vm4252_vm7 = vcmp.lt.s32.totalorder %v10838_v10, 4 }
 0x5aa   :  { %v4484_v8 = vsel %vm4482_vm5, %v4483_v40, %v10829_v58  ;;  %v4258_v43 = vsel %vm4252_vm7, %v4245_v27, 920167782  ;;  %v4480_v49 = vmul.u32 %v4473_v16, %v4464_v50  ;;  %vm4540_vm12 = vcmp.gt.s32.totalorder %v4539_v20, 0 }
 0x5ab   :  { %vm4249_vm8 = vcmp.lt.s32.totalorder %v10838_v10, 1  ;;  %vm4251_vm0 = vcmp.lt.s32.totalorder %v10838_v10, 3  ;;  %v4262_v62 = vsel %vm4252_vm7, %v4248_v37, 1326507024  ;;  %v4225_v25 = vor.u32 8388608, %v4224_v42 }
 0x5ac   :  { %v4485_v2 = vadd.s32 %v4484_v8, %v4480_v49  ;;  %v4257_v63 = vsel %vm4249_vm8, %v4236_v51, %v4239_v5  ;;  %v4259_v6 = vsel %vm4251_vm0, %v4242_v26, %v4258_v43  ;;  %v4541_v0 = vsel %vm4540_vm12, %v4539_v20, 0 }
 0x5ad   :  { %vm4250_vm6 = vcmp.lt.s32.totalorder %v10838_v10, 2  ;;  %v4261_v16 = vsel %vm4249_vm8, %v4239_v5, %v4242_v26  ;;  %v4263_v58 = vsel %vm4251_vm0, %v4245_v27, %v4262_v62  ;;  %v10879_v33 = vadd.f32 %v4157_v29, %v4000_v22 }
 0x5ae   :  { %v4260_v44 = vsel %vm4250_vm6, %v4257_v63, %v4259_v6  ;;  %v4486_v32 = vadd.s32 536870912, %v4485_v2  ;;  %v4265_v15 = vshll.u32 %v4225_v25, 8  ;;  %v4543_v61 = vand.u32 31, %v4541_v0 }
 0x5af   :  { %13296 = vst [vmem:[#allocation28_spill] sm:$0xff] %v10879_v33  ;;  %v4264_v53 = vsel %vm4250_vm6, %v4261_v16, %v4263_v58  ;;  %v4324_v23 = vand.u32 2139095040, %v10879_v33  ;;  %v4233_v27 = vshrl.u32 %v12945_v54, %v10823_v1  ;;  %v4254_v13 = vsel %vm4252_vm7, %v4242_v26, 2102212464 }
 0x5b0   :  { %v10883_v11 = vmul.u32.u64.low %v4265_v15, %v4260_v44  ;;  %v10884_v56 = vmul.u32.u64.high %v4265_v15, %v4260_v44, %v10883_v11  ;;  %v10888_v31 = vshrl.u32 %v4486_v32, 30  ;;  %v4544_v28 = vsub.s32 32, %v4543_v61 }
 0x5b1   :  { %v10890_v21 = vmul.u32.u64.low %v4265_v15, %v4264_v53  ;;  %v10891_v40 = vmul.u32.u64.high %v4265_v15, %v4264_v53, %v10890_v21  ;;  %v4325_v20 = vshrl.u32 %v4324_v23, 23  ;;  %v4253_v50 = vsel %vm4249_vm8, %v4233_v27, %v4236_v51 }
 0x5b2   :  { %v4488_v24 = vshll.u32 %v10888_v31, 30  ;;  %v4556_v30 = vshrl.u32 %v12928_v35, %v4544_v28  ;;  %v12870_v42 = vand.u32 2147483647, %v10802_v4  ;;  %v4559_v37 = vshrl.u32 %v13092_v59, %v4544_v28 }
 0x5b3   :  { %v4255_v8 = vsel %vm4251_vm0, %v4239_v5, %v4254_v13  ;;  %v4275_v1 = vadd.s32 1, %v10884_v56  ;;  %v4542_v43 = vshrl.u32 %v4541_v0, 5  ;;  %v4555_v26 = vshll.u32 %v12950_v18, %v4543_v61 }
 0x5b4   :  { %v4547_v49 = vshrl.u32 %v12951_v17, %v4544_v28  ;;  %v4550_v62 = vshrl.u32 %v12952_v46, %v4544_v28  ;;  %v4553_v25 = vshrl.u32 %v12950_v18, %v4544_v28  ;;  %v4558_v51 = vshll.u32 %v12928_v35, %v4543_v61 }
 0x5b5   :  { %v10911_v63 = vsub.s32 %v4485_v2, %v4488_v24  ;;  %vm4274_vm2 = vc.u32 %v10891_v40, %v10883_v11  ;;  %v4557_v6 = vor.u32 %v4556_v30, %v4555_v26  ;;  %v6131_v5 = vadd.s32 4294967169, %v4325_v20 }
 0x5b6   :  { %v4546_v29 = vshll.u32 %v12945_v54, %v4543_v61  ;;  %v4549_v0 = vshll.u32 %v12951_v17, %v4543_v61  ;;  %v4552_v22 = vshll.u32 %v12952_v46, %v4543_v61  ;;  %v4560_v16 = vor.u32 %v4559_v37, %v4558_v51 }
 0x5b7   :  { %v4256_v58 = vsel %vm4250_vm6, %v4253_v50, %v4255_v8  ;;  %v4536_v44 = vand.u32 8388607, %v12870_v42  ;;  %vm4564_vm1 = vcmp.lt.s32.totalorder %v4542_v43, 4  ;;  %v4276_v23 = vsel %vm4274_vm2, %v4275_v1, %v10884_v56 }
 0x5b8   :  { %v4548_v2 = vor.u32 %v4547_v49, %v4546_v29  ;;  %v4551_v32 = vor.u32 %v4550_v62, %v4549_v0  ;;  %v4554_v53 = vor.u32 %v4553_v25, %v4552_v22  ;;  %v4570_v21 = vsel %vm4564_vm1, %v4557_v6, 920167782 }
 0x5b9   :  { %v4491_v27 = vsub.s32 0, %v10911_v63  ;;  %v4272_v13 = vmul.u32 %v4265_v15, %v4256_v58  ;;  %v4574_v61 = vsel %vm4564_vm1, %v4560_v16, 1326507024  ;;  %v4331_v24 = vadd.s32 1, %v6131_v5 }
 0x5ba   :  { %vm4561_vm4 = vcmp.lt.s32.totalorder %v4542_v43, 1  ;;  %vm4563_vm9 = vcmp.lt.s32.totalorder %v4542_v43, 3  ;;  %v4537_v30 = vor.u32 8388608, %v4536_v44  ;;  %vm4562_vm10 = vcmp.lt.s32.totalorder %v4542_v43, 2 }
 0x5bb   :  { %v4277_v10 = vadd.s32 %v4276_v23, %v4272_v13  ;;  %v4569_v20 = vsel %vm4561_vm4, %v4548_v2, %v4551_v32  ;;  %v4571_v50 = vsel %vm4563_vm9, %v4554_v53, %v4570_v21  ;;  %v4573_v37 = vsel %vm4561_vm4, %v4551_v32, %v4554_v53 }
 0x5bc   :  { %v4575_v56 = vsel %vm4563_vm9, %v4557_v6, %v4574_v61  ;;  %v6136_v8 = vmin.u32 %v4491_v27, %v10911_v63  ;;  %vm4332_vm15 = vcmp.gt.s32.totalorder %v4331_v24, 0  ;;  %v4572_v15 = vsel %vm4562_vm10, %v4569_v20, %v4571_v50  ;;  %v6286_v6 = vpop.f32.mrf.mxu1 }
 0x5bd   :  { %v4278_v1 = vadd.s32 536870912, %v4277_v10  ;;  %v4576_v26 = vsel %vm4562_vm10, %v4573_v37, %v4575_v56  ;;  %v4577_v49 = vshll.u32 %v4537_v30, 8  ;;  %v4333_v62 = vsel %vm4332_vm15, %v4331_v24, 0 }
 0x5be   :  { %v4493_v25 = vclz %v6136_v8  ;;  %v4566_v16 = vsel %vm4564_vm1, %v4554_v53, 2102212464  ;;  %v4335_v58 = vand.u32 31, %v4333_v62  ;;  %v4545_v44 = vshrl.u32 %v12945_v54, %v4544_v28 }
 0x5bf   :  { %v10933_v51 = vmul.u32.u64.low %v4577_v49, %v4572_v15  ;;  %v10934_v5 = vmul.u32.u64.high %v4577_v49, %v4572_v15, %v10933_v51  ;;  %v10937_v29 = vmul.u32.u64.low %v4577_v49, %v4576_v26  ;;  %v10938_v0 = vmul.u32.u64.high %v4577_v49, %v4576_v26, %v10937_v29 }
 0x5c0   :  { %v10940_v22 = vshrl.u32 %v4278_v1, 30  ;;  %v6137_v23 = vadd.s32 4294967294, %v4493_v25  ;;  %v10945_v21 = vadd.f32 %v6286_v6, %v10781_v12  ;;  %v4565_v27 = vsel %vm4561_vm4, %v4545_v44, %v4548_v2  ;;  %v4170_v25 = vpop.f32.mrf.mxu1 }
 0x5c1   :  { %v4567_v13 = vsel %vm4563_vm9, %v4551_v32, %v4566_v16  ;;  %v10950_v24 = vsub.s32 32, %v4335_v58  ;;  %v4587_v53 = vadd.s32 1, %v10934_v5  ;;  %vm4586_vm11 = vc.u32 %v10938_v0, %v10933_v51 }
 0x5c2   :  { %13297 = vst [vmem:[#allocation32_spill] sm:$0xff] %v10945_v21  ;;  %v4280_v61 = vshll.u32 %v10940_v22, 30  ;;  %vm6138_vm13 = vcmp.lt.s32.totalorder %v6137_v23, 0  ;;  %v4568_v30 = vsel %vm4562_vm10, %v4565_v27, %v4567_v13  ;;  %v4844_v20 = vand.u32 2139095040, %v10945_v21 }
 0x5c3   :  { %v4348_v28 = vshrl.u32 %v12928_v35, %v10950_v24  ;;  %v10961_v2 = vsel %vm6138_vm13, 0, %v6137_v23  ;;  %v4584_v32 = vmul.u32 %v4577_v49, %v4568_v30  ;;  %v12871_v50 = vand.u32 2147483647, %v10879_v33 }
 0x5c4   :  { %v10957_v12 = vsub.s32 %v4277_v10, %v4280_v61  ;;  %v4351_v43 = vshrl.u32 %v13092_v59, %v10950_v24  ;;  %v4588_v37 = vsel %vm4586_vm11, %v4587_v53, %v10934_v5  ;;  %v4339_v56 = vshrl.u32 %v12951_v17, %v10950_v24 }
 0x5c5   :  { %v4347_v8 = vshll.u32 %v12950_v18, %v4335_v58  ;;  %v4845_v10 = vshrl.u32 %v4844_v20, 23  ;;  %v10970_v15 = vshrl.u32 %v4333_v62, 5  ;;  %v4342_v1 = vshrl.u32 %v12952_v46, %v10950_v24 }
 0x5c6   :  { %v4345_v26 = vshrl.u32 %v12950_v18, %v10950_v24  ;;  %v4350_v49 = vshll.u32 %v12928_v35, %v4335_v58  ;;  %v4283_v29 = vsub.s32 0, %v10957_v12  ;;  %v4338_v5 = vshll.u32 %v12945_v54, %v4335_v58 }
 0x5c7   :  { %v4349_v6 = vor.u32 %v4348_v28, %v4347_v8  ;;  %v6151_v16 = vadd.s32 4294967169, %v4845_v10  ;;  %v4589_v44 = vadd.s32 %v4588_v37, %v4584_v32  ;;  %v4341_v23 = vshll.u32 %v12951_v17, %v4335_v58 }
 0x5c8   :  { %v4344_v62 = vshll.u32 %v12952_v46, %v4335_v58  ;;  %v4352_v27 = vor.u32 %v4351_v43, %v4350_v49  ;;  %v4328_v13 = vand.u32 8388607, %v12871_v50  ;;  %v4340_v61 = vor.u32 %v4339_v56, %v4338_v5 }
 0x5c9   :  { %v10984_v30 = vadd.f32 %v4170_v25, %v10785_v55  ;;  %v4343_v53 = vor.u32 %v4342_v1, %v4341_v23  ;;  %vm4356_vm14 = vcmp.lt.s32.totalorder %v10970_v15, 4  ;;  %v4851_v42 = vadd.s32 1, %v6151_v16 }
 0x5ca   :  { %v4346_v20 = vor.u32 %v4345_v26, %v4344_v62  ;;  %v4501_v28 = vsub.s32 4294967266, %v10961_v2  ;;  %v4362_v32 = vsel %vm4356_vm14, %v4349_v6, 920167782  ;;  %v6128_v58 = vmin.u32 %v4283_v29, %v10957_v12 }
 0x5cb   :  { %13298 = vst [vmem:[#allocation27_spill] sm:$0xff] %v10984_v30  ;;  %v4590_v43 = vadd.s32 536870912, %v4589_v44  ;;  %v4366_v37 = vsel %vm4356_vm14, %v4352_v27, 1326507024  ;;  %vm4852_vm3 = vcmp.gt.s32.totalorder %v4851_v42, 0  ;;  %vm4353_vm5 = vcmp.lt.s32.totalorder %v10970_v15, 1 }
 0x5cc   :  { %vm4355_vm7 = vcmp.lt.s32.totalorder %v10970_v15, 3  ;;  %v4853_v55 = vsel %vm4852_vm3, %v4851_v42, 0  ;;  %v4636_v56 = vand.u32 2139095040, %v10984_v30  ;;  %v4497_v8 = vsub.s32 32, %v10961_v2 }
 0x5cd   :  { %v4329_v10 = vor.u32 8388608, %v4328_v13  ;;  %v4361_v1 = vsel %vm4353_vm5, %v4340_v61, %v4343_v53  ;;  %v4363_v26 = vsel %vm4355_vm7, %v4346_v20, %v4362_v32  ;;  %v4502_v49 = vadd.s32 127, %v4501_v28 }
 0x5ce   :  { %v4365_v25 = vsel %vm4353_vm5, %v4343_v53, %v4346_v20  ;;  %v4367_v29 = vsel %vm4355_vm7, %v4349_v6, %v4366_v37  ;;  %v4855_v5 = vand.u32 31, %v4853_v55  ;;  %v4285_v42 = vclz %v6128_v58 }
 0x5cf   :  { %v11005_v16 = vshrl.u32 %v4590_v43, 30  ;;  %vm4354_vm12 = vcmp.lt.s32.totalorder %v10970_v15, 2  ;;  %v4481_v23 = vadd.s32 %v10828_v45, %v10826_v38  ;;  %v4637_v27 = vshrl.u32 %v4636_v56, 23  ;;  %v6287_v15 = vpop.f32.mrf.mxu1 }
 0x5d0   :  { %v4364_v62 = vsel %vm4354_vm12, %v4361_v1, %v4363_v26  ;;  %v4368_v13 = vsel %vm4354_vm12, %v4365_v25, %v4367_v29  ;;  %v11014_v28 = vshll.u32 %v4329_v10, 8  ;;  %v12872_v6 = vand.u32 2147483647, %v10945_v21 }
 0x5d1   :  { %v4498_v32 = vshll.u32 %v10911_v63, %v10961_v2  ;;  %v4499_v58 = vshrl.u32 %v4481_v23, %v4497_v8  ;;  %v4503_v43 = vshll.u32 %v4502_v49, 23  ;;  %v11019_v37 = vsub.s32 32, %v4855_v5 }
 0x5d2   :  { %v6129_v50 = vadd.s32 4294967294, %v4285_v42  ;;  %v4592_v38 = vshll.u32 %v11005_v16, 30  ;;  %v11023_v45 = vmul.u32.u64.low %v11014_v28, %v4364_v62  ;;  %v11024_v56 = vmul.u32.u64.high %v11014_v28, %v4364_v62, %v11023_v45 }
 0x5d3   :  { %v4358_v10 = vsel %vm4356_vm14, %v4346_v20, 2102212464  ;;  %v11030_v1 = vmul.u32.u64.low %v11014_v28, %v4368_v13  ;;  %v11031_v26 = vmul.u32.u64.high %v11014_v28, %v4368_v13, %v11030_v1  ;;  %v6143_v63 = vadd.s32 4294967169, %v4637_v27 }
 0x5d4   :  { %v4337_v8 = vshrl.u32 %v12945_v54, %v10950_v24  ;;  %v11036_v49 = vor.u32 %v4499_v58, %v4498_v32  ;;  %v11038_v25 = vor.u32 4788187, %v4503_v43  ;;  %v4848_v29 = vand.u32 8388607, %v12872_v6 }
 0x5d5   :  { %v4868_v20 = vshrl.u32 %v12928_v35, %v11019_v37  ;;  %vm6130_vm8 = vcmp.lt.s32.totalorder %v6129_v50, 0  ;;  %v4359_v23 = vsel %vm4355_vm7, %v4343_v53, %v4358_v10  ;;  %v4871_v24 = vshrl.u32 %v13092_v59, %v11019_v37 }
 0x5d6   :  { %v4357_v42 = vsel %vm4353_vm5, %v4337_v8, %v4340_v61  ;;  %v11050_v62 = vsub.s32 %v4589_v44, %v4592_v38  ;;  %v4859_v27 = vshrl.u32 %v12951_v17, %v11019_v37  ;;  %v4867_v13 = vshll.u32 %v12950_v18, %v4855_v5 }
 0x5d7   :  { %v4643_v32 = vadd.s32 1, %v6143_v63  ;;  %v11055_v58 = vshrl.u32 %v4853_v55, 5  ;;  %v4862_v43 = vshrl.u32 %v12952_v46, %v11019_v37  ;;  %v4865_v61 = vshrl.u32 %v12950_v18, %v11019_v37 }
 0x5d8   :  { %v4870_v53 = vshll.u32 %v12928_v35, %v4855_v5  ;;  %v4360_v44 = vsel %vm4354_vm12, %v4357_v42, %v4359_v23  ;;  %v4849_v38 = vor.u32 8388608, %v4848_v29  ;;  %v4858_v10 = vshll.u32 %v12945_v54, %v4855_v5 }
 0x5d9   :  { %v4869_v1 = vor.u32 %v4868_v20, %v4867_v13  ;;  %v4861_v8 = vshll.u32 %v12951_v17, %v4855_v5  ;;  %v4864_v55 = vshll.u32 %v12952_v46, %v4855_v5  ;;  %v12874_v6 = vand.u32 2147483647, %v10984_v30 }
 0x5da   :  { %v4872_v63 = vor.u32 %v4871_v24, %v4870_v53  ;;  %vm4378_vm0 = vc.u32 %v11031_v26, %v11023_v45  ;;  %v4379_v9 = vadd.s32 1, %v11024_v56  ;;  %v11071_v2 = vor.u32 %v4859_v27, %v4858_v10 }
 0x5db   :  { %vm4644_vm6 = vcmp.gt.s32.totalorder %v4643_v32, 0  ;;  %v11073_v29 = vor.u32 %v4862_v43, %v4861_v8  ;;  %v4866_v42 = vor.u32 %v4865_v61, %v4864_v55  ;;  %vm4876_vm2 = vcmp.lt.s32.totalorder %v11055_v58, 4 }
 0x5dc   :  { %v4645_v20 = vsel %vm4644_vm6, %v4643_v32, 0  ;;  %v11078_v23 = vsel %vm6130_vm8, 0, %v6129_v50  ;;  %v4882_v24 = vsel %vm4876_vm2, %v4869_v1, 920167782  ;;  %v4595_v27 = vsub.s32 0, %v11050_v62 }
 0x5dd   :  { %v4647_v13 = vand.u32 31, %v4645_v20  ;;  %v4376_v53 = vmul.u32 %v11014_v28, %v4360_v44  ;;  %v4886_v43 = vsel %vm4876_vm2, %v4872_v63, 1326507024  ;;  %v11087_v61 = vadd.f32 %v6287_v15, %v10789_v52 }
 0x5de   :  { %v4380_v50 = vsel %vm4378_vm0, %v4379_v9, %v11024_v56  ;;  %vm4873_vm1 = vcmp.lt.s32.totalorder %v11055_v58, 1  ;;  %vm4875_vm4 = vcmp.lt.s32.totalorder %v11055_v58, 3  ;;  %v11103_v44 = vshll.u32 %v4849_v38, 8 }
 0x5df   :  { %13299 = vst [vmem:[#allocation37_spill] sm:$0xff] %v11087_v61  ;;  %v11095_v32 = vsub.s32 32, %v4647_v13  ;;  %v4881_v28 = vsel %vm4873_vm1, %v11071_v2, %v11073_v29  ;;  %v4883_v52 = vsel %vm4875_vm4, %v4866_v42, %v4882_v24  ;;  %v4640_v10 = vand.u32 8388607, %v12874_v6 }
 0x5e0   :  { %v4885_v9 = vsel %vm4873_vm1, %v11073_v29, %v4866_v42  ;;  %v4887_v56 = vsel %vm4875_vm4, %v4869_v1, %v4886_v43  ;;  %v11116_v63 = vadd.s32 %v4380_v50, %v4376_v53  ;;  %vm4874_vm9 = vcmp.lt.s32.totalorder %v11055_v58, 2 }
 0x5e1   :  { %v4651_v8 = vshrl.u32 %v12951_v17, %v11095_v32  ;;  %v4654_v55 = vshrl.u32 %v12952_v46, %v11095_v32  ;;  %v4650_v38 = vshll.u32 %v12945_v54, %v4647_v13  ;;  %v4657_v15 = vshrl.u32 %v12950_v18, %v11095_v32 }
 0x5e2   :  { %v4884_v24 = vsel %vm4874_vm9, %v4881_v28, %v4883_v52  ;;  %v4653_v1 = vshll.u32 %v12951_v17, %v4647_v13  ;;  %v4659_v43 = vshll.u32 %v12950_v18, %v4647_v13  ;;  %v4660_v6 = vshrl.u32 %v12928_v35, %v11095_v32 }
 0x5e3   :  { %v4888_v53 = vsel %vm4874_vm9, %v4885_v9, %v4887_v56  ;;  %v11130_v50 = vshrl.u32 %v4645_v20, 5  ;;  %v11132_v5 = vor.u32 %v4651_v8, %v4650_v38  ;;  %v4656_v19 = vshll.u32 %v12952_v46, %v4647_v13 }
 0x5e4   :  { %v11135_v48 = vor.u32 %v4654_v55, %v4653_v1  ;;  %v4661_v41 = vor.u32 %v4660_v6, %v4659_v43  ;;  %v4662_v28 = vshll.u32 %v12928_v35, %v4647_v13  ;;  %v4663_v52 = vshrl.u32 %v13092_v59, %v11095_v32 }
 0x5e5   :  { %v4293_v36 = vsub.s32 4294967266, %v11078_v23  ;;  %v11142_v14 = vmul.u32.u64.low %v11103_v44, %v4884_v24  ;;  %v11143_v47 = vmul.u32.u64.high %v11103_v44, %v4884_v24, %v11142_v14  ;;  %v4658_v20 = vor.u32 %v4657_v15, %v4656_v19 }
 0x5e6   :  { %v11147_v9 = vmul.u32.u64.low %v11103_v44, %v4888_v53  ;;  %v11148_v56 = vmul.u32.u64.high %v11103_v44, %v4888_v53, %v11147_v9  ;;  %v4664_v8 = vor.u32 %v4663_v52, %v4662_v28  ;;  %v4948_v6 = vand.u32 2139095040, %v11087_v61 }
 0x5e7   :  { %vm4427_vm10 = vcmp.lt.s32.totalorder %v10791_v57, 0  ;;  %v6140_v13 = vmin.u32 %v4595_v27, %v11050_v62  ;;  %v4641_v55 = vor.u32 8388608, %v4640_v10  ;;  %vm4665_vm15 = vcmp.lt.s32.totalorder %v11130_v50, 1 }
 0x5e8   :  { %vm4668_vm13 = vcmp.lt.s32.totalorder %v11130_v50, 4  ;;  %v4382_v38 = vadd.s32 536870912, %v11116_v63  ;;  %v4673_v19 = vsel %vm4665_vm15, %v11132_v5, %v11135_v48  ;;  %v4857_v27 = vshrl.u32 %v12945_v54, %v11019_v37 }
 0x5e9   :  { %v4674_v15 = vsel %vm4668_vm13, %v4661_v41, 920167782  ;;  %v4678_v24 = vsel %vm4668_vm13, %v4664_v8, 1326507024  ;;  %v4878_v10 = vsel %vm4876_vm2, %v4866_v42, 2102212464  ;;  %v4677_v1 = vsel %vm4665_vm15, %v11135_v48, %v4658_v20 }
 0x5ea   :  { %vm4667_vm11 = vcmp.lt.s32.totalorder %v11130_v50, 3  ;;  %vm4666_vm14 = vcmp.lt.s32.totalorder %v11130_v50, 2  ;;  %v4949_v28 = vshrl.u32 %v4948_v6, 23  ;;  %v4505_v37 = vand.u32 2147483647, %v11038_v25 }
 0x5eb   :  { %v4675_v43 = vsel %vm4667_vm11, %v4658_v20, %v4674_v15  ;;  %v4679_v53 = vsel %vm4667_vm11, %v4661_v41, %v4678_v24  ;;  %v4294_v52 = vadd.s32 127, %v4293_v36  ;;  %v11180_v9 = vshll.u32 %v4641_v55, 8  ;;  %v4173_v24 = vpop.f32.mrf.mxu1 }
 0x5ec   :  { %v4676_v42 = vsel %vm4666_vm14, %v4673_v19, %v4675_v43  ;;  %v13300_v8 = vand.u32 2147483647, %v10791_v57  ;;  %v4597_v3 = vclz %v6140_v13  ;;  %v4877_v41 = vsel %vm4873_vm1, %v4857_v27, %v11071_v2 }
 0x5ed   :  { %v4879_v36 = vsel %vm4875_vm4, %v11073_v29, %v4878_v10  ;;  %v4680_v25 = vsel %vm4666_vm14, %v4677_v1, %v4679_v53  ;;  %v11196_v6 = vshrl.u32 %v4382_v38, 30  ;;  %v4899_v55 = vadd.s32 1, %v11143_v47 }
 0x5ee   :  { %vm11184_vm3 = vcmp.le.f32.partialorder %v13300_v8, 0.7853982  ;;  %v11200_v19 = vmul.u32.u64.low %v11180_v9, %v4676_v42  ;;  %v11201_v15 = vmul.u32.u64.high %v11180_v9, %v4676_v42, %v11200_v19  ;;  %vm4898_vm5 = vc.u32 %v11148_v56, %v11142_v14 }
 0x5ef   :  { %v11207_v2 = vmul.u32.u64.low %v11180_v9, %v4680_v25  ;;  %v11208_v13 = vmul.u32.u64.high %v11180_v9, %v4680_v25, %v11207_v2  ;;  %v6155_v29 = vadd.s32 4294967169, %v4949_v28  ;;  %v13303_v27 = vcvt.s32.f32 %v11036_v49 }
 0x5f0   :  { %vm4219_vm7 = vcmp.lt.s32.totalorder %v10794_v39, 0  ;;  %v4289_v10 = vsub.s32 32, %v11078_v23  ;;  %v4880_v1 = vsel %vm4874_vm9, %v4877_v41, %v4879_v36  ;;  %v13304_v43 = vsub.s32 4, %v10888_v31 }
 0x5f1   :  { %v4508_v38 = vmul.f32 %v13303_v27, %v4505_v37  ;;  %v4273_v28 = vadd.s32 %v10883_v11, %v10891_v40  ;;  %v4295_v42 = vshll.u32 %v4294_v52, 23  ;;  %v4955_v8 = vadd.s32 1, %v6155_v29 }
 0x5f2   :  { %v4512_v53 = vsel %vm4427_vm10, %v13304_v43, %v10888_v31  ;;  %v6141_v49 = vadd.s32 4294967294, %v4597_v3  ;;  %v4900_v37 = vsel %vm4898_vm5, %v4899_v55, %v11143_v47  ;;  %v4670_v25 = vsel %vm4668_vm13, %v4658_v20, 2102212464 }
 0x5f3   :  { %v11227_v58 = vadd.f32 %v4173_v24, %v10796_v60  ;;  %v4384_v41 = vshll.u32 %v11196_v6, 30  ;;  %v4896_v36 = vmul.u32 %v11103_v44, %v4880_v1  ;;  %v4649_v31 = vshrl.u32 %v12945_v54, %v11095_v32 }
 0x5f4   :  { %vm4956_vm12 = vcmp.gt.s32.totalorder %v4955_v8, 0  ;;  %v4509_v11 = vxor.u32 2147483648, %v4508_v38  ;;  %v4291_v40 = vshrl.u32 %v4273_v28, %v4289_v10  ;;  %v4303_v3 = vsub.s32 4, %v10940_v22 }
 0x5f5   :  { %13305 = vst [vmem:[#allocation31_spill] sm:$0xff] %v11227_v58  ;;  %v4957_v52 = vsel %vm4956_vm12, %v4955_v8, 0  ;;  %v11234_v47 = vadd.s32 %v4900_v37, %v4896_v36  ;;  %v4669_v60 = vsel %vm4665_vm15, %v4649_v31, %v11132_v5  ;;  %v4671_v20 = vsel %vm4667_vm11, %v11135_v48, %v4670_v25 }
 0x5f6   :  { %v4959_v44 = vand.u32 31, %v4957_v52  ;;  %v4514_v32 = vsel %vm11184_vm3, 0, %v4512_v53  ;;  %v4290_v55 = vshll.u32 %v10957_v12, %v11078_v23  ;;  %v4296_v2 = vor.u32 4788187, %v4295_v42 }
 0x5f7   :  { %v4691_v29 = vadd.s32 1, %v11201_v15  ;;  %vm6142_vm8 = vcmp.lt.s32.totalorder %v6141_v49, 0  ;;  %v11248_v24 = vsub.s32 %v11116_v63, %v4384_v41  ;;  %vm4690_vm0 = vc.u32 %v11208_v13, %v11200_v19 }
 0x5f8   :  { %v4740_v5 = vand.u32 2139095040, %v11227_v58  ;;  %v4292_v48 = vor.u32 %v4291_v40, %v4290_v55  ;;  %v11256_v27 = vsel %vm4219_vm7, %v4303_v3, %v10940_v22  ;;  %v4672_v12 = vsel %vm4666_vm14, %v4669_v60, %v4671_v20 }
 0x5f9   :  { %v4510_v23 = vsel %vm4427_vm10, %v4509_v11, %v4508_v38  ;;  %v13306_v63 = vand.u32 2147483647, %v10794_v39  ;;  %v4902_v1 = vadd.s32 536870912, %v11234_v47  ;;  %v11269_v43 = vsub.s32 32, %v4959_v44 }
 0x5fa   :  { %v11271_v53 = vadd.s32 3, %v4514_v32  ;;  %v4297_v22 = vand.u32 2147483647, %v4296_v2  ;;  %v4600_v28 = vsel %vm6142_vm8, 0, %v6141_v49  ;;  %v4692_v50 = vsel %vm4690_vm0, %v4691_v29, %v11201_v15 }
 0x5fb   :  { %vm11264_vm6 = vcmp.le.f32.partialorder %v13306_v63, 0.7853982  ;;  %v4387_v42 = vsub.s32 0, %v11248_v24  ;;  %v4688_v8 = vmul.u32 %v11180_v9, %v4672_v12  ;;  %v4741_v37 = vshrl.u32 %v4740_v5, 23 }
 0x5fc   :  { %13309 = vst [vmem:[#allocation48_spill] sm:$0xff] %v11271_v53  ;;  %v11282_v25 = vsel %vm11184_vm3, %v10791_v57, %v4510_v23  ;;  %v4299_v41 = vcvt.s32.f32 %v4292_v48  ;;  %vm4531_vm2 = vcmp.lt.s32.totalorder %v10802_v4, 0  ;;  %v4585_v15 = vadd.s32 %v10933_v51, %v10938_v0 }
 0x5fd   :  { %v4615_v49 = vsub.s32 4, %v11005_v16  ;;  %v4601_v36 = vsub.s32 32, %v4600_v28  ;;  %v11288_v31 = vshrl.u32 %v4902_v1, 30  ;;  %v11290_v11 = vadd.s32 %v4692_v50, %v4688_v8 }
 0x5fe   :  { %v4972_v9 = vshrl.u32 %v12928_v35, %v11269_v43  ;;  %v4300_v40 = vmul.f32 %v4299_v41, %v4297_v22  ;;  %v4605_v30 = vsub.s32 4294967266, %v4600_v28  ;;  %v12878_v3 = vand.u32 2147483647, %v11087_v61 }
 0x5ff   :  { %v4975_v60 = vshrl.u32 %v13092_v59, %v11269_v43  ;;  %v6132_v20 = vmin.u32 %v4387_v42, %v11248_v24  ;;  %v11298_v51 = vshrl.u32 %v4957_v52, 5  ;;  %v4971_v0 = vshll.u32 %v12950_v18, %v4959_v44 }
 0x600   :  { %v6147_v32 = vadd.s32 4294967169, %v4741_v37  ;;  %v4963_v55 = vshrl.u32 %v12951_v17, %v11269_v43  ;;  %v4966_v2 = vshrl.u32 %v12952_v46, %v11269_v43  ;;  %v4969_v29 = vshrl.u32 %v12950_v18, %v11269_v43 }
 0x601   :  { %v4974_v5 = vshll.u32 %v12928_v35, %v4959_v44  ;;  %v4603_v48 = vshrl.u32 %v4585_v15, %v4601_v36  ;;  %v4904_v12 = vshll.u32 %v11288_v31, 30  ;;  %v4694_v52 = vadd.s32 536870912, %v11290_v11 }
 0x602   :  { %v4973_v23 = vor.u32 %v4972_v9, %v4971_v0  ;;  %v4962_v63 = vshll.u32 %v12945_v54, %v4959_v44  ;;  %v4965_v1 = vshll.u32 %v12951_v17, %v4959_v44  ;;  %v4968_v22 = vshll.u32 %v12952_v46, %v4959_v44 }
 0x603   :  { %v4976_v50 = vor.u32 %v4975_v60, %v4974_v5  ;;  %v4602_v42 = vshll.u32 %v11050_v62, %v4600_v28  ;;  %v4389_v8 = vclz %v6132_v20  ;;  %v4952_v37 = vand.u32 8388607, %v12878_v3 }
 0x604   :  { %v4747_v41 = vadd.s32 1, %v6147_v32  ;;  %v13310_v15 = vand.u32 2147483647, %v10802_v4  ;;  %v11322_v9 = vor.u32 %v4963_v55, %v4962_v63  ;;  %v11324_v0 = vor.u32 %v4966_v2, %v4965_v1 }
 0x605   :  { %v4970_v38 = vor.u32 %v4969_v29, %v4968_v22  ;;  %vm4980_vm4 = vcmp.lt.s32.totalorder %v11298_v51, 4  ;;  %v4301_v44 = vxor.u32 2147483648, %v4300_v40  ;;  %v4606_v62 = vadd.s32 127, %v4605_v30 }
 0x606   :  { %vm11318_vm1 = vcmp.le.f32.partialorder %v13310_v15, 0.7853982  ;;  %v11330_v28 = vsel %vm4531_vm2, %v4615_v49, %v11005_v16  ;;  %v4986_v60 = vsel %vm4980_vm4, %v4973_v23, 920167782  ;;  %v11334_v20 = vor.u32 %v4603_v48, %v4602_v42 }
 0x607   :  { %v11337_v32 = vsub.s32 %v11234_v47, %v4904_v12  ;;  %v11339_v55 = vshrl.u32 %v4694_v52, 30  ;;  %v4990_v2 = vsel %vm4980_vm4, %v4976_v50, 1326507024  ;;  %v6133_v29 = vadd.s32 4294967294, %v4389_v8 }
 0x608   :  { %vm4977_vm9 = vcmp.lt.s32.totalorder %v11298_v51, 1  ;;  %vm4979_vm10 = vcmp.lt.s32.totalorder %v11298_v51, 3  ;;  %vm4748_vm15 = vcmp.gt.s32.totalorder %v4747_v41, 0  ;;  %v4953_v16 = vor.u32 8388608, %v4952_v37 }
 0x609   :  { %v4985_v49 = vsel %vm4977_vm9, %v11322_v9, %v11324_v0  ;;  %v4987_v47 = vsel %vm4979_vm10, %v4970_v38, %v4986_v60  ;;  %v4749_v30 = vsel %vm4748_vm15, %v4747_v41, 0  ;;  %v4607_v5 = vshll.u32 %v4606_v62, 23 }
 0x60a   :  { %v4989_v48 = vsel %vm4977_vm9, %v11324_v0, %v4970_v38  ;;  %v4991_v12 = vsel %vm4979_vm10, %v4973_v23, %v4990_v2  ;;  %v4751_v52 = vand.u32 31, %v4749_v30  ;;  %v4302_v63 = vsel %vm4219_vm7, %v4301_v44, %v4300_v40 }
 0x60b   :  { %v4907_v1 = vsub.s32 0, %v11337_v32  ;;  %v4696_v22 = vshll.u32 %v11339_v55, 30  ;;  %vm4978_vm13 = vcmp.lt.s32.totalorder %v11298_v51, 2  ;;  %6681 = vcosq.f32 %v11282_v25 }
 0x60c   :  { %v13313_v50 = vsel %vm11264_vm6, 0, %v11256_v27  ;;  %v4988_v23 = vsel %vm4978_vm13, %v4985_v49, %v4987_v47  ;;  %v11370_v8 = vsub.s32 32, %v4751_v52  ;;  %6683 = vsinq.f32 %v11282_v25 }
 0x60d   :  { %v11366_v42 = vadd.s32 3, %v13313_v50  ;;  %vm6134_vm11 = vcmp.lt.s32.totalorder %v6133_v29, 0  ;;  %v4992_v40 = vsel %vm4978_vm13, %v4989_v48, %v4991_v12  ;;  %v11375_v37 = vshll.u32 %v4953_v16, 8 }
 0x60e   :  { %v11380_v41 = vsel %vm11264_vm6, %v10794_v39, %v4302_v63  ;;  %v11382_v27 = vor.u32 4788187, %v4607_v5  ;;  %v6152_v25 = vmin.u32 %v4907_v1, %v11337_v32  ;;  %v11390_v62 = vsub.s32 %v11290_v11, %v4696_v22  ;;  %v6290_v5 = vpop.f32.mrf.mxu1 }
 0x60f   :  { %13314 = vst [vmem:[#allocation11_spill] sm:$0xff] %v11366_v42  ;;  %v11393_v60 = vmul.u32.u64.low %v11375_v37, %v4988_v23  ;;  %v11394_v2 = vmul.u32.u64.high %v11375_v37, %v4988_v23, %v11393_v60  ;;  %v11397_v10 = vsel %vm6134_vm11, 0, %v6133_v29  ;;  %v4764_v47 = vshrl.u32 %v12928_v35, %v11370_v8 }
 0x610   :  { %v11400_v16 = vmul.u32.u64.low %v11375_v37, %v4992_v40  ;;  %v11401_v49 = vmul.u32.u64.high %v11375_v37, %v4992_v40, %v11400_v16  ;;  %v11406_v48 = vshrl.u32 %v4749_v30, 5  ;;  %v4763_v11 = vshll.u32 %v12950_v18, %v4751_v52 }
 0x611   :  { %v4767_v12 = vshrl.u32 %v13092_v59, %v11370_v8  ;;  %v4755_v29 = vshrl.u32 %v12951_v17, %v11370_v8  ;;  %v4758_v63 = vshrl.u32 %v12952_v46, %v11370_v8  ;;  %v4761_v1 = vshrl.u32 %v12950_v18, %v11370_v8 }
 0x612   :  { %v4766_v22 = vshll.u32 %v12928_v35, %v4751_v52  ;;  %v4909_v50 = vclz %v6152_v25  ;;  %v4699_v30 = vsub.s32 0, %v11390_v62  ;;  %v4982_v23 = vsel %vm4980_vm4, %v4970_v38, 2102212464 }
 0x613   :  { %v4765_v40 = vor.u32 %v4764_v47, %v4763_v11  ;;  %v4754_v16 = vshll.u32 %v12945_v54, %v4751_v52  ;;  %v4757_v3 = vshll.u32 %v12951_v17, %v4751_v52  ;;  %v4760_v44 = vshll.u32 %v12952_v46, %v4751_v52 }
 0x614   :  { %v4768_v15 = vor.u32 %v4767_v12, %v4766_v22  ;;  %v4609_v39 = vand.u32 2147483647, %v11382_v27  ;;  %v4397_v57 = vsub.s32 4294967266, %v11397_v10  ;;  %v4961_v25 = vshrl.u32 %v12945_v54, %v11269_v43 }
 0x615   :  { %v13315_v42 = vand.u32 2147483647, %v11227_v58  ;;  %v11430_v38 = vor.u32 %v4755_v29, %v4754_v16  ;;  %v11432_v47 = vor.u32 %v4758_v63, %v4757_v3  ;;  %v11434_v11 = vor.u32 %v4761_v1, %v4760_v44 }
 0x616   :  { %vm4772_vm14 = vcmp.lt.s32.totalorder %v11406_v48, 4  ;;  %v4981_v52 = vsel %vm4977_vm9, %v4961_v25, %v11322_v9  ;;  %v4983_v27 = vsel %vm4979_vm10, %v11324_v0, %v4982_v23  ;;  %v6153_v3 = vadd.s32 4294967294, %v4909_v50 }
 0x617   :  { %v4744_v53 = vand.u32 8388607, %v13315_v42  ;;  %v4778_v43 = vsel %vm4772_vm14, %v4765_v40, 920167782  ;;  %v11446_v42 = vadd.f32 %v6290_v5, %v10773_v7  ;;  %v6144_v44 = vmin.u32 %v4699_v30, %v11390_v62 }
 0x618   :  { %v5003_v12 = vadd.s32 1, %v11394_v2  ;;  %v4782_v29 = vsel %vm4772_vm14, %v4768_v15, 1326507024  ;;  %v11452_v63 = vpop.eup %6681  ;;  %v4398_v9 = vadd.s32 127, %v4397_v57  ;;  %vm5002_vm3 = vc.u32 %v11401_v49, %v11393_v60 }
 0x619   :  { %13316 = vst [vmem:[#allocation10_spill] sm:$0xff] %v11452_v63  ;;  %vm4769_vm5 = vcmp.lt.s32.totalorder %v11406_v48, 1  ;;  %vm4771_vm7 = vcmp.lt.s32.totalorder %v11406_v48, 3  ;;  %v11458_v7 = vpop.eup %6683  ;;  %v4984_v0 = vsel %vm4978_vm13, %v4981_v52, %v4983_v27  ;;  %v4745_v5 = vor.u32 8388608, %v4744_v53 }
 0x61a   :  { %13317 = vst [vmem:[#allocation41_spill] sm:$0xff] %v11458_v7  ;;  %v4777_v15 = vsel %vm4769_vm5, %v11430_v38, %v11432_v47  ;;  %v4779_v57 = vsel %vm4771_vm7, %v11434_v11, %v4778_v43  ;;  %v4393_v1 = vsub.s32 32, %v11397_v10  ;;  %v4781_v22 = vsel %vm4769_vm5, %v11432_v47, %v11434_v11 }
 0x61b   :  { %v4783_v51 = vsel %vm4771_vm7, %v4765_v40, %v4782_v29  ;;  %v5260_v53 = vand.u32 2139095040, %v11446_v42  ;;  %vm4323_vm12 = vcmp.lt.s32.totalorder %v10879_v33, 0  ;;  %vm6154_vm8 = vcmp.lt.s32.totalorder %v6153_v3, 0  ;;  %v4186_v40 = vpop.f32.mrf.mxu1 }
 0x61c   :  { %v4701_v50 = vclz %v6144_v44  ;;  %v5004_v30 = vsel %vm5002_vm3, %v5003_v12, %v11394_v2  ;;  %vm4770_vm0 = vcmp.lt.s32.totalorder %v11406_v48, 2  ;;  %v4377_v23 = vadd.s32 %v11023_v45, %v11031_v26 }
 0x61d   :  { %v5000_v16 = vmul.u32 %v11375_v37, %v4984_v0  ;;  %v4780_v25 = vsel %vm4770_vm0, %v4777_v15, %v4779_v57  ;;  %v5261_v52 = vshrl.u32 %v5260_v53, 23  ;;  %v13318_v27 = vcvt.s32.f32 %v11334_v20 }
 0x61e   :  { %v4399_v29 = vshll.u32 %v4398_v9, 23  ;;  %v4784_v44 = vsel %vm4770_vm0, %v4781_v22, %v4783_v51  ;;  %v11489_v2 = vshll.u32 %v4745_v5, 8  ;;  %v4395_v12 = vshrl.u32 %v4377_v23, %v4393_v1 }
 0x61f   :  { %v4612_v43 = vmul.f32 %v13318_v27, %v4609_v39  ;;  %v11491_v63 = vsel %vm6154_vm8, 0, %v6153_v3  ;;  %v11493_v45 = vadd.s32 %v5004_v30, %v5000_v16  ;;  %v6167_v26 = vadd.s32 4294967169, %v5261_v52 }
 0x620   :  { %v13319_v37 = vand.u32 2147483647, %v10879_v33  ;;  %v6145_v20 = vadd.s32 4294967294, %v4701_v50  ;;  %v11502_v39 = vmul.u32.u64.low %v11489_v2, %v4780_v25  ;;  %v11503_v9 = vmul.u32.u64.high %v11489_v2, %v4780_v25, %v11502_v39 }
 0x621   :  { %v11507_v5 = vadd.f32 %v4186_v40, %v10777_v34  ;;  %v4394_v3 = vshll.u32 %v11248_v24, %v11397_v10  ;;  %v4407_v15 = vsub.s32 4, %v11196_v6  ;;  %v4613_v22 = vxor.u32 2147483648, %v4612_v43 }
 0x622   :  { %vm11497_vm6 = vcmp.le.f32.partialorder %v13319_v37, 0.7853982  ;;  %v11513_v57 = vmul.u32.u64.low %v11489_v2, %v4784_v44  ;;  %v11514_v1 = vmul.u32.u64.high %v11489_v2, %v4784_v44, %v11513_v57  ;;  %v4400_v51 = vor.u32 4788187, %v4399_v29 }
 0x623   :  { %v4917_v53 = vsub.s32 4294967266, %v11491_v63  ;;  %v5267_v50 = vadd.s32 1, %v6167_v26  ;;  %6685 = vcosq.f32 %v11380_v41  ;;  %v13322_v34 = vsel %vm11318_vm1, 0, %v11330_v28 }
 0x624   :  { %v11522_v30 = vadd.s32 3, %v13322_v34  ;;  %v4396_v24 = vor.u32 %v4395_v12, %v4394_v3  ;;  %v5006_v10 = vadd.s32 536870912, %v11493_v45  ;;  %6687 = vsinq.f32 %v11380_v41  ;;  %v6291_v3 = vpop.f32.mrf.mxu1 }
 0x625   :  { %vm6146_vm4 = vcmp.lt.s32.totalorder %v6145_v20, 0  ;;  %vm5268_vm9 = vcmp.gt.s32.totalorder %v5267_v50, 0  ;;  %v5052_v23 = vand.u32 2139095040, %v11507_v5  ;;  %v11530_v16 = vsel %vm4323_vm12, %v4407_v15, %v11196_v6 }
 0x626   :  { %13323 = vst [vmem:[#allocation16_spill] sm:$0xff] %v11522_v30  ;;  %v4753_v25 = vshrl.u32 %v12945_v54, %v11370_v8  ;;  %v4774_v28 = vsel %vm4772_vm14, %v11434_v11, 2102212464  ;;  %v5269_v52 = vsel %vm5268_vm9, %v5267_v50, 0  ;;  %v4614_v41 = vsel %vm4531_vm2, %v4613_v22, %v4612_v43 }
 0x627   :  { %v4401_v40 = vand.u32 2147483647, %v4400_v51  ;;  %v4918_v27 = vadd.s32 127, %v4917_v53  ;;  %v5271_v29 = vand.u32 31, %v5269_v52  ;;  %v4403_v44 = vcvt.s32.f32 %v4396_v24 }
 0x628   :  { %v11539_v12 = vsel %vm6146_vm4, 0, %v6145_v20  ;;  %v11541_v26 = vshrl.u32 %v5006_v10, 30  ;;  %v4773_v6 = vsel %vm4769_vm5, %v4753_v25, %v11430_v38  ;;  %v4775_v8 = vsel %vm4771_vm7, %v11432_v47, %v4774_v28 }
 0x629   :  { %v4795_v11 = vadd.s32 1, %v11503_v9  ;;  %v11550_v37 = vsub.s32 32, %v5271_v29  ;;  %v5053_v43 = vshrl.u32 %v5052_v23, 23  ;;  %v11555_v20 = vsel %vm11318_vm1, %v10802_v4, %v4614_v41 }
 0x62a   :  { %v4897_v38 = vadd.s32 %v11142_v14, %v11148_v56  ;;  %vm4794_vm2 = vc.u32 %v11514_v1, %v11502_v39  ;;  %v11564_v47 = vmul.f32 %v4403_v44, %v4401_v40  ;;  %v4913_v15 = vsub.s32 32, %v11491_v63 }
 0x62b   :  { %v4919_v57 = vshll.u32 %v4918_v27, 23  ;;  %v4927_v22 = vsub.s32 4, %v11288_v31  ;;  %v4709_v36 = vsub.s32 4294967266, %v11539_v12  ;;  %v5008_v51 = vshll.u32 %v11541_v26, 30 }
 0x62c   :  { %v4776_v53 = vsel %vm4770_vm0, %v4773_v6, %v4775_v8  ;;  %v12882_v50 = vand.u32 2147483647, %v11446_v42  ;;  %v4796_v14 = vsel %vm4794_vm2, %v4795_v11, %v11503_v9  ;;  %v5283_v56 = vshll.u32 %v12950_v18, %v5271_v29 }
 0x62d   :  { %v5284_v34 = vshrl.u32 %v12928_v35, %v11550_v37  ;;  %v6159_v24 = vadd.s32 4294967169, %v5053_v43  ;;  %v11577_v10 = vshrl.u32 %v5269_v52, 5  ;;  %v5275_v23 = vshrl.u32 %v12951_v17, %v11550_v37 }
 0x62e   :  { %v5278_v25 = vshrl.u32 %v12952_v46, %v11550_v37  ;;  %v5281_v48 = vshrl.u32 %v12950_v18, %v11550_v37  ;;  %v4792_v28 = vmul.u32 %v11489_v2, %v4776_v53  ;;  %v5286_v41 = vshll.u32 %v12928_v35, %v5271_v29 }
 0x62f   :  { %v5285_v9 = vor.u32 %v5284_v34, %v5283_v56  ;;  %v5287_v40 = vshrl.u32 %v13092_v59, %v11550_v37  ;;  %vm4843_vm1 = vcmp.lt.s32.totalorder %v10945_v21, 0  ;;  %v11591_v52 = vsub.s32 %v11493_v45, %v5008_v51 }
 0x630   :  { %v5274_v27 = vshll.u32 %v12945_v54, %v5271_v29  ;;  %v5277_v44 = vshll.u32 %v12951_v17, %v5271_v29  ;;  %v5280_v6 = vshll.u32 %v12952_v46, %v5271_v29  ;;  %v11596_v8 = vpop.eup %6685  ;;  %v11598_v2 = vadd.s32 %v4796_v14, %v4792_v28 }
 0x631   :  { %13324 = vst [vmem:[#allocation8_spill] sm:$0xff] %v11596_v8  ;;  %v5264_v11 = vand.u32 8388607, %v12882_v50  ;;  %v5288_v43 = vor.u32 %v5287_v40, %v5286_v41  ;;  %v5059_v53 = vadd.s32 1, %v6159_v24  ;;  %v11602_v56 = vpop.eup %6687  ;;  %vm5292_vm10 = vcmp.lt.s32.totalorder %v11577_v10, 4 }
 0x632   :  { %13325 = vst [vmem:[#allocation39_spill] sm:$0xff] %v11602_v56  ;;  %v11604_v34 = vor.u32 %v5275_v23, %v5274_v27  ;;  %v11606_v45 = vor.u32 %v5278_v25, %v5277_v44  ;;  %v5282_v51 = vor.u32 %v5281_v48, %v5280_v6  ;;  %v4405_v29 = vxor.u32 2147483648, %v11564_v47 }
 0x633   :  { %v4914_v14 = vshll.u32 %v11337_v32, %v11491_v63  ;;  %v4710_v28 = vadd.s32 127, %v4709_v36  ;;  %v5298_v50 = vsel %vm5292_vm10, %v5285_v9, 920167782  ;;  %v4915_v41 = vshrl.u32 %v4897_v38, %v4913_v15 }
 0x634   :  { %v4920_v24 = vor.u32 4788187, %v4919_v57  ;;  %v5011_v40 = vsub.s32 0, %v11591_v52  ;;  %v5302_v23 = vsel %vm5292_vm10, %v5288_v43, 1326507024  ;;  %v4705_v27 = vsub.s32 32, %v11539_v12 }
 0x635   :  { %v13326_v25 = vand.u32 2147483647, %v10945_v21  ;;  %v4798_v32 = vadd.s32 536870912, %v11598_v2  ;;  %vm5289_vm13 = vcmp.lt.s32.totalorder %v11577_v10, 1  ;;  %vm5291_vm11 = vcmp.lt.s32.totalorder %v11577_v10, 3 }
 0x636   :  { %v5265_v63 = vor.u32 8388608, %v5264_v11  ;;  %v5297_v38 = vsel %vm5289_vm13, %v11604_v34, %v11606_v45  ;;  %v5299_v15 = vsel %vm5291_vm11, %v5282_v51, %v5298_v50  ;;  %vm5060_vm14 = vcmp.gt.s32.totalorder %v5059_v53, 0 }
 0x637   :  { %vm11619_vm15 = vcmp.le.f32.partialorder %v13326_v25, 0.7853982  ;;  %v4689_v57 = vadd.s32 %v11200_v19, %v11208_v13  ;;  %v4711_v36 = vshll.u32 %v4710_v28, 23  ;;  %v5301_v44 = vsel %vm5289_vm13, %v11606_v45, %v5282_v51 }
 0x638   :  { %v5303_v6 = vsel %vm5291_vm11, %v5285_v9, %v5302_v23  ;;  %v4916_v11 = vor.u32 %v4915_v41, %v4914_v14  ;;  %v6156_v43 = vmin.u32 %v5011_v40, %v11591_v52  ;;  %vm5290_vm3 = vcmp.lt.s32.totalorder %v11577_v10, 2  ;;  %v13329_v23 = vld [vmem:[#allocation34_spill] sm:$0xff] }
 0x639   :  { %v5061_v25 = vsel %vm5060_vm14, %v5059_v53, 0  ;;  %v4928_v50 = vsel %vm4843_vm1, %v4927_v22, %v11288_v31  ;;  %v4707_v19 = vshrl.u32 %v4689_v57, %v4705_v27  ;;  %v11645_v13 = vshrl.u32 %v4798_v32, 30 }
 0x63a   :  { %v5300_v28 = vsel %vm5290_vm3, %v5297_v38, %v5299_v15  ;;  %v4406_v9 = vsel %vm4323_vm12, %v4405_v29, %v11564_v47  ;;  %v4921_v14 = vand.u32 2147483647, %v4920_v24  ;;  %v5304_v41 = vsel %vm5290_vm3, %v5301_v44, %v5303_v6 }
 0x63b   :  { %v11654_v53 = vshll.u32 %v5265_v63, 8  ;;  %v4706_v40 = vshll.u32 %v11390_v62, %v11539_v12  ;;  %v4712_v31 = vor.u32 4788187, %v4711_v36  ;;  %v5063_v22 = vand.u32 31, %v5061_v25 }
 0x63c   :  { %v11659_v27 = vadd.f32 %v6291_v3, %v13329_v23  ;;  %v4923_v32 = vcvt.s32.f32 %v4916_v11  ;;  %v5013_v38 = vclz %v6156_v43  ;;  %v4800_v29 = vshll.u32 %v11645_v13, 30 }
 0x63d   :  { %v11662_v15 = vmul.u32.u64.low %v11654_v53, %v5300_v28  ;;  %v11663_v57 = vmul.u32.u64.high %v11654_v53, %v5300_v28, %v11662_v15  ;;  %v4708_v47 = vor.u32 %v4707_v19, %v4706_v40  ;;  %6689 = vcosq.f32 %v11555_v20 }
 0x63e   :  { %v11668_v24 = vmul.u32.u64.low %v11654_v53, %v5304_v41  ;;  %v11669_v63 = vmul.u32.u64.high %v11654_v53, %v5304_v41, %v11668_v24  ;;  %v4409_v62 = vsel %vm11497_vm6, %v10879_v33, %v4406_v9  ;;  %v4924_v12 = vmul.f32 %v4923_v32, %v4921_v14  ;;  %v13333_v41 = vld [vmem:[#allocation27_spill] sm:$0xff] }
 0x63f   :  { %v4930_v3 = vsel %vm11619_vm15, 0, %v4928_v50  ;;  %v4713_v36 = vand.u32 2147483647, %v4712_v31  ;;  %v5294_v44 = vsel %vm5292_vm10, %v5282_v51, 2102212464  ;;  %v11679_v6 = vsub.s32 32, %v5063_v22 }
 0x640   :  { %v5364_v11 = vand.u32 2139095040, %v11659_v27  ;;  %6691 = vsinq.f32 %v11555_v20  ;;  %v13330_v43 = vsel %vm11497_vm6, 0, %v11530_v16  ;;  %v6157_v28 = vadd.s32 4294967294, %v5013_v38 }
 0x641   :  { %v11687_v19 = vadd.s32 3, %v13330_v43  ;;  %v5273_v50 = vshrl.u32 %v12945_v54, %v11550_v37  ;;  %6693 = vcosq.f32 %v4409_v62  ;;  %v11691_v9 = vadd.s32 3, %v4930_v3 }
 0x642   :  { %v4715_v51 = vcvt.s32.f32 %v4708_v47  ;;  %v11694_v14 = vsub.s32 %v11598_v2, %v4800_v29  ;;  %6695 = vsinq.f32 %v4409_v62  ;;  %vm4635_vm5 = vcmp.lt.s32.totalorder %v13333_v41, 0 }
 0x643   :  { %13331 = vst [vmem:[#allocation13_spill] sm:$0xff] %v11687_v19  ;;  %13332 = vst [vmem:[#allocation45_spill] sm:$0xff] %v11691_v9  ;;  %v4719_v0 = vsub.s32 4, %v11339_v55  ;;  %v5293_v16 = vsel %vm5289_vm13, %v5273_v50, %v11604_v34  ;;  %v5295_v37 = vsel %vm5291_vm11, %v11606_v45, %v5294_v44  ;;  %v4925_v20 = vxor.u32 2147483648, %v4924_v12 }
 0x644   :  { %v11704_v40 = vmul.f32 %v4715_v51, %v4713_v36  ;;  %v5079_v2 = vshrl.u32 %v13092_v59, %v11679_v6  ;;  %v5365_v31 = vshrl.u32 %v5364_v11, 23  ;;  %vm6158_vm7 = vcmp.lt.s32.totalorder %v6157_v28, 0 }
 0x645   :  { %v5315_v23 = vadd.s32 1, %v11663_v57  ;;  %v5076_v38 = vshrl.u32 %v12928_v35, %v11679_v6  ;;  %v4803_v34 = vsub.s32 0, %v11694_v14  ;;  %v5296_v45 = vsel %vm5290_vm3, %v5293_v16, %v5295_v37 }
 0x646   :  { %vm5314_vm12 = vc.u32 %v11669_v63, %v11662_v15  ;;  %v5078_v47 = vshll.u32 %v12928_v35, %v5063_v22  ;;  %v11718_v29 = vshrl.u32 %v5061_v25, 5  ;;  %v5070_v24 = vshrl.u32 %v12952_v46, %v11679_v6 }
 0x647   :  { %v5073_v62 = vshrl.u32 %v12950_v18, %v11679_v6  ;;  %v5075_v3 = vshll.u32 %v12950_v18, %v5063_v22  ;;  %v13334_v36 = vand.u32 2147483647, %v13333_v41  ;;  %v11731_v44 = vsel %vm6158_vm7, 0, %v6157_v28 }
 0x648   :  { %v5067_v25 = vshrl.u32 %v12951_v17, %v11679_v6  ;;  %v5080_v11 = vor.u32 %v5079_v2, %v5078_v47  ;;  %v6171_v43 = vadd.s32 4294967169, %v5365_v31  ;;  %v5316_v50 = vsel %vm5314_vm12, %v5315_v23, %v11663_v57 }
 0x649   :  { %vm11727_vm8 = vcmp.le.f32.partialorder %v13334_v36, 0.7853982  ;;  %v5069_v51 = vshll.u32 %v12951_v17, %v5063_v22  ;;  %v5072_v16 = vshll.u32 %v12952_v46, %v5063_v22  ;;  %v5077_v37 = vor.u32 %v5076_v38, %v5075_v3 }
 0x64a   :  { %vm4947_vm0 = vcmp.lt.s32.totalorder %v11087_v61, 0  ;;  %v6148_v36 = vmin.u32 %v4803_v34, %v11694_v14  ;;  %v5312_v32 = vmul.u32 %v11654_v53, %v5296_v45  ;;  %v13337_v28 = vand.u32 2147483647, %v11507_v5  ;;  %v11747_v23 = vpop.eup %6689 }
 0x64b   :  { %v5066_v4 = vshll.u32 %v12945_v54, %v5063_v22  ;;  %v11744_v2 = vor.u32 %v5070_v24, %v5069_v51  ;;  %v5074_v31 = vor.u32 %v5073_v62, %v5072_v16  ;;  %vm5084_vm6 = vcmp.lt.s32.totalorder %v11718_v29, 4  ;;  %13338 = vst [vmem:[#allocation5_spill] sm:$0xff] %v11747_v23 }
 0x64c   :  { %v5056_v33 = vand.u32 8388607, %v13337_v28  ;;  %v5371_v57 = vadd.s32 1, %v6171_v43  ;;  %v4720_v38 = vsel %vm4635_vm5, %v4719_v0, %v11339_v55  ;;  %v11752_v34 = vadd.s32 %v5316_v50, %v5312_v32  ;;  %v4189_v43 = vpop.f32.mrf.mxu1 }
 0x64d   :  { %v5068_v53 = vor.u32 %v5067_v25, %v5066_v4  ;;  %v5094_v45 = vsel %vm5084_vm6, %v5080_v11, 1326507024  ;;  %v4926_v22 = vsel %vm4843_vm1, %v4925_v20, %v4924_v12  ;;  %v5021_v47 = vsub.s32 4294967266, %v11731_v44  ;;  %v11762_v3 = vpop.eup %6691 }
 0x64e   :  { %v5031_v24 = vsub.s32 4, %v11541_v26  ;;  %v5090_v62 = vsel %vm5084_vm6, %v5077_v37, 920167782  ;;  %13339 = vst [vmem:[#allocation15_spill] sm:$0xff] %v11762_v3  ;;  %v13340_v55 = vand.u32 2147483647, %v11087_v61  ;;  %v4805_v4 = vclz %v6148_v36  ;;  %v11772_v12 = vpop.eup %6693 }
 0x64f   :  { %vm5081_vm9 = vcmp.lt.s32.totalorder %v11718_v29, 1  ;;  %vm5083_vm2 = vcmp.lt.s32.totalorder %v11718_v29, 3  ;;  %vm5372_vm1 = vcmp.gt.s32.totalorder %v5371_v57, 0  ;;  %13343 = vst [vmem:[#allocation25_spill] sm:$0xff] %v11772_v12  ;;  %v4717_v20 = vxor.u32 2147483648, %v11704_v40  ;;  %v11780_v50 = vpop.eup %6695  ;;  %v13345_v12 = vld [vmem:[#allocation14_spill] sm:$0xff] }
 0x650   :  { %vm11766_vm4 = vcmp.le.f32.partialorder %v13340_v55, 0.7853982  ;;  %v5057_v32 = vor.u32 8388608, %v5056_v33  ;;  %v5093_v25 = vsel %vm5081_vm9, %v11744_v2, %v5074_v31  ;;  %v5095_v11 = vsel %vm5083_vm2, %v5077_v37, %v5094_v45  ;;  %13344 = vst [vmem:[#allocation7_spill] sm:$0xff] %v11780_v50 }
 0x651   :  { %v5017_v51 = vsub.s32 32, %v11731_v44  ;;  %v5318_v16 = vadd.s32 536870912, %v11752_v34  ;;  %v5089_v36 = vsel %vm5081_vm9, %v5068_v53, %v11744_v2  ;;  %v5091_v33 = vsel %vm5083_vm2, %v5074_v31, %v5090_v62 }
 0x652   :  { %v4722_v28 = vsel %vm11727_vm8, 0, %v4720_v38  ;;  %v5022_v55 = vadd.s32 127, %v5021_v47  ;;  %vm5082_vm10 = vcmp.lt.s32.totalorder %v11718_v29, 2  ;;  %v5373_v37 = vsel %vm5372_vm1, %v5371_v57, 0 }
 0x653   :  { %v5001_v45 = vadd.s32 %v11393_v60, %v11401_v49  ;;  %v6149_v8 = vadd.s32 4294967294, %v4805_v4  ;;  %v5096_v56 = vsel %vm5082_vm10, %v5093_v25, %v5095_v11  ;;  %v11797_v50 = vadd.f32 %v4189_v43, %v13345_v12 }
 0x654   :  { %v4929_v62 = vsel %vm11619_vm15, %v10945_v21, %v4926_v22  ;;  %v5032_v38 = vsel %vm4947_vm0, %v5031_v24, %v11541_v26  ;;  %v5092_v57 = vsel %vm5082_vm10, %v5089_v36, %v5091_v33  ;;  %v11807_v47 = vshll.u32 %v5057_v32, 8 }
 0x655   :  { %13346 = vst [vmem:[#allocation24_spill] sm:$0xff] %v11797_v50  ;;  %v4718_v60 = vsel %vm4635_vm5, %v4717_v20, %v11704_v40  ;;  %v5019_v49 = vshrl.u32 %v5001_v45, %v5017_v51  ;;  %v11812_v4 = vshrl.u32 %v5318_v16, 30  ;;  %v5375_v12 = vand.u32 31, %v5373_v37  ;;  %v6294_v16 = vpop.f32.mrf.mxu1 }
 0x656   :  { %v5018_v48 = vshll.u32 %v11591_v52, %v11731_v44  ;;  %v5023_v22 = vshll.u32 %v5022_v55, 23  ;;  %v11817_v25 = vmul.u32.u64.low %v11807_v47, %v5096_v56  ;;  %v11818_v26 = vmul.u32.u64.high %v11807_v47, %v5096_v56, %v11817_v25 }
 0x657   :  { %vm6150_vm15 = vcmp.lt.s32.totalorder %v6149_v8, 0  ;;  %v11821_v24 = vmul.u32.u64.low %v11807_v47, %v5092_v57  ;;  %v11822_v32 = vmul.u32.u64.high %v11807_v47, %v5092_v57, %v11821_v24  ;;  %v5156_v40 = vand.u32 2139095040, %v11797_v50 }
 0x658   :  { %6697 = vcosq.f32 %v4929_v62  ;;  %v11829_v20 = vsel %vm11727_vm8, %v13333_v41, %v4718_v60  ;;  %v5034_v52 = vsel %vm11766_vm4, 0, %v5032_v38  ;;  %v5086_v56 = vsel %vm5084_vm6, %v5074_v31, 2102212464 }
 0x659   :  { %v5020_v44 = vor.u32 %v5019_v49, %v5018_v48  ;;  %v5320_v11 = vshll.u32 %v11812_v4, 30  ;;  %v5065_v43 = vshrl.u32 %v12945_v54, %v11679_v6  ;;  %v11838_v51 = vsub.s32 32, %v5375_v12 }
 0x65a   :  { %6699 = vsinq.f32 %v4929_v62  ;;  %v11840_v36 = vadd.s32 3, %v4722_v28  ;;  %v5024_v10 = vor.u32 4788187, %v5023_v22  ;;  %v11842_v33 = vsel %vm6150_vm15, 0, %v6149_v8  ;;  %v13349_v62 = vld [vmem:[#allocation20_spill] sm:$0xff] }
 0x65b   :  { %v11844_v55 = vadd.s32 3, %v5034_v52  ;;  %v5085_v31 = vsel %vm5081_vm9, %v5065_v43, %v5068_v53  ;;  %v5087_v45 = vsel %vm5083_vm2, %v11744_v2, %v5086_v56  ;;  %v5157_v38 = vshrl.u32 %v5156_v40, 23 }
 0x65c   :  { %13347 = vst [vmem:[#allocation30_spill] sm:$0xff] %v11840_v36  ;;  %6701 = vcosq.f32 %v11829_v20  ;;  %v4793_v6 = vadd.s32 %v11502_v39, %v11514_v1  ;;  %v12890_v28 = vand.u32 2147483647, %v11659_v27  ;;  %v11856_v8 = vadd.f32 %v6294_v16, %v13349_v62 }
 0x65d   :  { %13348 = vst [vmem:[#allocation17_spill] sm:$0xff] %v11844_v55  ;;  %v5027_v57 = vcvt.s32.f32 %v5020_v44  ;;  %v4813_v60 = vsub.s32 4294967266, %v11842_v33  ;;  %v11860_v53 = vsub.s32 %v11752_v34, %v5320_v11  ;;  %v5388_v2 = vshrl.u32 %v12928_v35, %v11838_v51 }
 0x65e   :  { %v5025_v49 = vand.u32 2147483647, %v5024_v10  ;;  %v4809_v48 = vsub.s32 32, %v11842_v33  ;;  %v5088_v39 = vsel %vm5082_vm10, %v5085_v31, %v5087_v45  ;;  %vm5106_vm13 = vc.u32 %v11818_v26, %v11821_v24 }
 0x65f   :  { %v5107_v1 = vadd.s32 1, %v11822_v32  ;;  %v5379_v22 = vshrl.u32 %v12951_v17, %v11838_v51  ;;  %v5387_v34 = vshll.u32 %v12950_v18, %v5375_v12  ;;  %v6163_v25 = vadd.s32 4294967169, %v5157_v38 }
 0x660   :  { %v11873_v40 = vshrl.u32 %v5373_v37, 5  ;;  %v5382_v52 = vshrl.u32 %v12952_v46, %v11838_v51  ;;  %v5385_v29 = vshrl.u32 %v12950_v18, %v11838_v51  ;;  %v5391_v56 = vshrl.u32 %v13092_v59, %v11838_v51 }
 0x661   :  { %v4814_v44 = vadd.s32 127, %v4813_v60  ;;  %v5323_v11 = vsub.s32 0, %v11860_v53  ;;  %v5378_v43 = vshll.u32 %v12945_v54, %v5375_v12  ;;  %v5389_v16 = vor.u32 %v5388_v2, %v5387_v34 }
 0x662   :  { %v5104_v10 = vmul.u32 %v11807_v47, %v5088_v39  ;;  %v5381_v37 = vshll.u32 %v12951_v17, %v5375_v12  ;;  %v5384_v31 = vshll.u32 %v12952_v46, %v5375_v12  ;;  %v5390_v45 = vshll.u32 %v12928_v35, %v5375_v12 }
 0x663   :  { %vm4739_vm11 = vcmp.lt.s32.totalorder %v11227_v58, 0  ;;  %v5108_v38 = vsel %vm5106_vm13, %v5107_v1, %v11822_v32  ;;  %v5368_v62 = vand.u32 8388607, %v12890_v28  ;;  %v11894_v60 = vor.u32 %v5379_v22, %v5378_v43 }
 0x664   :  { %v5163_v2 = vadd.s32 1, %v6163_v25  ;;  %v11896_v47 = vor.u32 %v5382_v52, %v5381_v37  ;;  %v5386_v39 = vor.u32 %v5385_v29, %v5384_v31  ;;  %v5392_v34 = vor.u32 %v5391_v56, %v5390_v45 }
 0x665   :  { %vm5396_vm14 = vcmp.lt.s32.totalorder %v11873_v40, 4  ;;  %v11899_v12 = vpop.eup %6697  ;;  %v4815_v19 = vshll.u32 %v4814_v44, 23  ;;  %v6168_v7 = vmin.u32 %v5323_v11, %v11860_v53  ;;  %v11904_v1 = vmul.f32 %v5027_v57, %v5025_v49 }
 0x666   :  { %13350 = vst [vmem:[#allocation18_spill] sm:$0xff] %v11899_v12  ;;  %v5402_v32 = vsel %vm5396_vm14, %v5389_v16, 920167782  ;;  %vm5164_vm3 = vcmp.gt.s32.totalorder %v5163_v2, 0  ;;  %v4811_v22 = vshrl.u32 %v4793_v6, %v4809_v48  ;;  %v4823_v25 = vsub.s32 4, %v11645_v13 }
 0x667   :  { %v11907_v52 = vadd.s32 %v5108_v38, %v5104_v10  ;;  %v11909_v29 = vpop.eup %6699  ;;  %vm5393_vm5 = vcmp.lt.s32.totalorder %v11873_v40, 1  ;;  %vm5395_vm7 = vcmp.lt.s32.totalorder %v11873_v40, 3  ;;  %v5165_v56 = vsel %vm5164_vm3, %v5163_v2, 0 }
 0x668   :  { %13351 = vst [vmem:[#allocation6_spill] sm:$0xff] %v11909_v29  ;;  %v5676_v44 = vand.u32 2139095040, %v11856_v8  ;;  %v5369_v11 = vor.u32 8388608, %v5368_v62  ;;  %v5401_v57 = vsel %vm5393_vm5, %v11894_v60, %v11896_v47  ;;  %v5403_v6 = vsel %vm5395_vm7, %v5386_v39, %v5402_v32 }
 0x669   :  { %v5406_v49 = vsel %vm5396_vm14, %v5392_v34, 1326507024  ;;  %v11922_v48 = vpop.eup %6701  ;;  %v11924_v43 = vor.u32 4788187, %v4815_v19  ;;  %v5325_v10 = vclz %v6168_v7  ;;  %v12891_v37 = vand.u32 2147483647, %v11797_v50 }
 0x66a   :  { %13352 = vst [vmem:[#allocation38_spill] sm:$0xff] %v11922_v48  ;;  %v5167_v31 = vand.u32 31, %v5165_v56  ;;  %v4810_v45 = vshll.u32 %v11694_v14, %v11842_v33  ;;  %v5110_v38 = vadd.s32 536870912, %v11907_v52  ;;  %vm5394_vm12 = vcmp.lt.s32.totalorder %v11873_v40, 2 }
 0x66b   :  { %v5405_v62 = vsel %vm5393_vm5, %v11896_v47, %v5386_v39  ;;  %v5404_v2 = vsel %vm5394_vm12, %v5401_v57, %v5403_v6  ;;  %v5407_v7 = vsel %vm5395_vm7, %v5389_v16, %v5406_v49  ;;  %v5677_v34 = vshrl.u32 %v5676_v44, 23 }
 0x66c   :  { %v11938_v19 = vsub.s32 32, %v5167_v31  ;;  %6703 = vsinq.f32 %v11829_v20  ;;  %v11945_v33 = vsel %vm4739_vm11, %v4823_v25, %v11645_v13  ;;  %v11947_v32 = vshll.u32 %v5369_v11, 8 }
 0x66d   :  { %v11949_v28 = vor.u32 %v4811_v22, %v4810_v45  ;;  %v4817_v57 = vand.u32 2147483647, %v11924_v43  ;;  %v6169_v6 = vadd.s32 4294967294, %v5325_v10  ;;  %v11954_v16 = vand.u32 8388607, %v12891_v37 }
 0x66e   :  { %v5408_v20 = vsel %vm5394_vm12, %v5405_v62, %v5407_v7  ;;  %v11959_v44 = vmul.u32.u64.low %v11947_v32, %v5404_v2  ;;  %v11960_v49 = vmul.u32.u64.high %v11947_v32, %v5404_v2, %v11959_v44  ;;  %v5180_v13 = vshrl.u32 %v12928_v35, %v11938_v19 }
 0x66f   :  { %v11965_v22 = vshrl.u32 %v5110_v38, 30  ;;  %v11967_v25 = vshrl.u32 %v5165_v56, 5  ;;  %v5179_v11 = vshll.u32 %v12950_v18, %v5167_v31  ;;  %v6183_v43 = vadd.s32 4294967169, %v5677_v34 }
 0x670   :  { %v5171_v10 = vshrl.u32 %v12951_v17, %v11938_v19  ;;  %v5174_v45 = vshrl.u32 %v12952_v46, %v11938_v19  ;;  %v5177_v62 = vshrl.u32 %v12950_v18, %v11938_v19  ;;  %v5183_v2 = vshrl.u32 %v13092_v59, %v11938_v19 }
 0x671   :  { %v11979_v38 = vmul.u32.u64.low %v11947_v32, %v5408_v20  ;;  %v11980_v7 = vmul.u32.u64.high %v11947_v32, %v5408_v20, %v11979_v38  ;;  %v5181_v56 = vor.u32 %v5180_v13, %v5179_v11  ;;  %v5182_v37 = vshll.u32 %v12928_v35, %v5167_v31 }
 0x672   :  { %v13353_v34 = vand.u32 2147483647, %v11227_v58  ;;  %vm6170_vm6 = vcmp.lt.s32.totalorder %v6169_v6, 0  ;;  %v5170_v23 = vshll.u32 %v12945_v54, %v5167_v31  ;;  %v5173_v3 = vshll.u32 %v12951_v17, %v5167_v31 }
 0x673   :  { %v5176_v41 = vshll.u32 %v12952_v46, %v5167_v31  ;;  %v5377_v20 = vshrl.u32 %v12945_v54, %v11838_v51  ;;  %v5398_v13 = vsel %vm5396_vm14, %v5386_v39, 2102212464  ;;  %v5184_v11 = vor.u32 %v5183_v2, %v5182_v37 }
 0x674   :  { %vm11985_vm8 = vcmp.le.f32.partialorder %v13353_v34, 0.7853982  ;;  %v5683_v38 = vadd.s32 1, %v6183_v43  ;;  %v11996_v30 = vor.u32 %v5171_v10, %v5170_v23  ;;  %v11998_v34 = vor.u32 %v5174_v45, %v5173_v3 }
 0x675   :  { %v5178_v21 = vor.u32 %v5177_v62, %v5176_v41  ;;  %vm5188_vm9 = vcmp.lt.s32.totalorder %v11967_v25, 4  ;;  %v4819_v48 = vcvt.s32.f32 %v11949_v28  ;;  %v5112_v36 = vshll.u32 %v11965_v22, 30 }
 0x676   :  { %v5194_v31 = vsel %vm5188_vm9, %v5181_v56, 920167782  ;;  %v12898_v51 = vand.u32 2147483647, %v11856_v8  ;;  %v12007_v39 = vsel %vm6170_vm6, 0, %v6169_v6  ;;  %v5397_v23 = vsel %vm5393_vm5, %v5377_v20, %v11894_v60 }
 0x677   :  { %v5399_v41 = vsel %vm5395_vm7, %v11896_v47, %v5398_v13  ;;  %v5161_v3 = vor.u32 8388608, %v11954_v16  ;;  %vm5185_vm2 = vcmp.lt.s32.totalorder %v11967_v25, 1  ;;  %vm5187_vm1 = vcmp.lt.s32.totalorder %v11967_v25, 3  ;;  %v4202_v16 = vpop.f32.mrf.mxu1 }
 0x678   :  { %v5198_v28 = vsel %vm5188_vm9, %v5184_v11, 1326507024  ;;  %vm5684_vm10 = vcmp.gt.s32.totalorder %v5683_v38, 0  ;;  %v5419_v37 = vadd.s32 1, %v11960_v49  ;;  %v5193_v60 = vsel %vm5185_vm2, %v11996_v30, %v11998_v34 }
 0x679   :  { %v5195_v47 = vsel %vm5187_vm1, %v5178_v21, %v5194_v31  ;;  %v5685_v6 = vsel %vm5684_vm10, %v5683_v38, 0  ;;  %v12027_v43 = vpop.eup %6703  ;;  %v12030_v10 = vsub.s32 %v11907_v52, %v5112_v36  ;;  %v5400_v45 = vsel %vm5394_vm12, %v5397_v23, %v5399_v41  ;;  %v13358_v38 = vld [vmem:[#allocation47_spill] sm:$0xff] }
 0x67a   :  { %13356 = vst [vmem:[#allocation43_spill] sm:$0xff] %v12027_v43  ;;  %vm5418_vm15 = vc.u32 %v11980_v7, %v11959_v44  ;;  %v5680_v62 = vand.u32 8388607, %v12898_v51  ;;  %vm5186_vm13 = vcmp.lt.s32.totalorder %v11967_v25, 2  ;;  %v5197_v2 = vsel %vm5185_vm2, %v11998_v34, %v5178_v21 }
 0x67b   :  { %v5199_v20 = vsel %vm5187_vm1, %v5181_v56, %v5198_v28  ;;  %v5687_v36 = vand.u32 31, %v5685_v6  ;;  %v13357_v40 = vxor.u32 2147483648, %v11904_v1  ;;  %v5196_v11 = vsel %vm5186_vm13, %v5193_v60, %v5195_v47 }
 0x67c   :  { %v12057_v31 = vadd.f32 %v4202_v16, %v13358_v38  ;;  %v12059_v23 = vmul.f32 %v4819_v48, %v4817_v57  ;;  %v5420_v56 = vsel %vm5418_vm15, %v5419_v37, %v11960_v49  ;;  %v12062_v41 = vshll.u32 %v5161_v3, 8 }
 0x67d   :  { %v12049_v52 = vsel %vm4947_vm0, %v13357_v40, %v11904_v1  ;;  %v5688_v28 = vsub.s32 32, %v5687_v36  ;;  %v5115_v40 = vsub.s32 0, %v12030_v10  ;;  %v5416_v51 = vmul.u32 %v11947_v32, %v5400_v45 }
 0x67e   :  { %v5200_v13 = vsel %vm5186_vm13, %v5197_v2, %v5199_v20  ;;  %v12070_v60 = vmul.u32.u64.low %v12062_v41, %v5196_v11  ;;  %v12071_v47 = vmul.u32.u64.high %v12062_v41, %v5196_v11, %v12070_v60  ;;  %v5681_v48 = vor.u32 8388608, %v5680_v62 }
 0x67f   :  { %v5691_v57 = vshrl.u32 %v12951_v17, %v5688_v28  ;;  %v12075_v49 = vadd.s32 %v5420_v56, %v5416_v51  ;;  %v5690_v3 = vshll.u32 %v12945_v54, %v5687_v36  ;;  %v5693_v37 = vshll.u32 %v12951_v17, %v5687_v36 }
 0x680   :  { %v5694_v16 = vshrl.u32 %v12952_v46, %v5688_v28  ;;  %v12081_v32 = vmul.u32.u64.low %v12062_v41, %v5200_v13  ;;  %v12082_v45 = vmul.u32.u64.high %v12062_v41, %v5200_v13, %v12081_v32  ;;  %v5686_v2 = vshrl.u32 %v5685_v6, 5 }
 0x681   :  { %v5697_v20 = vshrl.u32 %v12950_v18, %v5688_v28  ;;  %v6160_v11 = vmin.u32 %v5115_v40, %v12030_v10  ;;  %v5692_v62 = vor.u32 %v5691_v57, %v5690_v3  ;;  %v5696_v51 = vshll.u32 %v12952_v46, %v5687_v36 }
 0x682   :  { %v5695_v38 = vor.u32 %v5694_v16, %v5693_v37  ;;  %v5169_v56 = vshrl.u32 %v12945_v54, %v11938_v19  ;;  %v5190_v1 = vsel %vm5188_vm9, %v5178_v21, 2102212464  ;;  %v5699_v43 = vshll.u32 %v12950_v18, %v5687_v36 }
 0x683   :  { %v5700_v13 = vshrl.u32 %v12928_v35, %v5688_v28  ;;  %v5698_v32 = vor.u32 %v5697_v20, %v5696_v51  ;;  %v5702_v6 = vshll.u32 %v12928_v35, %v5687_v36  ;;  %v5703_v12 = vshrl.u32 %v13092_v59, %v5688_v28 }
 0x684   :  { %v12095_v40 = vshll.u32 %v5681_v48, 8  ;;  %v5422_v57 = vadd.s32 536870912, %v12075_v49  ;;  %v5189_v19 = vsel %vm5185_vm2, %v5169_v56, %v11996_v30  ;;  %vm5705_vm0 = vcmp.lt.s32.totalorder %v5686_v2, 1 }
 0x685   :  { %v5701_v3 = vor.u32 %v5700_v13, %v5699_v43  ;;  %v5191_v21 = vsel %vm5187_vm1, %v11998_v34, %v5190_v1  ;;  %v5704_v37 = vor.u32 %v5703_v12, %v5702_v6  ;;  %vm5708_vm14 = vcmp.lt.s32.totalorder %v5686_v2, 4 }
 0x686   :  { %v5713_v36 = vsel %vm5705_vm0, %v5692_v62, %v5695_v38  ;;  %vm5706_vm3 = vcmp.lt.s32.totalorder %v5686_v2, 2  ;;  %vm5707_vm5 = vcmp.lt.s32.totalorder %v5686_v2, 3  ;;  %v5468_v16 = vand.u32 2139095040, %v12057_v31 }
 0x687   :  { %v5714_v48 = vsel %vm5708_vm14, %v5701_v3, 920167782  ;;  %v5710_v20 = vsel %vm5708_vm14, %v5698_v32, 2102212464  ;;  %v5717_v30 = vsel %vm5705_vm0, %v5695_v38, %v5698_v32  ;;  %v5718_v43 = vsel %vm5708_vm14, %v5704_v37, 1326507024 }
 0x688   :  { %v5715_v51 = vsel %vm5707_vm5, %v5698_v32, %v5714_v48  ;;  %v5211_v56 = vadd.s32 1, %v12071_v47  ;;  %v5689_v13 = vshrl.u32 %v12945_v54, %v5688_v28  ;;  %v5719_v34 = vsel %vm5707_vm5, %v5701_v3, %v5718_v43 }
 0x689   :  { %v5716_v12 = vsel %vm5706_vm3, %v5713_v36, %v5715_v51  ;;  %v12112_v1 = vshrl.u32 %v5422_v57, 30  ;;  %v5192_v6 = vsel %vm5186_vm13, %v5189_v19, %v5191_v21  ;;  %vm5210_vm7 = vc.u32 %v12082_v45, %v12070_v60 }
 0x68a   :  { %v5720_v48 = vsel %vm5706_vm3, %v5717_v30, %v5719_v34  ;;  %v5709_v32 = vsel %vm5705_vm0, %v5689_v13, %v5692_v62  ;;  %v5711_v37 = vsel %vm5707_vm5, %v5695_v38, %v5710_v20  ;;  %v5117_v36 = vclz %v6160_v11 }
 0x68b   :  { %13359 = vst [vmem:[#allocation36_spill] sm:$0xff] %v12112_v1  ;;  %v12122_v28 = vmul.u32.u64.low %v12095_v40, %v5720_v48  ;;  %v12123_v29 = vmul.u32.u64.high %v12095_v40, %v5720_v48, %v12122_v28  ;;  %v12126_v57 = vmul.u32.u64.low %v12095_v40, %v5716_v12  ;;  %v12127_v3 = vmul.u32.u64.high %v12095_v40, %v5716_v12, %v12126_v57 }
 0x68c   :  { %v5469_v25 = vshrl.u32 %v5468_v16, 23  ;;  %v5033_v19 = vsel %vm11766_vm4, %v11087_v61, %v12049_v52  ;;  %v4821_v62 = vxor.u32 2147483648, %v12059_v23  ;;  %vm5259_vm12 = vcmp.lt.s32.totalorder %v11446_v42, 0 }
 0x68d   :  { %v5329_v38 = vsub.s32 32, %v12007_v39  ;;  %v5212_v21 = vsel %vm5210_vm7, %v5211_v56, %v12071_v47  ;;  %v5208_v11 = vmul.u32 %v12062_v41, %v5192_v6  ;;  %v5712_v20 = vsel %vm5706_vm3, %v5709_v32, %v5711_v37 }
 0x68e   :  { %v6175_v51 = vadd.s32 4294967169, %v5469_v25  ;;  %v5313_v16 = vadd.s32 %v11662_v15, %v11669_v63  ;;  %v13360_v30 = vsub.s32 4294967266, %v12007_v39  ;;  %v5424_v52 = vshll.u32 %v12112_v1, 30 }
 0x68f   :  { %vm5730_vm4 = vc.u32 %v12123_v29, %v12126_v57  ;;  %v12902_v43 = vmov 0.0   ;;  %v6161_v47 = vadd.s32 4294967294, %v5117_v36  ;;  %v12148_v56 = vadd.s32 %v5212_v21, %v5208_v11  ;;  %v6295_v36 = vpop.f32.mrf.mxu1 }
 0x690   :  { %v5334_v0 = vadd.s32 127, %v13360_v30  ;;  %6296 = vmatprep.subr.bf16.mxu0 %v12902_v43  ;;  %v5731_v41 = vadd.s32 1, %v12127_v3  ;;  %v5475_v2 = vadd.s32 1, %v6175_v51  ;;  %6705 = vcosq.f32 %v5033_v19 }
 0x691   :  { %v13361_v15 = vsel %vm11985_vm8, 0, %v11945_v33  ;;  %v5343_v13 = vsub.s32 4, %v11812_v4  ;;  %v5728_v12 = vmul.u32 %v12095_v40, %v5712_v20  ;;  %v4822_v34 = vsel %vm4739_vm11, %v4821_v62, %v12059_v23 }
 0x692   :  { %v12155_v63 = vadd.s32 3, %v13361_v15  ;;  %v5331_v6 = vshrl.u32 %v5313_v16, %v5329_v38  ;;  %v5732_v48 = vsel %vm5730_vm4, %v5731_v41, %v12127_v3  ;;  %vm5476_vm6 = vcmp.gt.s32.totalorder %v5475_v2, 0 }
 0x693   :  { %v5335_v32 = vshll.u32 %v5334_v0, 23  ;;  %v12164_v37 = vsub.s32 %v12075_v49, %v5424_v52  ;;  %v5733_v28 = vadd.s32 %v5732_v48, %v5728_v12  ;;  %v5477_v33 = vsel %vm5476_vm6, %v5475_v2, 0 }
 0x694   :  { %13362 = vst [vmem:[#allocation46_spill] sm:$0xff] %v12155_v63  ;;  %v5330_v25 = vshll.u32 %v11860_v53, %v12007_v39  ;;  %vm6162_vm9 = vcmp.lt.s32.totalorder %v6161_v47, 0  ;;  %v5214_v40 = vadd.s32 536870912, %v12148_v56  ;;  %v5479_v21 = vand.u32 31, %v5477_v33  ;;  %v13363_v39 = vld [vmem:[#allocation21_spill] sm:$0xff] }
 0x695   :  { %6707 = vsinq.f32 %v5033_v19  ;;  %v12172_v23 = vsel %vm11985_vm8, %v11227_v58, %v4822_v34  ;;  %v5734_v3 = vadd.s32 536870912, %v5733_v28  ;;  %v12904_v49 = vand.u32 2147483647, %v12057_v31 }
 0x696   :  { %v5332_v62 = vor.u32 %v5331_v6, %v5330_v25  ;;  %v12178_v38 = vsel %vm5259_vm12, %v5343_v13, %v11812_v4  ;;  %v5480_v53 = vsub.s32 32, %v5479_v21  ;;  %v12181_v11 = vadd.f32 %v6295_v36, %v13363_v39 }
 0x697   :  { %v5336_v20 = vor.u32 4788187, %v5335_v32  ;;  %v12183_v19 = vsel %vm6162_vm9, 0, %v6161_v47  ;;  %v5427_v14 = vsub.s32 0, %v12164_v37  ;;  %v12186_v51 = vshrl.u32 %v5734_v3, 30 }
 0x698   :  { %13364 = vst [vmem:[#allocation35_spill] sm:$0xff] %v12181_v11  ;;  %v12188_v16 = vshrl.u32 %v5214_v40, 30  ;;  %v5483_v30 = vshrl.u32 %v12951_v17, %v5480_v53  ;;  %v5486_v0 = vshrl.u32 %v12952_v46, %v5480_v53  ;;  %v5489_v4 = vshrl.u32 %v12950_v18, %v5480_v53 }
 0x699   :  { %v5736_v52 = vshll.u32 %v12186_v51, 30  ;;  %v5472_v41 = vand.u32 8388607, %v12904_v49  ;;  %v5482_v47 = vshll.u32 %v12945_v54, %v5479_v21  ;;  %v5485_v2 = vshll.u32 %v12951_v17, %v5479_v21 }
 0x69a   :  { %13365 = vst [vmem:[#allocation40_spill] sm:$0xff] %v12188_v16  ;;  %v5488_v15 = vshll.u32 %v12952_v46, %v5479_v21  ;;  %v5491_v13 = vshll.u32 %v12950_v18, %v5479_v21  ;;  %v5492_v12 = vshrl.u32 %v12928_v35, %v5480_v53  ;;  %v5780_v34 = vand.u32 2139095040, %v12181_v11 }
 0x69b   :  { %v12202_v6 = vsub.s32 %v5733_v28, %v5736_v52  ;;  %v5478_v48 = vshrl.u32 %v5477_v33, 5  ;;  %v5484_v32 = vor.u32 %v5483_v30, %v5482_v47  ;;  %v5487_v36 = vor.u32 %v5486_v0, %v5485_v2 }
 0x69c   :  { %v5490_v25 = vor.u32 %v5489_v4, %v5488_v15  ;;  %v5493_v40 = vor.u32 %v5492_v12, %v5491_v13  ;;  %v5494_v3 = vshll.u32 %v12928_v35, %v5479_v21  ;;  %v5495_v39 = vshrl.u32 %v13092_v59, %v5480_v53 }
 0x69d   :  { %v5337_v43 = vand.u32 2147483647, %v5336_v20  ;;  %v5339_v49 = vcvt.s32.f32 %v5332_v62  ;;  %v5125_v58 = vsub.s32 4294967266, %v12183_v19  ;;  %v5739_v61 = vsub.s32 0, %v12202_v6  ;;  %v12208_v63 = vpop.eup %6705 }
 0x69e   :  { %13366 = vst [vmem:[#allocation19_spill] sm:$0xff] %v12208_v63  ;;  %v13367_v28 = vand.u32 2147483647, %v11446_v42  ;;  %v6172_v30 = vmin.u32 %v5427_v14, %v12164_v37  ;;  %v5473_v0 = vor.u32 8388608, %v5472_v41  ;;  %v5496_v21 = vor.u32 %v5495_v39, %v5494_v3 }
 0x69f   :  { %v5781_v4 = vshrl.u32 %v5780_v34, 23  ;;  %v5216_v20 = vshll.u32 %v12188_v16, 30  ;;  %v6184_v62 = vmin.u32 %v5739_v61, %v12202_v6  ;;  %vm5497_vm8 = vcmp.lt.s32.totalorder %v5478_v48, 1 }
 0x6a0   :  { %vm12212_vm11 = vcmp.le.f32.partialorder %v13367_v28, 0.7853982  ;;  %vm5500_vm2 = vcmp.lt.s32.totalorder %v5478_v48, 4  ;;  %vm5499_vm1 = vcmp.lt.s32.totalorder %v5478_v48, 3  ;;  %v5505_v47 = vsel %vm5497_vm8, %v5484_v32, %v5487_v36 }
 0x6a1   :  { %v5502_v52 = vsel %vm5500_vm2, %v5490_v25, 2102212464  ;;  %v5506_v2 = vsel %vm5500_vm2, %v5493_v40, 920167782  ;;  %v5481_v15 = vshrl.u32 %v12945_v54, %v5480_v53  ;;  %vm5498_vm10 = vcmp.lt.s32.totalorder %v5478_v48, 2 }
 0x6a2   :  { %v5507_v13 = vsel %vm5499_vm1, %v5490_v25, %v5506_v2  ;;  %v5509_v14 = vsel %vm5497_vm8, %v5487_v36, %v5490_v25  ;;  %v12223_v41 = vpop.eup %6707  ;;  %v5510_v34 = vsel %vm5500_vm2, %v5496_v21, 1326507024  ;;  %v5513_v61 = vshll.u32 %v5473_v0, 8  ;;  %v4205_v25 = vpop.f32.mrf.mxu1 }
 0x6a3   :  { %13370 = vst [vmem:[#allocation22_spill] sm:$0xff] %v12223_v41  ;;  %v5508_v12 = vsel %vm5498_vm10, %v5505_v47, %v5507_v13  ;;  %v6187_v3 = vadd.s32 4294967169, %v5781_v4  ;;  %v5741_v39 = vclz %v6184_v62  ;;  %v5501_v28 = vsel %vm5497_vm8, %v5481_v15, %v5484_v32 }
 0x6a4   :  { %v5503_v63 = vsel %vm5499_vm1, %v5487_v36, %v5502_v52  ;;  %v5511_v9 = vsel %vm5499_vm1, %v5493_v40, %v5510_v34  ;;  %v5340_v53 = vmul.f32 %v5339_v49, %v5337_v43  ;;  %v5126_v41 = vadd.s32 127, %v5125_v58  ;;  %v13371_v58 = vld [vmem:[#allocation12_spill] sm:$0xff] }
 0x6a5   :  { %v5512_v55 = vsel %vm5498_vm10, %v5509_v14, %v5511_v9  ;;  %v12230_v2 = vmul.u32.u64.low %v5513_v61, %v5508_v12  ;;  %v12231_v16 = vmul.u32.u64.high %v5513_v61, %v5508_v12, %v12230_v2  ;;  %v5429_v47 = vclz %v6172_v30 }
 0x6a6   :  { %v12234_v21 = vmul.u32.u64.low %v5513_v61, %v5512_v55  ;;  %v12235_v0 = vmul.u32.u64.high %v5513_v61, %v5512_v55, %v12234_v21  ;;  %v12238_v4 = vsub.s32 %v12148_v56, %v5216_v20  ;;  %v5504_v32 = vsel %vm5498_vm10, %v5501_v28, %v5503_v63 }
 0x6a7   :  { %v12911_v36 = vand.u32 2147483647, %v12181_v11  ;;  %v5787_v43 = vadd.s32 1, %v6187_v3  ;;  %6709 = vcosq.f32 %v12172_v23  ;;  %v6185_v49 = vadd.s32 4294967294, %v5741_v39 }
 0x6a8   :  { %v12247_v40 = vadd.f32 %v4205_v25, %v13371_v58  ;;  %v5341_v55 = vxor.u32 2147483648, %v5340_v53  ;;  %v5121_v30 = vsub.s32 32, %v12183_v19  ;;  %v5523_v56 = vadd.s32 1, %v12231_v16 }
 0x6a9   :  { %vm5788_vm15 = vcmp.gt.s32.totalorder %v5787_v43, 0  ;;  %v5127_v63 = vshll.u32 %v5126_v41, 23  ;;  %v6173_v48 = vadd.s32 4294967294, %v5429_v47  ;;  %v5520_v20 = vmul.u32 %v5513_v61, %v5504_v32 }
 0x6aa   :  { %vm5522_vm13 = vc.u32 %v12235_v0, %v12230_v2  ;;  %v5219_v62 = vsub.s32 0, %v12238_v4  ;;  %v5784_v15 = vand.u32 8388607, %v12911_v36  ;;  %v5789_v13 = vsel %vm5788_vm15, %v5787_v43, 0 }
 0x6ab   :  { %v5524_v52 = vsel %vm5522_vm13, %v5523_v56, %v12231_v16  ;;  %v5105_v14 = vadd.s32 %v11821_v24, %v11818_v26  ;;  %vm6186_vm0 = vcmp.lt.s32.totalorder %v6185_v49, 0  ;;  %v5572_v41 = vand.u32 2139095040, %v12247_v40 }
 0x6ac   :  { %v5525_v12 = vadd.s32 %v5524_v52, %v5520_v20  ;;  %v12262_v34 = vsel %vm5259_vm12, %v5341_v55, %v5340_v53  ;;  %v12268_v16 = vadd.s32 %v11959_v44, %v11980_v7  ;;  %v5791_v3 = vand.u32 31, %v5789_v13 }
 0x6ad   :  { %v12270_v39 = vshrl.u32 %v5105_v14, %v5121_v30  ;;  %v12272_v28 = vor.u32 4788187, %v5127_v63  ;;  %vm6174_vm14 = vcmp.lt.s32.totalorder %v6173_v48, 0  ;;  %v6164_v24 = vmin.u32 %v5219_v62, %v12238_v4 }
 0x6ae   :  { %v5526_v26 = vadd.s32 536870912, %v5525_v12  ;;  %v12275_v25 = vsel %vm6186_vm0, 0, %v6185_v49  ;;  %v5785_v53 = vor.u32 8388608, %v5784_v15  ;;  %v5792_v47 = vsub.s32 32, %v5791_v3 }
 0x6af   :  { %v5794_v32 = vshll.u32 %v12945_v54, %v5791_v3  ;;  %v5797_v44 = vshll.u32 %v12951_v17, %v5791_v3  ;;  %v5573_v7 = vshrl.u32 %v5572_v41, 23  ;;  %v5800_v55 = vshll.u32 %v12952_v46, %v5791_v3 }
 0x6b0   :  { %v12277_v21 = vshrl.u32 %v5526_v26, 30  ;;  %v5795_v43 = vshrl.u32 %v12951_v17, %v5792_v47  ;;  %v5798_v58 = vshrl.u32 %v12952_v46, %v5792_v47  ;;  %v5801_v30 = vshrl.u32 %v12950_v18, %v5792_v47 }
 0x6b1   :  { %v5790_v56 = vshrl.u32 %v5789_v13, 5  ;;  %v5803_v63 = vshll.u32 %v12950_v18, %v5791_v3  ;;  %v5804_v20 = vshrl.u32 %v12928_v35, %v5792_v47  ;;  %v5807_v14 = vshrl.u32 %v13092_v59, %v5792_v47 }
 0x6b2   :  { %13372 = vst [vmem:[#allocation23_spill] sm:$0xff] %v12277_v21  ;;  %v5528_v49 = vshll.u32 %v12277_v21, 30  ;;  %v5796_v62 = vor.u32 %v5795_v43, %v5794_v32  ;;  %v5799_v52 = vor.u32 %v5798_v58, %v5797_v44  ;;  %v5802_v15 = vor.u32 %v5801_v30, %v5800_v55 }
 0x6b3   :  { %v5749_v41 = vsub.s32 4294967266, %v12275_v25  ;;  %v5805_v36 = vor.u32 %v5804_v20, %v5803_v63  ;;  %v5806_v9 = vshll.u32 %v12928_v35, %v5791_v3  ;;  %v12296_v13 = vsel %vm6174_vm14, 0, %v6173_v48 }
 0x6b4   :  { %v12290_v26 = vsub.s32 %v5525_v12, %v5528_v49  ;;  %v12293_v61 = vpop.eup %6709  ;;  %v5221_v21 = vclz %v6164_v24  ;;  %v5745_v11 = vsub.s32 32, %v12275_v25  ;;  %v5825_v32 = vshll.u32 %v5785_v53, 8 }
 0x6b5   :  { %13373 = vst [vmem:[#allocation42_spill] sm:$0xff] %v12293_v61  ;;  %v5808_v43 = vor.u32 %v5807_v14, %v5806_v9  ;;  %vm5809_vm3 = vcmp.lt.s32.totalorder %v5790_v56, 1  ;;  %vm5812_vm5 = vcmp.lt.s32.totalorder %v5790_v56, 4  ;;  %v5793_v12 = vshrl.u32 %v12945_v54, %v5792_v47 }
 0x6b6   :  { %v5531_v44 = vsub.s32 0, %v12290_v26  ;;  %v5814_v58 = vsel %vm5812_vm5, %v5802_v15, 2102212464  ;;  %v5817_v55 = vsel %vm5809_vm3, %v5796_v62, %v5799_v52  ;;  %v6179_v3 = vadd.s32 4294967169, %v5573_v7 }
 0x6b7   :  { %v5750_v30 = vadd.s32 127, %v5749_v41  ;;  %vm5811_vm7 = vcmp.lt.s32.totalorder %v5790_v56, 3  ;;  %v5818_v48 = vsel %vm5812_vm5, %v5805_v36, 920167782  ;;  %vm5810_vm12 = vcmp.lt.s32.totalorder %v5790_v56, 2 }
 0x6b8   :  { %v6176_v49 = vmin.u32 %v5531_v44, %v12290_v26  ;;  %v5813_v24 = vsel %vm5809_vm3, %v5793_v12, %v5796_v62  ;;  %v5819_v53 = vsel %vm5811_vm7, %v5802_v15, %v5818_v48  ;;  %v5821_v63 = vsel %vm5809_vm3, %v5799_v52, %v5802_v15 }
 0x6b9   :  { %v5815_v9 = vsel %vm5811_vm7, %v5799_v52, %v5814_v58  ;;  %v5820_v14 = vsel %vm5810_vm12, %v5817_v55, %v5819_v53  ;;  %v5822_v47 = vsel %vm5812_vm5, %v5808_v43, 1326507024  ;;  %v5579_v7 = vadd.s32 1, %v6179_v3 }
 0x6ba   :  { %v5533_v20 = vclz %v6176_v49  ;;  %v5823_v61 = vsel %vm5811_vm7, %v5805_v36, %v5822_v47  ;;  %v12306_v1 = vmul.u32.u64.low %v5825_v32, %v5820_v14  ;;  %v12307_v50 = vmul.u32.u64.high %v5825_v32, %v5820_v14, %v12306_v1 }
 0x6bb   :  { %v5437_v41 = vsub.s32 4294967266, %v12296_v13  ;;  %v5729_v44 = vadd.s32 %v12126_v57, %v12123_v29  ;;  %v5751_v62 = vshll.u32 %v5750_v30, 23  ;;  %v5824_v15 = vsel %vm5810_vm12, %v5821_v63, %v5823_v61 }
 0x6bc   :  { %v6165_v12 = vadd.s32 4294967294, %v5221_v21  ;;  %v12314_v52 = vmul.u32.u64.low %v5825_v32, %v5824_v15  ;;  %v12315_v58 = vmul.u32.u64.high %v5825_v32, %v5824_v15, %v12314_v52  ;;  %vm5580_vm4 = vcmp.gt.s32.totalorder %v5579_v7, 0 }
 0x6bd   :  { %v6177_v43 = vadd.s32 4294967294, %v5533_v20  ;;  %v5816_v36 = vsel %vm5810_vm12, %v5813_v24, %v5815_v9  ;;  %v5569_v55 = vand.u32 2147483647, %v12247_v40  ;;  %v5581_v49 = vsel %vm5580_vm4, %v5579_v7, 0 }
 0x6be   :  { %v13374_v3 = vshll.u32 %v12030_v10, %v12183_v19  ;;  %v5747_v29 = vshrl.u32 %v5729_v44, %v5745_v11  ;;  %v5835_v57 = vadd.s32 1, %v12307_v50  ;;  %v5583_v61 = vand.u32 31, %v5581_v49 }
 0x6bf   :  { %v5129_v21 = vand.u32 2147483647, %v12272_v28  ;;  %v5433_v30 = vsub.s32 32, %v12296_v13  ;;  %v12328_v53 = vadd.s32 127, %v5437_v41  ;;  %v5752_v56 = vor.u32 4788187, %v5751_v62 }
 0x6c0   :  { %v12323_v48 = vor.u32 %v12270_v39, %v13374_v3  ;;  %v5746_v24 = vshll.u32 %v12202_v6, %v12275_v25  ;;  %v5832_v63 = vmul.u32 %v5825_v32, %v5816_v36  ;;  %vm5834_vm6 = vc.u32 %v12315_v58, %v12306_v1 }
 0x6c1   :  { %v5584_v10 = vsub.s32 32, %v5583_v61  ;;  %vm6166_vm9 = vcmp.lt.s32.totalorder %v6165_v12, 0  ;;  %vm6178_vm8 = vcmp.lt.s32.totalorder %v6177_v43, 0  ;;  %v5836_v11 = vsel %vm5834_vm6, %v5835_v57, %v12307_v50 }
 0x6c2   :  { %v5576_v19 = vand.u32 8388607, %v5569_v55  ;;  %v5748_v39 = vor.u32 %v5747_v29, %v5746_v24  ;;  %v5837_v20 = vadd.s32 %v5836_v11, %v5832_v63  ;;  %v5753_v47 = vand.u32 2147483647, %v5752_v56 }
 0x6c3   :  { %v5587_v9 = vshrl.u32 %v12951_v17, %v5584_v10  ;;  %v5590_v14 = vshrl.u32 %v12952_v46, %v5584_v10  ;;  %v5586_v6 = vshll.u32 %v12945_v54, %v5583_v61  ;;  %v5589_v25 = vshll.u32 %v12951_v17, %v5583_v61 }
 0x6c4   :  { %v5593_v32 = vshrl.u32 %v12950_v18, %v5584_v10  ;;  %v12342_v7 = vsel %vm6178_vm8, 0, %v6177_v43  ;;  %v5838_v41 = vadd.s32 536870912, %v5837_v20  ;;  %v5582_v50 = vshrl.u32 %v5581_v49, 5 }
 0x6c5   :  { %v5592_v44 = vshll.u32 %v12952_v46, %v5583_v61  ;;  %v5588_v62 = vor.u32 %v5587_v9, %v5586_v6  ;;  %v5591_v15 = vor.u32 %v5590_v14, %v5589_v25  ;;  %v5595_v52 = vshll.u32 %v12950_v18, %v5583_v61 }
 0x6c6   :  { %v5596_v36 = vshrl.u32 %v12928_v35, %v5584_v10  ;;  %v5755_v3 = vcvt.s32.f32 %v5748_v39  ;;  %v12347_v29 = vshrl.u32 %v5838_v41, 30  ;;  %v5577_v57 = vor.u32 8388608, %v5576_v19 }
 0x6c7   :  { %v5599_v17 = vshrl.u32 %v13092_v59, %v5584_v10  ;;  %v5541_v56 = vsub.s32 4294967266, %v12342_v7  ;;  %v5594_v43 = vor.u32 %v5593_v32, %v5592_v44  ;;  %v5598_v49 = vshll.u32 %v12928_v35, %v5583_v61 }
 0x6c8   :  { %v5597_v24 = vor.u32 %v5596_v36, %v5595_v52  ;;  %v5439_v46 = vshll.u32 %v12328_v53, 23  ;;  %v12354_v63 = vsel %vm6166_vm9, 0, %v6165_v12  ;;  %v5840_v18 = vshll.u32 %v12347_v29, 30 }
 0x6c9   :  { %vm5601_vm2 = vcmp.lt.s32.totalorder %v5582_v50, 1  ;;  %v5756_v11 = vmul.f32 %v5755_v3, %v5753_v47  ;;  %v5600_v39 = vor.u32 %v5599_v17, %v5598_v49  ;;  %vm5604_vm1 = vcmp.lt.s32.totalorder %v5582_v50, 4 }
 0x6ca   :  { %v5609_v19 = vsel %vm5601_vm2, %v5588_v62, %v5591_v15  ;;  %v12358_v59 = vsub.s32 %v5837_v20, %v5840_v18  ;;  %vm5603_vm10 = vcmp.lt.s32.totalorder %v5582_v50, 3  ;;  %v5610_v9 = vsel %vm5604_vm1, %v5597_v24, 920167782 }
 0x6cb   :  { %v5617_v14 = vshll.u32 %v5577_v57, 8  ;;  %v5542_v35 = vadd.s32 127, %v5541_v56  ;;  %vm5602_vm15 = vcmp.lt.s32.totalorder %v5582_v50, 2  ;;  %v5606_v61 = vsel %vm5604_vm1, %v5594_v43, 2102212464 }
 0x6cc   :  { %v5611_v12 = vsel %vm5603_vm10, %v5594_v43, %v5610_v9  ;;  %vm5675_vm13 = vcmp.lt.s32.totalorder %v11856_v8, 0  ;;  %v5843_v53 = vsub.s32 0, %v12358_v59  ;;  %v5585_v47 = vshrl.u32 %v12945_v54, %v5584_v10 }
 0x6cd   :  { %v5612_v6 = vsel %vm5602_vm15, %v5609_v19, %v5611_v12  ;;  %v5613_v20 = vsel %vm5601_vm2, %v5591_v15, %v5594_v43  ;;  %v5537_v25 = vsub.s32 32, %v12342_v7  ;;  %v5614_v32 = vsel %vm5604_vm1, %v5600_v39, 1326507024 }
 0x6ce   :  { %v12370_v41 = vmul.u32.u64.low %v5617_v14, %v5612_v6  ;;  %v12371_v44 = vmul.u32.u64.high %v5617_v14, %v5612_v6, %v12370_v41  ;;  %v6188_v52 = vmin.u32 %v5843_v53, %v12358_v59  ;;  %v5605_v36 = vsel %vm5601_vm2, %v5585_v47, %v5588_v62 }
 0x6cf   :  { %v5607_v3 = vsel %vm5603_vm10, %v5591_v15, %v5606_v61  ;;  %v5615_v54 = vsel %vm5603_vm10, %v5597_v24, %v5614_v32  ;;  %v5229_v10 = vsub.s32 4294967266, %v12354_v63  ;;  %v5521_v57 = vadd.s32 %v12230_v2, %v12235_v0 }
 0x6d0   :  { %v5543_v17 = vshll.u32 %v5542_v35, 23  ;;  %v5616_v56 = vsel %vm5602_vm15, %v5613_v20, %v5615_v54  ;;  %v5131_v43 = vcvt.s32.f32 %v12323_v48  ;;  %v13375_v49 = vand.u32 2147483647, %v11856_v8 }
 0x6d1   :  { %v5845_v62 = vclz %v6188_v52  ;;  %v12389_v15 = vmul.u32.u64.low %v5617_v14, %v5616_v56  ;;  %v12390_v39 = vmul.u32.u64.high %v5617_v14, %v5616_v56, %v12389_v15  ;;  %v5757_v24 = vxor.u32 2147483648, %v5756_v11 }
 0x6d2   :  { %vm12385_vm0 = vcmp.le.f32.partialorder %v13375_v49, 0.7853982  ;;  %v5539_v19 = vshrl.u32 %v5521_v57, %v5537_v25  ;;  %v5608_v9 = vsel %vm5602_vm15, %v5605_v36, %v5607_v3  ;;  %v5627_v2 = vadd.s32 1, %v12371_v44 }
 0x6d3   :  { %v12396_v0 = vmul.f32 %v5131_v43, %v5129_v21  ;;  %v5434_v48 = vshll.u32 %v12164_v37, %v12296_v13  ;;  %v5435_v35 = vshrl.u32 %v12268_v16, %v5433_v30  ;;  %v6189_v61 = vadd.s32 4294967294, %v5845_v62 }
 0x6d4   :  { %v5440_v12 = vor.u32 4788187, %v5439_v46  ;;  %v5230_v53 = vadd.s32 127, %v5229_v10  ;;  %v5538_v50 = vshll.u32 %v12290_v26, %v12342_v7  ;;  %v5544_v47 = vor.u32 4788187, %v5543_v17 }
 0x6d5   :  { %v5225_v6 = vsub.s32 32, %v12354_v63  ;;  %vm6190_vm14 = vcmp.lt.s32.totalorder %v6189_v61, 0  ;;  %v5624_v28 = vmul.u32 %v5617_v14, %v5608_v9  ;;  %vm5626_vm3 = vc.u32 %v12390_v39, %v12370_v41 }
 0x6d6   :  { %v5758_v37 = vsel %vm5675_vm13, %v5757_v24, %v5756_v11  ;;  %v5540_v13 = vor.u32 %v5539_v19, %v5538_v50  ;;  %v5848_v21 = vsel %vm6190_vm14, 0, %v6189_v61  ;;  %v5628_v16 = vsel %vm5626_vm3, %v5627_v2, %v12371_v44 }
 0x6d7   :  { %v5833_v30 = vadd.s32 %v12306_v1, %v12315_v58  ;;  %v5849_v46 = vsub.s32 32, %v5848_v21  ;;  %v5853_v26 = vsub.s32 4294967266, %v5848_v21  ;;  %v5629_v7 = vadd.s32 %v5628_v16, %v5624_v28 }
 0x6d8   :  { %v5436_v20 = vor.u32 %v5435_v35, %v5434_v48  ;;  %v5209_v14 = vadd.s32 %v12070_v60, %v12082_v45  ;;  %v5231_v25 = vshll.u32 %v5230_v53, 23  ;;  %v5545_v32 = vand.u32 2147483647, %v5544_v47 }
 0x6d9   :  { %vm5051_vm5 = vcmp.lt.s32.totalorder %v11507_v5, 0  ;;  %v5850_v11 = vshll.u32 %v12358_v59, %v5848_v21  ;;  %v5851_v52 = vshrl.u32 %v5833_v30, %v5849_v46  ;;  %v5854_v36 = vadd.s32 127, %v5853_v26  ;;  %v13386_v26 = vld [vmem:[#allocation36_spill] sm:$0xff] }
 0x6da   :  { %v5630_v3 = vadd.s32 536870912, %v5629_v7  ;;  %v5441_v44 = vand.u32 2147483647, %v5440_v12  ;;  %v5227_v54 = vshrl.u32 %v5209_v14, %v5225_v6  ;;  %v5761_v1 = vsel %vm12385_vm0, %v11856_v8, %v5758_v37  ;;  %v13387_v14 = vld [vmem:[#allocation35_spill] sm:$0xff] }
 0x6db   :  { %v5547_v58 = vcvt.s32.f32 %v5540_v13  ;;  %6711 = vsinq.f32 %v12172_v23  ;;  %v5852_v10 = vor.u32 %v5851_v52, %v5850_v11  ;;  %v5855_v60 = vshll.u32 %v5854_v36, 23  ;;  %v13385_v13 = vld [vmem:[#allocation24_spill] sm:$0xff] }
 0x6dc   :  { %v12421_v45 = vshrl.u32 %v5630_v3, 30  ;;  %v13378_v57 = vand.u32 2147483647, %v11507_v5  ;;  %v5443_v17 = vcvt.s32.f32 %v5436_v20  ;;  %v5226_v56 = vshll.u32 %v12238_v4, %v12354_v63 }
 0x6dd   :  { %v5232_v43 = vor.u32 4788187, %v5231_v25  ;;  %v5548_v49 = vmul.f32 %v5547_v58, %v5545_v32  ;;  %v5345_v23 = vsel %vm12212_vm11, %v11446_v42, %v12262_v34  ;;  %vm5363_vm12 = vcmp.lt.s32.totalorder %v11659_v27, 0 }
 0x6de   :  { %vm12425_vm7 = vcmp.le.f32.partialorder %v13378_v57, 0.7853982  ;;  %6713 = vcosq.f32 %v5761_v1  ;;  %v5856_v62 = vor.u32 4788187, %v5855_v60  ;;  %v5632_v15 = vshll.u32 %v12421_v45, 30 }
 0x6df   :  { %v5133_v24 = vxor.u32 2147483648, %v12396_v0  ;;  %v5444_v19 = vmul.f32 %v5443_v17, %v5441_v44  ;;  %v5228_v9 = vor.u32 %v5227_v54, %v5226_v56  ;;  %6715 = vsinq.f32 %v5761_v1 }
 0x6e0   :  { %v5759_v4 = vsub.s32 4, %v12186_v51  ;;  %v5857_v63 = vand.u32 2147483647, %v5856_v62  ;;  %v5859_v2 = vcvt.s32.f32 %v5852_v10  ;;  %v12439_v48 = vsub.s32 %v5629_v7, %v5632_v15 }
 0x6e1   :  { %6717 = vcosq.f32 %v5345_v23  ;;  %v13381_v34 = vsel %vm12212_vm11, 0, %v12178_v38  ;;  %v13382_v61 = vand.u32 2147483647, %v11659_v27  ;;  %v5233_v53 = vand.u32 2147483647, %v5232_v43 }
 0x6e2   :  { %v12445_v35 = vadd.s32 3, %v13381_v34  ;;  %v5549_v50 = vxor.u32 2147483648, %v5548_v49  ;;  %6719 = vsinq.f32 %v5345_v23  ;;  %v5135_v47 = vsub.s32 4, %v11965_v22  ;;  %v13394_v23 = vld [vmem:[#allocation23_spill] sm:$0xff]  ;;  %v13395_v34 = vld [vmem:[#allocation40_spill] sm:$0xff] }
 0x6e3   :  { %vm12449_vm4 = vcmp.le.f32.partialorder %v13382_v61, 0.7853982  ;;  %v5860_v6 = vmul.f32 %v5859_v2, %v5857_v63  ;;  %v5635_v28 = vsub.s32 0, %v12439_v48  ;;  %v5134_v38 = vsel %vm5051_vm5, %v5133_v24, %v12396_v0 }
 0x6e4   :  { %v5445_v33 = vxor.u32 2147483648, %v5444_v19  ;;  %v5235_v37 = vcvt.s32.f32 %v5228_v9  ;;  %vm5467_vm11 = vcmp.lt.s32.totalorder %v12057_v31, 0  ;;  %vm5155_vm6 = vcmp.lt.s32.totalorder %v13385_v13, 0 }
 0x6e5   :  { %v5760_v21 = vsel %vm5675_vm13, %v5759_v4, %v12186_v51  ;;  %v5861_v16 = vxor.u32 2147483648, %v5860_v6  ;;  %v5863_v30 = vsub.s32 4, %v12347_v29  ;;  %v6180_v46 = vmin.u32 %v5635_v28, %v12439_v48 }
 0x6e6   :  { %v5447_v7 = vsub.s32 4, %v13386_v26  ;;  %v5236_v20 = vmul.f32 %v5235_v37, %v5233_v53  ;;  %v5550_v0 = vsel %vm5467_vm11, %v5549_v50, %v5548_v49  ;;  %vm5779_vm9 = vcmp.lt.s32.totalorder %v13387_v14, 0 }
 0x6e7   :  { %v5137_v25 = vsel %vm12425_vm7, %v11507_v5, %v5134_v38  ;;  %v13388_v32 = vand.u32 2147483647, %v13387_v14  ;;  %v5862_v11 = vsel %vm5779_vm9, %v5861_v16, %v5860_v6  ;;  %v5637_v52 = vclz %v6180_v46 }
 0x6e8   :  { %v5446_v36 = vsel %vm5363_vm12, %v5445_v33, %v5444_v19  ;;  %v5762_v3 = vsel %vm12385_vm0, 0, %v5760_v21  ;;  %v13391_v44 = vand.u32 2147483647, %v12057_v31  ;;  %v5864_v10 = vsel %vm5779_vm9, %v5863_v30, %v12347_v29  ;;  %v12495_v18 = vpop.eup %6711 }
 0x6e9   :  { %vm12474_vm8 = vcmp.le.f32.partialorder %v13388_v32, 0.7853982  ;;  %v6181_v60 = vadd.s32 4294967294, %v5637_v52  ;;  %v12500_v57 = vsel %vm5051_vm5, %v5135_v47, %v11965_v22  ;;  %v5448_v17 = vsel %vm5363_vm12, %v5447_v7, %v13386_v26 }
 0x6ea   :  { %vm12484_vm2 = vcmp.le.f32.partialorder %v13391_v44, 0.7853982  ;;  %v5865_v1 = vsel %vm12474_vm8, %v13387_v14, %v5862_v11  ;;  %v5237_v56 = vxor.u32 2147483648, %v5236_v20  ;;  %v5449_v29 = vsel %vm12449_vm4, %v11659_v27, %v5446_v36 }
 0x6eb   :  { %v5553_v58 = vsel %vm12484_vm2, %v12057_v31, %v5550_v0  ;;  %6721 = vcosq.f32 %v5865_v1  ;;  %v5766_v43 = vadd.s32 3, %v5762_v3  ;;  %vm6182_vm1 = vcmp.lt.s32.totalorder %v6181_v60, 0  ;;  %v6714_v49 = vpop.eup %6713 }
 0x6ec   :  { %6723 = vsinq.f32 %v5865_v1  ;;  %v5551_v62 = vsub.s32 4, %v13394_v23  ;;  %v5866_v22 = vsel %vm12474_vm8, 0, %v5864_v10  ;;  %v5640_v15 = vsel %vm6182_vm1, 0, %v6181_v60  ;;  %v6716_v24 = vpop.eup %6715 }
 0x6ed   :  { %6725 = vcosq.f32 %v5137_v25  ;;  %v5625_v19 = vadd.s32 %v12370_v41, %v12390_v39  ;;  %v5641_v9 = vsub.s32 32, %v5640_v15  ;;  %v5645_v4 = vsub.s32 4294967266, %v5640_v15 }
 0x6ee   :  { %6727 = vcosq.f32 %v5553_v58  ;;  %v5450_v63 = vsel %vm12449_vm4, 0, %v5448_v17  ;;  %v5238_v2 = vsel %vm5155_vm6, %v5237_v56, %v5236_v20  ;;  %v5239_v61 = vsub.s32 4, %v13395_v34  ;;  %v12518_v53 = vpop.eup %6717 }
 0x6ef   :  { %6729 = vsinq.f32 %v5553_v58  ;;  %v5642_v50 = vshll.u32 %v12439_v48, %v5640_v15  ;;  %v5643_v47 = vshrl.u32 %v5625_v19, %v5641_v9  ;;  %v5646_v6 = vadd.s32 127, %v5645_v4  ;;  %v12521_v38 = vpop.eup %6719 }
 0x6f0   :  { %6731 = vsinq.f32 %v5449_v29  ;;  %v5767_v28 = vand.u32 3, %v5766_v43  ;;  %v5552_v41 = vsel %vm5467_vm11, %v5551_v62, %v13394_v23  ;;  %v5870_v39 = vadd.s32 3, %v5866_v22 }
 0x6f1   :  { %v5770_v12 = vxor.u32 2147483648, %v6716_v24  ;;  %v5773_v33 = vxor.u32 2147483648, %v6714_v49  ;;  %6733 = vcosq.f32 %v5449_v29  ;;  %v13396_v37 = vand.u32 2147483647, %v13385_v13 }
 0x6f2   :  { %v5644_v48 = vor.u32 %v5643_v47, %v5642_v50  ;;  %v5647_v16 = vshll.u32 %v5646_v6, 23  ;;  %v5138_v30 = vsel %vm12425_vm7, 0, %v12500_v57  ;;  %6735 = vsinq.f32 %v5137_v25 }
 0x6f3   :  { %vm12528_vm10 = vcmp.le.f32.partialorder %v13396_v37, 0.7853982  ;;  %v5454_v46 = vadd.s32 3, %v5450_v63  ;;  %v5554_v7 = vsel %vm12484_vm2, 0, %v5552_v41  ;;  %vm5769_vm15 = vcmp.eq.s32.totalorder %v5767_v28, 0 }
 0x6f4   :  { %v5241_v26 = vsel %vm12528_vm10, %v13385_v13, %v5238_v2  ;;  %v5648_v20 = vor.u32 4788187, %v5647_v16  ;;  %vm5772_vm13 = vcmp.eq.s32.totalorder %v5767_v28, 2  ;;  %v5240_v0 = vsel %vm5155_vm6, %v5239_v61, %v13395_v34 }
 0x6f5   :  { %v5771_v32 = vsel %vm5769_vm15, %v6714_v49, %v5770_v12  ;;  %v5774_v51 = vsel %vm5772_vm13, %v5773_v33, %v6716_v24  ;;  %v5871_v59 = vand.u32 3, %v5870_v39  ;;  %6737 = vcosq.f32 %v5241_v26 }
 0x6f6   :  { %v5649_v25 = vand.u32 2147483647, %v5648_v20  ;;  %v5651_v11 = vcvt.s32.f32 %v5644_v48  ;;  %v5655_v52 = vsub.s32 4, %v12421_v45  ;;  %6739 = vsinq.f32 %v5241_v26 }
 0x6f7   :  { %v5558_v3 = vadd.s32 3, %v5554_v7  ;;  %vm12546_vm0 = vcmp.le.f32.partialorder %v5569_v55, 0.7853982  ;;  %vm5768_vm14 = vcmp.lt.s32.totalorder %v5767_v28, 2  ;;  %vm5571_vm3 = vcmp.lt.s32.totalorder %v12247_v40, 0 }
 0x6f8   :  { %v6722_v36 = vpop.eup %6721  ;;  %v5652_v1 = vmul.f32 %v5651_v11, %v5649_v25  ;;  %v5775_v58 = vsel %vm5768_vm14, %v5771_v32, %v5774_v51  ;;  %vm5765_vm5 = vweird.f32 %v11856_v8  ;;  %vm5869_vm7 = vweird.f32 %v13387_v14 }
 0x6f9   :  { %v6724_v54 = vpop.eup %6723  ;;  %v5877_v10 = vxor.u32 2147483648, %v6722_v36  ;;  %vm5876_vm12 = vcmp.eq.s32.totalorder %v5871_v59, 2  ;;  %v5656_v56 = vsel %vm5571_vm3, %v5655_v52, %v12421_v45  ;;  %vm5873_vm4 = vcmp.eq.s32.totalorder %v5871_v59, 0 }
 0x6fa   :  { %v12551_v60 = vpop.eup %6725  ;;  %v5874_v57 = vxor.u32 2147483648, %v6724_v54  ;;  %v5653_v55 = vxor.u32 2147483648, %v5652_v1  ;;  %v5776_v49 = vsel %vm5765_vm5, nan, %v5775_v58  ;;  %vm5872_vm11 = vcmp.lt.s32.totalorder %v5871_v59, 2  ;;  %v13402_v58 = vld [vmem:[#allocation17_spill] sm:$0xff] }
 0x6fb   :  { %v6728_v17 = vpop.eup %6727  ;;  %v5878_v29 = vsel %vm5876_vm12, %v5877_v10, %v6724_v54  ;;  %v5559_v62 = vand.u32 3, %v5558_v3  ;;  %v5351_v24 = vand.u32 3, %v12445_v35  ;;  %v5354_v19 = vxor.u32 2147483648, %v12521_v38 }
 0x6fc   :  { %v6730_v43 = vpop.eup %6729  ;;  %v5875_v23 = vsel %vm5873_vm4, %v6722_v36, %v5874_v57  ;;  %v5654_v8 = vsel %vm5571_vm3, %v5653_v55, %v5652_v1  ;;  %v5658_v9 = vsel %vm12546_vm0, 0, %v5656_v56  ;;  %v5357_v63 = vxor.u32 2147483648, %v12518_v53  ;;  %v13403_v55 = vld [vmem:[#allocation45_spill] sm:$0xff] }
 0x6fd   :  { %v6732_v22 = vpop.eup %6731  ;;  %v5879_v15 = vsel %vm5872_vm11, %v5875_v23, %v5878_v29  ;;  %v5657_v45 = vsel %vm12546_vm0, %v12247_v40, %v5654_v8  ;;  %v5562_v34 = vxor.u32 2147483648, %v6730_v43  ;;  %v5565_v61 = vxor.u32 2147483648, %v6728_v17  ;;  %v13404_v29 = vld [vmem:[#allocation22_spill] sm:$0xff] }
 0x6fe   :  { %v5880_v4 = vsel %vm5869_vm7, nan, %v5879_v15  ;;  %6741 = vcosq.f32 %v5657_v45  ;;  %v6734_v50 = vpop.eup %6733  ;;  %v5142_v35 = vadd.s32 3, %v5138_v30  ;;  %v5242_v47 = vsel %vm12528_vm10, 0, %v5240_v0 }
 0x6ff   :  { %v5889_v2 = vpack.c.bf16 %v5880_v4, %v5776_v49  ;;  %6743 = vsinq.f32 %v5657_v45  ;;  %vm5561_vm6 = vcmp.eq.s32.totalorder %v5559_v62, 0  ;;  %v6736_v6 = vpop.eup %6735  ;;  %v5662_v28 = vadd.s32 3, %v5658_v9  ;;  %v13405_v49 = vld [vmem:[#allocation19_spill] sm:$0xff] }
 0x700   :  { %vm5353_vm9 = vcmp.eq.s32.totalorder %v5351_v24, 0  ;;  %vm5356_vm8 = vcmp.eq.s32.totalorder %v5351_v24, 2  ;;  %v5455_v14 = vand.u32 3, %v5454_v46  ;;  %v13401_v41 = vmov 0.0  }
 0x701   :  { %6297 = vmatpush3.bf16.msra.mxu0 %v5889_v2  ;;  %vm5564_vm2 = vcmp.eq.s32.totalorder %v5559_v62, 2  ;;  %v5355_v39 = vsel %vm5353_vm9, %v12518_v53, %v5354_v19  ;;  %v5358_v12 = vsel %vm5356_vm8, %v5357_v63, %v12521_v38  ;;  %v5458_v33 = vxor.u32 2147483648, %v6732_v22  ;;  %v13407_v19 = vld [vmem:[#allocation18_spill] sm:$0xff] }
 0x702   :  { %6298 = vmatprep.subr.bf16.mxu0 %v13401_v41  ;;  %v5246_v37 = vadd.s32 3, %v5242_v47  ;;  %v5563_v48 = vsel %vm5561_vm6, %v6728_v17, %v5562_v34  ;;  %v5566_v21 = vsel %vm5564_vm2, %v5565_v61, %v6730_v43  ;;  %v5461_v16 = vxor.u32 2147483648, %v6734_v50  ;;  %v6738_v30 = vpop.eup %6737  ;;  %v13408_v47 = vld [vmem:[#allocation30_spill] sm:$0xff] }
 0x703   :  { %vm5557_vm1 = vweird.f32 %v12057_v31  ;;  %vm5560_vm10 = vcmp.lt.s32.totalorder %v5559_v62, 2  ;;  %vm5349_vm15 = vweird.f32 %v11446_v42  ;;  %vm5352_vm13 = vcmp.lt.s32.totalorder %v5351_v24, 2  ;;  %v6740_v46 = vpop.eup %6739 }
 0x704   :  { %v5663_v26 = vand.u32 3, %v5662_v28  ;;  %v5359_v7 = vsel %vm5352_vm13, %v5355_v39, %v5358_v12  ;;  %vm5457_vm0 = vcmp.eq.s32.totalorder %v5455_v14, 0  ;;  %v5143_v20 = vand.u32 3, %v5142_v35  ;;  %v13410_v12 = vld [vmem:[#allocation38_spill] sm:$0xff] }
 0x705   :  { %v5567_v53 = vsel %vm5560_vm10, %v5563_v48, %v5566_v21  ;;  %vm5453_vm14 = vweird.f32 %v11659_v27  ;;  %v5459_v38 = vsel %vm5457_vm0, %v6734_v50, %v5458_v33  ;;  %vm5460_vm3 = vcmp.eq.s32.totalorder %v5455_v14, 2 }
 0x706   :  { %v5462_v0 = vsel %vm5460_vm3, %v5461_v16, %v6732_v22  ;;  %v5146_v32 = vxor.u32 2147483648, %v6736_v6  ;;  %v5149_v51 = vxor.u32 2147483648, %v12551_v60  ;;  %v5247_v59 = vand.u32 3, %v5246_v37  ;;  %v13406_v22 = vld [vmem:[#allocation6_spill] sm:$0xff] }
 0x707   :  { %v12579_v25 = vsel %vm5349_vm15, nan, %v5359_v7  ;;  %vm5456_vm5 = vcmp.lt.s32.totalorder %v5455_v14, 2  ;;  %v5250_v42 = vxor.u32 2147483648, %v6740_v46  ;;  %v5253_v11 = vxor.u32 2147483648, %v6738_v30  ;;  %v13409_v14 = vld [vmem:[#allocation43_spill] sm:$0xff]  ;;  %v13411_v37 = vld [vmem:[#allocation46_spill] sm:$0xff] }
 0x708   :  { %v5568_v52 = vsel %vm5557_vm1, nan, %v5567_v53  ;;  %vm5661_vm7 = vweird.f32 %v12247_v40  ;;  %vm5664_vm12 = vcmp.lt.s32.totalorder %v5663_v26, 2  ;;  %vm5144_vm4 = vcmp.lt.s32.totalorder %v5143_v20, 2  ;;  %v13413_v7 = vld [vmem:[#allocation32_spill] sm:$0xff] }
 0x709   :  { %vm5145_vm11 = vcmp.eq.s32.totalorder %v5143_v20, 0  ;;  %vm5665_vm6 = vcmp.eq.s32.totalorder %v5663_v26, 0  ;;  %vm5668_vm9 = vcmp.eq.s32.totalorder %v5663_v26, 2  ;;  %v5463_v36 = vsel %vm5456_vm5, %v5459_v38, %v5462_v0 }
 0x70a   :  { %vm5148_vm8 = vcmp.eq.s32.totalorder %v5143_v20, 2  ;;  %v5147_v3 = vsel %vm5145_vm11, %v12551_v60, %v5146_v32  ;;  %vm5249_vm2 = vcmp.eq.s32.totalorder %v5247_v59, 0  ;;  %vm5252_vm10 = vcmp.eq.s32.totalorder %v5247_v59, 2  ;;  %v13414_v20 = vld [vmem:[#allocation37_spill] sm:$0xff] }
 0x70b   :  { %v5150_v44 = vsel %vm5148_vm8, %v5149_v51, %v6736_v6  ;;  %v6742_v54 = vpop.eup %6741  ;;  %vm5141_vm15 = vweird.f32 %v11507_v5  ;;  %v5251_v1 = vsel %vm5249_vm2, %v6738_v30, %v5250_v42  ;;  %v5254_v31 = vsel %vm5252_vm10, %v5253_v11, %v6740_v46  ;;  %v13412_v30 = vld [vmem:[#allocation42_spill] sm:$0xff]  ;;  %v13416_v42 = vld [vmem:[#allocation16_spill] sm:$0xff] }
 0x70c   :  { %v5039_v10 = vand.u32 3, %v13402_v58  ;;  %v6744_v57 = vpop.eup %6743  ;;  %v5669_v17 = vxor.u32 2147483648, %v6742_v54  ;;  %v4935_v56 = vand.u32 3, %v13403_v55  ;;  %v5042_v43 = vxor.u32 2147483648, %v13404_v29  ;;  %v13420_v58 = vld [vmem:[#allocation41_spill] sm:$0xff]  ;;  %v13422_v55 = vld [vmem:[#allocation10_spill] sm:$0xff] }
 0x70d   :  { %v5045_v23 = vxor.u32 2147483648, %v13405_v49  ;;  %vm6776_vm1 = vmmov 0   ;;  %v5666_v60 = vxor.u32 2147483648, %v6744_v57  ;;  %v5464_v62 = vsel %vm5453_vm14, nan, %v5463_v36  ;;  %v13417_v36 = vld [vmem:[#allocation27_spill] sm:$0xff] }
 0x70e   :  { %6312 = vmatprep.mubr.msk.bf16.mxu0 %vm6776_vm1, %v13401_v41  ;;  %vm5248_vm13 = vcmp.lt.s32.totalorder %v5247_v59, 2  ;;  %v4938_v8 = vxor.u32 2147483648, %v13406_v22  ;;  %v5670_v15 = vsel %vm5668_vm9, %v5669_v17, %v6744_v57  ;;  %vm5245_vm0 = vweird.f32 %v13385_v13  ;;  %v13415_v59 = vld [vmem:[#allocation48_spill] sm:$0xff]  ;;  %v13421_v57 = vld [vmem:[#allocation31_spill] sm:$0xff] }
 0x70f   :  { %v5255_v24 = vsel %vm5248_vm13, %v5251_v1, %v5254_v31  ;;  %v4941_v45 = vxor.u32 2147483648, %v13407_v19  ;;  %v5667_v9 = vsel %vm5665_vm6, %v6742_v54, %v5666_v60  ;;  %v5151_v4 = vsel %vm5144_vm4, %v5147_v3, %v5150_v44  ;;  %v13418_v3 = vld [vmem:[#allocation15_spill] sm:$0xff]  ;;  %v13419_v54 = vld [vmem:[#allocation5_spill] sm:$0xff] }
 0x710   :  { %vm5041_vm3 = vcmp.eq.s32.totalorder %v5039_v10, 0  ;;  %vm5044_vm5 = vcmp.eq.s32.totalorder %v5039_v10, 2  ;;  %v5671_v63 = vsel %vm5664_vm12, %v5667_v9, %v5670_v15  ;;  %vm4937_vm11 = vcmp.eq.s32.totalorder %v4935_v56, 0  ;;  %v13424_v60 = vld [vmem:[#allocation7_spill] sm:$0xff] }
 0x711   :  { %v5043_v27 = vsel %vm5041_vm3, %v13405_v49, %v5042_v43  ;;  %v5046_v2 = vsel %vm5044_vm5, %v5045_v23, %v13404_v29  ;;  %v5672_v34 = vsel %vm5661_vm7, nan, %v5671_v63  ;;  %v5256_v13 = vsel %vm5245_vm0, nan, %v5255_v24  ;;  %v13423_v29 = vld [vmem:[#allocation13_spill] sm:$0xff] }
 0x712   :  { %v4939_v61 = vsel %vm4937_vm11, %v13407_v19, %v4938_v8  ;;  %vm4940_vm14 = vcmp.eq.s32.totalorder %v4935_v56, 2  ;;  %v5888_v50 = vpack.c.bf16 %v5672_v34, %v5568_v52  ;;  %vm5040_vm4 = vcmp.lt.s32.totalorder %v5039_v10, 2  ;;  %v13426_v19 = vld [vmem:[#allocation11_spill] sm:$0xff] }
 0x713   :  { %v4942_v35 = vsel %vm4940_vm14, %v4941_v45, %v13406_v22  ;;  %v4727_v6 = vand.u32 3, %v13408_v47  ;;  %v5047_v28 = vsel %vm5040_vm4, %v5043_v27, %v5046_v2  ;;  %v4730_v39 = vxor.u32 2147483648, %v13409_v14  ;;  %v13425_v22 = vld [vmem:[#allocation25_spill] sm:$0xff]  ;;  %v13428_v27 = vld [vmem:[#allocation8_spill] sm:$0xff] }
 0x714   :  { %v4733_v33 = vxor.u32 2147483648, %v13410_v12  ;;  %v4831_v48 = vand.u32 3, %v13411_v37  ;;  %6299 = vmatpush3.bf16.msra.mxu0 %v5888_v50  ;;  %v5887_v40 = vpack.c.bf16 %v5464_v62, %v12579_v25  ;;  %v5152_v21 = vsel %vm5141_vm15, nan, %v5151_v4  ;;  %v13427_v4 = vld [vmem:[#allocation39_spill] sm:$0xff] }
 0x715   :  { %v4834_v16 = vxor.u32 2147483648, %v12495_v18  ;;  %v4837_v46 = vxor.u32 2147483648, %v13412_v30  ;;  %6300 = vmatprep.subr.bf16.mxu0 %v13401_v41  ;;  %v5886_v26 = vpack.c.bf16 %v5256_v13, %v5152_v21  ;;  %vm4933_vm7 = vweird.f32 %v13413_v7  ;;  %v13431_v21 = vld [vmem:[#allocation28_spill] sm:$0xff] }
 0x716   :  { %vm4936_vm12 = vcmp.lt.s32.totalorder %v4935_v56, 2  ;;  %vm5037_vm6 = vweird.f32 %v13414_v20  ;;  %vm4729_vm9 = vcmp.eq.s32.totalorder %v4727_v6, 0  ;;  %vm4732_vm8 = vcmp.eq.s32.totalorder %v4727_v6, 2  ;;  %v5881_v7 = vld [vmem:[%s12668_s5] sm:$0xf]  ;;  %v5894_v20 = vpop.permute.xlu0 %5893 }
 0x717   :  { %v4943_v53 = vsel %vm4936_vm12, %v4939_v61, %v4942_v35  ;;  %v5048_v38 = vsel %vm5037_vm6, nan, %v5047_v28  ;;  %v4731_v0 = vsel %vm4729_vm9, %v13410_v12, %v4730_v39  ;;  %v4734_v5 = vsel %vm4732_vm8, %v4733_v33, %v13409_v14  ;;  %v13429_v61 = vld [vmem:[#allocation26_spill] sm:$0xff]  ;;  %v13430_v12 = vld [vmem:[#allocation33_spill] sm:$0xff] }
 0x718   :  { %vm4833_vm2 = vcmp.eq.s32.totalorder %v4831_v48, 0  ;;  %vm4836_vm10 = vcmp.eq.s32.totalorder %v4831_v48, 2  ;;  %6301 = vmatpush3.bf16.msra.mxu0 %v5887_v40  ;;  %v4519_v25 = vand.u32 3, %v13415_v59  ;;  %v4623_v11 = vand.u32 3, %v13416_v42 }
 0x719   :  { %v4835_v32 = vsel %vm4833_vm2, %v13412_v30, %v4834_v16  ;;  %v4838_v51 = vsel %vm4836_vm10, %v4837_v46, %v12495_v18  ;;  %6302 = vmatprep.subr.bf16.mxu0 %v13401_v41  ;;  %v4944_v52 = vsel %vm4933_vm7, nan, %v4943_v53  ;;  %vm4725_vm15 = vweird.f32 %v13417_v36  ;;  %v13432_v30 = vld [vmem:[#allocation29_spill] sm:$0xff] }
 0x71a   :  { %v4626_v44 = vxor.u32 2147483648, %v13418_v3  ;;  %v4629_v1 = vxor.u32 2147483648, %v13419_v54  ;;  %v5885_v31 = vpack.c.bf16 %v5048_v38, %v4944_v52  ;;  %vm4728_vm1 = vcmp.lt.s32.totalorder %v4727_v6, 2 }
 0x71b   :  { %vm4832_vm13 = vcmp.lt.s32.totalorder %v4831_v48, 2  ;;  %v4522_v18 = vxor.u32 2147483648, %v13420_v58  ;;  %v4735_v10 = vsel %vm4728_vm1, %v4731_v0, %v4734_v5  ;;  %vm4829_vm0 = vweird.f32 %v13421_v57 }
 0x71c   :  { %v4839_v17 = vsel %vm4832_vm13, %v4835_v32, %v4838_v51  ;;  %v4525_v56 = vxor.u32 2147483648, %v13422_v55  ;;  %6303 = vmatpush3.bf16.msra.mxu0 %v5886_v26  ;;  %vm4521_vm3 = vcmp.eq.s32.totalorder %v4519_v25, 0  ;;  %vm4625_vm5 = vcmp.eq.s32.totalorder %v4623_v11, 0 }
 0x71d   :  { %vm4628_vm11 = vcmp.eq.s32.totalorder %v4623_v11, 2  ;;  %v4415_v43 = vand.u32 3, %v13423_v29  ;;  %6304 = vmatprep.subr.bf16.mxu0 %v13401_v41  ;;  %v4627_v49 = vsel %vm4625_vm5, %v13419_v54, %v4626_v44  ;;  %v4418_v62 = vxor.u32 2147483648, %v13424_v60 }
 0x71e   :  { %v4630_v23 = vsel %vm4628_vm11, %v4629_v1, %v13418_v3  ;;  %v4421_v8 = vxor.u32 2147483648, %v13425_v22  ;;  %v4840_v15 = vsel %vm4829_vm0, nan, %v4839_v17  ;;  %v4523_v24 = vsel %vm4521_vm3, %v13422_v55, %v4522_v18 }
 0x71f   :  { %vm4524_vm14 = vcmp.eq.s32.totalorder %v4519_v25, 2  ;;  %v4311_v45 = vand.u32 3, %v13426_v19  ;;  %vm4624_vm4 = vcmp.lt.s32.totalorder %v4623_v11, 2  ;;  %v4314_v63 = vxor.u32 2147483648, %v13427_v4 }
 0x720   :  { %v4526_v9 = vsel %vm4524_vm14, %v4525_v56, %v13420_v58  ;;  %v4317_v2 = vxor.u32 2147483648, %v13428_v27  ;;  %6305 = vmatpush3.bf16.msra.mxu0 %v5885_v31  ;;  %v4736_v34 = vsel %vm4725_vm15, nan, %v4735_v10  ;;  %v4631_v13 = vsel %vm4624_vm4, %v4627_v49, %v4630_v23 }
 0x721   :  { %vm4417_vm7 = vcmp.eq.s32.totalorder %v4415_v43, 0  ;;  %vm4420_vm12 = vcmp.eq.s32.totalorder %v4415_v43, 2  ;;  %6306 = vmatprep.subr.bf16.mxu0 %v13401_v41  ;;  %vm4520_vm6 = vcmp.lt.s32.totalorder %v4519_v25, 2  ;;  %vm4621_vm9 = vweird.f32 %v13429_v61 }
 0x722   :  { %v4419_v50 = vsel %vm4417_vm7, %v13425_v22, %v4418_v62  ;;  %v4422_v35 = vsel %vm4420_vm12, %v4421_v8, %v13424_v60  ;;  %v5884_v47 = vpack.c.bf16 %v4840_v15, %v4736_v34  ;;  %v4527_v6 = vsel %vm4520_vm6, %v4523_v24, %v4526_v9 }
 0x723   :  { %vm4313_vm8 = vcmp.eq.s32.totalorder %v4311_v45, 0  ;;  %vm4316_vm2 = vcmp.eq.s32.totalorder %v4311_v45, 2  ;;  %v4632_v28 = vsel %vm4621_vm9, nan, %v4631_v13  ;;  %vm4416_vm10 = vcmp.lt.s32.totalorder %v4415_v43, 2 }
 0x724   :  { %v4315_v14 = vsel %vm4313_vm8, %v13428_v27, %v4314_v63  ;;  %v4318_v39 = vsel %vm4316_vm2, %v4317_v2, %v13427_v4  ;;  %6307 = vmatpush3.bf16.msra.mxu0 %v5884_v47  ;;  %vm4517_vm15 = vweird.f32 %v13430_v12  ;;  %v4423_v33 = vsel %vm4416_vm10, %v4419_v50, %v4422_v35 }
 0x725   :  { %6308 = vmatprep.subr.bf16.mxu0 %v13401_v41  ;;  %v4528_v37 = vsel %vm4517_vm15, nan, %v4527_v6  ;;  %vm4312_vm1 = vcmp.lt.s32.totalorder %v4311_v45, 2  ;;  %vm4413_vm13 = vweird.f32 %v13431_v21  ;;  %vm4309_vm0 = vweird.f32 %v13432_v30 }
 0x726   :  { %v5883_v48 = vpack.c.bf16 %v4632_v28, %v4528_v37  ;;  %v4319_v40 = vsel %vm4312_vm1, %v4315_v14, %v4318_v39  ;;  %v4424_v16 = vsel %vm4413_vm13, nan, %v4423_v33 }
 0x727   :  { %v4320_v46 = vsel %vm4309_vm0, nan, %v4319_v40 }
 0x728   :  { %6309 = vmatpush3.bf16.msra.mxu0 %v5883_v48  ;;  %v5882_v26 = vpack.c.bf16 %v4424_v16, %v4320_v46 }
 0x729   :  { %6310 = vmatprep.subr.bf16.mxu0 %v13401_v41 }
 0x72c   :  { %6311 = vmatpush3.bf16.msra.mxu0 %v5882_v26 }
 0x72f   :  { %6313 = vmatmul.mubr.bf16.vlgmr.msra.gmra.mxu0 %v5881_v7 }
 0x7ef   :  { %v5930_v53 = vpop.f32.mrf.mxu0 }
 0x7f0   :  { %v5931_v38 = vadd.f32 %v5930_v53, %v5894_v20 }
 0x7f1   :  { %v6314_v0 = vpop.f32.mrf.mxu0 }
 0x7f2   :  { %5936 = vst [vmem:[#allocation2] sm:$0xff] %v5931_v38 }
 0x7f3   :  { %v5933_v5 = vpop.f32.mrf.mxu0 }
 0x7f4   :  { %6756 = shalt.err (!%p6753_p4)
}
 0x7f5   :  { %5946 = dma.vmem_to_hbm [thread:$0]  %s5944_s16, 128, %s12670_s7, [#allocation3]   ;;  %v6315_v41 = vpop.f32.mrf.mxu0 }
 0x7f6   :  { %6765 = dma.done.wait [#allocation3], 128  }
 0x7f7   :  { %6766 = vsyncadd [#allocation3], 4294967168 }
 0x7f8   :  { %5950 = vsyncpa [#allocation3], 1 }

</bundles_post_ra>
